<compile_context>
chip_gen: v7x
topology: tpu7x:2x2x1
jax: 0.10.0
libtpu: 0.0.40
codegen_flags: <defaults>
</compile_context>

<pallas_src>
import jax
import jax.numpy as jnp
from jax import lax
from jax.experimental import pallas as pl
from jax.experimental.pallas import tpu as pltpu


# ----------------------------------------------------------------------------
# Fused stage kernel: conv3x3+ReLU -> conv3x3+ReLU -> maxpool2x2
# ----------------------------------------------------------------------------
def _make_stage_kernel(h, w, cin, cmid, cout):
    ho, wo = h // 2, w // 2

    def _conv3x3(src_ref, wf_ref, b_ref, c_src):
        # src_ref: (h+2, w+2, c_src) zero-padded activation in VMEM
        # wf_ref : (9*c_src, c_dst) folded weights (bf16)
        # returns (h*w, c_dst) f32, after bias + ReLU.
        patches = jnp.concatenate(
            [src_ref[dy:dy + h, dx:dx + w, :].reshape(h * w, c_src)
             for dy in range(3) for dx in range(3)],
            axis=-1)                                   # (h*w, 9*c_src)
        acc = jnp.dot(patches, wf_ref[...],
                      preferred_element_type=jnp.float32)
        return jnp.maximum(acc + b_ref[...], 0.0)      # f32 epilogue

    def kernel(x_ref, w1_ref, b1_ref, w2_ref, b2_ref, o_ref,
               xpad_ref, mid_ref, hp_ref):
        # Zero-pad the input tile into VMEM (padding=1); no HBM pad/im2col.
        xpad_ref[...] = jnp.zeros_like(xpad_ref)
        xpad_ref[1:h + 1, 1:w + 1, :] = x_ref[0]

        # conv1 + ReLU (taps folded into K -> single MXU matmul).
        a1 = _conv3x3(xpad_ref, w1_ref, b1_ref, cin)          # (h*w, cmid) f32

        # Zero-pad the intermediate activation in VMEM (stored bf16).
        mid_ref[...] = jnp.zeros_like(mid_ref)
        mid_ref[1:h + 1, 1:w + 1, :] = (
            a1.reshape(h, w, cmid).astype(mid_ref.dtype))

        # conv2 + ReLU.
        a2 = _conv3x3(mid_ref, w2_ref, b2_ref, cmid)          # (h*w, cout) f32

        # Fused 2x2 max-pool (stride 2).
        # Rows: free leading-dim reshape (h*w,cout)->(ho,2,w,cout) + max.
        a2r = a2.reshape(ho, 2, w, cout)
        hp_ref[...] = jnp.maximum(a2r[:, 0], a2r[:, 1])       # (ho, w, cout)
        # Cols: sublane-strided reads (stride 2) from the VMEM scratch.
        left = hp_ref[:, pl.ds(0, wo, stride=2), :]
        right = hp_ref[:, pl.ds(1, wo, stride=2), :]
        o_ref[0] = jnp.maximum(left, right).astype(o_ref.dtype)

    return kernel


def conv_stage(x, w1, b1, w2, b2):
    # x: (N, H, W, Cin) bf16 NHWC.  Returns (N, H//2, W//2, Cout) bf16.
    n, h, w, cin = x.shape
    cmid = w1.shape[-1]
    cout = w2.shape[-1]
    ho, wo = h // 2, w // 2

    # Fold the 3x3 taps into the contraction dimension once, in bf16.
    w1f = w1.reshape(9 * cin, cmid).astype(jnp.bfloat16)
    w2f = w2.reshape(9 * cmid, cout).astype(jnp.bfloat16)
    b1f = b1.reshape(1, cmid).astype(jnp.float32)
    b2f = b2.reshape(1, cout).astype(jnp.float32)

    kernel = _make_stage_kernel(h, w, cin, cmid, cout)

    return pl.pallas_call(
        kernel,
        out_shape=jax.ShapeDtypeStruct((n, ho, wo, cout), jnp.bfloat16),
        grid=(n,),
        in_specs=[
            pl.BlockSpec((1, h, w, cin), lambda i: (i, 0, 0, 0)),
            pl.BlockSpec((9 * cin, cmid), lambda i: (0, 0)),   # resident weights
            pl.BlockSpec((1, cmid), lambda i: (0, 0)),
            pl.BlockSpec((9 * cmid, cout), lambda i: (0, 0)),
            pl.BlockSpec((1, cout), lambda i: (0, 0)),
        ],
        out_specs=pl.BlockSpec((1, ho, wo, cout), lambda i: (i, 0, 0, 0)),
        scratch_shapes=[
            pltpu.VMEM((h + 2, w + 2, cin), jnp.bfloat16),     # padded input
            pltpu.VMEM((h + 2, w + 2, cmid), jnp.bfloat16),    # padded conv1 out
            pltpu.VMEM((ho, w, cout), jnp.float32),            # row-pooled conv2
        ],
        compiler_params=pltpu.CompilerParams(
            dimension_semantics=("parallel",),
            vmem_limit_bytes=48 * 1024 * 1024,
        ),
    )(x, w1f, b1f, w2f, b2f)


# ----------------------------------------------------------------------------
# Linear: y = x @ W^T + b, W kept lane-dense as (out, F), K-tiled over F.
# ----------------------------------------------------------------------------
def _linear_kernel(x_ref, w_ref, b_ref, o_ref, acc_ref):
    k = pl.program_id(0)

    @pl.when(k == 0)
    def _():
        acc_ref[...] = jnp.zeros_like(acc_ref)

    acc_ref[...] += lax.dot_general(
        x_ref[...], w_ref[...],
        dimension_numbers=(((1,), (1,)), ((), ())),   # contract last dims
        preferred_element_type=jnp.float32)

    @pl.when(k == pl.num_programs(0) - 1)
    def _():
        o_ref[...] = acc_ref[...] + b_ref[...]


def _pick_tk(f):
    for tk in (512, 256, 128):
        if f % tk == 0:
            return tk
    return f


def linear(x_flat, w, b):
    # x_flat: (N, F); w: (out, F) lane-dense; b: (out,)
    n, f = x_flat.shape
    out_dim = w.shape[0]
    tk = _pick_tk(f)
    kt = f // tk

    return pl.pallas_call(
        _linear_kernel,
        out_shape=jax.ShapeDtypeStruct((n, out_dim), jnp.float32),
        grid=(kt,),
        in_specs=[
            pl.BlockSpec((n, tk), lambda k: (0, k)),
            pl.BlockSpec((out_dim, tk), lambda k: (0, k)),
            pl.BlockSpec((1, out_dim), lambda k: (0, 0)),
        ],
        out_specs=pl.BlockSpec((n, out_dim), lambda k: (0, 0)),
        scratch_shapes=[pltpu.VMEM((n, out_dim), jnp.float32)],
        compiler_params=pltpu.CompilerParams(
            dimension_semantics=("arbitrary",),
        ),
    )(x_flat.astype(jnp.bfloat16), w.astype(jnp.bfloat16),
      b.reshape(1, out_dim).astype(jnp.float32))


# ----------------------------------------------------------------------------
# Full model
# ----------------------------------------------------------------------------
def init_params(key, h, w):
    ks = jax.random.split(key, 10)

    def conv_w(k, cin, cout):
        fan_in = cin * 9
        return (jax.random.normal(k, (3, 3, cin, cout), jnp.float32)
                * (1.0 / fan_in) ** 0.5)

    feat = 128 * (h // 4) * (w // 4)
    # NOTE: fc_w is stored as (3, F) for the NHWC flatten order used by the
    # kernels; importing PyTorch weights would need the (C,H,W)->(H,W,C)
    # column permutation of its NCHW-flattened Linear weight.
    return {
        "c1a_w": conv_w(ks[0], 3, 16),
        "c1a_b": jax.random.normal(ks[1], (16,), jnp.float32) * 0.01,
        "c1b_w": conv_w(ks[2], 16, 32),
        "c1b_b": jax.random.normal(ks[3], (32,), jnp.float32) * 0.01,
        "c2a_w": conv_w(ks[4], 32, 64),
        "c2a_b": jax.random.normal(ks[5], (64,), jnp.float32) * 0.01,
        "c2b_w": conv_w(ks[6], 64, 128),
        "c2b_b": jax.random.normal(ks[7], (128,), jnp.float32) * 0.01,
        "fc_w": jax.random.normal(ks[8], (3, feat), jnp.float32)
        * (1.0 / feat) ** 0.5,
        "fc_b": jax.random.normal(ks[9], (3,), jnp.float32) * 0.01,
    }


def model_forward(params, x_nchw):
    # NCHW (PyTorch convention) -> NHWC, bf16 activations.
    x = jnp.transpose(x_nchw, (0, 2, 3, 1)).astype(jnp.bfloat16)

    # Stage 1: conv(3->16)+ReLU -> conv(16->32)+ReLU -> maxpool2x2 (fused).
    x = conv_stage(x, params["c1a_w"], params["c1a_b"],
                   params["c1b_w"], params["c1b_b"])
    # Stage 2: conv(32->64)+ReLU -> conv(64->128)+ReLU -> maxpool2x2 (fused).
    x = conv_stage(x, params["c2a_w"], params["c2a_b"],
                   params["c2b_w"], params["c2b_b"])

    # Flatten directly in NHWC order (fc_w is stored to match) — no relayout.
    n = x.shape[0]
    x_flat = x.reshape(n, -1)

    # Dropout is identity at inference time (eval mode).
    return linear(x_flat, params["fc_w"], params["fc_b"])


if __name__ == "__main__":
    key = jax.random.PRNGKey(0)
    k_in, k_p = jax.random.split(key)

    N, C, H, W = 2, 3, 16, 16   # small demo shape (original model uses 640x640)
    x = jax.random.normal(k_in, (N, C, H, W), jnp.float32)
    params = init_params(k_p, H, W)

    out = jax.jit(model_forward)(params, x)
    out = jax.block_until_ready(out)
    assert out.shape == (N, 3), out.shape
    assert bool(jnp.all(jnp.isfinite(out)))
    print("KERNEL_OK")
</pallas_src>

<mosaic_0001>
module attributes {stable_mosaic.version = 11 : i64} {
  func.func @kernel(%arg0: i32, %arg1: memref<1x16x16x3xbf16, #tpu.memory_space<vmem>>, %arg2: memref<27x16xbf16, #tpu.memory_space<vmem>>, %arg3: memref<1x16xf32, #tpu.memory_space<vmem>>, %arg4: memref<144x32xbf16, #tpu.memory_space<vmem>>, %arg5: memref<1x32xf32, #tpu.memory_space<vmem>>, %arg6: memref<1x8x8x32xbf16, #tpu.memory_space<vmem>>, %arg7: memref<18x18x3xbf16, #tpu.memory_space<vmem>>, %arg8: memref<18x18x16xbf16, #tpu.memory_space<vmem>>, %arg9: memref<8x16x32xf32, #tpu.memory_space<vmem>>) attributes {dimension_semantics = [#tpu.dimension_semantics<parallel>], iteration_bounds = array<i64: 2>, scalar_prefetch = 0 : i64, scratch_operands = 3 : i64, tpu.core_type = #tpu.core_type<tc>, window_params = [{transform_indices = @transform_0, window_bounds = array<i64: 1, 16, 16, 3>}, {pipeline_mode = #tpu.pipeline_mode<synchronous>, transform_indices = @transform_1, window_bounds = array<i64: 27, 16>}, {pipeline_mode = #tpu.pipeline_mode<synchronous>, transform_indices = @transform_2, window_bounds = array<i64: 1, 16>}, {pipeline_mode = #tpu.pipeline_mode<synchronous>, transform_indices = @transform_3, window_bounds = array<i64: 144, 32>}, {pipeline_mode = #tpu.pipeline_mode<synchronous>, transform_indices = @transform_4, window_bounds = array<i64: 1, 32>}, {transform_indices = @transform_5, window_bounds = array<i64: 1, 8, 8, 32>}]} {
    %cst = arith.constant 0.000000e+00 : bf16
    %0 = vector.broadcast %cst : bf16 to vector<18x18x3xbf16>
    %c0 = arith.constant 0 : index
    %c0_0 = arith.constant 0 : index
    %c0_1 = arith.constant 0 : index
    %1 = vector.load %arg7[%c0, %c0_0, %c0_1] : memref<18x18x3xbf16, #tpu.memory_space<vmem>>, vector<18x18x3xbf16>
    tpu.vector_store %arg7[%c0, %c0_0, %c0_1], %0 {strides = array<i32>} : memref<18x18x3xbf16, #tpu.memory_space<vmem>>, vector<18x18x3xbf16>,
    %c0_2 = arith.constant 0 : index
    %c0_3 = arith.constant 0 : index
    %c0_4 = arith.constant 0 : index
    %c0_5 = arith.constant 0 : index
    %2 = vector.load %arg1[%c0_2, %c0_3, %c0_4, %c0_5] : memref<1x16x16x3xbf16, #tpu.memory_space<vmem>>, vector<1x16x16x3xbf16>
    %3 = vector.shape_cast %2 : vector<1x16x16x3xbf16> to vector<16x16x3xbf16>
    %c1 = arith.constant 1 : index
    %c1_6 = arith.constant 1 : index
    %c0_7 = arith.constant 0 : index
    %4 = vector.load %arg7[%c1, %c1_6, %c0_7] : memref<18x18x3xbf16, #tpu.memory_space<vmem>>, vector<16x16x3xbf16>
    tpu.vector_store %arg7[%c1, %c1_6, %c0_7], %3 {strides = array<i32>} : memref<18x18x3xbf16, #tpu.memory_space<vmem>>, vector<16x16x3xbf16>,
    %c0_8 = arith.constant 0 : index
    %c0_9 = arith.constant 0 : index
    %c0_10 = arith.constant 0 : index
    %5 = vector.load %arg7[%c0_8, %c0_9, %c0_10] : memref<18x18x3xbf16, #tpu.memory_space<vmem>>, vector<16x16x3xbf16>
    %6 = vector.shape_cast %5 : vector<16x16x3xbf16> to vector<256x3xbf16>
    %c0_11 = arith.constant 0 : index
    %c1_12 = arith.constant 1 : index
    %c0_13 = arith.constant 0 : index
    %7 = vector.load %arg7[%c0_11, %c1_12, %c0_13] : memref<18x18x3xbf16, #tpu.memory_space<vmem>>, vector<16x16x3xbf16>
    %8 = vector.shape_cast %7 : vector<16x16x3xbf16> to vector<256x3xbf16>
    %c0_14 = arith.constant 0 : index
    %c2 = arith.constant 2 : index
    %c0_15 = arith.constant 0 : index
    %9 = vector.load %arg7[%c0_14, %c2, %c0_15] : memref<18x18x3xbf16, #tpu.memory_space<vmem>>, vector<16x16x3xbf16>
    %10 = vector.shape_cast %9 : vector<16x16x3xbf16> to vector<256x3xbf16>
    %c1_16 = arith.constant 1 : index
    %c0_17 = arith.constant 0 : index
    %c0_18 = arith.constant 0 : index
    %11 = vector.load %arg7[%c1_16, %c0_17, %c0_18] : memref<18x18x3xbf16, #tpu.memory_space<vmem>>, vector<16x16x3xbf16>
    %12 = vector.shape_cast %11 : vector<16x16x3xbf16> to vector<256x3xbf16>
    %c1_19 = arith.constant 1 : index
    %c1_20 = arith.constant 1 : index
    %c0_21 = arith.constant 0 : index
    %13 = vector.load %arg7[%c1_19, %c1_20, %c0_21] : memref<18x18x3xbf16, #tpu.memory_space<vmem>>, vector<16x16x3xbf16>
    %14 = vector.shape_cast %13 : vector<16x16x3xbf16> to vector<256x3xbf16>
    %c1_22 = arith.constant 1 : index
    %c2_23 = arith.constant 2 : index
    %c0_24 = arith.constant 0 : index
    %15 = vector.load %arg7[%c1_22, %c2_23, %c0_24] : memref<18x18x3xbf16, #tpu.memory_space<vmem>>, vector<16x16x3xbf16>
    %16 = vector.shape_cast %15 : vector<16x16x3xbf16> to vector<256x3xbf16>
    %c2_25 = arith.constant 2 : index
    %c0_26 = arith.constant 0 : index
    %c0_27 = arith.constant 0 : index
    %17 = vector.load %arg7[%c2_25, %c0_26, %c0_27] : memref<18x18x3xbf16, #tpu.memory_space<vmem>>, vector<16x16x3xbf16>
    %18 = vector.shape_cast %17 : vector<16x16x3xbf16> to vector<256x3xbf16>
    %c2_28 = arith.constant 2 : index
    %c1_29 = arith.constant 1 : index
    %c0_30 = arith.constant 0 : index
    %19 = vector.load %arg7[%c2_28, %c1_29, %c0_30] : memref<18x18x3xbf16, #tpu.memory_space<vmem>>, vector<16x16x3xbf16>
    %20 = vector.shape_cast %19 : vector<16x16x3xbf16> to vector<256x3xbf16>
    %c2_31 = arith.constant 2 : index
    %c2_32 = arith.constant 2 : index
    %c0_33 = arith.constant 0 : index
    %21 = vector.load %arg7[%c2_31, %c2_32, %c0_33] : memref<18x18x3xbf16, #tpu.memory_space<vmem>>, vector<16x16x3xbf16>
    %22 = vector.shape_cast %21 : vector<16x16x3xbf16> to vector<256x3xbf16>
    %23 = tpu.concatenate %6, %8, %10, %12, %14, %16, %18, %20, %22 in 1 : vector<256x3xbf16>, vector<256x3xbf16>, vector<256x3xbf16>, vector<256x3xbf16>, vector<256x3xbf16>, vector<256x3xbf16>, vector<256x3xbf16>, vector<256x3xbf16>, vector<256x3xbf16> -> vector<256x27xbf16>
    %c0_34 = arith.constant 0 : index
    %c0_35 = arith.constant 0 : index
    %24 = vector.load %arg2[%c0_34, %c0_35] : memref<27x16xbf16, #tpu.memory_space<vmem>>, vector<27x16xbf16>
    %cst_36 = arith.constant dense<0.000000e+00> : vector<256x16xf32>
    %25 = tpu.matmul %23, %24, %cst_36 {dimension_numbers = #tpu.dot_dimension_numbers<[1], [0], [0], [1], [0, 0, 1, 1], [], []>} : vector<256x27xbf16>, vector<27x16xbf16>, vector<256x16xf32> -> vector<256x16xf32>
    %c0_37 = arith.constant 0 : index
    %c0_38 = arith.constant 0 : index
    %26 = vector.load %arg3[%c0_37, %c0_38] : memref<1x16xf32, #tpu.memory_space<vmem>>, vector<1x16xf32>
    %27 = vector.broadcast %26 : vector<1x16xf32> to vector<256x16xf32>
    %28 = arith.addf %25, %27 : vector<256x16xf32>
    %cst_39 = arith.constant 0.000000e+00 : f32
    %29 = vector.broadcast %cst_39 : f32 to vector<256x16xf32>
    %30 = arith.maximumf %28, %29 : vector<256x16xf32>
    %cst_40 = arith.constant 0.000000e+00 : bf16
    %31 = vector.broadcast %cst_40 : bf16 to vector<18x18x16xbf16>
    %c0_41 = arith.constant 0 : index
    %c0_42 = arith.constant 0 : index
    %c0_43 = arith.constant 0 : index
    %32 = vector.load %arg8[%c0_41, %c0_42, %c0_43] : memref<18x18x16xbf16, #tpu.memory_space<vmem>>, vector<18x18x16xbf16>
    tpu.vector_store %arg8[%c0_41, %c0_42, %c0_43], %31 {strides = array<i32>} : memref<18x18x16xbf16, #tpu.memory_space<vmem>>, vector<18x18x16xbf16>,
    %33 = vector.shape_cast %30 : vector<256x16xf32> to vector<16x16x16xf32>
    %34 = arith.truncf %33 : vector<16x16x16xf32> to vector<16x16x16xbf16>
    %c1_44 = arith.constant 1 : index
    %c1_45 = arith.constant 1 : index
    %c0_46 = arith.constant 0 : index
    %35 = vector.load %arg8[%c1_44, %c1_45, %c0_46] : memref<18x18x16xbf16, #tpu.memory_space<vmem>>, vector<16x16x16xbf16>
    tpu.vector_store %arg8[%c1_44, %c1_45, %c0_46], %34 {strides = array<i32>} : memref<18x18x16xbf16, #tpu.memory_space<vmem>>, vector<16x16x16xbf16>,
    %c0_47 = arith.constant 0 : index
    %c0_48 = arith.constant 0 : index
    %c0_49 = arith.constant 0 : index
    %36 = vector.load %arg8[%c0_47, %c0_48, %c0_49] : memref<18x18x16xbf16, #tpu.memory_space<vmem>>, vector<16x16x16xbf16>
    %37 = vector.shape_cast %36 : vector<16x16x16xbf16> to vector<256x16xbf16>
    %c0_50 = arith.constant 0 : index
    %c1_51 = arith.constant 1 : index
    %c0_52 = arith.constant 0 : index
    %38 = vector.load %arg8[%c0_50, %c1_51, %c0_52] : memref<18x18x16xbf16, #tpu.memory_space<vmem>>, vector<16x16x16xbf16>
    %39 = vector.shape_cast %38 : vector<16x16x16xbf16> to vector<256x16xbf16>
    %c0_53 = arith.constant 0 : index
    %c2_54 = arith.constant 2 : index
    %c0_55 = arith.constant 0 : index
    %40 = vector.load %arg8[%c0_53, %c2_54, %c0_55] : memref<18x18x16xbf16, #tpu.memory_space<vmem>>, vector<16x16x16xbf16>
    %41 = vector.shape_cast %40 : vector<16x16x16xbf16> to vector<256x16xbf16>
    %c1_56 = arith.constant 1 : index
    %c0_57 = arith.constant 0 : index
    %c0_58 = arith.constant 0 : index
    %42 = vector.load %arg8[%c1_56, %c0_57, %c0_58] : memref<18x18x16xbf16, #tpu.memory_space<vmem>>, vector<16x16x16xbf16>
    %43 = vector.shape_cast %42 : vector<16x16x16xbf16> to vector<256x16xbf16>
    %c1_59 = arith.constant 1 : index
    %c1_60 = arith.constant 1 : index
    %c0_61 = arith.constant 0 : index
    %44 = vector.load %arg8[%c1_59, %c1_60, %c0_61] : memref<18x18x16xbf16, #tpu.memory_space<vmem>>, vector<16x16x16xbf16>
    %45 = vector.shape_cast %44 : vector<16x16x16xbf16> to vector<256x16xbf16>
    %c1_62 = arith.constant 1 : index
    %c2_63 = arith.constant 2 : index
    %c0_64 = arith.constant 0 : index
    %46 = vector.load %arg8[%c1_62, %c2_63, %c0_64] : memref<18x18x16xbf16, #tpu.memory_space<vmem>>, vector<16x16x16xbf16>
    %47 = vector.shape_cast %46 : vector<16x16x16xbf16> to vector<256x16xbf16>
    %c2_65 = arith.constant 2 : index
    %c0_66 = arith.constant 0 : index
    %c0_67 = arith.constant 0 : index
    %48 = vector.load %arg8[%c2_65, %c0_66, %c0_67] : memref<18x18x16xbf16, #tpu.memory_space<vmem>>, vector<16x16x16xbf16>
    %49 = vector.shape_cast %48 : vector<16x16x16xbf16> to vector<256x16xbf16>
    %c2_68 = arith.constant 2 : index
    %c1_69 = arith.constant 1 : index
    %c0_70 = arith.constant 0 : index
    %50 = vector.load %arg8[%c2_68, %c1_69, %c0_70] : memref<18x18x16xbf16, #tpu.memory_space<vmem>>, vector<16x16x16xbf16>
    %51 = vector.shape_cast %50 : vector<16x16x16xbf16> to vector<256x16xbf16>
    %c2_71 = arith.constant 2 : index
    %c2_72 = arith.constant 2 : index
    %c0_73 = arith.constant 0 : index
    %52 = vector.load %arg8[%c2_71, %c2_72, %c0_73] : memref<18x18x16xbf16, #tpu.memory_space<vmem>>, vector<16x16x16xbf16>
    %53 = vector.shape_cast %52 : vector<16x16x16xbf16> to vector<256x16xbf16>
    %54 = tpu.concatenate %37, %39, %41, %43, %45, %47, %49, %51, %53 in 1 : vector<256x16xbf16>, vector<256x16xbf16>, vector<256x16xbf16>, vector<256x16xbf16>, vector<256x16xbf16>, vector<256x16xbf16>, vector<256x16xbf16>, vector<256x16xbf16>, vector<256x16xbf16> -> vector<256x144xbf16>
    %c0_74 = arith.constant 0 : index
    %c0_75 = arith.constant 0 : index
    %55 = vector.load %arg4[%c0_74, %c0_75] : memref<144x32xbf16, #tpu.memory_space<vmem>>, vector<144x32xbf16>
    %cst_76 = arith.constant dense<0.000000e+00> : vector<256x32xf32>
    %56 = tpu.matmul %54, %55, %cst_76 {dimension_numbers = #tpu.dot_dimension_numbers<[1], [0], [0], [1], [0, 0, 1, 1], [], []>} : vector<256x144xbf16>, vector<144x32xbf16>, vector<256x32xf32> -> vector<256x32xf32>
    %c0_77 = arith.constant 0 : index
    %c0_78 = arith.constant 0 : index
    %57 = vector.load %arg5[%c0_77, %c0_78] : memref<1x32xf32, #tpu.memory_space<vmem>>, vector<1x32xf32>
    %58 = vector.broadcast %57 : vector<1x32xf32> to vector<256x32xf32>
    %59 = arith.addf %56, %58 : vector<256x32xf32>
    %cst_79 = arith.constant 0.000000e+00 : f32
    %60 = vector.broadcast %cst_79 : f32 to vector<256x32xf32>
    %61 = arith.maximumf %59, %60 : vector<256x32xf32>
    %62 = vector.shape_cast %61 : vector<256x32xf32> to vector<8x2x16x32xf32>
    %63 = vector.extract_strided_slice %62 {offsets = [0, 0, 0, 0], sizes = [8, 1, 16, 32], strides = [1, 1, 1, 1]} : vector<8x2x16x32xf32> to vector<8x1x16x32xf32>
    %64 = vector.shape_cast %63 : vector<8x1x16x32xf32> to vector<8x16x32xf32>
    %65 = vector.extract_strided_slice %62 {offsets = [0, 1, 0, 0], sizes = [8, 1, 16, 32], strides = [1, 1, 1, 1]} : vector<8x2x16x32xf32> to vector<8x1x16x32xf32>
    %66 = vector.shape_cast %65 : vector<8x1x16x32xf32> to vector<8x16x32xf32>
    %67 = arith.maximumf %64, %66 : vector<8x16x32xf32>
    %c0_80 = arith.constant 0 : index
    %c0_81 = arith.constant 0 : index
    %c0_82 = arith.constant 0 : index
    %68 = vector.load %arg9[%c0_80, %c0_81, %c0_82] : memref<8x16x32xf32, #tpu.memory_space<vmem>>, vector<8x16x32xf32>
    tpu.vector_store %arg9[%c0_80, %c0_81, %c0_82], %67 {strides = array<i32>} : memref<8x16x32xf32, #tpu.memory_space<vmem>>, vector<8x16x32xf32>,
    %c0_83 = arith.constant 0 : index
    %c0_84 = arith.constant 0 : index
    %c0_85 = arith.constant 0 : index
    %69 = tpu.strided_load %arg9[%c0_83, %c0_84, %c0_85] {strides = array<i32: 1, 2, 1>} : memref<8x16x32xf32, #tpu.memory_space<vmem>>, vector<8x8x32xf32>
    %c0_86 = arith.constant 0 : index
    %c1_87 = arith.constant 1 : index
    %c0_88 = arith.constant 0 : index
    %70 = tpu.strided_load %arg9[%c0_86, %c1_87, %c0_88] {strides = array<i32: 1, 2, 1>} : memref<8x16x32xf32, #tpu.memory_space<vmem>>, vector<8x8x32xf32>
    %71 = arith.maximumf %69, %70 : vector<8x8x32xf32>
    %72 = arith.truncf %71 : vector<8x8x32xf32> to vector<8x8x32xbf16>
    %c0_89 = arith.constant 0 : index
    %c0_90 = arith.constant 0 : index
    %c0_91 = arith.constant 0 : index
    %c0_92 = arith.constant 0 : index
    %73 = vector.load %arg6[%c0_89, %c0_90, %c0_91, %c0_92] : memref<1x8x8x32xbf16, #tpu.memory_space<vmem>>, vector<1x8x8x32xbf16>
    %74 = vector.shape_cast %73 : vector<1x8x8x32xbf16> to vector<8x8x32xbf16>
    %75 = vector.shape_cast %72 : vector<8x8x32xbf16> to vector<1x8x8x32xbf16>
    tpu.vector_store %arg6[%c0_89, %c0_90, %c0_91, %c0_92], %75 {strides = array<i32>} : memref<1x8x8x32xbf16, #tpu.memory_space<vmem>>, vector<1x8x8x32xbf16>,
    return
  }
  func.func @transform_0(%arg0: i32) -> (i32, i32, i32, i32) {
    %c0_i32 = arith.constant 0 : i32
    %c0_i32_0 = arith.constant 0 : i32
    %c0_i32_1 = arith.constant 0 : i32
    %c0_i32_2 = arith.constant 0 : i32
    return %arg0, %c0_i32, %c0_i32_0, %c0_i32_1 : i32, i32, i32, i32
  }
  func.func @transform_1(%arg0: i32) -> (i32, i32) {
    %c0_i32 = arith.constant 0 : i32
    %c0_i32_0 = arith.constant 0 : i32
    %c0_i32_1 = arith.constant 0 : i32
    return %c0_i32, %c0_i32_0 : i32, i32
  }
  func.func @transform_2(%arg0: i32) -> (i32, i32) {
    %c0_i32 = arith.constant 0 : i32
    %c0_i32_0 = arith.constant 0 : i32
    %c0_i32_1 = arith.constant 0 : i32
    return %c0_i32, %c0_i32_0 : i32, i32
  }
  func.func @transform_3(%arg0: i32) -> (i32, i32) {
    %c0_i32 = arith.constant 0 : i32
    %c0_i32_0 = arith.constant 0 : i32
    %c0_i32_1 = arith.constant 0 : i32
    return %c0_i32, %c0_i32_0 : i32, i32
  }
  func.func @transform_4(%arg0: i32) -> (i32, i32) {
    %c0_i32 = arith.constant 0 : i32
    %c0_i32_0 = arith.constant 0 : i32
    %c0_i32_1 = arith.constant 0 : i32
    return %c0_i32, %c0_i32_0 : i32, i32
  }
  func.func @transform_5(%arg0: i32) -> (i32, i32, i32, i32) {
    %c0_i32 = arith.constant 0 : i32
    %c0_i32_0 = arith.constant 0 : i32
    %c0_i32_1 = arith.constant 0 : i32
    %c0_i32_2 = arith.constant 0 : i32
    return %arg0, %c0_i32, %c0_i32_0, %c0_i32_1 : i32, i32, i32, i32
  }
}

module attributes {stable_mosaic.version = 11 : i64} {
  func.func @kernel(%arg0: i32, %arg1: memref<1x8x8x32xbf16, #tpu.memory_space<vmem>>, %arg2: memref<288x64xbf16, #tpu.memory_space<vmem>>, %arg3: memref<1x64xf32, #tpu.memory_space<vmem>>, %arg4: memref<576x128xbf16, #tpu.memory_space<vmem>>, %arg5: memref<1x128xf32, #tpu.memory_space<vmem>>, %arg6: memref<1x4x4x128xbf16, #tpu.memory_space<vmem>>, %arg7: memref<10x10x32xbf16, #tpu.memory_space<vmem>>, %arg8: memref<10x10x64xbf16, #tpu.memory_space<vmem>>, %arg9: memref<4x8x128xf32, #tpu.memory_space<vmem>>) attributes {dimension_semantics = [#tpu.dimension_semantics<parallel>], iteration_bounds = array<i64: 2>, scalar_prefetch = 0 : i64, scratch_operands = 3 : i64, tpu.core_type = #tpu.core_type<tc>, window_params = [{transform_indices = @transform_0, window_bounds = array<i64: 1, 8, 8, 32>}, {pipeline_mode = #tpu.pipeline_mode<synchronous>, transform_indices = @transform_1, window_bounds = array<i64: 288, 64>}, {pipeline_mode = #tpu.pipeline_mode<synchronous>, transform_indices = @transform_2, window_bounds = array<i64: 1, 64>}, {pipeline_mode = #tpu.pipeline_mode<synchronous>, transform_indices = @transform_3, window_bounds = array<i64: 576, 128>}, {pipeline_mode = #tpu.pipeline_mode<synchronous>, transform_indices = @transform_4, window_bounds = array<i64: 1, 128>}, {transform_indices = @transform_5, window_bounds = array<i64: 1, 4, 4, 128>}]} {
    %cst = arith.constant 0.000000e+00 : bf16
    %0 = vector.broadcast %cst : bf16 to vector<10x10x32xbf16>
    %c0 = arith.constant 0 : index
    %c0_0 = arith.constant 0 : index
    %c0_1 = arith.constant 0 : index
    %1 = vector.load %arg7[%c0, %c0_0, %c0_1] : memref<10x10x32xbf16, #tpu.memory_space<vmem>>, vector<10x10x32xbf16>
    tpu.vector_store %arg7[%c0, %c0_0, %c0_1], %0 {strides = array<i32>} : memref<10x10x32xbf16, #tpu.memory_space<vmem>>, vector<10x10x32xbf16>,
    %c0_2 = arith.constant 0 : index
    %c0_3 = arith.constant 0 : index
    %c0_4 = arith.constant 0 : index
    %c0_5 = arith.constant 0 : index
    %2 = vector.load %arg1[%c0_2, %c0_3, %c0_4, %c0_5] : memref<1x8x8x32xbf16, #tpu.memory_space<vmem>>, vector<1x8x8x32xbf16>
    %3 = vector.shape_cast %2 : vector<1x8x8x32xbf16> to vector<8x8x32xbf16>
    %c1 = arith.constant 1 : index
    %c1_6 = arith.constant 1 : index
    %c0_7 = arith.constant 0 : index
    %4 = vector.load %arg7[%c1, %c1_6, %c0_7] : memref<10x10x32xbf16, #tpu.memory_space<vmem>>, vector<8x8x32xbf16>
    tpu.vector_store %arg7[%c1, %c1_6, %c0_7], %3 {strides = array<i32>} : memref<10x10x32xbf16, #tpu.memory_space<vmem>>, vector<8x8x32xbf16>,
    %c0_8 = arith.constant 0 : index
    %c0_9 = arith.constant 0 : index
    %c0_10 = arith.constant 0 : index
    %5 = vector.load %arg7[%c0_8, %c0_9, %c0_10] : memref<10x10x32xbf16, #tpu.memory_space<vmem>>, vector<8x8x32xbf16>
    %6 = vector.shape_cast %5 : vector<8x8x32xbf16> to vector<64x32xbf16>
    %c0_11 = arith.constant 0 : index
    %c1_12 = arith.constant 1 : index
    %c0_13 = arith.constant 0 : index
    %7 = vector.load %arg7[%c0_11, %c1_12, %c0_13] : memref<10x10x32xbf16, #tpu.memory_space<vmem>>, vector<8x8x32xbf16>
    %8 = vector.shape_cast %7 : vector<8x8x32xbf16> to vector<64x32xbf16>
    %c0_14 = arith.constant 0 : index
    %c2 = arith.constant 2 : index
    %c0_15 = arith.constant 0 : index
    %9 = vector.load %arg7[%c0_14, %c2, %c0_15] : memref<10x10x32xbf16, #tpu.memory_space<vmem>>, vector<8x8x32xbf16>
    %10 = vector.shape_cast %9 : vector<8x8x32xbf16> to vector<64x32xbf16>
    %c1_16 = arith.constant 1 : index
    %c0_17 = arith.constant 0 : index
    %c0_18 = arith.constant 0 : index
    %11 = vector.load %arg7[%c1_16, %c0_17, %c0_18] : memref<10x10x32xbf16, #tpu.memory_space<vmem>>, vector<8x8x32xbf16>
    %12 = vector.shape_cast %11 : vector<8x8x32xbf16> to vector<64x32xbf16>
    %c1_19 = arith.constant 1 : index
    %c1_20 = arith.constant 1 : index
    %c0_21 = arith.constant 0 : index
    %13 = vector.load %arg7[%c1_19, %c1_20, %c0_21] : memref<10x10x32xbf16, #tpu.memory_space<vmem>>, vector<8x8x32xbf16>
    %14 = vector.shape_cast %13 : vector<8x8x32xbf16> to vector<64x32xbf16>
    %c1_22 = arith.constant 1 : index
    %c2_23 = arith.constant 2 : index
    %c0_24 = arith.constant 0 : index
    %15 = vector.load %arg7[%c1_22, %c2_23, %c0_24] : memref<10x10x32xbf16, #tpu.memory_space<vmem>>, vector<8x8x32xbf16>
    %16 = vector.shape_cast %15 : vector<8x8x32xbf16> to vector<64x32xbf16>
    %c2_25 = arith.constant 2 : index
    %c0_26 = arith.constant 0 : index
    %c0_27 = arith.constant 0 : index
    %17 = vector.load %arg7[%c2_25, %c0_26, %c0_27] : memref<10x10x32xbf16, #tpu.memory_space<vmem>>, vector<8x8x32xbf16>
    %18 = vector.shape_cast %17 : vector<8x8x32xbf16> to vector<64x32xbf16>
    %c2_28 = arith.constant 2 : index
    %c1_29 = arith.constant 1 : index
    %c0_30 = arith.constant 0 : index
    %19 = vector.load %arg7[%c2_28, %c1_29, %c0_30] : memref<10x10x32xbf16, #tpu.memory_space<vmem>>, vector<8x8x32xbf16>
    %20 = vector.shape_cast %19 : vector<8x8x32xbf16> to vector<64x32xbf16>
    %c2_31 = arith.constant 2 : index
    %c2_32 = arith.constant 2 : index
    %c0_33 = arith.constant 0 : index
    %21 = vector.load %arg7[%c2_31, %c2_32, %c0_33] : memref<10x10x32xbf16, #tpu.memory_space<vmem>>, vector<8x8x32xbf16>
    %22 = vector.shape_cast %21 : vector<8x8x32xbf16> to vector<64x32xbf16>
    %23 = tpu.concatenate %6, %8, %10, %12, %14, %16, %18, %20, %22 in 1 : vector<64x32xbf16>, vector<64x32xbf16>, vector<64x32xbf16>, vector<64x32xbf16>, vector<64x32xbf16>, vector<64x32xbf16>, vector<64x32xbf16>, vector<64x32xbf16>, vector<64x32xbf16> -> vector<64x288xbf16>
    %c0_34 = arith.constant 0 : index
    %c0_35 = arith.constant 0 : index
    %24 = vector.load %arg2[%c0_34, %c0_35] : memref<288x64xbf16, #tpu.memory_space<vmem>>, vector<288x64xbf16>
    %cst_36 = arith.constant dense<0.000000e+00> : vector<64x64xf32>
    %25 = tpu.matmul %23, %24, %cst_36 {dimension_numbers = #tpu.dot_dimension_numbers<[1], [0], [0], [1], [0, 0, 1, 1], [], []>} : vector<64x288xbf16>, vector<288x64xbf16>, vector<64x64xf32> -> vector<64x64xf32>
    %c0_37 = arith.constant 0 : index
    %c0_38 = arith.constant 0 : index
    %26 = vector.load %arg3[%c0_37, %c0_38] : memref<1x64xf32, #tpu.memory_space<vmem>>, vector<1x64xf32>
    %27 = vector.broadcast %26 : vector<1x64xf32> to vector<64x64xf32>
    %28 = arith.addf %25, %27 : vector<64x64xf32>
    %cst_39 = arith.constant 0.000000e+00 : f32
    %29 = vector.broadcast %cst_39 : f32 to vector<64x64xf32>
    %30 = arith.maximumf %28, %29 : vector<64x64xf32>
    %cst_40 = arith.constant 0.000000e+00 : bf16
    %31 = vector.broadcast %cst_40 : bf16 to vector<10x10x64xbf16>
    %c0_41 = arith.constant 0 : index
    %c0_42 = arith.constant 0 : index
    %c0_43 = arith.constant 0 : index
    %32 = vector.load %arg8[%c0_41, %c0_42, %c0_43] : memref<10x10x64xbf16, #tpu.memory_space<vmem>>, vector<10x10x64xbf16>
    tpu.vector_store %arg8[%c0_41, %c0_42, %c0_43], %31 {strides = array<i32>} : memref<10x10x64xbf16, #tpu.memory_space<vmem>>, vector<10x10x64xbf16>,
    %33 = vector.shape_cast %30 : vector<64x64xf32> to vector<8x8x64xf32>
    %34 = arith.truncf %33 : vector<8x8x64xf32> to vector<8x8x64xbf16>
    %c1_44 = arith.constant 1 : index
    %c1_45 = arith.constant 1 : index
    %c0_46 = arith.constant 0 : index
    %35 = vector.load %arg8[%c1_44, %c1_45, %c0_46] : memref<10x10x64xbf16, #tpu.memory_space<vmem>>, vector<8x8x64xbf16>
    tpu.vector_store %arg8[%c1_44, %c1_45, %c0_46], %34 {strides = array<i32>} : memref<10x10x64xbf16, #tpu.memory_space<vmem>>, vector<8x8x64xbf16>,
    %c0_47 = arith.constant 0 : index
    %c0_48 = arith.constant 0 : index
    %c0_49 = arith.constant 0 : index
    %36 = vector.load %arg8[%c0_47, %c0_48, %c0_49] : memref<10x10x64xbf16, #tpu.memory_space<vmem>>, vector<8x8x64xbf16>
    %37 = vector.shape_cast %36 : vector<8x8x64xbf16> to vector<64x64xbf16>
    %c0_50 = arith.constant 0 : index
    %c1_51 = arith.constant 1 : index
    %c0_52 = arith.constant 0 : index
    %38 = vector.load %arg8[%c0_50, %c1_51, %c0_52] : memref<10x10x64xbf16, #tpu.memory_space<vmem>>, vector<8x8x64xbf16>
    %39 = vector.shape_cast %38 : vector<8x8x64xbf16> to vector<64x64xbf16>
    %c0_53 = arith.constant 0 : index
    %c2_54 = arith.constant 2 : index
    %c0_55 = arith.constant 0 : index
    %40 = vector.load %arg8[%c0_53, %c2_54, %c0_55] : memref<10x10x64xbf16, #tpu.memory_space<vmem>>, vector<8x8x64xbf16>
    %41 = vector.shape_cast %40 : vector<8x8x64xbf16> to vector<64x64xbf16>
    %c1_56 = arith.constant 1 : index
    %c0_57 = arith.constant 0 : index
    %c0_58 = arith.constant 0 : index
    %42 = vector.load %arg8[%c1_56, %c0_57, %c0_58] : memref<10x10x64xbf16, #tpu.memory_space<vmem>>, vector<8x8x64xbf16>
    %43 = vector.shape_cast %42 : vector<8x8x64xbf16> to vector<64x64xbf16>
    %c1_59 = arith.constant 1 : index
    %c1_60 = arith.constant 1 : index
    %c0_61 = arith.constant 0 : index
    %44 = vector.load %arg8[%c1_59, %c1_60, %c0_61] : memref<10x10x64xbf16, #tpu.memory_space<vmem>>, vector<8x8x64xbf16>
    %45 = vector.shape_cast %44 : vector<8x8x64xbf16> to vector<64x64xbf16>
    %c1_62 = arith.constant 1 : index
    %c2_63 = arith.constant 2 : index
    %c0_64 = arith.constant 0 : index
    %46 = vector.load %arg8[%c1_62, %c2_63, %c0_64] : memref<10x10x64xbf16, #tpu.memory_space<vmem>>, vector<8x8x64xbf16>
    %47 = vector.shape_cast %46 : vector<8x8x64xbf16> to vector<64x64xbf16>
    %c2_65 = arith.constant 2 : index
    %c0_66 = arith.constant 0 : index
    %c0_67 = arith.constant 0 : index
    %48 = vector.load %arg8[%c2_65, %c0_66, %c0_67] : memref<10x10x64xbf16, #tpu.memory_space<vmem>>, vector<8x8x64xbf16>
    %49 = vector.shape_cast %48 : vector<8x8x64xbf16> to vector<64x64xbf16>
    %c2_68 = arith.constant 2 : index
    %c1_69 = arith.constant 1 : index
    %c0_70 = arith.constant 0 : index
    %50 = vector.load %arg8[%c2_68, %c1_69, %c0_70] : memref<10x10x64xbf16, #tpu.memory_space<vmem>>, vector<8x8x64xbf16>
    %51 = vector.shape_cast %50 : vector<8x8x64xbf16> to vector<64x64xbf16>
    %c2_71 = arith.constant 2 : index
    %c2_72 = arith.constant 2 : index
    %c0_73 = arith.constant 0 : index
    %52 = vector.load %arg8[%c2_71, %c2_72, %c0_73] : memref<10x10x64xbf16, #tpu.memory_space<vmem>>, vector<8x8x64xbf16>
    %53 = vector.shape_cast %52 : vector<8x8x64xbf16> to vector<64x64xbf16>
    %54 = tpu.concatenate %37, %39, %41, %43, %45, %47, %49, %51, %53 in 1 : vector<64x64xbf16>, vector<64x64xbf16>, vector<64x64xbf16>, vector<64x64xbf16>, vector<64x64xbf16>, vector<64x64xbf16>, vector<64x64xbf16>, vector<64x64xbf16>, vector<64x64xbf16> -> vector<64x576xbf16>
    %c0_74 = arith.constant 0 : index
    %c0_75 = arith.constant 0 : index
    %55 = vector.load %arg4[%c0_74, %c0_75] : memref<576x128xbf16, #tpu.memory_space<vmem>>, vector<576x128xbf16>
    %cst_76 = arith.constant dense<0.000000e+00> : vector<64x128xf32>
    %56 = tpu.matmul %54, %55, %cst_76 {dimension_numbers = #tpu.dot_dimension_numbers<[1], [0], [0], [1], [0, 0, 1, 1], [], []>} : vector<64x576xbf16>, vector<576x128xbf16>, vector<64x128xf32> -> vector<64x128xf32>
    %c0_77 = arith.constant 0 : index
    %c0_78 = arith.constant 0 : index
    %57 = vector.load %arg5[%c0_77, %c0_78] : memref<1x128xf32, #tpu.memory_space<vmem>>, vector<1x128xf32>
    %58 = vector.broadcast %57 : vector<1x128xf32> to vector<64x128xf32>
    %59 = arith.addf %56, %58 : vector<64x128xf32>
    %cst_79 = arith.constant 0.000000e+00 : f32
    %60 = vector.broadcast %cst_79 : f32 to vector<64x128xf32>
    %61 = arith.maximumf %59, %60 : vector<64x128xf32>
    %62 = vector.shape_cast %61 : vector<64x128xf32> to vector<4x2x8x128xf32>
    %63 = vector.extract_strided_slice %62 {offsets = [0, 0, 0, 0], sizes = [4, 1, 8, 128], strides = [1, 1, 1, 1]} : vector<4x2x8x128xf32> to vector<4x1x8x128xf32>
    %64 = vector.shape_cast %63 : vector<4x1x8x128xf32> to vector<4x8x128xf32>
    %65 = vector.extract_strided_slice %62 {offsets = [0, 1, 0, 0], sizes = [4, 1, 8, 128], strides = [1, 1, 1, 1]} : vector<4x2x8x128xf32> to vector<4x1x8x128xf32>
    %66 = vector.shape_cast %65 : vector<4x1x8x128xf32> to vector<4x8x128xf32>
    %67 = arith.maximumf %64, %66 : vector<4x8x128xf32>
    %c0_80 = arith.constant 0 : index
    %c0_81 = arith.constant 0 : index
    %c0_82 = arith.constant 0 : index
    %68 = vector.load %arg9[%c0_80, %c0_81, %c0_82] : memref<4x8x128xf32, #tpu.memory_space<vmem>>, vector<4x8x128xf32>
    tpu.vector_store %arg9[%c0_80, %c0_81, %c0_82], %67 {strides = array<i32>} : memref<4x8x128xf32, #tpu.memory_space<vmem>>, vector<4x8x128xf32>,
    %c0_83 = arith.constant 0 : index
    %c0_84 = arith.constant 0 : index
    %c0_85 = arith.constant 0 : index
    %69 = tpu.strided_load %arg9[%c0_83, %c0_84, %c0_85] {strides = array<i32: 1, 2, 1>} : memref<4x8x128xf32, #tpu.memory_space<vmem>>, vector<4x4x128xf32>
    %c0_86 = arith.constant 0 : index
    %c1_87 = arith.constant 1 : index
    %c0_88 = arith.constant 0 : index
    %70 = tpu.strided_load %arg9[%c0_86, %c1_87, %c0_88] {strides = array<i32: 1, 2, 1>} : memref<4x8x128xf32, #tpu.memory_space<vmem>>, vector<4x4x128xf32>
    %71 = arith.maximumf %69, %70 : vector<4x4x128xf32>
    %72 = arith.truncf %71 : vector<4x4x128xf32> to vector<4x4x128xbf16>
    %c0_89 = arith.constant 0 : index
    %c0_90 = arith.constant 0 : index
    %c0_91 = arith.constant 0 : index
    %c0_92 = arith.constant 0 : index
    %73 = vector.load %arg6[%c0_89, %c0_90, %c0_91, %c0_92] : memref<1x4x4x128xbf16, #tpu.memory_space<vmem>>, vector<1x4x4x128xbf16>
    %74 = vector.shape_cast %73 : vector<1x4x4x128xbf16> to vector<4x4x128xbf16>
    %75 = vector.shape_cast %72 : vector<4x4x128xbf16> to vector<1x4x4x128xbf16>
    tpu.vector_store %arg6[%c0_89, %c0_90, %c0_91, %c0_92], %75 {strides = array<i32>} : memref<1x4x4x128xbf16, #tpu.memory_space<vmem>>, vector<1x4x4x128xbf16>,
    return
  }
  func.func @transform_0(%arg0: i32) -> (i32, i32, i32, i32) {
    %c0_i32 = arith.constant 0 : i32
    %c0_i32_0 = arith.constant 0 : i32
    %c0_i32_1 = arith.constant 0 : i32
    %c0_i32_2 = arith.constant 0 : i32
    return %arg0, %c0_i32, %c0_i32_0, %c0_i32_1 : i32, i32, i32, i32
  }
  func.func @transform_1(%arg0: i32) -> (i32, i32) {
    %c0_i32 = arith.constant 0 : i32
    %c0_i32_0 = arith.constant 0 : i32
    %c0_i32_1 = arith.constant 0 : i32
    return %c0_i32, %c0_i32_0 : i32, i32
  }
  func.func @transform_2(%arg0: i32) -> (i32, i32) {
    %c0_i32 = arith.constant 0 : i32
    %c0_i32_0 = arith.constant 0 : i32
    %c0_i32_1 = arith.constant 0 : i32
    return %c0_i32, %c0_i32_0 : i32, i32
  }
  func.func @transform_3(%arg0: i32) -> (i32, i32) {
    %c0_i32 = arith.constant 0 : i32
    %c0_i32_0 = arith.constant 0 : i32
    %c0_i32_1 = arith.constant 0 : i32
    return %c0_i32, %c0_i32_0 : i32, i32
  }
  func.func @transform_4(%arg0: i32) -> (i32, i32) {
    %c0_i32 = arith.constant 0 : i32
    %c0_i32_0 = arith.constant 0 : i32
    %c0_i32_1 = arith.constant 0 : i32
    return %c0_i32, %c0_i32_0 : i32, i32
  }
  func.func @transform_5(%arg0: i32) -> (i32, i32, i32, i32) {
    %c0_i32 = arith.constant 0 : i32
    %c0_i32_0 = arith.constant 0 : i32
    %c0_i32_1 = arith.constant 0 : i32
    %c0_i32_2 = arith.constant 0 : i32
    return %arg0, %c0_i32, %c0_i32_0, %c0_i32_1 : i32, i32, i32, i32
  }
}

module attributes {stable_mosaic.version = 11 : i64} {
  func.func @_linear_kernel(%arg0: i32, %arg1: memref<2x512xbf16, #tpu.memory_space<vmem>>, %arg2: memref<3x512xbf16, #tpu.memory_space<vmem>>, %arg3: memref<1x3xf32, #tpu.memory_space<vmem>>, %arg4: memref<2x3xf32, #tpu.memory_space<vmem>>, %arg5: memref<2x3xf32, #tpu.memory_space<vmem>>) attributes {dimension_semantics = [#tpu.dimension_semantics<arbitrary>], iteration_bounds = array<i64: 4>, scalar_prefetch = 0 : i64, scratch_operands = 1 : i64, tpu.core_type = #tpu.core_type<tc>, window_params = [{transform_indices = @transform_0, window_bounds = array<i64: 2, 512>}, {transform_indices = @transform_1, window_bounds = array<i64: 3, 512>}, {pipeline_mode = #tpu.pipeline_mode<synchronous>, transform_indices = @transform_2, window_bounds = array<i64: 1, 3>}, {pipeline_mode = #tpu.pipeline_mode<synchronous>, transform_indices = @transform_3, window_bounds = array<i64: 2, 3>}]} {
    %c0_i32 = arith.constant 0 : i32
    %0 = arith.cmpi eq, %arg0, %c0_i32 : i32
    %1 = arith.extui %0 : i1 to i32
    %c0_i32_0 = arith.constant 0 : i32
    %2 = arith.cmpi ne, %1, %c0_i32_0 : i32
    scf.if %2 {
      %cst_9 = arith.constant 0.000000e+00 : f32
      %12 = vector.broadcast %cst_9 : f32 to vector<2x3xf32>
      %c0_10 = arith.constant 0 : index
      %c0_11 = arith.constant 0 : index
      %13 = vector.load %arg5[%c0_10, %c0_11] : memref<2x3xf32, #tpu.memory_space<vmem>>, vector<2x3xf32>
      tpu.vector_store %arg5[%c0_10, %c0_11], %12 {strides = array<i32>} : memref<2x3xf32, #tpu.memory_space<vmem>>, vector<2x3xf32>,
    } else {
    }
    %c0 = arith.constant 0 : index
    %c0_1 = arith.constant 0 : index
    %3 = vector.load %arg5[%c0, %c0_1] : memref<2x3xf32, #tpu.memory_space<vmem>>, vector<2x3xf32>
    %c0_2 = arith.constant 0 : index
    %c0_3 = arith.constant 0 : index
    %4 = vector.load %arg1[%c0_2, %c0_3] : memref<2x512xbf16, #tpu.memory_space<vmem>>, vector<2x512xbf16>
    %c0_4 = arith.constant 0 : index
    %c0_5 = arith.constant 0 : index
    %5 = vector.load %arg2[%c0_4, %c0_5] : memref<3x512xbf16, #tpu.memory_space<vmem>>, vector<3x512xbf16>
    %cst = arith.constant dense<0.000000e+00> : vector<2x3xf32>
    %6 = tpu.matmul %4, %5, %cst {dimension_numbers = #tpu.dot_dimension_numbers<[1], [1], [0], [0], [0, 0, 1, 0], [], []>} : vector<2x512xbf16>, vector<3x512xbf16>, vector<2x3xf32> -> vector<2x3xf32>
    %7 = arith.addf %3, %6 : vector<2x3xf32>
    %c0_6 = arith.constant 0 : index
    %c0_7 = arith.constant 0 : index
    %8 = vector.load %arg5[%c0_6, %c0_7] : memref<2x3xf32, #tpu.memory_space<vmem>>, vector<2x3xf32>
    tpu.vector_store %arg5[%c0_6, %c0_7], %7 {strides = array<i32>} : memref<2x3xf32, #tpu.memory_space<vmem>>, vector<2x3xf32>,
    %c3_i32 = arith.constant 3 : i32
    %9 = arith.cmpi eq, %arg0, %c3_i32 : i32
    %10 = arith.extui %9 : i1 to i32
    %c0_i32_8 = arith.constant 0 : i32
    %11 = arith.cmpi ne, %10, %c0_i32_8 : i32
    scf.if %11 {
      %c0_9 = arith.constant 0 : index
      %c0_10 = arith.constant 0 : index
      %12 = vector.load %arg5[%c0_9, %c0_10] : memref<2x3xf32, #tpu.memory_space<vmem>>, vector<2x3xf32>
      %c0_11 = arith.constant 0 : index
      %c0_12 = arith.constant 0 : index
      %13 = vector.load %arg3[%c0_11, %c0_12] : memref<1x3xf32, #tpu.memory_space<vmem>>, vector<1x3xf32>
      %14 = vector.broadcast %13 : vector<1x3xf32> to vector<2x3xf32>
      %15 = arith.addf %12, %14 : vector<2x3xf32>
      %c0_13 = arith.constant 0 : index
      %c0_14 = arith.constant 0 : index
      %16 = vector.load %arg4[%c0_13, %c0_14] : memref<2x3xf32, #tpu.memory_space<vmem>>, vector<2x3xf32>
      tpu.vector_store %arg4[%c0_13, %c0_14], %15 {strides = array<i32>} : memref<2x3xf32, #tpu.memory_space<vmem>>, vector<2x3xf32>,
    } else {
    }
    return
  }
  func.func @transform_0(%arg0: i32) -> (i32, i32) {
    %c0_i32 = arith.constant 0 : i32
    %c0_i32_0 = arith.constant 0 : i32
    return %c0_i32, %arg0 : i32, i32
  }
  func.func @transform_1(%arg0: i32) -> (i32, i32) {
    %c0_i32 = arith.constant 0 : i32
    %c0_i32_0 = arith.constant 0 : i32
    return %c0_i32, %arg0 : i32, i32
  }
  func.func @transform_2(%arg0: i32) -> (i32, i32) {
    %c0_i32 = arith.constant 0 : i32
    %c0_i32_0 = arith.constant 0 : i32
    %c0_i32_1 = arith.constant 0 : i32
    return %c0_i32, %c0_i32_0 : i32, i32
  }
  func.func @transform_3(%arg0: i32) -> (i32, i32) {
    %c0_i32 = arith.constant 0 : i32
    %c0_i32_0 = arith.constant 0 : i32
    %c0_i32_1 = arith.constant 0 : i32
    return %c0_i32, %c0_i32_0 : i32, i32
  }
}

</mosaic_0001>

<bundles_post_ra>
// kernel: model_forward.5
= control target key start
LH: loop header
LB: loop body
LE: loop exit
PB: predicated region body
PF: predicated region fallthrough
CT: control target
= control target key end

     0   :  { %8 = vsyncpa [#allocation4], 0  ;;  %s487_s12 = smov 0   ;;  %s535_s0 = inlined_call_operand.vmem [shape: bf16[2,2048], index: 0, kind: input, shape index: {}]   ;;  %s536_s1 = inlined_call_operand.vmem [shape: bf16[3,2048], index: 1, kind: input, shape index: {}]   ;;  %s537_s2 = inlined_call_operand.vmem [shape: f32[1,3], index: 2, kind: input, shape index: {}]   ;;  %s538_s3 = inlined_call_operand.hbm [shape: f32[2,3], index: 3, kind: output, shape index: {}]  }
   0x1 LB: > { %s493_s13 = sadd.s32 4294967295, %s461_s12   ;;  %p394_p0 = scmp.ge.s32.totalorder %s461_s12, 1  ;;  %s461_s12 = sphi %s487_s12, %s14_s12  }
   0x2   : > { %p144_p1 = scmp.lt.s32.totalorder %s461_s12, 5 }
   0x4   : > { %p145_p2 = pnand %p394_p0, %p144_p1 }
   0x5   : > { %s395_s14 = sshll.u32 (!%p145_p2), %s493_s13, 2  ;;  %p398_p4 = scmp.ne.s32.totalorder (!%p145_p2), %s493_s13, 0 }
   0x6   : > { %148 = sbr.rel (%p145_p2) target bundleno = 291 (0x123), region = 32  ;;  %p168_p3 = scmp.lt.s32.totalorder (!%p145_p2), %s395_s14, 15 }
   0xd   : > { %s540_s14 = smov (!%p168_p3, %s395_s14), 15  ;;  %182 = sbr.rel (%p398_p4) target bundleno = 20 (0x14), region = 36 }
   0xe   : > { %s170_s17 = scalar_lea.vmem %s535_s0, %s540_s14  ;;  %s397_s18 = sshll.u32 %s540_s14, 1  ;;  %vm183_vm0 = vcmask (!%p398_p4), 17408   ;;  %v463_v0 = vmov (!%p398_p4), 0.0  }
   0xf   : > { %s176_s21 = scalar_lea.vmem %s536_s1, %s397_s18  ;;  %184 = vst.msk [vmem:[#allocation2] sm:$0x3] (!%p398_p4), %vm183_vm0, %v463_v0 }
  0x14 PF: > { %v187_v1 = vld [vmem:[%s176_s21] sm:$0xff]  ;;  %v200_v2 = vlaneseq  ;;  %v464_v3 = vmov 1983009808   ;;  %v465_v6 = vmov 1966171168   ;;  %vm320_vm1 = vcmask 17408  }
  0x15   : > { %v220_v4 = vunpack.c.l.s4 %v464_v3  ;;  %v399_v5 = vld.sshfl [vmem:[%s170_s17] sm:$0x33 pattern:$0x75316420]  ;;  %v198_v7 = vunpack.c.l.s4 %v465_v6  ;;  %v218_v10 = vcombine.high %v187_v1, %v187_v1  ;;  %p400_p5 = scmp.ne.s32.totalorder %s493_s13, 3 }
  0x16   : > { %v201_v8 = vshrl.u32 %v200_v2, 7  ;;  %v196_v11 = vcombine.high %v399_v5, %v399_v5  ;;  %v185_v24 = vld [vmem:[#allocation2] sm:$0x3] }
  0x17   : > { %v221_v9 = vunpack.c.0.s8 %v220_v4  ;;  %v199_v12 = vunpack.c.0.s8 %v198_v7  ;;  %v401_v35 = vld [vmem:[%s537_s2] ss:$0 sm:$0xff] (!%p400_p5) }
  0x19   : > { %v224_v13 = vsub.s32 %v221_v9, %v201_v8  ;;  %v202_v14 = vsub.s32 %v199_v12, %v201_v8 }
  0x1b   : > { %v225_v15 = vrot.slane %v187_v1, %v224_v13  ;;  %v232_v16 = vrot.slane %v218_v10, %v224_v13  ;;  %v210_v17 = vrot.slane %v196_v11, %v202_v14  ;;  %v203_v21 = vrot.slane %v399_v5, %v202_v14 }
  0x1d   : > { %v233_v18 = vcombine.high %v225_v15, %v225_v15  ;;  %v234_v19 = vcombine.high %v232_v16, %v232_v16  ;;  %271 = vmatprep.mubr.bf16.mxu0 %v210_v17  ;;  %v212_v20 = vcombine.high %v210_v17, %v210_v17  ;;  %v211_v22 = vcombine.high %v203_v21, %v203_v21 }
  0x1f   : > { %239 = vmatprep.subr.bf16.mxu0 %v233_v18  ;;  %279 = vmatprep.subr.bf16.mxu1 %v234_v19 }
  0x20   : > { %240 = vmatpush1.bf16.xpose.msra.mxu0 %v225_v15  ;;  %280 = vmatpush1.bf16.xpose.msra.mxu1 %v232_v16 }
  0x21   : > { %311 = vmatprep.mubr.bf16.mxu1 %v212_v20 }
  0x27   : > { %272 = vmatmul.mubr.bf16.vlgmr.msra.gmra.mrb[0].mxu0 %v203_v21  ;;  %312 = vmatmul.mubr.bf16.vlgmr.msra.gmra.mrb[0].mxu1 %v211_v22 }
  0xf9   : > { %325 = sbr.rel (%p400_p5) target bundleno = 266 (0x10a), region = 40 }
  0xfa   : > { %v273_v23 = vpop.f32.mrb[0].mxu0  ;;  %v313_v25 = vpop.f32.mrb[0].mxu1 }
  0xfb   : > { %v314_v26 = vadd.f32 %v313_v25, %v273_v23  ;;  %v275_v27 = vpop.f32.mrb[1].mxu0  ;;  %v315_v28 = vpop.f32.mrb[1].mxu1 }
  0xfc   : > { %v276_v29 = vpop.f32.mrb[2].mxu0  ;;  %v316_v30 = vpop.f32.mrb[2].mxu1 }
  0xfd   : > { %v319_v31 = vadd.f32 %v314_v26, %v185_v24  ;;  %v277_v32 = vpop.f32.mrb[3].mxu0  ;;  %v317_v33 = vpop.f32.mrb[3].mxu1 }
  0xff   : > { %321 = vst.msk [vmem:[#allocation2] sm:$0x3] %vm320_vm1, %v319_v31 }
 0x106   : > { %v326_v34 = vld [vmem:[#allocation2] sm:$0x3] }
 0x107   : > { %v334_v36 = vadd.f32 %v401_v35, %v326_v34 }
 0x109   : > { %335 = vst.msk [vmem:[#allocation3] sm:$0x3] %vm320_vm1, %v334_v36 }
 0x10a PF: > { %p410_p6 = scmp.eq.s32.totalorder %s493_s13, 3  ;;  %s466_s24 = smov [#allocation3]  }
 0x10b   : > { %s343_s25 = sshll.u32 %s466_s24, 4  ;;  %s344_s25 = int_to_ptr.vmem [resolvable:$true] %s343_s25 }
 0x10c   : > { %s425_s26 = scalar_lea.vmem %s344_s25, 32  ;;  %p432_p10 = scmp.lt.s32.totalorder %s344_s25, %s344_s25 }
 0x10d   : > { %p426_p7 = scmp.ne.s32.totalorder %s344_s25, %s425_s26  ;;  %p433_p11 = scmp.lt.s32.totalorder %s425_s26, %s425_s26 }
 0x10f   : > { %p427_p8 = pnand %p426_p7, %p410_p6  ;;  %p434_p12 = por %p433_p11, %p432_p10 }
 0x111   : > { %p428_p9 = pneg %p427_p8 }
 0x113   : > { %p435_p13 = pnand %p434_p12, %p428_p9 }
 0x115   : > { %438 = shalt.err (!%p435_p13)
}
 0x116   : > { %s439_s29 = scalar_lea.hbm %s538_s3, 32 }
 0x117   : > { %p440_p0 = scmp.ne.s32.totalorder %s538_s3, %s439_s29  ;;  %p445_p3 = scmp.lt.u32.totalorder %s439_s29, %s538_s3 }
 0x119   : > { %p441_p1 = pnand %p440_p0, %p410_p6 }
 0x11b   : > { %p442_p2 = pneg %p441_p1 }
 0x11d   : > { %p447_p4 = pnand %p445_p3, %p442_p2 }
 0x11f   : > { %450 = shalt.err (!%p447_p4)
}
 0x120   : > { %407 = dma.vmem_to_hbm [thread:$0]  (%p410_p6), %s344_s25, 32, %s538_s3, [#allocation4]  }
 0x121   : > { %456 = dma.done.wait (%p410_p6), [#allocation4], 32  }
 0x122   : > { %458 = vsyncadd (%p410_p6), [#allocation4], 4294967264 }
 0x123 PF: > { %s14_s12 = sadd.s32 1, %s461_s12  }
 0x124   : > { %p11_p5 = scmp.ge.s32.totalorder %s14_s12, 6  }
 0x126   :  { %13 = sbr.rel (!%p11_p5) target bundleno = 1 (0x1), region = 70 }
 0x12d   :  { %356 = vsyncpa [#allocation4], 1 }
 0x12e   :  { %358 = vsyncpa [#allocation4 + $0x1], 1 }

// kernel: model_forward.4
= control target key start
LH: loop header
LB: loop body
LE: loop exit
PB: predicated region body
PF: predicated region fallthrough
CT: control target
= control target key end

     0   :  { %s3576_s18 = smov 0   ;;  %s4878_s0 = inlined_call_operand.vmem [shape: bf16[2,8,8,32], index: 0, kind: input, shape index: {}]   ;;  %s4879_s1 = inlined_call_operand.vmem [shape: bf16[288,64], index: 1, kind: input, shape index: {}]   ;;  %s4880_s2 = inlined_call_operand.vmem [shape: f32[1,64], index: 2, kind: input, shape index: {}]   ;;  %s4881_s3 = inlined_call_operand.vmem [shape: bf16[576,128], index: 3, kind: input, shape index: {}]   ;;  %s4882_s4 = inlined_call_operand.vmem [shape: f32[1,128], index: 4, kind: input, shape index: {}]   ;;  %s4883_s5 = inlined_call_operand.vmem [shape: bf16[2,4,4,128], index: 5, kind: output, shape index: {}]  }
   0x1 LB: > { %s3066_s19 = sadd.s32 4294967295, %s3540_s18   ;;  %p3070_p0 = scmp.ge.s32.totalorder %s3540_s18, 1  ;;  %s3540_s18 = sphi %s3576_s18, %s15_s18  }
   0x2   : > { %p187_p1 = scmp.lt.s32.totalorder %s3540_s18, 3 }
   0x4   : > { %p188_p2 = pnand %p3070_p0, %p187_p1 }
   0x6   : > { %191 = sbr.rel (%p188_p2) target bundleno = 872 (0x368), region = 40 }
   0xd   : > { %p3584_p3 = scmp.lt.s32.totalorder %s3066_s19, 1  ;;  %vm226_vm0 = vcmask 257024   ;;  %v4884_v0 = vmov 0   ;;  %vm228_vm1 = vcmask 253952   ;;  %v3461_v1 = vld [vmem:[%s4879_s1 + $0x40] sm:$0xff]   ;;  %vm546_vm4 = vcmask 1042432  }
   0xe   : > { %236 = vst.msk [vmem:[#allocation2 + $0x20] sm:$0xf] %vm226_vm0, %v4884_v0  ;;  %238 = vst.msk [vmem:[#allocation2 + $0x28] sm:$0xf] %vm226_vm0, %v4884_v0  ;;  %vm338_vm2 = vsmask.f32 7938  ;;  %3279 = vmatprep.subr.bf16.mxu0 %v3461_v1 }
   0xf   : > { %227 = vst.msk [vmem:[#allocation2] sm:$0xf] %vm226_vm0, %v4884_v0  ;;  %230 = vst.msk [vmem:[#allocation2 + $0x8] sm:$0xf] %vm226_vm0, %v4884_v0  ;;  %s4950_s19 = smov (!%p3584_p3, %s3066_s19), 1  ;;  %v3462_v2 = vld [vmem:[%s4879_s1] sm:$0xff]  }
  0x10   : > { %232 = vst.msk [vmem:[#allocation2 + $0x10] sm:$0xf] %vm226_vm0, %v4884_v0  ;;  %234 = vst.msk [vmem:[#allocation2 + $0x18] sm:$0xf] %vm226_vm0, %v4884_v0  ;;  %s3269_s23 = sshll.u32 %s4950_s19, 5  ;;  %3280 = vmatpush3.bf16.msra.mxu0 %v3462_v2  ;;  %vm547_vm6 = vcmask 1046532  }
  0x11   : > { %240 = vst.msk [vmem:[#allocation2 + $0x30] sm:$0xf] %vm226_vm0, %v4884_v0  ;;  %242 = vst.msk [vmem:[#allocation2 + $0x38] sm:$0xf] %vm226_vm0, %v4884_v0  ;;  %s3639_s26 = scalar_lea.vmem %s4878_s0, %s3269_s23  ;;  %vm344_vm3 = vsmask.f32 256 }
  0x12   : > { %244 = vst.msk [vmem:[#allocation2 + $0x40] sm:$0xf] %vm226_vm0, %v4884_v0  ;;  %246 = vst.msk [vmem:[#allocation2 + $0x48] sm:$0xf] %vm226_vm0, %v4884_v0  ;;  %v251_v3 = vld [vmem:[%s3639_s26 + $0xc] sm:$0xf] }
  0x13   : > { %231 = vst.msk [vmem:[#allocation2 + $0xc] sm:$0x1] %vm228_vm1, %v4884_v0  ;;  %233 = vst.msk [vmem:[#allocation2 + $0x14] sm:$0x1] %vm228_vm1, %v4884_v0  ;;  %v252_v4 = vld [vmem:[%s3639_s26 + $0x10] sm:$0xf] }
  0x14   : > { %229 = vst.msk [vmem:[#allocation2 + $0x4] sm:$0x1] %vm228_vm1, %v4884_v0  ;;  %235 = vst.msk [vmem:[#allocation2 + $0x1c] sm:$0x1] %vm228_vm1, %v4884_v0  ;;  %v249_v5 = vld [vmem:[%s3639_s26 + $0x4] sm:$0xf] }
  0x15   : > { %237 = vst.msk [vmem:[#allocation2 + $0x24] sm:$0x1] %vm228_vm1, %v4884_v0  ;;  %239 = vst.msk [vmem:[#allocation2 + $0x2c] sm:$0x1] %vm228_vm1, %v4884_v0  ;;  %v281_v6 = vshrl.u32 %v251_v3, 16  ;;  %v284_v7 = vshll.u32 %v251_v3, 16 }
  0x16   : > { %241 = vst.msk [vmem:[#allocation2 + $0x34] sm:$0x1] %vm228_vm1, %v4884_v0  ;;  %243 = vst.msk [vmem:[#allocation2 + $0x3c] sm:$0x1] %vm228_vm1, %v4884_v0  ;;  %v289_v8 = vshrl.u32 %v252_v4, 16  ;;  %v292_v9 = vshll.u32 %v252_v4, 16 }
  0x17   : > { %245 = vst.msk [vmem:[#allocation2 + $0x44] sm:$0x1] %vm228_vm1, %v4884_v0  ;;  %247 = vst.msk [vmem:[#allocation2 + $0x4c] sm:$0x1] %vm228_vm1, %v4884_v0  ;;  %v250_v10 = vld [vmem:[%s3639_s26 + $0x8] sm:$0xf] }
  0x18   : > { %v361_v11 = vld [vmem:[#allocation2 + $0x20] sm:$0xf]  ;;  %v265_v12 = vshrl.u32 %v249_v5, 16  ;;  %v268_v13 = vshll.u32 %v249_v5, 16  ;;  %v283_v14 = vrot.slane %v281_v6, 7  ;;  %v291_v15 = vrot.slane %v289_v8, 7  ;;  %vm3650_vm5 = vmand %vm226_vm0, %vm338_vm2 }
  0x19   : > { %v367_v16 = vld [vmem:[#allocation2 + $0x28] sm:$0xf]  ;;  %v273_v17 = vshrl.u32 %v250_v10, 16  ;;  %v276_v20 = vshll.u32 %v250_v10, 16  ;;  %v248_v21 = vld [vmem:[%s3639_s26] sm:$0xf]  ;;  %vm3660_vm7 = vmand %vm228_vm1, %vm344_vm3 }
  0x1a   : > { %v267_v19 = vrot.slane %v265_v12, 7  ;;  %v3463_v22 = vld [vmem:[%s4879_s1 + $0x48] sm:$0xff]   ;;  %v286_v23 = vor.u32 %v284_v7, %v283_v14  ;;  %v287_v24 = vrot.slane %v283_v14, 4  ;;  %v294_v25 = vor.u32 %v292_v9, %v291_v15  ;;  %v349_v27 = vld [vmem:[#allocation2 + $0x10] sm:$0xf]  ;;  %v3467_v4 = vld [vmem:[%s4879_s1 + $0x58] sm:$0xff]  }
  0x1b   : > { %v295_v26 = vrot.slane %v291_v15, 4  ;;  %v355_v28 = vld [vmem:[#allocation2 + $0x18] sm:$0xf]  ;;  %v275_v31 = vrot.slane %v273_v17, 7  ;;  %v257_v32 = vshrl.u32 %v248_v21, 16  ;;  %3281 = vmatprep.subr.bf16.mxu0 %v3463_v22  ;;  %v3464_v35 = vld [vmem:[%s4879_s1 + $0x8] sm:$0xff]   ;;  %vm3706_vm8 = vmor %vm546_vm4, %vm547_vm6 }
  0x1c   : > { %v270_v29 = vor.u32 %v268_v13, %v267_v19  ;;  %v271_v30 = vrot.slane %v267_v19, 4  ;;  %v352_v34 = vld [vmem:[#allocation2 + $0x14] sm:$0x1]  ;;  %v362_v36 = vsel %vm3650_vm5, %v286_v23, %v361_v11  ;;  %v368_v37 = vsel %vm3650_vm5, %v294_v25, %v367_v16  ;;  %v358_v39 = vld [vmem:[#allocation2 + $0x1c] sm:$0x1]  ;;  %3282 = vmatpush3.bf16.msra.mxu0 %v3464_v35  ;;  %s3543_s16 = smov 64  }
  0x1d   : > { %v260_v38 = vshll.u32 %v248_v21, 16  ;;  %v364_v40 = vld [vmem:[#allocation2 + $0x24] sm:$0x1]  ;;  %v3465_v41 = vld [vmem:[%s4879_s1 + $0x50] sm:$0xff]   ;;  %363 = vst [vmem:[#allocation2 + $0x20] sm:$0xf] %v362_v36  ;;  %v278_v42 = vor.u32 %v276_v20, %v275_v31 }
  0x1e   : > { %369 = vst [vmem:[#allocation2 + $0x28] sm:$0xf] %v368_v37  ;;  %v279_v43 = vrot.slane %v275_v31, 4  ;;  %v350_v44 = vsel %vm3650_vm5, %v270_v29, %v349_v27  ;;  %v259_v45 = vrot.slane %v257_v32, 7  ;;  %v253_v46 = vld [vmem:[%s3639_s26 + $0x14] sm:$0xf]  ;;  %v353_v50 = vsel %vm3660_vm7, %v271_v30, %v352_v34  ;;  %3283 = vmatprep.subr.bf16.mxu0 %v3465_v41 }
  0x1f   : > { %v370_v47 = vld [vmem:[#allocation2 + $0x2c] sm:$0x1]  ;;  %351 = vst [vmem:[#allocation2 + $0x10] sm:$0xf] %v350_v44  ;;  %v340_v48 = vld [vmem:[#allocation2 + $0x8] sm:$0xf]  ;;  %v365_v51 = vsel %vm3660_vm7, %v287_v24, %v364_v40  ;;  %v356_v54 = vsel %vm3650_vm5, %v278_v42, %v355_v28 }
  0x20   : > { %v346_v49 = vld [vmem:[#allocation2 + $0xc] sm:$0x1]  ;;  %v297_v52 = vshrl.u32 %v253_v46, 16  ;;  %v300_v53 = vshll.u32 %v253_v46, 16  ;;  %v262_v55 = vor.u32 %v260_v38, %v259_v45  ;;  %v263_v56 = vrot.slane %v259_v45, 4  ;;  %v3466_v61 = vld [vmem:[%s4879_s1 + $0x10] sm:$0xff]  }
  0x21   : > { %354 = vst [vmem:[#allocation2 + $0x14] sm:$0x1] %v353_v50  ;;  %v359_v57 = vsel %vm3660_vm7, %v279_v43, %v358_v39  ;;  %366 = vst [vmem:[#allocation2 + $0x24] sm:$0x1] %v365_v51  ;;  %v373_v58 = vld [vmem:[#allocation2 + $0x30] sm:$0xf]  ;;  %v371_v63 = vsel %vm3660_vm7, %v295_v26, %v370_v47  ;;  %3284 = vmatpush3.bf16.msra.mxu0 %v3466_v61 }
  0x22   : > { %v3685_v59 = vld [vmem:[#allocation2 + $0x4] sm:$0x1]  ;;  %v522_v60 = vld [vmem:[#allocation2] sm:$0xe]  ;;  %357 = vst [vmem:[#allocation2 + $0x18] sm:$0xf] %v356_v54  ;;  %v341_v5 = vsel %vm3650_vm5, %v262_v55, %v340_v48  ;;  %v347_v6 = vsel %vm3660_vm7, %v263_v56, %v346_v49  ;;  %3285 = vmatprep.subr.bf16.mxu0 %v3467_v4 }
  0x23   : > { %360 = vst [vmem:[#allocation2 + $0x1c] sm:$0x1] %v359_v57  ;;  %v299_v62 = vrot.slane %v297_v52, 7  ;;  %v3075_v1 = vrot.slane %v522_v60, 9  ;;  %v551_v2 = vrot.slane %v3685_v59, 5  ;;  %v420_v13 = vshll.u32 %v3685_v59, 16 }
  0x24   : > { %v391_v3 = vld [vmem:[#allocation2] sm:$0xf]  ;;  %372 = vst [vmem:[#allocation2 + $0x2c] sm:$0x1] %v371_v63  ;;  %v376_v7 = vld [vmem:[#allocation2 + $0x34] sm:$0x1] }
  0x25   : > { %v411_v8 = vshrl.u32 %v391_v3, 16  ;;  %v414_v9 = vshll.u32 %v391_v3, 16  ;;  %v3701_v10 = vld [vmem:[%s3639_s26 + $0x18] sm:$0xf]  ;;  %342 = vst [vmem:[#allocation2 + $0x8] sm:$0xf] %v341_v5  ;;  %v302_v11 = vor.u32 %v300_v53, %v299_v62  ;;  %v3724_v25 = vsel %vm3706_vm8, %v3075_v1, %v551_v2 }
  0x26   : > { %348 = vst [vmem:[#allocation2 + $0xc] sm:$0x1] %v347_v6  ;;  %v303_v12 = vrot.slane %v299_v62, 4  ;;  %v305_v17 = vshrl.u32 %v3701_v10, 16  ;;  %v308_v19 = vshll.u32 %v3701_v10, 16  ;;  %v3468_v31 = vld [vmem:[%s4879_s1 + $0x18] sm:$0xff]  }
  0x27   : > { %v3710_v15 = vrot.slane %v411_v8, 4  ;;  %v3712_v16 = vrot.slane %v414_v9, 5  ;;  %v768_v20 = vld [vmem:[#allocation2 + $0x20] sm:$0xf]  ;;  %v769_v21 = vld [vmem:[#allocation2 + $0x28] sm:$0xf]  ;;  %v374_v23 = vsel %vm3650_vm5, %v302_v11, %v373_v58  ;;  %3286 = vmatpush3.bf16.msra.mxu0 %v3468_v31 }
  0x28   : > { %v3716_v22 = vld [vmem:[#allocation2 + $0x20] sm:$0xe]  ;;  %v377_v24 = vsel %vm3660_vm7, %v303_v12, %v376_v7  ;;  %v825_v26 = vshrl.u32 %v769_v21, 16  ;;  %v828_v27 = vshll.u32 %v769_v21, 16  ;;  %v3124_v28 = vcombine.low %v768_v20, %v769_v21  ;;  %v766_v30 = vld [vmem:[#allocation2 + $0x10] sm:$0xf] }
  0x29   : > { %v811_v29 = vshrl.u32 %v768_v20, 16  ;;  %375 = vst [vmem:[#allocation2 + $0x30] sm:$0xf] %v374_v23  ;;  %378 = vst [vmem:[#allocation2 + $0x34] sm:$0x1] %v377_v24  ;;  %v814_v32 = vshll.u32 %v768_v20, 16  ;;  %v417_v54 = vor.u32 %v3712_v16, %v3710_v15 }
  0x2a   : > { %v783_v34 = vshrl.u32 %v766_v30, 16  ;;  %v786_v35 = vshll.u32 %v766_v30, 16  ;;  %v3729_v36 = vld [vmem:[#allocation2 + $0x14] sm:$0x1]  ;;  %v3086_v37 = vrot.slane %v3716_v22, 9  ;;  %v827_v38 = vrot.slane %v825_v26, 4  ;;  %1092 = vrot.lane.b32.xlu0 %v3124_v28, %s3543_s16 }
  0x2b   : > { %v830_v39 = vrot.slane %v828_v27, 5  ;;  %v813_v40 = vrot.slane %v811_v29, 4  ;;  %v767_v41 = vld [vmem:[#allocation2 + $0x18] sm:$0xf]  ;;  %v621_v42 = vshll.u32 %v3729_v36, 16  ;;  %v816_v43 = vrot.slane %v814_v32, 5 }
  0x2c   : > { %v797_v44 = vshrl.u32 %v767_v41, 16  ;;  %v800_v45 = vshll.u32 %v767_v41, 16  ;;  %v3123_v46 = vcombine.low %v766_v30, %v767_v41  ;;  %v710_v47 = vld [vmem:[#allocation2 + $0x10] sm:$0xe]  ;;  %v3469_v48 = vld [vmem:[%s4879_s1 + $0x60] sm:$0xff]   ;;  %v785_v50 = vrot.slane %v783_v34, 4 }
  0x2d   : > { %v831_v49 = vor.u32 %v830_v39, %v827_v38  ;;  %v788_v51 = vrot.slane %v786_v35, 5  ;;  %v3737_v52 = vld [vmem:[#allocation2 + $0xc] sm:$0x1]  ;;  %v709_v53 = vld [vmem:[#allocation2 + $0x8] sm:$0xe]  ;;  %v817_v55 = vor.u32 %v816_v43, %v813_v40  ;;  %3287 = vmatprep.subr.bf16.mxu0 %v3469_v48  ;;  %v3470_v61 = vld [vmem:[%s4879_s1 + $0x20] sm:$0xff]  }
  0x2e   : > { %v799_v56 = vrot.slane %v797_v44, 4  ;;  %v802_v57 = vrot.slane %v800_v45, 5  ;;  %1090 = vrot.lane.b32.xlu1 %v3123_v46, %s3543_s16  ;;  %v607_v58 = vshll.u32 %v3737_v52, 16  ;;  %v581_v60 = vld [vmem:[#allocation2 + $0x8] sm:$0xf]  ;;  %v3083_v1 = vrot.slane %v709_v53, 9  ;;  %3288 = vmatpush3.bf16.msra.mxu0 %v3470_v61 }
  0x2f   : > { %v3746_v62 = vrot.slane %v831_v49, 4  ;;  %v789_v63 = vor.u32 %v788_v51, %v785_v50  ;;  %v735_v2 = vrot.slane %v3737_v52, 5  ;;  %v582_v3 = vld [vmem:[#allocation2 + $0x10] sm:$0xf]  ;;  %v3471_v4 = vld [vmem:[%s4879_s1 + $0x68] sm:$0xff]   ;;  %v3752_v5 = vrot.slane %v817_v55, 4 }
  0x30   : > { %v803_v6 = vor.u32 %v802_v57, %v799_v56  ;;  %v3084_v7 = vrot.slane %v710_v47, 9  ;;  %v739_v8 = vrot.slane %v3729_v36, 5  ;;  %v3472_v9 = vld [vmem:[%s4879_s1 + $0x28] sm:$0xff]   ;;  %v612_v20 = vshrl.u32 %v582_v3, 16  ;;  %v3762_v23 = vld [vmem:[#allocation2 + $0x1c] sm:$0x1]  ;;  %3289 = vmatprep.subr.bf16.mxu0 %v3471_v4 }
  0x31   : > { %v3758_v11 = vrot.slane %v789_v63, 4  ;;  %v736_v12 = vsel %vm3706_vm8, %v3083_v1, %v735_v2  ;;  %v615_v21 = vshll.u32 %v582_v3, 16  ;;  %v3111_v27 = vcombine.low %v581_v60, %v582_v3  ;;  %v3768_v29 = vld [vmem:[#allocation2 + $0x24] sm:$0x1]  ;;  %v711_v30 = vld [vmem:[#allocation2 + $0x18] sm:$0xe] }
  0x32   : > { %v3764_v24 = vrot.slane %v803_v6, 4  ;;  %v740_v26 = vsel %vm3706_vm8, %v3084_v7, %v739_v8  ;;  %v598_v28 = vshrl.u32 %v581_v60, 16  ;;  %v614_v32 = vrot.slane %v612_v20, 4  ;;  %v583_v38 = vld [vmem:[#allocation2 + $0x18] sm:$0xf]  ;;  %v3473_v39 = vld [vmem:[%s4879_s1 + $0x70] sm:$0xff]   ;;  %3290 = vmatpush3.bf16.msra.mxu0 %v3472_v9 }
  0x33   : > { %v3119_v31 = vcombine.low %v736_v12, %v740_v26  ;;  %v617_v34 = vrot.slane %v615_v21, 5  ;;  %v601_v35 = vshll.u32 %v581_v60, 16  ;;  %s3544_s30 = smov 96   ;;  %v3085_v44 = vrot.slane %v711_v30, 9  ;;  %v584_v45 = vld [vmem:[#allocation2 + $0x20] sm:$0xf]  ;;  %3291 = vmatprep.subr.bf16.mxu0 %v3473_v39 }
  0x34   : > { %1030 = vrot.lane.b32.xlu1 %v3111_v27, %s3544_s30  ;;  %v600_v40 = vrot.slane %v598_v28, 4  ;;  %s3545_s6 = smov 32   ;;  %v743_v48 = vrot.slane %v3762_v23, 5  ;;  %v747_v49 = vrot.slane %v3768_v29, 5  ;;  %v3779_v50 = vld [vmem:[#allocation2 + $0x2c] sm:$0x1]  ;;  %v3112_v27 = vcombine.low %v583_v38, %v584_v45 }
  0x35   : > { %1062 = vrot.lane.b32.xlu0 %v3119_v31, %s3545_s6  ;;  %v618_v46 = vor.u32 %v617_v34, %v614_v32  ;;  %v603_v47 = vrot.slane %v601_v35, 5  ;;  %v3474_v51 = vld [vmem:[%s4879_s1 + $0x30] sm:$0xff]   ;;  %v626_v53 = vshrl.u32 %v583_v38, 16  ;;  %v629_v55 = vshll.u32 %v583_v38, 16  ;;  %v713_v61 = vld [vmem:[#allocation2 + $0x28] sm:$0xe] }
  0x36   : > { %v640_v56 = vshrl.u32 %v584_v45, 16  ;;  %v643_v57 = vshll.u32 %v584_v45, 16  ;;  %v3784_v60 = vld [vmem:[#allocation2 + $0x34] sm:$0x1]  ;;  %v744_v2 = vsel %vm3706_vm8, %v3085_v44, %v743_v48  ;;  %v748_v3 = vsel %vm3706_vm8, %v3086_v37, %v747_v49  ;;  %v714_v4 = vld [vmem:[#allocation2 + $0x30] sm:$0xe]  ;;  %3292 = vmatpush3.bf16.msra.mxu0 %v3474_v51 }
  0x37   : > { %v3786_v63 = vrot.slane %v618_v46, 4  ;;  %v604_v1 = vor.u32 %v603_v47, %v600_v40  ;;  %v3794_v6 = vld [vmem:[#allocation2 + $0xc] sm:$0x1]  ;;  %v3475_v7 = vld [vmem:[%s4879_s1 + $0x80] sm:$0xff]   ;;  %v3120_v8 = vcombine.low %v744_v2, %v748_v3  ;;  %v628_v9 = vrot.slane %v626_v53, 4  ;;  %v3477_v59 = vld [vmem:[%s4879_s1 + $0x78] sm:$0xff]  }
  0x38   : > { %v631_v12 = vrot.slane %v629_v55, 5  ;;  %v642_v20 = vrot.slane %v640_v56, 4  ;;  %v523_v21 = vld [vmem:[#allocation2 + $0x8] sm:$0xe]  ;;  %vm407_vm9 = vsmask.f32 3328  ;;  %3413 = vmatprep.subr.bf16.mxu1 %v3475_v7  ;;  %1032 = vrot.lane.b32.xlu1 %v3112_v27, %s3544_s30 }
  0x39   : > { %vm408_vm10 = vsmask.f32 7440  ;;  %v3799_v26 = vrot.slane %v604_v1, 4  ;;  %v645_v22 = vrot.slane %v643_v57, 5  ;;  %v3802_v28 = vld [vmem:[#allocation2 + $0x14] sm:$0x1]  ;;  %1064 = vrot.lane.b32.xlu0 %v3120_v8, %s3545_s6  ;;  %3414 = vmatpush3.bf16.msra.mxu1 %v3475_v7 }
  0x3a   : > { %v632_v30 = vor.u32 %v631_v12, %v628_v9  ;;  %v3087_v32 = vrot.slane %v713_v61, 9  ;;  %v751_v34 = vrot.slane %v3779_v50, 5  ;;  %v3807_v35 = vld [vmem:[#allocation2 + $0x1c] sm:$0x1]  ;;  %v3088_v38 = vrot.slane %v714_v4, 9  ;;  %3293 = vmatprep.subr.bf16.mxu0 %v3477_v59  ;;  %vm3858_vm11 = vmor %vm407_vm9, %vm408_vm10  ;;  %s3270_s29 = sshll.u32 %s4950_s19, 3 }
  0x3b   : > { %v646_v39 = vor.u32 %v645_v22, %v642_v20  ;;  %v755_v40 = vrot.slane %v3784_v60, 5  ;;  %v3076_v44 = vrot.slane %v523_v21, 9  ;;  %v524_v45 = vld [vmem:[#allocation2 + $0x10] sm:$0xe]  ;;  %v555_v48 = vrot.slane %v3794_v6, 5  ;;  %s224_s7 = scalar_lea.vmem %s4883_s5, %s3270_s29 }
  0x3c   : > { %v3811_v46 = vrot.slane %v632_v30, 4  ;;  %v752_v47 = vsel %vm3706_vm8, %v3087_v32, %v751_v34  ;;  %v525_v49 = vld [vmem:[#allocation2 + $0x18] sm:$0xe]  ;;  %v3077_v51 = vrot.slane %v524_v45, 9  ;;  %v559_v56 = vrot.slane %v3802_v28, 5 }
  0x3d   : > { %v3816_v53 = vrot.slane %v646_v39, 4  ;;  %v756_v55 = vsel %vm3706_vm8, %v3088_v38, %v755_v40  ;;  %v3078_v57 = vrot.slane %v525_v49, 9  ;;  %v3821_v61 = vld [vmem:[#allocation2 + $0x8] sm:$0xf]  ;;  %v556_v2 = vsel %vm3706_vm8, %v3076_v44, %v555_v48  ;;  %v3829_v7 = vld [vmem:[#allocation2 + $0x24] sm:$0x1] }
  0x3e   : > { %v3121_v1 = vcombine.low %v752_v47, %v756_v55  ;;  %v563_v3 = vrot.slane %v3807_v35, 5  ;;  %v418_v4 = vrot.slane %v417_v54, 4  ;;  %v3831_v8 = vld [vmem:[#allocation2 + $0x2c] sm:$0x1]  ;;  %v3107_v9 = vcombine.low %v3724_v25, %v556_v2  ;;  %v526_v22 = vld [vmem:[#allocation2 + $0x20] sm:$0xe] }
  0x3f   : > { %v560_v12 = vsel %vm3706_vm8, %v3077_v51, %v559_v56  ;;  %v422_v20 = vrot.slane %v420_v13, 5  ;;  %v425_v21 = vshrl.u32 %v3821_v61, 16  ;;  %v527_v27 = vld [vmem:[#allocation2 + $0x28] sm:$0xe]  ;;  %v428_v16 = vshll.u32 %v3821_v61, 16 }
  0x40   : > { %1066 = vrot.lane.b32.xlu0 %v3121_v1, %s3545_s6  ;;  %v564_v15 = vsel %vm3706_vm8, %v3078_v57, %v563_v3  ;;  %v434_v54 = vshll.u32 %v3794_v6, 16  ;;  %v3079_v25 = vrot.slane %v526_v22, 9  ;;  %v3844_v30 = vld [vmem:[#allocation2 + $0x14] sm:$0x1]  ;;  %1002 = vrot.lane.b32.xlu1 %v3107_v9, %s3543_s16  ;;  %v567_v34 = vrot.slane %v3829_v7, 5  ;;  %v3478_v57 = vld [vmem:[%s4879_s1 + $0x38] sm:$0xff]  }
  0x41   : > { %v3108_v13 = vcombine.low %v560_v12, %v564_v15  ;;  %v427_v32 = vrot.slane %v425_v21, 4  ;;  %v3851_v39 = vld [vmem:[#allocation2 + $0x1c] sm:$0x1]  ;;  %v3853_v38 = vld [vmem:[#allocation2 + $0x10] sm:$0xf]  ;;  %v430_v40 = vrot.slane %v428_v16, 5  ;;  %3294 = vmatpush3.bf16.msra.mxu0 %v3478_v57  ;;  %v423_v16 = vsel %vm3858_vm11, %v418_v4, %v422_v20 }
  0x42   : > { %v436_v44 = vrot.slane %v434_v54, 5  ;;  %v3080_v6 = vrot.slane %v527_v27, 9  ;;  %v571_v45 = vrot.slane %v3831_v8, 5  ;;  %v568_v48 = vsel %vm3706_vm8, %v3079_v25, %v567_v34  ;;  %v3866_v55 = vld [vmem:[#allocation2 + $0x18] sm:$0xf]  ;;  %v3479_v15 = vld [vmem:[%s4879_s1 + $0x88] sm:$0xff]  }
  0x43   : > { %v792_v49 = vshll.u32 %v3844_v30, 16  ;;  %v806_v51 = vshll.u32 %v3851_v39, 16  ;;  %v439_v56 = vshrl.u32 %v3853_v38, 16  ;;  %v431_v1 = vor.u32 %v430_v40, %v427_v32  ;;  %v3891_v40 = vld [vmem:[#allocation2 + $0x30] sm:$0xf]  ;;  %3415 = vmatprep.subr.bf16.mxu1 %v3479_v15 }
  0x44   : > { %v572_v2 = vsel %vm3706_vm8, %v3080_v6, %v571_v45  ;;  %v442_v3 = vshll.u32 %v3853_v38, 16  ;;  %v448_v9 = vshll.u32 %v3802_v28, 16  ;;  %1004 = vrot.lane.b32.xlu1 %v3108_v13, %s3543_s16  ;;  %v453_v59 = vshrl.u32 %v3866_v55, 16  ;;  %3416 = vmatpush3.bf16.msra.mxu1 %v3479_v15  ;;  %v379_v57 = vld [vmem:[#allocation2 + $0x38] sm:$0xf] }
  0x45   : > { %v3109_v12 = vcombine.low %v568_v48, %v572_v2  ;;  %v794_v21 = vrot.slane %v792_v49, 5  ;;  %v808_v22 = vrot.slane %v806_v51, 5  ;;  %v441_v27 = vrot.slane %v439_v56, 4  ;;  %v3898_v51 = vld [vmem:[#allocation2 + $0x28] sm:$0xf] }
  0x46   : > { %v432_v54 = vrot.slane %v431_v1, 4  ;;  %v444_v25 = vrot.slane %v442_v3, 5  ;;  %v456_v32 = vshll.u32 %v3866_v55, 16  ;;  %v462_v34 = vshll.u32 %v3807_v35, 16  ;;  %v586_v15 = vld [vmem:[#allocation2 + $0x30] sm:$0xf] }
  0x47   : > { %v795_v28 = vsel %vm3858_vm11, %v3758_v11, %v794_v21  ;;  %v809_v13 = vsel %vm3858_vm11, %v3764_v24, %v808_v22  ;;  %v450_v6 = vrot.slane %v448_v9, 5  ;;  %v455_v45 = vrot.slane %v453_v59, 4  ;;  %v3909_v21 = vld [vmem:[#allocation2 + $0x2c] sm:$0x1] }
  0x48   : > { %v437_v4 = vsel %vm3858_vm11, %v432_v54, %v436_v44  ;;  %v445_v20 = vor.u32 %v444_v25, %v441_v27  ;;  %1006 = vrot.lane.b32.xlu1 %v3109_v12, %s3543_s16  ;;  %v3127_v11 = vcombine.low %v795_v28, %v809_v13  ;;  %v458_v49 = vrot.slane %v456_v32, 5  ;;  %v3913_v54 = vld [vmem:[#allocation2 + $0x20] sm:$0xf]  ;;  %v3985_v41 = vld [vmem:[#allocation2 + $0x4c] sm:$0x1] }
  0x49   : > { %v3103_v48 = vcombine.low %v423_v16, %v437_v4  ;;  %v307_v24 = vrot.slane %v305_v17, 7  ;;  %v464_v56 = vrot.slane %v462_v34, 5  ;;  %v839_v1 = vshrl.u32 %v3891_v40, 16  ;;  %v3907_v17 = vld [vmem:[#allocation2 + $0x24] sm:$0x1] }
  0x4a   : > { %v446_v35 = vrot.slane %v445_v20, 4  ;;  %v654_v44 = vshrl.u32 %v3898_v51, 16  ;;  %v459_v2 = vor.u32 %v458_v49, %v455_v45  ;;  %v842_v9 = vshll.u32 %v3891_v40, 16  ;;  %v3919_v4 = vld [vmem:[#allocation2 + $0x28] sm:$0xf] }
  0x4b   : > { %982 = vrot.lane.b32.xlu0 %v3103_v48, %s3545_s6  ;;  %v310_v3 = vor.u32 %v308_v19, %v307_v24  ;;  %v657_v12 = vshll.u32 %v3898_v51, 16  ;;  %v311_v27 = vrot.slane %v307_v24, 4  ;;  %v668_v59 = vshrl.u32 %v586_v15, 16 }
  0x4c   : > { %v451_v22 = vsel %vm3858_vm11, %v446_v35, %v450_v6  ;;  %v656_v16 = vrot.slane %v654_v44, 4  ;;  %v460_v25 = vrot.slane %v459_v2, 4  ;;  %v841_v28 = vrot.slane %v839_v1, 4  ;;  %v382_v1 = vld [vmem:[#allocation2 + $0x3c] sm:$0x1] }
  0x4d   : > { %v380_v10 = vsel %vm3650_vm5, %v310_v3, %v379_v57  ;;  %v659_v19 = vrot.slane %v657_v12, 5  ;;  %v671_v13 = vshll.u32 %v586_v15, 16  ;;  %v820_v32 = vshll.u32 %v3907_v17, 16  ;;  %v388_v2 = vld [vmem:[#allocation2 + $0x44] sm:$0x1] }
  0x4e   : > { %381 = vst [vmem:[#allocation2 + $0x38] sm:$0xf] %v380_v10  ;;  %v834_v34 = vshll.u32 %v3909_v21, 16  ;;  %v465_v20 = vsel %vm3858_vm11, %v460_v25, %v464_v56  ;;  %v844_v6 = vrot.slane %v842_v9, 5  ;;  %v670_v48 = vrot.slane %v668_v59, 4 }
  0x4f   : > { %1110 = vrot.lane.b32.xlu0 %v3127_v11, %s3544_s30  ;;  %v660_v45 = vor.u32 %v659_v19, %v656_v16  ;;  %v3104_v49 = vcombine.low %v451_v22, %v465_v20  ;;  %v673_v24 = vrot.slane %v671_v13, 5  ;;  %v822_v35 = vrot.slane %v820_v32, 5  ;;  %v3933_v16 = vld [vmem:[#allocation2 + $0x34] sm:$0x1]  ;;  %v385_v9 = vld [vmem:[#allocation2 + $0x40] sm:$0xf] }
  0x50   : > { %v836_v57 = vrot.slane %v834_v34, 5  ;;  %v467_v3 = vshrl.u32 %v3913_v54, 16  ;;  %v470_v12 = vshll.u32 %v3913_v54, 16  ;;  %v3113_v56 = vcombine.low %v3898_v51, %v586_v15 }
  0x51   : > { %v3924_v44 = vrot.slane %v660_v45, 4  ;;  %984 = vrot.lane.b32.xlu1 %v3104_v49, %s3545_s6  ;;  %v674_v11 = vor.u32 %v673_v24, %v670_v48  ;;  %v476_v22 = vshll.u32 %v3829_v7, 16  ;;  %v823_v25 = vsel %vm3858_vm11, %v3752_v5, %v822_v35  ;;  %v3946_v48 = vld [vmem:[#allocation2 + $0x30] sm:$0xf] }
  0x52   : > { %v469_v10 = vrot.slane %v467_v3, 4  ;;  %v472_v19 = vrot.slane %v470_v12, 5  ;;  %v481_v59 = vshrl.u32 %v3919_v4, 16  ;;  %v837_v13 = vsel %vm3858_vm11, %v3746_v62, %v836_v57  ;;  %v3950_v57 = vld [vmem:[#allocation2 + $0x34] sm:$0x1] }
  0x53   : > { %v478_v32 = vrot.slane %v476_v22, 5  ;;  %v484_v51 = vshll.u32 %v3919_v4, 16  ;;  %v490_v15 = vshll.u32 %v3831_v8, 16  ;;  %v383_v45 = vsel %vm3660_vm7, %v311_v27, %v382_v1 }
  0x54   : > { %v473_v34 = vor.u32 %v472_v19, %v469_v10  ;;  %v483_v20 = vrot.slane %v481_v59, 4  ;;  %v845_v5 = vor.u32 %v844_v6, %v841_v28  ;;  %384 = vst [vmem:[#allocation2 + $0x3c] sm:$0x1] %v383_v45  ;;  %v3952_v8 = vrot.slane %v674_v11, 4  ;;  %v255_v10 = vld [vmem:[%s3639_s26 + $0x1c] sm:$0xf] }
  0x55   : > { %v771_v7 = vld [vmem:[#allocation2 + $0x38] sm:$0xf]  ;;  %1034 = vrot.lane.b32.xlu1 %v3113_v56, %s3544_s30  ;;  %v486_v62 = vrot.slane %v484_v51, 5  ;;  %v3128_v3 = vcombine.low %v823_v25, %v837_v13  ;;  %v848_v27 = vshll.u32 %v3933_v16, 16  ;;  %v495_v11 = vshrl.u32 %v3946_v48, 16 }
  0x56   : > { %v853_v49 = vshrl.u32 %v771_v7, 16  ;;  %v856_v24 = vshll.u32 %v771_v7, 16  ;;  %v3125_v35 = vcombine.low %v3891_v40, %v771_v7  ;;  %v474_v12 = vrot.slane %v473_v34, 4  ;;  %v3955_v28 = vld [vmem:[#allocation2 + $0x38] sm:$0xf] }
  0x57   : > { %v487_v22 = vor.u32 %v486_v62, %v483_v20  ;;  %v492_v40 = vrot.slane %v490_v15, 5  ;;  %v846_v19 = vrot.slane %v845_v5, 4  ;;  %v498_v25 = vshll.u32 %v3946_v48, 16 }
  0x58   : > { %v855_v6 = vrot.slane %v853_v49, 4  ;;  %v858_v1 = vrot.slane %v856_v24, 5  ;;  %1094 = vrot.lane.b32.xlu0 %v3125_v35, %s3543_s16  ;;  %v479_v56 = vsel %vm3858_vm11, %v474_v12, %v478_v32  ;;  %v504_v51 = vshll.u32 %v3950_v57, 16  ;;  %v3969_v24 = vld [vmem:[#allocation2 + $0x38] sm:$0xe] }
  0x59   : > { %v488_v59 = vrot.slane %v487_v22, 4  ;;  %v509_v7 = vshrl.u32 %v3955_v28, 16  ;;  %v850_v34 = vrot.slane %v848_v27, 5  ;;  %v497_v45 = vrot.slane %v495_v11, 4  ;;  %v528_v22 = vld [vmem:[#allocation2 + $0x30] sm:$0xe] }
  0x5a   : > { %v859_v13 = vor.u32 %v858_v1, %v855_v6  ;;  %v500_v49 = vrot.slane %v498_v25, 5  ;;  %v512_v15 = vshll.u32 %v3955_v28, 16  ;;  %v506_v20 = vrot.slane %v504_v51, 5 }
  0x5b   : > { %v493_v32 = vsel %vm3858_vm11, %v488_v59, %v492_v40  ;;  %v511_v5 = vrot.slane %v509_v7, 4  ;;  %v3971_v62 = vld [vmem:[#allocation2 + $0x3c] sm:$0x1]  ;;  %v313_v27 = vshrl.u32 %v255_v10, 16  ;;  %v936_v33 = vrot.slane %v3933_v16, 5 }
  0x5c   : > { %1112 = vrot.lane.b32.xlu0 %v3128_v3, %s3544_s30  ;;  %v3105_v35 = vcombine.low %v479_v56, %v493_v32  ;;  %v406_v12 = vld [vmem:[#allocation2 + $0x3c] sm:$0x1]  ;;  %v501_v6 = vor.u32 %v500_v49, %v497_v45  ;;  %v514_v1 = vrot.slane %v512_v15, 5  ;;  %v860_v11 = vrot.slane %v859_v13, 4  ;;  %v529_v45 = vld [vmem:[#allocation2 + $0x38] sm:$0xe] }
  0x5d   : > { %v862_v25 = vshll.u32 %v3971_v62, 16  ;;  %v518_v0 = vshll.u32 %v406_v12, 16  ;;  %v316_v3 = vshll.u32 %v255_v10, 16  ;;  %v3974_v40 = vld [vmem:[#allocation2 + $0x3c] sm:$0x1]  ;;  %v851_v56 = vsel %vm3858_vm11, %v846_v19, %v850_v34 }
  0x5e   : > { %986 = vrot.lane.b32.xlu1 %v3105_v35, %s3545_s6  ;;  %v502_v59 = vrot.slane %v501_v6, 4  ;;  %v515_v51 = vor.u32 %v514_v1, %v511_v5  ;;  %v315_v7 = vrot.slane %v313_v27, 7  ;;  %v3089_v13 = vrot.slane %v3969_v24, 9  ;;  %v3981_v10 = vld [vmem:[#allocation2 + $0x48] sm:$0xf] }
  0x5f   : > { %v864_v49 = vrot.slane %v862_v25, 5  ;;  %v520_v15 = vrot.slane %v518_v0, 5  ;;  %v759_v32 = vrot.slane %v3974_v40, 5  ;;  %v3081_v34 = vrot.slane %v528_v22, 9  ;;  %v3990_v5 = vld [vmem:[#allocation2 + $0x38] sm:$0xf] }
  0x60   : > { %v507_v31 = vsel %vm3858_vm11, %v502_v59, %v506_v20  ;;  %v516_v37 = vrot.slane %v515_v51, 4  ;;  %v318_v35 = vor.u32 %v316_v3, %v315_v7  ;;  %v319_v43 = vrot.slane %v315_v7, 4 }
  0x61   : > { %v865_v19 = vsel %vm3858_vm11, %v860_v11, %v864_v49  ;;  %v575_v0 = vrot.slane %v3950_v57, 5  ;;  %v3082_v11 = vrot.slane %v529_v45, 9  ;;  %v579_v57 = vrot.slane %v406_v12, 5 }
  0x62   : > { %v3129_v24 = vcombine.low %v851_v56, %v865_v19  ;;  %v521_v6 = vsel %vm3858_vm11, %v516_v37, %v520_v15  ;;  %v386_v20 = vsel %vm3650_vm5, %v318_v35, %v385_v9  ;;  %v389_v1 = vsel %vm3660_vm7, %v319_v43, %v388_v2 }
  0x63   : > { %v3106_v27 = vcombine.low %v507_v31, %v521_v6  ;;  %387 = vst [vmem:[#allocation2 + $0x40] sm:$0xf] %v386_v20  ;;  %390 = vst [vmem:[#allocation2 + $0x44] sm:$0x1] %v389_v1  ;;  %v576_v22 = vsel %vm3706_vm8, %v3081_v34, %v575_v0  ;;  %v881_v25 = vshrl.u32 %v3981_v10, 16  ;;  %v884_v37 = vshll.u32 %v3981_v10, 16 }
  0x64   : > { %1114 = vrot.lane.b32.xlu0 %v3129_v24, %s3544_s30  ;;  %v682_v18 = vshrl.u32 %v3990_v5, 16  ;;  %v685_v9 = vshll.u32 %v3990_v5, 16  ;;  %v580_v43 = vsel %vm3706_vm8, %v3082_v11, %v579_v57  ;;  %v890_v31 = vshll.u32 %v3985_v41, 16 }
  0x65   : > { %988 = vrot.lane.b32.xlu1 %v3106_v27, %s3545_s6  ;;  %v609_v2 = vrot.slane %v607_v58, 5  ;;  %v3110_v12 = vcombine.low %v576_v22, %v580_v43  ;;  %v883_v3 = vrot.slane %v881_v25, 4  ;;  %v886_v56 = vrot.slane %v884_v37, 5 }
  0x66   : > { %v684_v59 = vrot.slane %v682_v18, 4  ;;  %v940_v51 = vrot.slane %v3971_v62, 5  ;;  %v691_v7 = vshll.u32 %v3974_v40, 16  ;;  %v687_v45 = vrot.slane %v685_v9, 5 }
  0x67   : > { %v623_v49 = vrot.slane %v621_v42, 5  ;;  %v760_v15 = vsel %vm3706_vm8, %v3089_v13, %v759_v32  ;;  %v610_v52 = vsel %vm3858_vm11, %v3799_v26, %v609_v2  ;;  %v4903_v58 = vshll.u32 %v3762_v23, 16 }
  0x68   : > { %v4904_v19 = vshll.u32 %v3768_v29, 16  ;;  %v887_v0 = vor.u32 %v886_v56, %v883_v3  ;;  %v4026_v24 = vrot.slane %v890_v31, 5  ;;  %v948_v36 = vrot.slane %v3985_v41, 5 }
  0x69   : > { %v637_v35 = vrot.slane %v4903_v58, 5  ;;  %1008 = vrot.lane.b32.xlu1 %v3110_v12, %s3543_s16  ;;  %v624_v42 = vsel %vm3858_vm11, %v3786_v63, %v623_v49  ;;  %v688_v23 = vor.u32 %v687_v45, %v684_v59  ;;  %v4905_v11 = vshll.u32 %v3779_v50, 16  ;;  %v894_v45 = vld [vmem:[#allocation2 + $0x10] sm:$0xe] }
  0x6a   : > { %v651_v34 = vrot.slane %v4904_v19, 5  ;;  %v4032_v13 = vld [vmem:[#allocation2 + $0x44] sm:$0x1]  ;;  %v716_v26 = vld [vmem:[#allocation2 + $0x40] sm:$0xe]  ;;  %v4034_v6 = vcombine.low %v610_v52, %v624_v42  ;;  %vm1130_vm12 = vcmask 261120  }
  0x6b   : > { %v772_v32 = vld [vmem:[#allocation2 + $0x40] sm:$0xf]  ;;  %v638_v29 = vsel %vm3858_vm11, %v3811_v46, %v637_v35  ;;  %v3090_v1 = vrot.slane %v716_v26, 9  ;;  %v763_v27 = vrot.slane %v4032_v13, 5  ;;  %v665_v57 = vrot.slane %v4905_v11, 5 }
  0x6c   : > { %v652_v20 = vsel %vm3858_vm11, %v3816_v53, %v651_v34  ;;  %v867_v22 = vshrl.u32 %v772_v32, 16  ;;  %v588_v63 = vld [vmem:[#allocation2 + $0x40] sm:$0xf]  ;;  %v705_v25 = vshll.u32 %v4032_v13, 16  ;;  %v870_v37 = vshll.u32 %v772_v32, 16 }
  0x6d   : > { %v696_v18 = vshrl.u32 %v588_v63, 16  ;;  %v4046_v9 = vld [vmem:[#allocation2 + $0x44] sm:$0x1]  ;;  %v4906_v46 = vshll.u32 %v3784_v60, 16  ;;  %v764_v53 = vsel %vm3706_vm8, %v3090_v1, %v763_v27  ;;  %v699_v2 = vshll.u32 %v588_v63, 16 }
  0x6e   : > { %v869_v31 = vrot.slane %v867_v22, 4  ;;  %v3114_v12 = vcombine.low %v3990_v5, %v588_v63  ;;  %v3122_v3 = vcombine.low %v760_v15, %v764_v53  ;;  %v872_v56 = vrot.slane %v870_v37, 5  ;;  %v895_v35 = vld [vmem:[#allocation2 + $0x18] sm:$0xe]  ;;  %v896_v19 = vld [vmem:[#allocation2 + $0x20] sm:$0xe] }
  0x6f   : > { %v679_v43 = vrot.slane %v4906_v46, 5  ;;  %v698_v50 = vrot.slane %v696_v18, 4  ;;  %v876_v59 = vshll.u32 %v4046_v9, 16  ;;  %v3126_v49 = vcombine.low %v772_v32, %v3981_v10  ;;  %v897_v42 = vld [vmem:[#allocation2 + $0x28] sm:$0xe] }
  0x70   : > { %v701_v52 = vrot.slane %v699_v2, 5  ;;  %1036 = vrot.lane.b32.xlu1 %v3114_v12, %s3544_s30  ;;  %v888_v60 = vrot.slane %v887_v0, 4  ;;  %v4056_v58 = vcombine.low %v638_v29, %v652_v20  ;;  %1068 = vrot.lane.b32.xlu0 %v3122_v3, %s3545_s6  ;;  %v873_v5 = vor.u32 %v872_v56, %v869_v31  ;;  %v899_v22 = vld [vmem:[#allocation2 + $0x38] sm:$0xe]  ;;  %v901_v37 = vld [vmem:[#allocation2 + $0x48] sm:$0xe] }
  0x71   : > { %v878_v15 = vrot.slane %v876_v59, 5  ;;  %v666_v34 = vsel %vm3858_vm11, %v3924_v44, %v665_v57  ;;  %v680_v10 = vsel %vm3858_vm11, %v3952_v8, %v679_v43  ;;  %v689_v13 = vrot.slane %v688_v23, 4  ;;  %v898_v44 = vld [vmem:[#allocation2 + $0x30] sm:$0xe]  ;;  %v900_v57 = vld [vmem:[#allocation2 + $0x40] sm:$0xe] }
  0x72   : > { %v702_v0 = vor.u32 %v701_v52, %v698_v50  ;;  %v944_v26 = vrot.slane %v4046_v9, 5  ;;  %v4066_v32 = vcombine.low %v666_v34, %v680_v10  ;;  %v874_v29 = vrot.slane %v873_v5, 4 }
  0x73   : > { %v893_v20 = vsel %vm3858_vm11, %v888_v60, %v4026_v24  ;;  %v3091_v1 = vrot.slane %v894_v45, 9  ;;  %v920_v27 = vrot.slane %v3844_v30, 5  ;;  %v3092_v11 = vrot.slane %v895_v35, 9 }
  0x74   : > { %v703_v63 = vrot.slane %v702_v0, 4  ;;  %v924_v8 = vrot.slane %v3851_v39, 5  ;;  %v3093_v23 = vrot.slane %v896_v19, 9  ;;  %1096 = vrot.lane.b32.xlu0 %v3126_v49, %s3543_s16  ;;  %v879_v18 = vsel %vm3858_vm11, %v874_v29, %v878_v15  ;;  %v3531_v0 = vld [vmem:[#allocation2] sm:$0xf] }
  0x75   : > { %v921_v24 = vsel %vm3706_vm8, %v3091_v1, %v920_v27  ;;  %v3094_v9 = vrot.slane %v897_v42, 9  ;;  %v3100_v30 = vcombine.low %v3853_v38, %v3866_v55  ;;  %v3130_v46 = vcombine.low %v879_v18, %v893_v20 }
  0x76   : > { %v925_v43 = vsel %vm3706_vm8, %v3092_v11, %v924_v8  ;;  %v4907_v39 = vrot.slane %v3907_v17, 5  ;;  %v3101_v31 = vcombine.low %v3913_v54, %v3919_v4  ;;  %v4908_v12 = vrot.slane %v3909_v21, 5 }
  0x77   : > { %v3131_v2 = vcombine.low %v921_v24, %v925_v43  ;;  %v3102_v38 = vcombine.low %v3946_v48, %v3955_v28  ;;  %v693_v55 = vrot.slane %v691_v7, 5  ;;  %v707_v17 = vrot.slane %v705_v25, 5 }
  0x78   : > { %v929_v53 = vsel %vm3706_vm8, %v3093_v23, %v4907_v39  ;;  %v933_v3 = vsel %vm3706_vm8, %v3094_v9, %v4908_v12  ;;  %v3095_v50 = vrot.slane %v898_v44, 9  ;;  %v3096_v59 = vrot.slane %v899_v22, 9  ;;  %1116 = vrot.lane.b32.xlu0 %v3130_v46, %s3544_s30 }
  0x79   : > { %v3132_v56 = vcombine.low %v929_v53, %v933_v3  ;;  %3417 = vmatprep.mubr.msk.bf16.mxu1 %vm1130_vm12, %v3131_v2  ;;  %v694_v21 = vsel %vm3858_vm11, %v689_v13, %v693_v55  ;;  %v3097_v45 = vrot.slane %v900_v57, 9  ;;  %v3098_v49 = vrot.slane %v901_v37, 9 }
  0x7a   : > { %v708_v52 = vsel %vm3858_vm11, %v703_v63, %v707_v17  ;;  %v937_v40 = vsel %vm3706_vm8, %v3095_v50, %v936_v33  ;;  %v941_v7 = vsel %vm3706_vm8, %v3096_v59, %v940_v51  ;;  %v3099_v41 = vcombine.low %v3531_v0, %v3821_v61  ;;  %v3504_v0 = vld [vmem:[%s4881_s3 + $0x90] sm:$0xff]  }
  0x7b   : > { %3418 = vmatmul.mubr.msk.bf16.vlgmr.msra.gmra.mrb[0].mxu1 %vm1130_vm12, %v3132_v56  ;;  %v3118_v25 = vcombine.low %v694_v21, %v708_v52  ;;  %v3133_v60 = vcombine.low %v937_v40, %v941_v7  ;;  %v945_v35 = vsel %vm3706_vm8, %v3097_v45, %v944_v26  ;;  %v949_v19 = vsel %vm3706_vm8, %v3098_v49, %v948_v36 }
  0x7c   : > { %v3134_v16 = vcombine.low %v945_v35, %v949_v19  ;;  %vm1143_vm13 = vcmask 523264   ;;  %vm1152_vm14 = vcmask 785408   ;;  %vm1498_vm15 = vcmask 519168   ;;  %v3487_v35 = vld [vmem:[%s4881_s3 + $0x40] sm:$0xff]  }
  0x7d   : > { %3421 = vmatprep.mubr.msk.bf16.mxu1 %vm1130_vm12, %v3133_v60  ;;  %vm1500_vm0 = vcmask 516096   ;;  %v4909_v49 = vmov 0   ;;  %v3488_v19 = vld [vmem:[%s4881_s3] sm:$0xff]   ;;  %3325 = vmatprep.subr.bf16.mxu1 %v3487_v35  ;;  %vm4276_vm1 = vmand %vm1498_vm15, %vm338_vm2 }
  0x7e   : > { %1502 = vst.msk [vmem:[#allocation3 + $0x8] sm:$0xf] %vm1498_vm15, %v4909_v49  ;;  %1499 = vst.msk [vmem:[#allocation3] sm:$0xf] %vm1498_vm15, %v4909_v49  ;;  %3326 = vmatpush3.bf16.msra.mxu1 %v3488_v19 }
  0x7f   : > { %1503 = vst.msk [vmem:[#allocation3 + $0xc] sm:$0x1] %vm1500_vm0, %v4909_v49  ;;  %1501 = vst.msk [vmem:[#allocation3 + $0x4] sm:$0x1] %vm1500_vm0, %v4909_v49 }
  0x80   : > { %1504 = vst.msk [vmem:[#allocation3 + $0x10] sm:$0xf] %vm1498_vm15, %v4909_v49  ;;  %1506 = vst.msk [vmem:[#allocation3 + $0x18] sm:$0xf] %vm1498_vm15, %v4909_v49 }
  0x81   : > { %1505 = vst.msk [vmem:[#allocation3 + $0x14] sm:$0x1] %vm1500_vm0, %v4909_v49  ;;  %1507 = vst.msk [vmem:[#allocation3 + $0x1c] sm:$0x1] %vm1500_vm0, %v4909_v49 }
  0x82   : > { %1508 = vst.msk [vmem:[#allocation3 + $0x20] sm:$0xf] %vm1498_vm15, %v4909_v49  ;;  %1510 = vst.msk [vmem:[#allocation3 + $0x28] sm:$0xf] %vm1498_vm15, %v4909_v49 }
  0x83   : > { %3422 = vmatmul.mubr.msk.bf16.gmra.mrb[4].mxu1 %vm1130_vm12, %v3134_v16  ;;  %1509 = vst.msk [vmem:[#allocation3 + $0x24] sm:$0x1] %vm1500_vm0, %v4909_v49  ;;  %1511 = vst.msk [vmem:[#allocation3 + $0x2c] sm:$0x1] %vm1500_vm0, %v4909_v49  ;;  %v3489_v16 = vld [vmem:[%s4881_s3 + $0x48] sm:$0xff]  }
  0x84   : > { %1512 = vst.msk [vmem:[#allocation3 + $0x30] sm:$0xf] %vm1498_vm15, %v4909_v49  ;;  %1514 = vst.msk [vmem:[#allocation3 + $0x38] sm:$0xf] %vm1498_vm15, %v4909_v49  ;;  %3327 = vmatprep.subr.bf16.mxu1 %v3489_v16 }
  0x85   : > { %1513 = vst.msk [vmem:[#allocation3 + $0x34] sm:$0x1] %vm1500_vm0, %v4909_v49  ;;  %1515 = vst.msk [vmem:[#allocation3 + $0x3c] sm:$0x1] %vm1500_vm0, %v4909_v49 }
  0x86   : > { %1516 = vst.msk [vmem:[#allocation3 + $0x40] sm:$0xf] %vm1498_vm15, %v4909_v49  ;;  %1518 = vst.msk [vmem:[#allocation3 + $0x48] sm:$0xf] %vm1498_vm15, %v4909_v49 }
  0x87   : > { %1517 = vst.msk [vmem:[#allocation3 + $0x44] sm:$0x1] %vm1500_vm0, %v4909_v49  ;;  %1519 = vst.msk [vmem:[#allocation3 + $0x4c] sm:$0x1] %vm1500_vm0, %v4909_v49 }
  0x88   : > { %vm4282_vm4 = vmand %vm1500_vm0, %vm344_vm3 }
  0x9c   : > { %v1093_v62 = vpop.permute.xlu0 %1092 }
  0xa0   : > { %v1091_v33 = vpop.permute.xlu1 %1090 }
  0xa6   : > { %v1031_v5 = vpop.permute.xlu1 %1030 }
  0xa7   : > { %v1063_v15 = vpop.permute.xlu0 %1062 }
  0xa8   : > { %v1167_v36 = vsel %vm1130_vm12, %v4034_v6, %v1063_v15  ;;  %v3498_v15 = vld [vmem:[%s4881_s3 + $0xc8] sm:$0xff]  }
  0xa9   : > { %v1178_v44 = vsel %vm1143_vm13, %v1167_v36, %v1091_v33  ;;  %v3494_v33 = vld [vmem:[%s4881_s3 + $0xc0] sm:$0xff]  }
  0xaa   : > { %v1033_v51 = vpop.permute.xlu1 %1032  ;;  %3365 = vmatprep.subr.bf16.mxu0 %v3494_v33  ;;  %v3497_v36 = vld [vmem:[%s4881_s3 + $0x60] sm:$0xff]  }
  0xab   : > { %v1065_v34 = vpop.permute.xlu0 %1064 }
  0xac   : > { %v1170_v8 = vsel %vm1130_vm12, %v4056_v58, %v1065_v34  ;;  %v3500_v34 = vld [vmem:[%s4881_s3 + $0x88] sm:$0xff]  }
  0xad   : > { %v1180_v18 = vsel %vm1143_vm13, %v1170_v8, %v1093_v62  ;;  %v3490_v62 = vld [vmem:[%s4881_s3 + $0x8] sm:$0xff]  }
  0xae   : > { %3328 = vmatpush3.bf16.msra.mxu1 %v3490_v62  ;;  %v1643_v62 = vld [vmem:[#allocation3 + $0x10] sm:$0xf] }
  0xb2   : > { %v1003_v10 = vpop.permute.xlu1 %1002  ;;  %v1067_v42 = vpop.permute.xlu0 %1066 }
  0xb3   : > { %v1173_v58 = vsel %vm1130_vm12, %v4066_v32, %v1067_v42  ;;  %v3492_v42 = vld [vmem:[%s4881_s3 + $0x10] sm:$0xff]  }
  0xb6   : > { %v1005_v13 = vpop.permute.xlu1 %1004 }
  0xba   : > { %v1007_v20 = vpop.permute.xlu1 %1006 }
  0xbd   : > { %v983_v26 = vpop.permute.xlu0 %982 }
  0xbe   : > { %v1133_v29 = vsel %vm1130_vm12, %v3099_v41, %v983_v26  ;;  %v3506_v41 = vld [vmem:[%s4881_s3 + $0xd8] sm:$0xff]  }
  0xbf   : > { %v1145_v1 = vsel %vm1143_vm13, %v1133_v29, %v1003_v10  ;;  %v3502_v10 = vld [vmem:[%s4881_s3 + $0xd0] sm:$0xff]   ;;  %v3495_v26 = vld [vmem:[%s4881_s3 + $0x18] sm:$0xff]   ;;  %v3499_v29 = vld [vmem:[%s4881_s3 + $0x20] sm:$0xff]  }
  0xc0   : > { %v1154_v63 = vsel %vm1152_vm14, %v1145_v1, %v1031_v5  ;;  %v3496_v5 = vld [vmem:[%s4881_s3 + $0x80] sm:$0xff]   ;;  %v3503_v1 = vld [vmem:[%s4881_s3 + $0x28] sm:$0xff]  }
  0xc1   : > { %v1111_v27 = vpop.permute.xlu0 %1110 }
  0xc2   : > { %v1186_v22 = vsel %vm1152_vm14, %v1178_v44, %v1111_v27  ;;  %v3505_v27 = vld [vmem:[%s4881_s3 + $0x70] sm:$0xff]  }
  0xc3   : > { %1392 = vmatprep.mubr.bf16.mxu0 %v1186_v22  ;;  %v985_v61 = vpop.permute.xlu1 %984 }
  0xc4   : > { %1393 = vmatmul.mubr.bf16.vlgmr.msra.gmra.mrb[0].mxu0 %v1154_v63  ;;  %v1136_v11 = vsel %vm1130_vm12, %v3100_v30, %v985_v61  ;;  %v4268_v63 = vld [vmem:[%s4880_s2] ss:$0 sm:$0xff] }
  0xc5   : > { %v1147_v57 = vsel %vm1143_vm13, %v1136_v11, %v1005_v13  ;;  %3366 = vmatpush3.bf16.msra.mxu0 %v3496_v5  ;;  %v3493_v13 = vld [vmem:[%s4881_s3 + $0x58] sm:$0xff]  }
  0xc6   : > { %v1157_v9 = vsel %vm1152_vm14, %v1147_v57, %v1033_v51  ;;  %v3491_v51 = vld [vmem:[%s4881_s3 + $0x50] sm:$0xff]   ;;  %3367 = vmatprep.subr.bf16.mxu0 %v3498_v15  ;;  %v1646_v15 = vld [vmem:[#allocation3 + $0x14] sm:$0x1] }
  0xc7   : > { %v1035_v23 = vpop.permute.xlu1 %1034  ;;  %3329 = vmatprep.subr.bf16.mxu1 %v3491_v51  ;;  %v1685_v57 = vld [vmem:[#allocation3] sm:$0xf] }
  0xc8   : > { %3330 = vmatpush3.bf16.msra.mxu1 %v3492_v42 }
  0xc9   : > { %3368 = vmatpush3.bf16.msra.mxu0 %v3500_v34  ;;  %3331 = vmatprep.subr.bf16.mxu1 %v3493_v13  ;;  %v1813_v13 = vld [vmem:[#allocation3] sm:$0xe] }
  0xca   : > { %v1095_v6 = vpop.permute.xlu0 %1094  ;;  %3369 = vmatprep.subr.bf16.mxu0 %v3502_v10 }
  0xcb   : > { %v1182_v39 = vsel %vm1143_vm13, %v1173_v58, %v1095_v6 }
  0xcc   : > { %3332 = vmatpush3.bf16.msra.mxu1 %v3495_v26 }
  0xcd   : > { %3370 = vmatpush3.bf16.msra.mxu0 %v3504_v0  ;;  %3333 = vmatprep.subr.bf16.mxu1 %v3497_v36 }
  0xce   : > { %v1113_v37 = vpop.permute.xlu0 %1112  ;;  %3371 = vmatprep.subr.bf16.mxu0 %v3506_v41 }
  0xcf   : > { %v1189_v24 = vsel %vm1152_vm14, %v1180_v18, %v1113_v37 }
  0xd0   : > { %1400 = vmatprep.mubr.bf16.mxu0 %v1189_v24  ;;  %v987_v46 = vpop.permute.xlu1 %986  ;;  %3334 = vmatpush3.bf16.msra.mxu1 %v3499_v29  ;;  %v1702_v24 = vshrl.u32 %v1685_v57, 16  ;;  %v3507_v29 = vld [vmem:[%s4881_s3 + $0x30] sm:$0xff]  }
  0xd1   : > { %1401 = vmatmul.mubr.bf16.gmra.mrb[4].mxu0 %v1157_v9  ;;  %v1139_v30 = vsel %vm1130_vm12, %v3101_v31, %v987_v46  ;;  %v1705_v9 = vshll.u32 %v1685_v57, 16  ;;  %v3511_v57 = vld [vmem:[%s4881_s3 + $0x38] sm:$0xff]  }
  0xd2   : > { %v1149_v43 = vsel %vm1143_vm13, %v1139_v30, %v1007_v20  ;;  %v3501_v20 = vld [vmem:[%s4881_s3 + $0x68] sm:$0xff]  }
  0xd3   : > { %v1160_v12 = vsel %vm1152_vm14, %v1149_v43, %v1035_v23  ;;  %3335 = vmatprep.subr.bf16.mxu1 %v3501_v20  ;;  %v3508_v20 = vld [vmem:[%s4881_s3 + $0x98] sm:$0xff]  }
  0xd4   : > { %3336 = vmatpush3.bf16.msra.mxu1 %v3503_v1  ;;  %3372 = vmatpush3.bf16.msra.mxu0 %v3508_v20 }
  0xd5   : > { %3337 = vmatprep.subr.bf16.mxu1 %v3505_v27 }
  0xd6   : > { %v1115_v53 = vpop.permute.xlu0 %1114 }
  0xd7   : > { %v1192_v2 = vsel %vm1152_vm14, %v1182_v39, %v1115_v53  ;;  %v989_v3 = vpop.permute.xlu1 %988  ;;  %v1704_v39 = vrot.slane %v1702_v24, 4  ;;  %v1707_v53 = vrot.slane %v1705_v9, 5 }
  0xd8   : > { %1408 = vmatprep.mubr.bf16.mxu0 %v1192_v2  ;;  %v1142_v32 = vsel %vm1130_vm12, %v3102_v38, %v989_v3  ;;  %3338 = vmatpush3.bf16.msra.mxu1 %v3507_v29 }
  0xd9   : > { %1409 = vmatmul.mubr.bf16.gmra.mrb[8].mxu0 %v1160_v12 }
  0xdb   : > { %v1009_v55 = vpop.permute.xlu1 %1008 }
  0xdc   : > { %v1151_v17 = vsel %vm1143_vm13, %v1142_v32, %v1009_v55  ;;  %v4272_v55 = vld [vmem:[#allocation3 + $0x4] sm:$0x1] }
  0xe2   : > { %v1069_v56 = vpop.permute.xlu0 %1068  ;;  %v1037_v4 = vpop.permute.xlu1 %1036 }
  0xe3   : > { %v1176_v31 = vsel %vm1130_vm12, %v3118_v25, %v1069_v56  ;;  %v1163_v21 = vsel %vm1152_vm14, %v1151_v17, %v1037_v4  ;;  %v2061_v17 = vld [vmem:[#allocation3 + $0x48] sm:$0xf] }
  0xe4   : > { %v2169_v10 = vshrl.u32 %v2061_v17, 16  ;;  %v2172_v42 = vshll.u32 %v2061_v17, 16 }
  0xe6   : > { %v1097_v54 = vpop.permute.xlu0 %1096  ;;  %v2171_v24 = vrot.slane %v2169_v10, 4  ;;  %v2174_v9 = vrot.slane %v2172_v42, 5 }
  0xe7   : > { %v1184_v50 = vsel %vm1143_vm13, %v1176_v31, %v1097_v54 }
  0xea   : > { %v1117_v59 = vpop.permute.xlu0 %1116 }
  0xeb   : > { %v1195_v45 = vsel %vm1152_vm14, %v1184_v50, %v1117_v59  ;;  %v1635_v50 = vld [vmem:[#allocation3 + $0x8] sm:$0xf] }
  0xec   : > { %1416 = vmatprep.mubr.bf16.mxu0 %v1195_v45 }
  0xed   : > { %1417 = vmatmul.mubr.bf16.gmra.mrb[12].mxu0 %v1163_v21  ;;  %v1640_v21 = vld [vmem:[#allocation3 + $0xc] sm:$0x1] }
 0x14e   : > { %v4193_v48 = vpop.f32.mrb[0].mxu1 }
 0x14f   : > { %v1459_v28 = vpop.f32.mrb[1].mxu1 }
 0x150   : > { %v4195_v38 = vpop.f32.mrb[2].mxu1 }
 0x151   : > { %v1462_v52 = vpop.f32.mrb[3].mxu1 }
 0x156   : > { %v4197_v40 = vpop.f32.mrb[4].mxu1 }
 0x157   : > { %v4199_v7 = vpop.f32.mrb[5].mxu1 }
 0x158   : > { %v4201_v25 = vpop.f32.mrb[6].mxu1 }
 0x159   : > { %v4203_v60 = vpop.f32.mrb[7].mxu1 }
 0x197   : > { %v3295_v44 = vpop.f32.mrb[0].mxu0 }
 0x198   : > { %v3296_v22 = vpop.f32.mrb[1].mxu0 }
 0x199   : > { %v3297_v61 = vadd.f32 %v3296_v22, %v3295_v44  ;;  %v3298_v11 = vpop.f32.mrb[2].mxu0 }
 0x19a   : > { %v3299_v6 = vpop.f32.mrb[3].mxu0 }
 0x19b   : > { %v1395_v8 = vadd.f32 %v3297_v61, %v4268_v63  ;;  %v3300_v23 = vadd.f32 %v3299_v6, %v3298_v11  ;;  %v3166_v6 = vrot.slane %v1813_v13, 9 }
 0x19d   : > { %v1460_v37 = vadd.f32 %v1459_v28, %v1395_v8  ;;  %v1398_v18 = vadd.f32 %v3300_v23, %v4268_v63  ;;  %v1708_v28 = vor.u32 %v1707_v53, %v1704_v39  ;;  %v1839_v8 = vrot.slane %v4272_v55, 5  ;;  %v3510_v23 = vld [vmem:[%s4881_s3 + $0xe0] sm:$0xff]  }
 0x19e   : > { %3373 = vmatprep.subr.bf16.mxu0 %v3510_v23 }
 0x19f   : > { %v1490_v46 = vmax.f32 %v1460_v37, 0.0  ;;  %v1463_v30 = vadd.f32 %v1462_v52, %v1398_v18  ;;  %v1711_v52 = vshll.u32 %v4272_v55, 16  ;;  %v4300_v44 = vrot.slane %v1708_v28, 4 }
 0x1a1   : > { %v3271_v58 = vpack.c.bf16 %v1490_v46, %v1490_v46  ;;  %v1491_v43 = vmax.f32 %v1463_v30, 0.0  ;;  %v4302_v22 = vrot.slane %v1711_v52, 5  ;;  %v3512_v46 = vld [vmem:[%s4881_s3 + $0xa0] sm:$0xff]   ;;  %v1649_v52 = vld [vmem:[#allocation3 + $0x18] sm:$0xf] }
 0x1a2   : > { %3374 = vmatpush3.bf16.msra.mxu0 %v3512_v46  ;;  %v4365_v46 = vld [vmem:[%s4881_s3 + $0x100] sm:$0xff]  }
 0x1a3   : > { %v1553_v2 = vshrl.u32 %v3271_v58, 16  ;;  %v3272_v12 = vpack.c.bf16 %v1491_v43, %v1491_v43  ;;  %v1556_v54 = vshll.u32 %v3271_v58, 16  ;;  %4916 = vst [vmem:[#allocation7_spill] sm:$0xff] %v4365_v46 }
 0x1a4   : > { %v3301_v3 = vpop.f32.mrb[4].mxu0 }
 0x1a5   : > { %v1555_v56 = vrot.slane %v1553_v2, 7  ;;  %v1561_v32 = vshrl.u32 %v3272_v12, 16  ;;  %v3302_v31 = vpop.f32.mrb[5].mxu0  ;;  %v1564_v33 = vshll.u32 %v3272_v12, 16  ;;  %v1714_v12 = vsel %vm3858_vm11, %v4300_v44, %v4302_v22 }
 0x1a6   : > { %v3303_v45 = vadd.f32 %v3302_v31, %v3301_v3  ;;  %v3304_v49 = vpop.f32.mrb[6].mxu0 }
 0x1a7   : > { %v1558_v35 = vor.u32 %v1556_v54, %v1555_v56  ;;  %v1559_v19 = vrot.slane %v1555_v56, 4  ;;  %v1563_v16 = vrot.slane %v1561_v32, 7  ;;  %v3305_v5 = vpop.f32.mrb[7].mxu0  ;;  %v4326_v56 = vld [vmem:[#allocation3 + $0x4c] sm:$0x1]  ;;  %v2175_v54 = vor.u32 %v2174_v9, %v2171_v24  ;;  %v3514_v9 = vld [vmem:[%s4881_s3 + $0xe8] sm:$0xff]  }
 0x1a8   : > { %v1403_v51 = vadd.f32 %v3303_v45, %v4268_v63  ;;  %v3306_v34 = vadd.f32 %v3305_v5, %v3304_v49  ;;  %4914 = vst [vmem:[#allocation5_spill] sm:$0xff] %v4326_v56  ;;  %v4330_v32 = vsel %vm3706_vm8, %v3166_v6, %v1839_v8  ;;  %v2178_v49 = vshll.u32 %v4326_v56, 16  ;;  %3375 = vmatprep.subr.bf16.mxu0 %v3514_v9 }
 0x1a9   : > { %v1636_v0 = vsel %vm4276_vm1, %v1558_v35, %v1635_v50  ;;  %v1641_v41 = vsel %vm4282_vm4, %v1559_v19, %v1640_v21  ;;  %v1566_v26 = vor.u32 %v1564_v33, %v1563_v16  ;;  %v1567_v36 = vrot.slane %v1563_v16, 4  ;;  %v1652_v33 = vld [vmem:[#allocation3 + $0x1c] sm:$0x1] }
 0x1aa   : > { %1637 = vst [vmem:[#allocation3 + $0x8] sm:$0xf] %v1636_v0  ;;  %1642 = vst [vmem:[#allocation3 + $0xc] sm:$0x1] %v1641_v41  ;;  %v1468_v1 = vadd.f32 %v4193_v48, %v1403_v51  ;;  %v1406_v27 = vadd.f32 %v3306_v34, %v4268_v63  ;;  %v3509_v48 = vld [vmem:[%s4881_s3 + $0x78] sm:$0xff]   ;;  %v4347_v23 = vrot.slane %v2175_v54, 4 }
 0x1ab   : > { %v1644_v61 = vsel %vm4276_vm1, %v1566_v26, %v1643_v62  ;;  %v1647_v11 = vsel %vm4282_vm4, %v1567_v36, %v1646_v15  ;;  %3339 = vmatprep.subr.bf16.mxu1 %v3509_v48  ;;  %v1655_v41 = vld [vmem:[#allocation3 + $0x20] sm:$0xf]  ;;  %v1658_v26 = vld [vmem:[#allocation3 + $0x24] sm:$0x1] }
 0x1ac   : > { %1645 = vst [vmem:[#allocation3 + $0x10] sm:$0xf] %v1644_v61  ;;  %1648 = vst [vmem:[#allocation3 + $0x14] sm:$0x1] %v1647_v11  ;;  %v1492_v37 = vmax.f32 %v1468_v1, 0.0  ;;  %v1471_v18 = vadd.f32 %v4195_v38, %v1406_v27  ;;  %v3307_v30 = vpop.f32.mrb[8].mxu0  ;;  %3340 = vmatpush3.bf16.msra.mxu1 %v3511_v57 }
 0x1ad   : > { %v3308_v39 = vpop.f32.mrb[9].mxu0  ;;  %3425 = vmatprep.subr.bf16.mxu1 %v4365_v46 }
 0x1ae   : > { %v3273_v58 = vpack.c.bf16 %v1492_v37, %v1492_v37  ;;  %v1493_v43 = vmax.f32 %v1471_v18, 0.0  ;;  %v3309_v53 = vadd.f32 %v3308_v39, %v3307_v30  ;;  %v3310_v2 = vpop.f32.mrb[10].mxu0  ;;  %v4367_v30 = vld [vmem:[#allocation3 + $0x48] sm:$0xe] }
 0x1af   : > { %v3311_v55 = vpop.f32.mrb[11].mxu0  ;;  %4917 = vst [vmem:[#allocation8_spill] sm:$0xff] %v4367_v30 }
 0x1b0   : > { %v1569_v38 = vshrl.u32 %v3273_v58, 16  ;;  %v3274_v3 = vpack.c.bf16 %v1493_v43, %v1493_v43  ;;  %v1572_v31 = vshll.u32 %v3273_v58, 16  ;;  %v1411_v17 = vadd.f32 %v3309_v53, %v4268_v63 }
 0x1b1   : > { %v3312_v50 = vadd.f32 %v3311_v55, %v3310_v2  ;;  %v1869_v21 = vld [vmem:[#allocation3 + $0x8] sm:$0xf]  ;;  %v4345_v48 = vld [vmem:[#allocation3 + $0xc] sm:$0x1] }
 0x1b2   : > { %v4333_v45 = vld [vmem:[#allocation3 + $0x8] sm:$0xf]  ;;  %v1571_v28 = vrot.slane %v1569_v38, 7  ;;  %v1577_v35 = vshrl.u32 %v3274_v3, 16  ;;  %v1580_v19 = vshll.u32 %v3274_v3, 16  ;;  %v1886_v16 = vshrl.u32 %v1869_v21, 16 }
 0x1b3   : > { %4915 = vst [vmem:[#allocation6_spill] sm:$0xff] %v4333_v45  ;;  %v1476_v62 = vadd.f32 %v4199_v7, %v1411_v17  ;;  %v1414_v5 = vadd.f32 %v3312_v50, %v4268_v63  ;;  %v1870_v15 = vld [vmem:[#allocation3 + $0x10] sm:$0xf]  ;;  %v1889_v51 = vshll.u32 %v1869_v21, 16  ;;  %v1716_v34 = vshrl.u32 %v4333_v45, 16  ;;  %v3516_v38 = vld [vmem:[%s4881_s3 + $0xa8] sm:$0xff]  }
 0x1b4   : > { %v1574_v10 = vor.u32 %v1572_v31, %v1571_v28  ;;  %v1575_v42 = vrot.slane %v1571_v28, 4  ;;  %v1579_v13 = vrot.slane %v1577_v35, 7  ;;  %v1900_v0 = vshrl.u32 %v1870_v15, 16  ;;  %v4371_v53 = vld [vmem:[#allocation3 + $0x10] sm:$0xf]  ;;  %v3517_v17 = vld [vmem:[%s4881_s3 + $0xf0] sm:$0xff]   ;;  %3376 = vmatpush3.bf16.msra.mxu0 %v3516_v38 }
 0x1b5   : > { %v1494_v36 = vmax.f32 %v1476_v62, 0.0  ;;  %v1479_v29 = vadd.f32 %v4203_v60, %v1414_v5  ;;  %v1903_v20 = vshll.u32 %v1870_v15, 16  ;;  %v3202_v1 = vcombine.low %v1869_v21, %v1870_v15  ;;  %4918 = vst [vmem:[#allocation9_spill] sm:$0xff] %v4371_v53  ;;  %v3518_v35 = vld [vmem:[%s4881_s3 + $0xb0] sm:$0xff]   ;;  %3377 = vmatprep.subr.bf16.mxu0 %v3517_v17 }
 0x1b6   : > { %v1650_v7 = vsel %vm4276_vm1, %v1574_v10, %v1649_v52  ;;  %v1653_v27 = vsel %vm4282_vm4, %v1575_v42, %v1652_v33  ;;  %v1582_v61 = vor.u32 %v1580_v19, %v1579_v13  ;;  %v1583_v11 = vrot.slane %v1579_v13, 4  ;;  %v1664_v19 = vld [vmem:[#allocation3 + $0x2c] sm:$0x1]  ;;  %v1667_v42 = vld [vmem:[#allocation3 + $0x30] sm:$0xf] }
 0x1b7   : > { %1651 = vst [vmem:[#allocation3 + $0x18] sm:$0xf] %v1650_v7  ;;  %1654 = vst [vmem:[#allocation3 + $0x1c] sm:$0x1] %v1653_v27  ;;  %v3275_v6 = vpack.c.bf16 %v1494_v36, %v1494_v36  ;;  %v1495_v8 = vmax.f32 %v1479_v29, 0.0  ;;  %2310 = vrot.lane.b32.xlu0 %v3202_v1, %s3543_s16  ;;  %v4349_v60 = vrot.slane %v2178_v49, 5 }
 0x1b8   : > { %v1656_v57 = vsel %vm4276_vm1, %v1582_v61, %v1655_v41  ;;  %v1659_v37 = vsel %vm4282_vm4, %v1583_v11, %v1658_v26  ;;  %v4355_v18 = vrot.slane %v1900_v0, 4  ;;  %v4357_v24 = vrot.slane %v1903_v20, 5  ;;  %v1661_v49 = vld [vmem:[#allocation3 + $0x28] sm:$0xf]  ;;  %v1670_v13 = vld [vmem:[#allocation3 + $0x34] sm:$0x1]  ;;  %3378 = vmatpush3.bf16.msra.mxu0 %v3518_v35 }
 0x1b9   : > { %1657 = vst [vmem:[#allocation3 + $0x20] sm:$0xf] %v1656_v57  ;;  %1660 = vst [vmem:[#allocation3 + $0x24] sm:$0x1] %v1659_v37  ;;  %v1585_v58 = vshrl.u32 %v3275_v6, 16  ;;  %v3276_v43 = vpack.c.bf16 %v1495_v8, %v1495_v8  ;;  %v4369_v39 = vrot.slane %v1886_v16, 4 }
 0x1ba   : > { %v4377_v3 = vrot.slane %v1889_v51, 5  ;;  %v1718_v55 = vrot.slane %v1716_v34, 4  ;;  %v1719_v54 = vshll.u32 %v4333_v45, 16  ;;  %v1725_v31 = vshll.u32 %v4345_v48, 16  ;;  %v4403_v61 = vld [vmem:[#allocation3 + $0x14] sm:$0x1] }
 0x1bb   : > { %v1587_v50 = vrot.slane %v1585_v58, 7  ;;  %v1588_v21 = vshll.u32 %v3275_v6, 16  ;;  %v1593_v28 = vshrl.u32 %v3276_v43, 16  ;;  %v1906_v16 = vor.u32 %v4357_v24, %v4355_v18 }
 0x1bc   : > { %v1721_v33 = vrot.slane %v1719_v54, 5  ;;  %v2071_v62 = vshrl.u32 %v4371_v53, 16  ;;  %v1596_v10 = vshll.u32 %v3276_v43, 16  ;;  %v1892_v0 = vor.u32 %v4377_v3, %v4369_v39 }
 0x1bd   : > { %v1590_v15 = vor.u32 %v1588_v21, %v1587_v50  ;;  %v1591_v51 = vrot.slane %v1587_v50, 4  ;;  %v1595_v34 = vrot.slane %v1593_v28, 7  ;;  %v1727_v26 = vrot.slane %v1725_v31, 5 }
 0x1be   : > { %v1722_v41 = vor.u32 %v1721_v33, %v1718_v55  ;;  %v1871_v36 = vld [vmem:[#allocation3 + $0x18] sm:$0xf]  ;;  %v2074_v29 = vshll.u32 %v4371_v53, 16  ;;  %v2073_v37 = vrot.slane %v2071_v62, 4  ;;  %v2080_v62 = vshll.u32 %v4403_v61, 16 }
 0x1bf   : > { %v1662_v20 = vsel %vm4276_vm1, %v1590_v15, %v1661_v49  ;;  %v1665_v1 = vsel %vm4282_vm4, %v1591_v51, %v1664_v19  ;;  %v1598_v7 = vor.u32 %v1596_v10, %v1595_v34  ;;  %v1599_v27 = vrot.slane %v1595_v34, 4  ;;  %v4409_v39 = vld [vmem:[#allocation3 + $0x18] sm:$0xf] }
 0x1c0   : > { %1663 = vst [vmem:[#allocation3 + $0x28] sm:$0xf] %v1662_v20  ;;  %1666 = vst [vmem:[#allocation3 + $0x2c] sm:$0x1] %v1665_v1  ;;  %v1723_v11 = vrot.slane %v1722_v41, 4  ;;  %v1914_v8 = vshrl.u32 %v1871_v36, 16 }
 0x1c1   : > { %v1872_v6 = vld [vmem:[#allocation3 + $0x20] sm:$0xf]  ;;  %v1917_v57 = vshll.u32 %v1871_v36, 16  ;;  %v1668_v18 = vsel %vm4276_vm1, %v1598_v7, %v1667_v42  ;;  %v1671_v24 = vsel %vm4282_vm4, %v1599_v27, %v1670_v13  ;;  %v3313_v9 = vpop.f32.mrb[12].mxu0  ;;  %4919 = vst [vmem:[#allocation10_spill] sm:$0xff] %v4409_v39  ;;  %v2076_v33 = vrot.slane %v2074_v29, 5 }
 0x1c2   : > { %v1928_v58 = vshrl.u32 %v1872_v6, 16  ;;  %v1931_v43 = vshll.u32 %v1872_v6, 16  ;;  %1669 = vst [vmem:[#allocation3 + $0x30] sm:$0xf] %v1668_v18  ;;  %1672 = vst [vmem:[#allocation3 + $0x34] sm:$0x1] %v1671_v24  ;;  %v1728_v3 = vsel %vm3858_vm11, %v1723_v11, %v1727_v26  ;;  %v3203_v55 = vcombine.low %v1871_v36, %v1872_v6 }
 0x1c3   : > { %v3314_v38 = vpop.f32.mrb[13].mxu0  ;;  %v1916_v54 = vrot.slane %v1914_v8, 4  ;;  %v1919_v31 = vrot.slane %v1917_v57, 5  ;;  %v3194_v21 = vcombine.low %v1714_v12, %v1728_v3  ;;  %v2085_v15 = vshrl.u32 %v4409_v39, 16  ;;  %v4423_v42 = vld [vmem:[#allocation3 + $0x1c] sm:$0x1] }
 0x1c4   : > { %v3315_v17 = vadd.f32 %v3314_v38, %v3313_v9  ;;  %v3316_v50 = vpop.f32.mrb[14].mxu0  ;;  %v1930_v49 = vrot.slane %v1928_v58, 4  ;;  %v1933_v28 = vrot.slane %v1931_v43, 5  ;;  %2312 = vrot.lane.b32.xlu0 %v3203_v55, %s3543_s16  ;;  %v2088_v44 = vshll.u32 %v4409_v39, 16  ;;  %v4430_v26 = vld [vmem:[#allocation3 + $0x10] sm:$0xf] }
 0x1c5   : > { %v3317_v35 = vpop.f32.mrb[15].mxu0  ;;  %v1920_v19 = vor.u32 %v1919_v31, %v1916_v54  ;;  %2270 = vrot.lane.b32.xlu1 %v3194_v21, %s3543_s16  ;;  %v4426_v22 = vrot.slane %v1906_v16, 4  ;;  %v4428_v12 = vrot.slane %v1892_v0, 4  ;;  %v2077_v13 = vor.u32 %v2076_v33, %v2073_v37  ;;  %v4440_v57 = vld [vmem:[#allocation3 + $0x18] sm:$0xf]  ;;  %v3519_v58 = vld [vmem:[%s4881_s3 + $0xf8] sm:$0xff]  }
 0x1c6   : > { %v1419_v51 = vadd.f32 %v3315_v17, %v4268_v63  ;;  %v3318_v34 = vadd.f32 %v3317_v35, %v3316_v50  ;;  %v1934_v10 = vor.u32 %v1933_v28, %v1930_v49  ;;  %v2087_v41 = vrot.slane %v2085_v15, 4  ;;  %v4442_v37 = vld [vmem:[#allocation3 + $0x14] sm:$0x1]  ;;  %v4451_v55 = vld [vmem:[#allocation3 + $0x1c] sm:$0x1]  ;;  %3379 = vmatprep.subr.bf16.mxu0 %v3519_v58 }
 0x1c7   : > { %v4434_v20 = vrot.slane %v1920_v19, 4  ;;  %v2090_v1 = vrot.slane %v2088_v44, 5  ;;  %v2078_v27 = vrot.slane %v2077_v13, 4  ;;  %v2082_v11 = vrot.slane %v2080_v62, 5  ;;  %v1673_v19 = vld [vmem:[#allocation3 + $0x38] sm:$0xf] }
 0x1c8   : > { %v1484_v36 = vadd.f32 %v4197_v40, %v1419_v51  ;;  %v1422_v29 = vadd.f32 %v3318_v34, %v4268_v63  ;;  %v4436_v7 = vrot.slane %v1934_v10, 4  ;;  %v2094_v16 = vshll.u32 %v4423_v42, 16  ;;  %v1676_v33 = vld [vmem:[#allocation3 + $0x3c] sm:$0x1]  ;;  %v4460_v10 = vld [vmem:[#allocation3 + $0xc] sm:$0x1] }
 0x1c9   : > { %v2091_v8 = vor.u32 %v2090_v1, %v2087_v41  ;;  %v1730_v40 = vshrl.u32 %v4430_v26, 16  ;;  %v1733_v9 = vshll.u32 %v4430_v26, 16  ;;  %v1739_v31 = vshll.u32 %v4442_v37, 16  ;;  %v2065_v59 = vld [vmem:[#allocation3 + $0x2c] sm:$0x1] }
 0x1ca   : > { %v1496_v6 = vmax.f32 %v1484_v36, 0.0  ;;  %v1487_v0 = vadd.f32 %v4201_v25, %v1422_v29  ;;  %v2096_v63 = vrot.slane %v2094_v16, 5  ;;  %v1744_v17 = vshrl.u32 %v4440_v57, 16  ;;  %v1997_v29 = vld [vmem:[#allocation3 + $0x8] sm:$0xe] }
 0x1cb   : > { %v2092_v38 = vrot.slane %v2091_v8, 4  ;;  %v1732_v3 = vrot.slane %v1730_v40, 4  ;;  %v1735_v54 = vrot.slane %v1733_v9, 5  ;;  %v1747_v50 = vshll.u32 %v4440_v57, 16  ;;  %v1679_v16 = vld [vmem:[#allocation3 + $0x40] sm:$0xf] }
 0x1cc   : > { %v3277_v43 = vpack.c.bf16 %v1496_v6, %v1496_v6  ;;  %v1497_v25 = vmax.f32 %v1487_v0, 0.0  ;;  %v2083_v28 = vsel %vm3858_vm11, %v2078_v27, %v2082_v11  ;;  %v1746_v51 = vrot.slane %v1744_v17, 4  ;;  %v1682_v27 = vld [vmem:[#allocation3 + $0x44] sm:$0x1]  ;;  %v4464_v8 = vld [vmem:[#allocation3 + $0x14] sm:$0x1] }
 0x1cd   : > { %v2097_v35 = vsel %vm3858_vm11, %v2092_v38, %v2096_v63  ;;  %v1736_v15 = vor.u32 %v1735_v54, %v1732_v3  ;;  %v1749_v34 = vrot.slane %v1747_v50, 5  ;;  %v1753_v36 = vshll.u32 %v4451_v55, 16  ;;  %v3522_v40 = vld [vmem:[%s4881_s3 + $0xb8] sm:$0xff]  }
 0x1ce   : > { %v1601_v21 = vshrl.u32 %v3277_v43, 16  ;;  %v3278_v49 = vpack.c.bf16 %v1497_v25, %v1497_v25  ;;  %v3218_v62 = vcombine.low %v2083_v28, %v2097_v35  ;;  %v1604_v13 = vshll.u32 %v3277_v43, 16  ;;  %v1998_v25 = vld [vmem:[#allocation3 + $0x10] sm:$0xe]  ;;  %3380 = vmatpush3.bf16.msra.mxu0 %v3522_v40  ;;  %v1873_v35 = vld [vmem:[#allocation3 + $0x28] sm:$0xf] }
 0x1cf   : > { %v1737_v11 = vrot.slane %v1736_v15, 4  ;;  %v1741_v6 = vrot.slane %v1739_v31, 5  ;;  %v1750_v0 = vor.u32 %v1749_v34, %v1746_v51  ;;  %v1755_v43 = vrot.slane %v1753_v36, 5  ;;  %v1874_v31 = vld [vmem:[#allocation3 + $0x30] sm:$0xf] }
 0x1d0   : > { %v1603_v44 = vrot.slane %v1601_v21, 7  ;;  %v1609_v41 = vshrl.u32 %v3278_v49, 16  ;;  %v1612_v1 = vshll.u32 %v3278_v49, 16  ;;  %2382 = vrot.lane.b32.xlu0 %v3218_v62, %s3543_s16  ;;  %v3174_v54 = vrot.slane %v1997_v29, 9  ;;  %v2064_v36 = vld [vmem:[#allocation3 + $0x24] sm:$0x1] }
 0x1d1   : > { %v1742_v38 = vsel %vm3858_vm11, %v1737_v11, %v1741_v6  ;;  %v1751_v3 = vrot.slane %v1750_v0, 4  ;;  %v2023_v17 = vrot.slane %v4460_v10, 5  ;;  %v3175_v51 = vrot.slane %v1998_v25, 9  ;;  %v4489_v0 = vld [vmem:[#allocation3 + $0x28] sm:$0xf] }
 0x1d2   : > { %v1606_v63 = vor.u32 %v1604_v13, %v1603_v44  ;;  %v1607_v9 = vrot.slane %v1603_v44, 4  ;;  %v1611_v58 = vrot.slane %v1609_v41, 7  ;;  %v2027_v34 = vrot.slane %v4464_v8, 5  ;;  %v4481_v44 = vld [vmem:[#allocation3 + $0x20] sm:$0xf] }
 0x1d3   : > { %v1756_v62 = vsel %vm3858_vm11, %v1751_v3, %v1755_v43  ;;  %v2024_v15 = vsel %vm3706_vm8, %v3174_v54, %v2023_v17  ;;  %v1956_v41 = vshrl.u32 %v1874_v31, 16  ;;  %v3204_v11 = vcombine.low %v1873_v35, %v1874_v31  ;;  %v2184_v25 = vld [vmem:[#allocation3 + $0x20] sm:$0xe]  ;;  %v4591_v39 = vld [vmem:[#allocation3 + $0x2c] sm:$0x1] }
 0x1d4   : > { %v1674_v50 = vsel %vm4276_vm1, %v1606_v63, %v1673_v19  ;;  %v1677_v21 = vsel %vm4282_vm4, %v1607_v9, %v1676_v33  ;;  %v1614_v49 = vor.u32 %v1612_v1, %v1611_v58  ;;  %v1615_v28 = vrot.slane %v1611_v58, 4 }
 0x1d5   : > { %1675 = vst [vmem:[#allocation3 + $0x38] sm:$0xf] %v1674_v50  ;;  %1678 = vst [vmem:[#allocation3 + $0x3c] sm:$0x1] %v1677_v21  ;;  %v3195_v13 = vcombine.low %v1742_v38, %v1756_v62  ;;  %v2028_v29 = vsel %vm3706_vm8, %v3175_v51, %v2027_v34  ;;  %v1959_v1 = vshll.u32 %v1874_v31, 16  ;;  %v1942_v6 = vshrl.u32 %v1873_v35, 16  ;;  %2314 = vrot.lane.b32.xlu0 %v3204_v11, %s3543_s16 }
 0x1d6   : > { %v1680_v19 = vsel %vm4276_vm1, %v1614_v49, %v1679_v16  ;;  %v1683_v33 = vsel %vm4282_vm4, %v1615_v28, %v1682_v27  ;;  %v3210_v4 = vcombine.low %v2024_v15, %v2028_v29  ;;  %v1958_v16 = vrot.slane %v1956_v41, 4  ;;  %v4497_v31 = vld [vmem:[#allocation3 + $0x20] sm:$0xf] }
 0x1d7   : > { %1681 = vst [vmem:[#allocation3 + $0x40] sm:$0xf] %v1680_v19  ;;  %1684 = vst [vmem:[#allocation3 + $0x44] sm:$0x1] %v1683_v33  ;;  %2272 = vrot.lane.b32.xlu1 %v3195_v13, %s3543_s16  ;;  %v1945_v40 = vshll.u32 %v1873_v35, 16  ;;  %v2099_v27 = vshrl.u32 %v4481_v44, 16 }
 0x1d8   : > { %v1961_v63 = vrot.slane %v1959_v1, 5  ;;  %v1944_v9 = vrot.slane %v1942_v6, 4  ;;  %v2102_v58 = vshll.u32 %v4481_v44, 16  ;;  %v2108_v43 = vshll.u32 %v2064_v36, 16  ;;  %v2185_v35 = vld [vmem:[#allocation3 + $0x28] sm:$0xe] }
 0x1d9   : > { %v1947_v38 = vrot.slane %v1945_v40, 5  ;;  %v2101_v3 = vrot.slane %v2099_v27, 4  ;;  %v2113_v54 = vshrl.u32 %v4489_v0, 16  ;;  %v2116_v17 = vshll.u32 %v4489_v0, 16  ;;  %v4502_v19 = vld [vmem:[#allocation3 + $0x24] sm:$0x1] }
 0x1da   : > { %v1962_v21 = vor.u32 %v1961_v63, %v1958_v16  ;;  %v2104_v49 = vrot.slane %v2102_v58, 5  ;;  %v2122_v28 = vshll.u32 %v2065_v59, 16  ;;  %v2110_v13 = vrot.slane %v2108_v43, 5  ;;  %v4504_v1 = vld [vmem:[#allocation3 + $0x28] sm:$0xf] }
 0x1db   : > { %2342 = vrot.lane.b32.xlu1 %v3210_v4, %s3543_s16  ;;  %v1948_v15 = vor.u32 %v1947_v38, %v1944_v9  ;;  %v2115_v51 = vrot.slane %v2113_v54, 4  ;;  %v2118_v34 = vrot.slane %v2116_v17, 5  ;;  %v3184_v41 = vrot.slane %v2184_v25, 9  ;;  %v4508_v58 = vld [vmem:[#allocation3 + $0x2c] sm:$0x1] }
 0x1dc   : > { %v2105_v33 = vor.u32 %v2104_v49, %v2101_v3  ;;  %v2216_v29 = vrot.slane %v2064_v36, 5  ;;  %v4506_v11 = vrot.slane %v1962_v21, 4  ;;  %v2124_v16 = vrot.slane %v2122_v28, 5  ;;  %v4516_v3 = vld [vmem:[#allocation3 + $0x1c] sm:$0x1] }
 0x1dd   : > { %v2119_v6 = vor.u32 %v2118_v34, %v2115_v51  ;;  %v3185_v40 = vrot.slane %v2185_v35, 9  ;;  %v2220_v63 = vrot.slane %v2065_v59, 5  ;;  %v1758_v4 = vshrl.u32 %v4497_v31, 16  ;;  %v1999_v49 = vld [vmem:[#allocation3 + $0x18] sm:$0xe] }
 0x1de   : > { %4920 = vst [vmem:[#allocation11_spill] sm:$0xff] %v4506_v11  ;;  %v2106_v27 = vrot.slane %v2105_v33, 4  ;;  %v1761_v9 = vshll.u32 %v4497_v31, 16  ;;  %v4512_v38 = vrot.slane %v1948_v15, 4  ;;  %v1767_v36 = vshll.u32 %v4502_v19, 16 }
 0x1df   : > { %v2120_v43 = vrot.slane %v2119_v6, 4  ;;  %v1772_v25 = vshrl.u32 %v4504_v1, 16  ;;  %v4520_v54 = vsel %vm3706_vm8, %v3184_v41, %v2216_v29  ;;  %v1760_v59 = vrot.slane %v1758_v4, 4  ;;  %v4528_v34 = vld [vmem:[#allocation3 + $0x24] sm:$0x1] }
 0x1e0   : > { %v1763_v17 = vrot.slane %v1761_v9, 5  ;;  %v1775_v21 = vshll.u32 %v4504_v1, 16  ;;  %v2111_v28 = vsel %vm3858_vm11, %v2106_v27, %v2110_v13  ;;  %v1781_v51 = vshll.u32 %v4508_v58, 16  ;;  %v2000_v33 = vld [vmem:[#allocation3 + $0x20] sm:$0xe] }
 0x1e1   : > { %v2125_v35 = vsel %vm3858_vm11, %v2120_v43, %v2124_v16  ;;  %v1774_v15 = vrot.slane %v1772_v25, 4  ;;  %v4532_v41 = vsel %vm3706_vm8, %v3185_v40, %v2220_v63  ;;  %v1876_v9 = vld [vmem:[#allocation3 + $0x40] sm:$0xf]  ;;  %v1769_v5 = vrot.slane %v1767_v36, 5  ;;  %v1875_v43 = vld [vmem:[#allocation3 + $0x38] sm:$0xf] }
 0x1e2   : > { %v3219_v29 = vcombine.low %v2111_v28, %v2125_v35  ;;  %v1764_v6 = vor.u32 %v1763_v17, %v1760_v59  ;;  %v1777_v4 = vrot.slane %v1775_v21, 5  ;;  %v3176_v27 = vrot.slane %v1999_v49, 9  ;;  %v4540_v36 = vld [vmem:[#allocation3 + $0x30] sm:$0xf]  ;;  %v4574_v53 = vld [vmem:[#allocation3 + $0x3c] sm:$0x1] }
 0x1e3   : > { %v2031_v16 = vrot.slane %v4516_v3, 5  ;;  %v3177_v24 = vrot.slane %v2000_v33, 9  ;;  %v2035_v18 = vrot.slane %v4528_v34, 5  ;;  %v1783_v40 = vrot.slane %v1781_v51, 5 }
 0x1e4   : > { %2384 = vrot.lane.b32.xlu0 %v3219_v29, %s3543_s16  ;;  %v1765_v25 = vrot.slane %v1764_v6, 4  ;;  %v1778_v2 = vor.u32 %v1777_v4, %v1774_v15  ;;  %v1984_v59 = vshrl.u32 %v1876_v9, 16  ;;  %v1987_v17 = vshll.u32 %v1876_v9, 16  ;;  %v4544_v29 = vld [vmem:[#allocation3 + $0x34] sm:$0x1] }
 0x1e5   : > { %v2032_v63 = vsel %vm3706_vm8, %v3176_v27, %v2031_v16  ;;  %v3205_v28 = vcombine.low %v1875_v43, %v1876_v9  ;;  %v1970_v35 = vshrl.u32 %v1875_v43, 16  ;;  %4921 = vst [vmem:[#allocation12_spill] sm:$0xff] %v4544_v29  ;;  %v2036_v15 = vsel %vm3706_vm8, %v3177_v24, %v2035_v18  ;;  %v4548_v4 = vld [vmem:[#allocation3 + $0x38] sm:$0xf] }
 0x1e6   : > { %v1770_v21 = vsel %vm3858_vm11, %v1765_v25, %v1769_v5  ;;  %v1779_v49 = vrot.slane %v1778_v2, 4  ;;  %v1986_v33 = vrot.slane %v1984_v59, 4  ;;  %v1989_v51 = vrot.slane %v1987_v17, 5  ;;  %v4553_v5 = vld [vmem:[#allocation3 + $0x3c] sm:$0x1] }
 0x1e7   : > { %v1973_v6 = vshll.u32 %v1875_v43, 16  ;;  %v1972_v16 = vrot.slane %v1970_v35, 4  ;;  %4922 = vst [vmem:[#allocation13_spill] sm:$0xff] %v4553_v5  ;;  %v2127_v2 = vshrl.u32 %v4540_v36, 16  ;;  %v2130_v9 = vshll.u32 %v4540_v36, 16 }
 0x1e8   : > { %v1784_v27 = vsel %vm3858_vm11, %v1779_v49, %v1783_v40  ;;  %2316 = vrot.lane.b32.xlu0 %v3205_v28, %s3543_s16  ;;  %v1990_v13 = vor.u32 %v1989_v51, %v1986_v33  ;;  %v2136_v24 = vshll.u32 %v4544_v29, 16  ;;  %v2141_v17 = vshrl.u32 %v4548_v4, 16  ;;  %v4560_v49 = vld [vmem:[#allocation3 + $0x30] sm:$0xf]  ;;  %v4565_v33 = vld [vmem:[#allocation3 + $0x34] sm:$0x1] }
 0x1e9   : > { %v3196_v25 = vcombine.low %v1770_v21, %v1784_v27  ;;  %v1975_v18 = vrot.slane %v1973_v6, 5  ;;  %v2129_v43 = vrot.slane %v2127_v2, 4  ;;  %v2132_v59 = vrot.slane %v2130_v9, 5  ;;  %v4569_v9 = vld [vmem:[#allocation3 + $0x38] sm:$0xf] }
 0x1ea   : > { %v2144_v40 = vshll.u32 %v4548_v4, 16  ;;  %v3211_v35 = vcombine.low %v2032_v63, %v2036_v15  ;;  %v2150_v21 = vshll.u32 %v4553_v5, 16  ;;  %v4567_v51 = vrot.slane %v1990_v13, 4  ;;  %v4578_v28 = vld [vmem:[#allocation3 + $0x40] sm:$0xf] }
 0x1eb   : > { %2274 = vrot.lane.b32.xlu1 %v3196_v25, %s3543_s16  ;;  %v1976_v62 = vor.u32 %v1975_v18, %v1972_v16  ;;  %v2133_v6 = vor.u32 %v2132_v59, %v2129_v43  ;;  %v2143_v27 = vrot.slane %v2141_v17, 4  ;;  %v2138_v52 = vrot.slane %v2136_v24, 5  ;;  %v4584_v17 = vld [vmem:[#allocation3 + $0x44] sm:$0x1] }
 0x1ec   : > { %4923 = vst [vmem:[#allocation14_spill] sm:$0xff] %v4567_v51  ;;  %v2146_v2 = vrot.slane %v2144_v40, 5  ;;  %v1786_v63 = vshrl.u32 %v4560_v49, 16  ;;  %v2152_v18 = vrot.slane %v2150_v21, 5  ;;  %v1789_v13 = vshll.u32 %v4560_v49, 16 }
 0x1ed   : > { %v4571_v50 = vrot.slane %v1976_v62, 4  ;;  %v2134_v15 = vrot.slane %v2133_v6, 4  ;;  %v1795_v62 = vshll.u32 %v4565_v33, 16  ;;  %v1800_v24 = vshrl.u32 %v4569_v9, 16  ;;  %v2001_v51 = vld [vmem:[#allocation3 + $0x28] sm:$0xe] }
 0x1ee   : > { %v2147_v16 = vor.u32 %v2146_v2, %v2143_v27  ;;  %v1788_v43 = vrot.slane %v1786_v63, 4  ;;  %v1803_v59 = vshll.u32 %v4569_v9, 16  ;;  %v1791_v27 = vrot.slane %v1789_v13, 5  ;;  %v4597_v13 = vld [vmem:[#allocation3 + $0x34] sm:$0x1] }
 0x1ef   : > { %4924 = vst [vmem:[#allocation15_spill] sm:$0xff] %v4571_v50  ;;  %2344 = vrot.lane.b32.xlu1 %v3211_v35, %s3543_s16  ;;  %v1809_v21 = vshll.u32 %v4574_v53, 16  ;;  %v2139_v2 = vsel %vm3858_vm11, %v2134_v15, %v2138_v52  ;;  %v1802_v25 = vrot.slane %v1800_v24, 4  ;;  %v2155_v63 = vshrl.u32 %v4578_v28, 16  ;;  %v2002_v24 = vld [vmem:[#allocation3 + $0x30] sm:$0xe] }
 0x1f0   : > { %v2148_v40 = vrot.slane %v2147_v16, 4  ;;  %v1805_v35 = vrot.slane %v1803_v59, 5  ;;  %v1792_v45 = vor.u32 %v1791_v27, %v1788_v43  ;;  %v2158_v16 = vshll.u32 %v4578_v28, 16  ;;  %v4599_v59 = vld [vmem:[#allocation3 + $0x3c] sm:$0x1] }
 0x1f1   : > { %v2164_v6 = vshll.u32 %v4584_v17, 16  ;;  %v1797_v5 = vrot.slane %v1795_v62, 5  ;;  %v2157_v15 = vrot.slane %v2155_v63, 4  ;;  %v1811_v30 = vrot.slane %v1809_v21, 5  ;;  %v2003_v62 = vld [vmem:[#allocation3 + $0x38] sm:$0xe] }
 0x1f2   : > { %v2153_v46 = vsel %vm3858_vm11, %v2148_v40, %v2152_v18  ;;  %v1806_v52 = vor.u32 %v1805_v35, %v1802_v25  ;;  %v1793_v29 = vrot.slane %v1792_v45, 4  ;;  %v2160_v56 = vrot.slane %v2158_v16, 5  ;;  %v4601_v18 = vld [vmem:[#allocation3 + $0x44] sm:$0x1]  ;;  %v2004_v21 = vld [vmem:[#allocation3 + $0x40] sm:$0xe] }
 0x1f3   : > { %v3220_v50 = vcombine.low %v2139_v2, %v2153_v46  ;;  %v2166_v11 = vrot.slane %v2164_v6, 5  ;;  %v3178_v27 = vrot.slane %v2001_v51, 9  ;;  %v2039_v46 = vrot.slane %v4591_v39, 5  ;;  %v1814_v16 = vld [vmem:[#allocation3 + $0x8] sm:$0xe] }
 0x1f4   : > { %v1807_v43 = vrot.slane %v1806_v52, 4  ;;  %v2161_v25 = vor.u32 %v2160_v56, %v2157_v15  ;;  %v3179_v35 = vrot.slane %v2002_v24, 9  ;;  %v2043_v45 = vrot.slane %v4597_v13, 5  ;;  %v1815_v52 = vld [vmem:[#allocation3 + $0x10] sm:$0xe] }
 0x1f5   : > { %2386 = vrot.lane.b32.xlu0 %v3220_v50, %s3543_s16  ;;  %v1798_v6 = vsel %vm3858_vm11, %v1793_v29, %v1797_v5  ;;  %v2040_v63 = vsel %vm3706_vm8, %v3178_v27, %v2039_v46  ;;  %v1979_v51 = vshll.u32 %v4599_v59, 16  ;;  %v3180_v2 = vrot.slane %v2003_v62, 9 }
 0x1f6   : > { %v1812_v50 = vsel %vm3858_vm11, %v1807_v43, %v1811_v30  ;;  %v2162_v15 = vrot.slane %v2161_v25, 4  ;;  %v2044_v24 = vsel %vm3706_vm8, %v3179_v35, %v2043_v45  ;;  %v1993_v40 = vshll.u32 %v4601_v18, 16  ;;  %v1816_v43 = vld [vmem:[#allocation3 + $0x18] sm:$0xe] }
 0x1f7   : > { %v3197_v56 = vcombine.low %v1798_v6, %v1812_v50  ;;  %v2047_v29 = vrot.slane %v4599_v59, 5  ;;  %v3181_v5 = vrot.slane %v2004_v21, 9  ;;  %v2051_v30 = vrot.slane %v4601_v18, 5 }
 0x1f8   : > { %v2167_v27 = vsel %vm3858_vm11, %v2162_v15, %v2166_v11  ;;  %v3167_v46 = vrot.slane %v1814_v16, 9  ;;  %v1843_v25 = vrot.slane %v4345_v48, 5  ;;  %v3168_v6 = vrot.slane %v1815_v52, 9  ;;  %v1818_v15 = vld [vmem:[#allocation3 + $0x28] sm:$0xe] }
 0x1f9   : > { %2276 = vrot.lane.b32.xlu1 %v3197_v56, %s3543_s16  ;;  %v4925_v62 = vsel %vm3858_vm11, %v4347_v23, %v4349_v60  ;;  %v3212_v45 = vcombine.low %v2040_v63, %v2044_v24  ;;  %v2052_v21 = vsel %vm3706_vm8, %v3181_v5, %v2051_v30  ;;  %v1847_v50 = vrot.slane %v4442_v37, 5  ;;  %v1817_v56 = vld [vmem:[#allocation3 + $0x20] sm:$0xe] }
 0x1fa   : > { %v3221_v35 = vcombine.low %v2167_v27, %v4925_v62  ;;  %v2048_v11 = vsel %vm3706_vm8, %v3180_v2, %v2047_v29  ;;  %v4636_v48 = vsel %vm3706_vm8, %v3167_v46, %v1843_v25  ;;  %v3169_v16 = vrot.slane %v1816_v43, 9  ;;  %v1819_v43 = vld [vmem:[#allocation3 + $0x30] sm:$0xe]  ;;  %v1820_v62 = vld [vmem:[#allocation3 + $0x38] sm:$0xe] }
 0x1fb   : > { %v1851_v52 = vrot.slane %v4451_v55, 5  ;;  %v3213_v23 = vcombine.low %v2048_v11, %v2052_v21  ;;  %v3198_v60 = vcombine.low %v4330_v32, %v4636_v48  ;;  %v4644_v37 = vsel %vm3706_vm8, %v3168_v6, %v1847_v50  ;;  %v2182_v50 = vld [vmem:[#allocation3 + $0x10] sm:$0xe]  ;;  %v4946_v32 = vld [vmem:[#allocation7_spill] sm:$0xff] }
 0x1fc   : > { %2388 = vrot.lane.b32.xlu0 %v3221_v35, %s3543_s16  ;;  %v3191_v2 = vcombine.low %v4430_v26, %v4440_v57  ;;  %v4926_v55 = vshll.u32 %v4460_v10, 16  ;;  %v4927_v29 = vshll.u32 %v4464_v8, 16  ;;  %v3170_v30 = vrot.slane %v1817_v56, 9  ;;  %v2183_v56 = vld [vmem:[#allocation3 + $0x18] sm:$0xe]  ;;  %v3524_v48 = vld [vmem:[%s4881_s3 + $0x110] sm:$0xff]  }
 0x1fd   : > { %2346 = vrot.lane.b32.xlu1 %v3212_v45, %s3543_s16  ;;  %v4651_v63 = vsel %vm3706_vm8, %v3169_v16, %v1851_v52  ;;  %v1855_v46 = vrot.slane %v4502_v19, 5  ;;  %v3171_v25 = vrot.slane %v1818_v15, 9  ;;  %v1859_v6 = vrot.slane %v4508_v58, 5 }
 0x1fe   : > { %v1897_v24 = vrot.slane %v4926_v55, 5  ;;  %v1911_v5 = vrot.slane %v4927_v29, 5  ;;  %v3199_v27 = vcombine.low %v4644_v37, %v4651_v63  ;;  %v3192_v8 = vcombine.low %v4497_v31, %v4504_v1  ;;  %v4947_v37 = vld [vmem:[#allocation10_spill] sm:$0xff]  ;;  %v4948_v63 = vld [vmem:[#allocation9_spill] sm:$0xff]  ;;  %v3533_v1 = vld [vmem:[#allocation3 + $0x48] sm:$0xf] }
 0x1ff   : > { %v3215_v45 = vcombine.low %v4481_v44, %v4489_v0  ;;  %v4675_v19 = vsel %vm3706_vm8, %v3170_v30, %v1855_v46  ;;  %v4679_v58 = vsel %vm3706_vm8, %v3171_v25, %v1859_v6  ;;  %v1863_v11 = vrot.slane %v4565_v33, 5 }
 0x200   : > { %v1898_v35 = vsel %vm3858_vm11, %v4428_v12, %v1897_v24  ;;  %v1912_v10 = vsel %vm3858_vm11, %v4426_v22, %v1911_v5  ;;  %v3172_v12 = vrot.slane %v1819_v43, 9  ;;  %v3200_v22 = vcombine.low %v4675_v19, %v4679_v58 }
 0x201   : > { %v4671_v21 = vcombine.low %v1898_v35, %v1912_v10  ;;  %2348 = vrot.lane.b32.xlu1 %v3213_v23, %s3543_s16  ;;  %v3173_v16 = vrot.slane %v1820_v62, 9  ;;  %v1867_v52 = vrot.slane %v4574_v53, 5  ;;  %v4928_v15 = vshll.u32 %v4516_v3, 16  ;;  %v2186_v62 = vld [vmem:[#allocation3 + $0x30] sm:$0xe] }
 0x202   : > { %v4929_v24 = vshll.u32 %v4528_v34, 16  ;;  %v3193_v5 = vcombine.low %v4560_v49, %v4569_v9  ;;  %v3216_v23 = vcombine.low %v4540_v36, %v4548_v4  ;;  %v4696_v30 = vsel %vm3706_vm8, %v3172_v12, %v1863_v11  ;;  %v2187_v35 = vld [vmem:[#allocation3 + $0x38] sm:$0xe]  ;;  %v2188_v11 = vld [vmem:[#allocation3 + $0x40] sm:$0xe] }
 0x203   : > { %v1925_v55 = vrot.slane %v4928_v15, 5  ;;  %v4700_v33 = vsel %vm3706_vm8, %v3173_v16, %v1867_v52  ;;  %v3182_v53 = vrot.slane %v2182_v50, 9  ;;  %v3183_v3 = vrot.slane %v2183_v56, 9  ;;  %v4934_v15 = vld [vmem:[#allocation11_spill] sm:$0xff] }
 0x204   : > { %v1939_v29 = vrot.slane %v4929_v24, 5  ;;  %v3201_v34 = vcombine.low %v4696_v30, %v4700_v33  ;;  %v4930_v25 = vshll.u32 %v4591_v39, 16  ;;  %v4931_v12 = vrot.slane %v4403_v61, 5 }
 0x205   : > { %v1926_v43 = vsel %vm3858_vm11, %v4434_v20, %v1925_v55  ;;  %v4932_v56 = vrot.slane %v4423_v42, 5  ;;  %v2232_v16 = vrot.slane %v4584_v17, 5  ;;  %v3223_v42 = vcombine.low %v4520_v54, %v4532_v41 }
 0x206   : > { %v1940_v46 = vsel %vm3858_vm11, %v4436_v7, %v1939_v29  ;;  %v1953_v6 = vrot.slane %v4930_v25, 5  ;;  %v4718_v50 = vsel %vm3706_vm8, %v3182_v53, %v4931_v12  ;;  %v4933_v7 = vshll.u32 %v4597_v13, 16  ;;  %v4939_v12 = vld [vmem:[#allocation12_spill] sm:$0xff] }
 0x207   : > { %v4712_v10 = vcombine.low %v1926_v43, %v1940_v46  ;;  %v4724_v20 = vsel %vm3706_vm8, %v3183_v3, %v4932_v56  ;;  %v3186_v24 = vrot.slane %v2186_v62, 9  ;;  %v3187_v13 = vrot.slane %v2187_v35, 9  ;;  %v4935_v43 = vld [vmem:[#allocation5_spill] sm:$0xff]  ;;  %v4937_v46 = vld [vmem:[#allocation8_spill] sm:$0xff] }
 0x208   : > { %v1967_v39 = vrot.slane %v4933_v7, 5  ;;  %v3222_v52 = vcombine.low %v4718_v50, %v4724_v20  ;;  %v1954_v61 = vsel %vm3858_vm11, %v4512_v38, %v1953_v6  ;;  %v1981_v29 = vrot.slane %v1979_v51, 5  ;;  %v4941_v51 = vld [vmem:[#allocation13_spill] sm:$0xff] }
 0x209   : > { %v1995_v53 = vrot.slane %v1993_v40, 5  ;;  %v3188_v3 = vrot.slane %v2188_v11, 9  ;;  %v4936_v38 = vrot.slane %v4935_v43, 5  ;;  %v4938_v25 = vrot.slane %v4937_v46, 9  ;;  %v4943_v40 = vld [vmem:[#allocation15_spill] sm:$0xff]  ;;  %v4945_v43 = vld [vmem:[#allocation6_spill] sm:$0xff] }
 0x20a   : > { %v1968_v55 = vsel %vm3858_vm11, %v4934_v15, %v1967_v39  ;;  %v4940_v62 = vrot.slane %v4939_v12, 5  ;;  %v4942_v35 = vrot.slane %v4941_v51, 5  ;;  %v1982_v56 = vsel %vm3858_vm11, %v4943_v40, %v1981_v29  ;;  %v4944_v39 = vld [vmem:[#allocation14_spill] sm:$0xff]  ;;  %v3532_v29 = vld [vmem:[#allocation3] sm:$0xf] }
 0x20b   : > { %v4741_v17 = vcombine.low %v1954_v61, %v1968_v55  ;;  %v4751_v6 = vsel %vm3706_vm8, %v4938_v25, %v4936_v38  ;;  %v1996_v11 = vsel %vm3858_vm11, %v4944_v39, %v1995_v53  ;;  %v4775_v61 = vsel %vm3706_vm8, %v3188_v3, %v2232_v16  ;;  %v3520_v16 = vld [vmem:[%s4881_s3 + $0x108] sm:$0xff]  }
 0x20c   : > { %v4757_v59 = vsel %vm3706_vm8, %v3186_v24, %v4940_v62  ;;  %v4763_v18 = vsel %vm3706_vm8, %v3187_v13, %v4942_v35  ;;  %v4777_v15 = vcombine.low %v1982_v56, %v1996_v11  ;;  %v3225_v55 = vcombine.low %v4775_v61, %v4751_v6 }
 0x20d   : > { %v3224_v7 = vcombine.low %v4757_v59, %v4763_v18  ;;  %v3190_v47 = vcombine.low %v3532_v29, %v4945_v43 }
 0x229   : > { %v2311_v24 = vpop.permute.xlu0 %2310 }
 0x22a   : > { %v2420_v13 = vsel %vm1143_vm13, %v3198_v60, %v2311_v24  ;;  %v3527_v60 = vld [vmem:[%s4881_s3 + $0x118] sm:$0xff]  }
 0x22b   : > { %2805 = vmatprep.mubr.bf16.mxu1 %v2420_v13 }
 0x236   : > { %v2313_v53 = vpop.permute.xlu0 %2312 }
 0x237   : > { %v2271_v38 = vpop.permute.xlu1 %2270  ;;  %v2424_v14 = vsel %vm1143_vm13, %v3199_v27, %v2313_v53  ;;  %v3214_v27 = vcombine.low %v4948_v63, %v4947_v37 }
 0x238   : > { %v2404_v3 = vsel %vm1143_vm13, %v3190_v47, %v2271_v38 }
 0x239   : > { %2806 = vmatmul.mubr.bf16.vlgmr.msra.gmra.mrb[8].mxu1 %v2404_v3 }
 0x23a   : > { %3426 = vmatpush3.bf16.msra.mxu1 %v4946_v32  ;;  %2813 = vmatprep.mubr.bf16.mxu1 %v2424_v14 }
 0x23b   : > { %3427 = vmatprep.subr.bf16.mxu1 %v3520_v16 }
 0x23e   : > { %3428 = vmatpush3.bf16.msra.mxu1 %v3520_v16 }
 0x23f   : > { %3429 = vmatprep.subr.bf16.mxu1 %v3524_v48 }
 0x242   : > { %v2383_v46 = vpop.permute.xlu0 %2382  ;;  %3430 = vmatpush3.bf16.msra.mxu1 %v3524_v48 }
 0x243   : > { %v2452_v25 = vsel %vm1143_vm13, %v3214_v27, %v2383_v46  ;;  %3431 = vmatprep.subr.bf16.mxu1 %v3527_v60 }
 0x244   : > { %2870 = vmatprep.mubr.bf16.mxu0 %v2452_v25 }
 0x246   : > { %3432 = vmatpush3.bf16.msra.mxu1 %v3527_v60 }
 0x247   : > { %v2315_v51 = vpop.permute.xlu0 %2314 }
 0x248   : > { %v2428_v35 = vsel %vm1143_vm13, %v3200_v22, %v2315_v51 }
 0x249   : > { %v2273_v12 = vpop.permute.xlu1 %2272 }
 0x24a   : > { %v2408_v62 = vsel %vm1143_vm13, %v3191_v2, %v2273_v12 }
 0x24b   : > { %2814 = vmatmul.mubr.bf16.gmra.mrb[12].mxu1 %v2408_v62 }
 0x24c   : > { %2821 = vmatprep.mubr.bf16.mxu1 %v2428_v35 }
 0x24d   : > { %v2343_v40 = vpop.permute.xlu1 %2342 }
 0x24e   : > { %v2436_v56 = vsel %vm1143_vm13, %v4671_v21, %v2343_v40 }
 0x24f   : > { %2871 = vmatmul.mubr.bf16.vlgmr.msra.gmra.mrb[16].mxu0 %v2436_v56 }
 0x256   : > { %v2385_v39 = vpop.permute.xlu0 %2384 }
 0x257   : > { %v2456_v26 = vsel %vm1143_vm13, %v3215_v45, %v2385_v39 }
 0x258   : > { %2878 = vmatprep.mubr.bf16.mxu0 %v2456_v26 }
 0x25a   : > { %v2317_v57 = vpop.permute.xlu0 %2316 }
 0x25b   : > { %v2432_v19 = vsel %vm1143_vm13, %v3201_v34, %v2317_v57 }
 0x25d   : > { %v2275_v2 = vpop.permute.xlu1 %2274 }
 0x25e   : > { %v2412_v21 = vsel %vm1143_vm13, %v3192_v8, %v2275_v2  ;;  %v3217_v8 = vcombine.low %v4578_v28, %v3533_v1 }
 0x25f   : > { %2822 = vmatmul.mubr.bf16.gmra.mrb[16].mxu1 %v2412_v21 }
 0x260   : > { %2829 = vmatprep.mubr.bf16.mxu1 %v2432_v19 }
 0x261   : > { %v2345_v58 = vpop.permute.xlu1 %2344 }
 0x262   : > { %v2440_v44 = vsel %vm1143_vm13, %v4712_v10, %v2345_v58 }
 0x263   : > { %2879 = vmatmul.mubr.bf16.gmra.mrb[20].mxu0 %v2440_v44 }
 0x267   : > { %v2387_v0 = vpop.permute.xlu0 %2386 }
 0x268   : > { %v2460_v45 = vsel %vm1143_vm13, %v3216_v23, %v2387_v0 }
 0x269   : > { %2886 = vmatprep.mubr.bf16.mxu0 %v2460_v45 }
 0x26b   : > { %v2277_v22 = vpop.permute.xlu1 %2276 }
 0x26c   : > { %v2416_v31 = vsel %vm1143_vm13, %v3193_v5, %v2277_v22 }
 0x26d   : > { %2830 = vmatmul.mubr.bf16.gmra.mrb[20].mxu1 %v2416_v31 }
 0x26e   : > { %3433 = vmatprep.mubr.msk.bf16.mxu1 %vm1143_vm13, %v3222_v52  ;;  %v2389_v30 = vpop.permute.xlu0 %2388 }
 0x26f   : > { %v2347_v36 = vpop.permute.xlu1 %2346  ;;  %v2464_v4 = vsel %vm1143_vm13, %v3217_v8, %v2389_v30 }
 0x270   : > { %v2444_v23 = vsel %vm1143_vm13, %v4741_v17, %v2347_v36 }
 0x271   : > { %2887 = vmatmul.mubr.bf16.gmra.mrb[24].mxu0 %v2444_v23 }
 0x272   : > { %2894 = vmatprep.mubr.bf16.mxu0 %v2464_v4 }
 0x273   : > { %v2349_v49 = vpop.permute.xlu1 %2348 }
 0x274   : > { %v2448_v28 = vsel %vm1143_vm13, %v4777_v15, %v2349_v49 }
 0x275   : > { %3434 = vmatmul.mubr.msk.bf16.vlgmr.msra.gmra.mrb[24].mxu1 %vm1143_vm13, %v3223_v42  ;;  %v4861_v42 = vld [vmem:[%s4882_s4] ss:$0 sm:$0xff] }
 0x276   : > { %3437 = vmatprep.mubr.msk.bf16.mxu1 %vm1143_vm13, %v3224_v7 }
 0x279   : > { %2895 = vmatmul.mubr.bf16.gmra.mrb[28].mxu0 %v2448_v28 }
 0x27d   : > { %3438 = vmatmul.mubr.msk.bf16.gmra.mrb[28].mxu1 %vm1143_vm13, %v3225_v55 }
 0x30c   : > { %v3341_v9 = vpop.f32.mrb[8].mxu1 }
 0x30d   : > { %v3342_v5 = vpop.f32.mrb[9].mxu1 }
 0x30e   : > { %v3343_v33 = vadd.f32 %v3342_v5, %v3341_v9  ;;  %v3344_v54 = vpop.f32.mrb[10].mxu1 }
 0x30f   : > { %v3345_v41 = vpop.f32.mrb[11].mxu1 }
 0x310   : > { %v3346_v34 = vadd.f32 %v3345_v41, %v3344_v54  ;;  %v2808_v7 = vadd.f32 %v3343_v33, %v4861_v42 }
 0x312   : > { %v2811_v55 = vadd.f32 %v3346_v34, %v4861_v42 }
 0x31e   : > { %v3347_v10 = vpop.f32.mrb[12].mxu1 }
 0x31f   : > { %v3348_v50 = vpop.f32.mrb[13].mxu1 }
 0x320   : > { %v3349_v20 = vadd.f32 %v3348_v50, %v3347_v10  ;;  %v3350_v52 = vpop.f32.mrb[14].mxu1 }
 0x321   : > { %v3351_v17 = vpop.f32.mrb[15].mxu1 }
 0x322   : > { %v3352_v59 = vadd.f32 %v3351_v17, %v3350_v52  ;;  %v3381_v6 = vpop.f32.mrb[16].mxu0  ;;  %v2816_v48 = vadd.f32 %v3349_v20, %v4861_v42 }
 0x323   : > { %v3382_v18 = vpop.f32.mrb[17].mxu0 }
 0x324   : > { %v3383_v11 = vadd.f32 %v3382_v18, %v3381_v6  ;;  %v3384_v61 = vpop.f32.mrb[18].mxu0  ;;  %v2819_v27 = vadd.f32 %v3352_v59, %v4861_v42 }
 0x325   : > { %v3385_v15 = vpop.f32.mrb[19].mxu0 }
 0x326   : > { %v3386_v24 = vadd.f32 %v3385_v15, %v3384_v61  ;;  %v2873_v13 = vadd.f32 %v3383_v11, %v2808_v7 }
 0x328   : > { %v2876_v29 = vadd.f32 %v3386_v24, %v2811_v55 }
 0x332   : > { %v3353_v43 = vpop.f32.mrb[16].mxu1 }
 0x333   : > { %v3354_v47 = vpop.f32.mrb[17].mxu1 }
 0x334   : > { %v3355_v53 = vadd.f32 %v3354_v47, %v3353_v43  ;;  %v3356_v38 = vpop.f32.mrb[18].mxu1 }
 0x335   : > { %v3357_v14 = vpop.f32.mrb[19].mxu1 }
 0x336   : > { %v3358_v16 = vadd.f32 %v3357_v14, %v3356_v38  ;;  %v3387_v3 = vpop.f32.mrb[20].mxu0  ;;  %v2824_v2 = vadd.f32 %v3355_v53, %v4861_v42 }
 0x337   : > { %v3388_v32 = vpop.f32.mrb[21].mxu0 }
 0x338   : > { %v3389_v60 = vadd.f32 %v3388_v32, %v3387_v3  ;;  %v3390_v37 = vpop.f32.mrb[22].mxu0  ;;  %v2827_v44 = vadd.f32 %v3358_v16, %v4861_v42 }
 0x339   : > { %v3391_v63 = vpop.f32.mrb[23].mxu0 }
 0x33a   : > { %v3392_v46 = vadd.f32 %v3391_v63, %v3390_v37  ;;  %v2881_v25 = vadd.f32 %v3389_v60, %v2816_v48 }
 0x33c   : > { %v2884_v12 = vadd.f32 %v3392_v46, %v2819_v27 }
 0x340   : > { %v3359_v62 = vpop.f32.mrb[20].mxu1 }
 0x341   : > { %v3360_v51 = vpop.f32.mrb[21].mxu1 }
 0x342   : > { %v3361_v35 = vadd.f32 %v3360_v51, %v3359_v62  ;;  %v3362_v40 = vpop.f32.mrb[22].mxu1 }
 0x343   : > { %v3363_v56 = vpop.f32.mrb[23].mxu1 }
 0x344   : > { %v3364_v39 = vadd.f32 %v3363_v56, %v3362_v40  ;;  %v3393_v26 = vpop.f32.mrb[24].mxu0  ;;  %v2832_v54 = vadd.f32 %v3361_v35, %v4861_v42 }
 0x345   : > { %v3394_v57 = vpop.f32.mrb[25].mxu0 }
 0x346   : > { %v3395_v19 = vadd.f32 %v3394_v57, %v3393_v26  ;;  %v3396_v21 = vpop.f32.mrb[26].mxu0  ;;  %v2835_v17 = vadd.f32 %v3364_v39, %v4861_v42 }
 0x347   : > { %v3397_v58 = vpop.f32.mrb[27].mxu0 }
 0x348   : > { %v3398_v0 = vadd.f32 %v3397_v58, %v3396_v21  ;;  %v3435_v45 = vpop.f32.mrb[24].mxu1  ;;  %v2889_v22 = vadd.f32 %v3395_v19, %v2824_v2 }
 0x349   : > { %v2946_v31 = vadd.f32 %v3435_v45, %v2881_v25  ;;  %v2937_v1 = vpop.f32.mrb[25].mxu1 }
 0x34a   : > { %v2938_v8 = vadd.f32 %v2937_v1, %v2873_v13  ;;  %v3436_v30 = vpop.f32.mrb[26].mxu1  ;;  %v2892_v36 = vadd.f32 %v3398_v0, %v2827_v44 }
 0x34b   : > { %v2949_v4 = vadd.f32 %v3436_v30, %v2884_v12  ;;  %v2940_v23 = vpop.f32.mrb[27].mxu1  ;;  %v2970_v9 = vmax.f32 %v2946_v31, 0.0 }
 0x34c   : > { %v2941_v49 = vadd.f32 %v2940_v23, %v2876_v29  ;;  %v3399_v28 = vpop.f32.mrb[28].mxu0  ;;  %v2968_v41 = vmax.f32 %v2938_v8, 0.0 }
 0x34d   : > { %v2971_v5 = vmax.f32 %v2949_v4, 0.0  ;;  %v3400_v33 = vpop.f32.mrb[29].mxu0 }
 0x34e   : > { %v2969_v34 = vmax.f32 %v2941_v49, 0.0  ;;  %v3401_v10 = vadd.f32 %v3400_v33, %v3399_v28  ;;  %v3402_v50 = vpop.f32.mrb[30].mxu0 }
 0x34f   : > { %v2977_v20 = vmax.f32 %v2970_v9, %v2971_v5  ;;  %v3403_v52 = vpop.f32.mrb[31].mxu0 }
 0x350   : > { %v2976_v59 = vmax.f32 %v2968_v41, %v2969_v34  ;;  %v3404_v6 = vadd.f32 %v3403_v52, %v3402_v50  ;;  %v2897_v18 = vadd.f32 %v3401_v10, %v2832_v54  ;;  %v3439_v7 = vpop.f32.mrb[28].mxu1 }
 0x351   : > { %2981 = vst [vmem:[#allocation4 + $0x8] sm:$0xff] %v2977_v20  ;;  %v2953_v11 = vpop.f32.mrb[29].mxu1 }
 0x352   : > { %2980 = vst [vmem:[#allocation4] sm:$0xff] %v2976_v59  ;;  %v2962_v61 = vadd.f32 %v3439_v7, %v2897_v18  ;;  %v2954_v15 = vadd.f32 %v2953_v11, %v2889_v22  ;;  %v2900_v55 = vadd.f32 %v3404_v6, %v2835_v17  ;;  %v3440_v24 = vpop.f32.mrb[30].mxu1 }
 0x353   : > { %v2956_v13 = vpop.f32.mrb[31].mxu1 }
 0x354   : > { %v2965_v29 = vadd.f32 %v3440_v24, %v2900_v55  ;;  %v2957_v43 = vadd.f32 %v2956_v13, %v2892_v36  ;;  %v2974_v47 = vmax.f32 %v2962_v61, 0.0  ;;  %v2972_v53 = vmax.f32 %v2954_v15, 0.0 }
 0x356   : > { %v2975_v38 = vmax.f32 %v2965_v29, 0.0  ;;  %v2973_v14 = vmax.f32 %v2957_v43, 0.0 }
 0x358   : > { %v2986_v42 = vld [vmem:[#allocation4 + $0x8] ss:$2 sm:$0xf]  ;;  %v2994_v16 = vld [vmem:[#allocation4 + $0x9] ss:$2 sm:$0xf]  ;;  %v2979_v3 = vmax.f32 %v2974_v47, %v2975_v38  ;;  %v2978_v32 = vmax.f32 %v2972_v53, %v2973_v14 }
 0x359   : > { %v3000_v48 = vmax.f32 %v2986_v42, %v2994_v16  ;;  %v2984_v60 = vld [vmem:[#allocation4] ss:$2 sm:$0xf]  ;;  %v2992_v37 = vld [vmem:[#allocation4 + $0x1] ss:$2 sm:$0xf] }
 0x35a   : > { %v2999_v63 = vmax.f32 %v2984_v60, %v2992_v37  ;;  %2983 = vst [vmem:[#allocation4 + $0x18] sm:$0xff] %v2979_v3  ;;  %2982 = vst [vmem:[#allocation4 + $0x10] sm:$0xff] %v2978_v32 }
 0x35b   : > { %v3004_v27 = vpack.c.bf16 %v3000_v48, %v3000_v48 }
 0x35c   : > { %v3003_v46 = vpack.c.bf16 %v2999_v63, %v2999_v63 }
 0x35d   : > { %3008 = vst [vmem:[%s224_s7 + $0x2] sm:$0x3] %v3004_v27 }
 0x35e   : > { %3007 = vst [vmem:[%s224_s7] sm:$0x3] %v3003_v46 }
 0x361   : > { %v2990_v25 = vld [vmem:[#allocation4 + $0x18] ss:$2 sm:$0xf]  ;;  %v2998_v12 = vld [vmem:[#allocation4 + $0x19] ss:$2 sm:$0xf] }
 0x362   : > { %v3002_v62 = vmax.f32 %v2990_v25, %v2998_v12  ;;  %v2988_v51 = vld [vmem:[#allocation4 + $0x10] ss:$2 sm:$0xf]  ;;  %v2996_v35 = vld [vmem:[#allocation4 + $0x11] ss:$2 sm:$0xf] }
 0x363   : > { %v3001_v40 = vmax.f32 %v2988_v51, %v2996_v35 }
 0x364   : > { %v3006_v56 = vpack.c.bf16 %v3002_v62, %v3002_v62 }
 0x365   : > { %v3005_v39 = vpack.c.bf16 %v3001_v40, %v3001_v40 }
 0x366   : > { %3010 = vst [vmem:[%s224_s7 + $0x6] sm:$0x3] %v3006_v56 }
 0x367   : > { %3009 = vst [vmem:[%s224_s7 + $0x4] sm:$0x3] %v3005_v39 }
 0x368 PF: > { %s15_s18 = sadd.s32 1, %s3540_s18  }
 0x369   : > { %p12_p4 = scmp.ge.s32.totalorder %s15_s18, 4  }
 0x36b   :  { %14 = sbr.rel (!%p12_p4) target bundleno = 1 (0x1), region = 81 }

// kernel: model_forward.3
= control target key start
LH: loop header
LB: loop body
LE: loop exit
PB: predicated region body
PF: predicated region fallthrough
CT: control target
= control target key end

     0   :  { %s8497_s18 = smov 0   ;;  %s12515_s0 = inlined_call_operand.vmem [shape: bf16[2,16,16,3], index: 0, kind: input, shape index: {}]   ;;  %s12516_s1 = inlined_call_operand.vmem [shape: bf16[27,16], index: 1, kind: input, shape index: {}]   ;;  %s12517_s2 = inlined_call_operand.vmem [shape: f32[1,16], index: 2, kind: input, shape index: {}]   ;;  %s12518_s3 = inlined_call_operand.vmem [shape: bf16[144,32], index: 3, kind: input, shape index: {}]   ;;  %s12519_s4 = inlined_call_operand.vmem [shape: f32[1,32], index: 4, kind: input, shape index: {}]   ;;  %s12520_s5 = inlined_call_operand.vmem [shape: bf16[2,8,8,32], index: 5, kind: output, shape index: {}]  }
   0x1 LB: > { %s7701_s19 = sadd.s32 4294967295, %s8448_s18   ;;  %p7705_p0 = scmp.ge.s32.totalorder %s8448_s18, 1  ;;  %s8448_s18 = sphi %s8497_s18, %s15_s18  }
   0x2   : > { %p187_p1 = scmp.lt.s32.totalorder %s8448_s18, 3 }
   0x4   : > { %p188_p2 = pnand %p7705_p0, %p187_p1 }
   0x6   : > { %191 = sbr.rel (%p188_p2) target bundleno = 1239 (0x4d7), region = 40 }
   0xd   : > { %vm226_vm0 = vcmask 19456   ;;  %vm229_vm1 = vcmask 16384   ;;  %v12521_v0 = vmov 0   ;;  %p215_p3 = scmp.lt.s32.totalorder %s7701_s19, 1  ;;  %vm1254_vm2 = vcmask 1042432   ;;  %s8451_s24 = smov 6  }
   0xe   : > { %227 = vst.msk [vmem:[#allocation2] sm:$0xf] %vm226_vm0, %v12521_v0  ;;  %228 = vst.msk [vmem:[#allocation2 + $0x4] sm:$0xf] %vm226_vm0, %v12521_v0  ;;  %8261 = vmatprep.subr.bf16.mxu1 %v12521_v0  ;;  %vm1255_vm3 = vcmask 1046532   ;;  %s8452_s25 = smov 3  }
   0xf   : > { %230 = vst.msk [vmem:[#allocation2 + $0x8] sm:$0x1] %vm229_vm1, %v12521_v0  ;;  %233 = vst.msk [vmem:[#allocation2 + $0x14] sm:$0x1] %vm229_vm1, %v12521_v0  ;;  %s12657_s19 = smov (!%p215_p3, %s7701_s19), 1  ;;  %s8453_s26 = smov 9  }
  0x10   : > { %231 = vst.msk [vmem:[#allocation2 + $0xc] sm:$0xf] %vm226_vm0, %v12521_v0  ;;  %232 = vst.msk [vmem:[#allocation2 + $0x10] sm:$0xf] %vm226_vm0, %v12521_v0  ;;  %vm803_vm4 = vsmask.f32 3328 }
  0x11   : > { %234 = vst.msk [vmem:[#allocation2 + $0x18] sm:$0xf] %vm226_vm0, %v12521_v0  ;;  %235 = vst.msk [vmem:[#allocation2 + $0x1c] sm:$0xf] %vm226_vm0, %v12521_v0  ;;  %vm804_vm5 = vsmask.f32 7440 }
  0x12   : > { %236 = vst.msk [vmem:[#allocation2 + $0x20] sm:$0x1] %vm229_vm1, %v12521_v0  ;;  %239 = vst.msk [vmem:[#allocation2 + $0x2c] sm:$0x1] %vm229_vm1, %v12521_v0  ;;  %s8173_s20 = sshll.u32 %s12657_s19, 7  ;;  %s8454_s27 = smov 18  }
  0x13   : > { %237 = vst.msk [vmem:[#allocation2 + $0x24] sm:$0xf] %vm226_vm0, %v12521_v0  ;;  %238 = vst.msk [vmem:[#allocation2 + $0x28] sm:$0xf] %vm226_vm0, %v12521_v0  ;;  %s8624_s23 = scalar_lea.vmem %s12515_s0, %s8173_s20  ;;  %vm12523_vm6 = vsmask.f32 256 }
  0x14   : > { %240 = vst.msk [vmem:[#allocation2 + $0x30] sm:$0xf] %vm226_vm0, %v12521_v0  ;;  %241 = vst.msk [vmem:[#allocation2 + $0x34] sm:$0xf] %vm226_vm0, %v12521_v0  ;;  %v284_v2 = vld [vmem:[%s8624_s23 + $0x8] sm:$0xf] }
  0x15   : > { %242 = vst.msk [vmem:[#allocation2 + $0x38] sm:$0x1] %vm229_vm1, %v12521_v0  ;;  %245 = vst.msk [vmem:[#allocation2 + $0x44] sm:$0x1] %vm229_vm1, %v12521_v0  ;;  %vm315_vm8 = vsmask.f32 4368 }
  0x16   : > { %243 = vst.msk [vmem:[#allocation2 + $0x3c] sm:$0xf] %vm226_vm0, %v12521_v0  ;;  %244 = vst.msk [vmem:[#allocation2 + $0x40] sm:$0xf] %vm226_vm0, %v12521_v0  ;;  %vm639_vm9 = vsmask.f32 7938 }
  0x17   : > { %246 = vst.msk [vmem:[#allocation2 + $0x48] sm:$0xf] %vm226_vm0, %v12521_v0  ;;  %247 = vst.msk [vmem:[#allocation2 + $0x4c] sm:$0xf] %vm226_vm0, %v12521_v0  ;;  %v756_v3 = vld [vmem:[#allocation2 + $0x4] sm:$0xf] }
  0x18   : > { %248 = vst.msk [vmem:[#allocation2 + $0x50] sm:$0x1] %vm229_vm1, %v12521_v0  ;;  %251 = vst.msk [vmem:[#allocation2 + $0x5c] sm:$0x1] %vm229_vm1, %v12521_v0  ;;  %v787_v4 = vld [vmem:[#allocation2 + $0x8] sm:$0x1] }
  0x19   : > { %249 = vst.msk [vmem:[#allocation2 + $0x54] sm:$0xf] %vm226_vm0, %v12521_v0  ;;  %250 = vst.msk [vmem:[#allocation2 + $0x58] sm:$0xf] %vm226_vm0, %v12521_v0  ;;  %v1190_v5 = vld [vmem:[#allocation2] sm:$0xe] }
  0x1a   : > { %252 = vst.msk [vmem:[#allocation2 + $0x60] sm:$0xf] %vm226_vm0, %v12521_v0  ;;  %253 = vst.msk [vmem:[#allocation2 + $0x64] sm:$0xf] %vm226_vm0, %v12521_v0  ;;  %v7710_v6 = vrot.slane %v1190_v5, 9  ;;  %v1259_v7 = vrot.slane %v756_v3, 5 }
  0x1b   : > { %254 = vst.msk [vmem:[#allocation2 + $0x68] sm:$0x1] %vm229_vm1, %v12521_v0  ;;  %257 = vst.msk [vmem:[#allocation2 + $0x74] sm:$0x1] %vm229_vm1, %v12521_v0  ;;  %v1262_v8 = vrot.slane %v787_v4, 5  ;;  %v816_v10 = vshll.u32 %v756_v3, 16 }
  0x1c   : > { %255 = vst.msk [vmem:[#allocation2 + $0x6c] sm:$0xf] %vm226_vm0, %v12521_v0  ;;  %256 = vst.msk [vmem:[#allocation2 + $0x70] sm:$0xf] %vm226_vm0, %v12521_v0  ;;  %v755_v9 = vld [vmem:[#allocation2] sm:$0xf] }
  0x1d   : > { %258 = vst.msk [vmem:[#allocation2 + $0x78] sm:$0xf] %vm226_vm0, %v12521_v0  ;;  %259 = vst.msk [vmem:[#allocation2 + $0x7c] sm:$0xf] %vm226_vm0, %v12521_v0  ;;  %v807_v11 = vshrl.u32 %v755_v9, 16  ;;  %v810_v12 = vshll.u32 %v755_v9, 16 }
  0x1e   : > { %260 = vst.msk [vmem:[#allocation2 + $0x80] sm:$0x1] %vm229_vm1, %v12521_v0  ;;  %263 = vst.msk [vmem:[#allocation2 + $0x8c] sm:$0x1] %vm229_vm1, %v12521_v0  ;;  %v820_v13 = vshrl.u32 %v756_v3, 16  ;;  %v826_v14 = vshll.u32 %v787_v4, 16 }
  0x1f   : > { %261 = vst.msk [vmem:[#allocation2 + $0x84] sm:$0xf] %vm226_vm0, %v12521_v0  ;;  %262 = vst.msk [vmem:[#allocation2 + $0x88] sm:$0xf] %vm226_vm0, %v12521_v0  ;;  %v285_v15 = vld [vmem:[%s8624_s23 + $0xc] sm:$0xf] }
  0x20   : > { %264 = vst.msk [vmem:[#allocation2 + $0x90] sm:$0xf] %vm226_vm0, %v12521_v0  ;;  %265 = vst.msk [vmem:[#allocation2 + $0x94] sm:$0xf] %vm226_vm0, %v12521_v0  ;;  %v1261_v17 = vrot.slane %v1259_v7, 4  ;;  %v818_v18 = vrot.slane %v816_v10, 5 }
  0x21   : > { %266 = vst.msk [vmem:[#allocation2 + $0x98] sm:$0x1] %vm229_vm1, %v12521_v0  ;;  %269 = vst.msk [vmem:[#allocation2 + $0xa4] sm:$0x1] %vm229_vm1, %v12521_v0  ;;  %v335_v19 = vshrl.u32 %v284_v2, 16  ;;  %v809_v20 = vrot.slane %v807_v11, 4 }
  0x22   : > { %267 = vst.msk [vmem:[#allocation2 + $0x9c] sm:$0xf] %vm226_vm0, %v12521_v0  ;;  %268 = vst.msk [vmem:[#allocation2 + $0xa0] sm:$0xf] %vm226_vm0, %v12521_v0  ;;  %v812_v21 = vrot.slane %v810_v12, 5  ;;  %v822_v22 = vrot.slane %v820_v13, 4 }
  0x23   : > { %270 = vst.msk [vmem:[#allocation2 + $0xa8] sm:$0xf] %vm226_vm0, %v12521_v0  ;;  %271 = vst.msk [vmem:[#allocation2 + $0xac] sm:$0xf] %vm226_vm0, %v12521_v0  ;;  %v828_v23 = vrot.slane %v826_v14, 5  ;;  %v337_v26 = vrot.slane %v335_v19, 7 }
  0x24   : > { %272 = vst.msk [vmem:[#allocation2 + $0xb0] sm:$0x1] %vm229_vm1, %v12521_v0  ;;  %275 = vst.msk [vmem:[#allocation2 + $0xbc] sm:$0x1] %vm229_vm1, %v12521_v0  ;;  %v282_v24 = vld [vmem:[%s8624_s23] sm:$0xf]  ;;  %v813_v31 = vor.u32 %v812_v21, %v809_v20  ;;  %v823_v32 = vor.u32 %v822_v22, %v818_v18 }
  0x25   : > { %273 = vst.msk [vmem:[#allocation2 + $0xb4] sm:$0xf] %vm226_vm0, %v12521_v0  ;;  %274 = vst.msk [vmem:[#allocation2 + $0xb8] sm:$0xf] %vm226_vm0, %v12521_v0  ;;  %v338_v27 = vshll.u32 %v284_v2, 16  ;;  %v343_v28 = vshrl.u32 %v285_v15, 16 }
  0x26   : > { %276 = vst.msk [vmem:[#allocation2 + $0xc0] sm:$0xf] %vm226_vm0, %v12521_v0  ;;  %277 = vst.msk [vmem:[#allocation2 + $0xc4] sm:$0xf] %vm226_vm0, %v12521_v0  ;;  %v283_v29 = vld [vmem:[%s8624_s23 + $0x4] sm:$0xf] }
  0x27   : > { %278 = vst.msk [vmem:[#allocation2 + $0xc8] sm:$0x1] %vm229_vm1, %v12521_v0  ;;  %281 = vst.msk [vmem:[#allocation2 + $0xd4] sm:$0x1] %vm229_vm1, %v12521_v0  ;;  %v346_v33 = vshll.u32 %v285_v15, 16  ;;  %v340_v37 = vor.u32 %v338_v27, %v337_v26  ;;  %v341_v38 = vrot.slane %v337_v26, 4 }
  0x28   : > { %279 = vst.msk [vmem:[#allocation2 + $0xcc] sm:$0xf] %vm226_vm0, %v12521_v0  ;;  %280 = vst.msk [vmem:[#allocation2 + $0xd0] sm:$0xf] %vm226_vm0, %v12521_v0  ;;  %v650_v35 = vld [vmem:[#allocation2 + $0x18] sm:$0xf] }
  0x29   : > { %vm8626_vm7 = vmor %vm1254_vm2, %vm1255_vm3  ;;  %v345_v39 = vrot.slane %v343_v28, 7  ;;  %v318_v40 = vshrl.u32 %v282_v24, 16  ;;  %v286_v41 = vld [vmem:[%s8624_s23 + $0x10] sm:$0xf]  ;;  %v814_v42 = vrot.slane %v813_v31, 4  ;;  %v824_v43 = vrot.slane %v823_v32, 4 }
  0x2a   : > { %v1260_v16 = vsel %vm8626_vm7, %v7710_v6, %v1259_v7  ;;  %v1263_v25 = vsel %vm8626_vm7, %v1261_v17, %v1262_v8  ;;  %vm8640_vm10 = vmand %vm226_vm0, %vm639_vm9  ;;  %v321_v45 = vshll.u32 %v282_v24, 16  ;;  %v326_v46 = vshrl.u32 %v283_v29, 16  ;;  %v287_v51 = vld [vmem:[%s8624_s23 + $0x14] sm:$0xf]  ;;  %v641_v55 = vld [vmem:[#allocation2 + $0xc] sm:$0xf] }
  0x2b   : > { %v7790_v30 = vcombine.low %v1260_v16, %v1263_v25  ;;  %vm8646_vm11 = vmor %vm803_vm4, %vm804_vm5  ;;  %v348_v47 = vor.u32 %v346_v33, %v345_v39  ;;  %v651_v48 = vsel %vm8640_vm10, %v340_v37, %v650_v35  ;;  %v320_v49 = vrot.slane %v318_v40, 7  ;;  %v647_v61 = vld [vmem:[#allocation2 + $0x14] sm:$0x1]  ;;  %v654_v62 = vld [vmem:[#allocation2 + $0x20] sm:$0x1]  ;;  %s8455_s28 = smov 15  }
  0x2c   : > { %vm8654_vm12 = vmor %vm12523_vm6, %vm315_vm8  ;;  %v329_v50 = vshll.u32 %v283_v29, 16  ;;  %v819_v52 = vsel %vm8646_vm11, %v814_v42, %v818_v18  ;;  %v829_v53 = vsel %vm8646_vm11, %v824_v43, %v828_v23  ;;  %652 = vst [vmem:[#allocation2 + $0x18] sm:$0xf] %v651_v48  ;;  %v328_v54 = vrot.slane %v326_v46, 7  ;;  %v8675_v6 = vld [vmem:[%s8624_s23 + $0x18] sm:$0xf] }
  0x2d   : > { %2778 = vrot.lane.b32.xlu1 %v7790_v30, %s8451_s24  ;;  %v352_v56 = vshrl.u32 %v286_v41, 16  ;;  %v7774_v57 = vcombine.low %v819_v52, %v829_v53  ;;  %v349_v58 = vsel %vm8654_vm12, %v341_v38, %v348_v47  ;;  %v323_v59 = vor.u32 %v321_v45, %v320_v49  ;;  %vm8670_vm13 = vmand %vm229_vm1, %vm12523_vm6  ;;  %v657_v9 = vld [vmem:[#allocation2 + $0x24] sm:$0xf]  ;;  %v661_v22 = vld [vmem:[#allocation2 + $0x2c] sm:$0x1]  ;;  %s8456_s29 = smov 24  }
  0x2e   : > { %v324_v60 = vrot.slane %v320_v49, 4  ;;  %653 = vst.msk [vmem:[#allocation2 + $0x1c] sm:$0xf] %vm226_vm0, %v349_v58  ;;  %v331_v63 = vor.u32 %v329_v50, %v328_v54  ;;  %v355_v3 = vshll.u32 %v286_v41, 16  ;;  %v360_v4 = vshrl.u32 %v287_v51, 16  ;;  %s8457_s30 = smov 12  }
  0x2f   : > { %v354_v2 = vrot.slane %v352_v56, 7  ;;  %2698 = vrot.lane.b32.xlu0 %v7774_v57, %s8452_s25  ;;  %v642_v7 = vsel %vm8640_vm10, %v323_v59, %v641_v55  ;;  %v363_v8 = vshll.u32 %v287_v51, 16  ;;  %v333_v10 = vrot.slane %v328_v54, 4  ;;  %v8691_v23 = vld [vmem:[%s8624_s23 + $0x1c] sm:$0xf]  ;;  %s8458_s6 = smov 21  }
  0x30   : > { %v350_v11 = vrot.slane %v345_v39, 4  ;;  %v332_v12 = vsel %vm8654_vm12, %v324_v60, %v331_v63  ;;  %643 = vst [vmem:[#allocation2 + $0xc] sm:$0xf] %v642_v7  ;;  %v362_v15 = vrot.slane %v360_v4, 7  ;;  %v369_v18 = vshrl.u32 %v8675_v6, 16  ;;  %s8460_s11 = smov 16  }
  0x31   : > { %v357_v13 = vor.u32 %v355_v3, %v354_v2  ;;  %v358_v14 = vrot.slane %v354_v2, 4  ;;  %644 = vst.msk [vmem:[#allocation2 + $0x10] sm:$0xf] %vm226_vm0, %v332_v12  ;;  %v648_v16 = vsel %vm8670_vm13, %v333_v10, %v647_v61  ;;  %v372_v24 = vshll.u32 %v8675_v6, 16  ;;  %s8461_s12 = smov 32   ;;  %s8462_s15 = smov 96  }
  0x32   : > { %v655_v17 = vsel %vm8670_vm13, %v350_v11, %v654_v62  ;;  %v365_v19 = vor.u32 %v363_v8, %v362_v15  ;;  %649 = vst [vmem:[#allocation2 + $0x14] sm:$0x1] %v648_v16  ;;  %v367_v21 = vrot.slane %v362_v15, 4  ;;  %v377_v38 = vshrl.u32 %v8691_v23, 16  ;;  %s8463_s16 = smov 48   ;;  %s8464_s17 = smov 80  }
  0x33   : > { %v658_v20 = vsel %vm8640_vm10, %v357_v13, %v657_v9  ;;  %656 = vst [vmem:[#allocation2 + $0x20] sm:$0x1] %v655_v17  ;;  %v1371_v25 = vld [vmem:[#allocation2 + $0x18] sm:$0xf]  ;;  %vm3322_vm14 = vcmask 23552   ;;  %vm12525_vm15 = vcmask 48128  }
  0x34   : > { %659 = vst [vmem:[#allocation2 + $0x24] sm:$0xf] %v658_v20  ;;  %v8694_v26 = vld [vmem:[#allocation2 + $0x18] sm:$0xf]  ;;  %v1442_v28 = vshrl.u32 %v1371_v25, 16  ;;  %v1445_v29 = vshll.u32 %v1371_v25, 16  ;;  %v366_v30 = vsel %vm8654_vm12, %v358_v14, %v365_v19  ;;  %v662_v37 = vsel %vm8670_vm13, %v367_v21, %v661_v22 }
  0x35   : > { %v2410_v27 = vld [vmem:[#allocation2 + $0x18] sm:$0xe]  ;;  %v2027_v31 = vshrl.u32 %v8694_v26, 16  ;;  %v8699_v32 = vld [vmem:[#allocation2 + $0x1c] sm:$0xf]  ;;  %v2030_v35 = vshll.u32 %v8694_v26, 16 }
  0x36   : > { %660 = vst.msk [vmem:[#allocation2 + $0x28] sm:$0xf] %vm226_vm0, %v366_v30  ;;  %v8702_v33 = vld [vmem:[#allocation2 + $0x1c] sm:$0xf]  ;;  %v7807_v39 = vcombine.low %v1371_v25, %v8699_v32  ;;  %v8709_v40 = vrot.slane %v1442_v28, 4  ;;  %v8711_v41 = vrot.slane %v1445_v29, 5 }
  0x37   : > { %v7742_v42 = vrot.slane %v2410_v27, 9  ;;  %663 = vst [vmem:[#allocation2 + $0x2c] sm:$0x1] %v662_v37  ;;  %v1455_v43 = vshrl.u32 %v8699_v32, 16  ;;  %v1369_v45 = vld [vmem:[#allocation2 + $0xc] sm:$0xf]  ;;  %v7854_v52 = vcombine.low %v8694_v26, %v8702_v33 }
  0x38   : > { %v8714_v46 = vrot.slane %v2027_v31, 4  ;;  %v8716_v47 = vrot.slane %v2030_v35, 5  ;;  %v2040_v48 = vshrl.u32 %v8702_v33, 16  ;;  %2876 = vrot.lane.b32.xlu1 %v7807_v39, %s8453_s26  ;;  %v8720_v49 = vld [vmem:[#allocation2 + $0x10] sm:$0xf]  ;;  %v1418_v50 = vshrl.u32 %v1369_v45, 16 }
  0x39   : > { %v1421_v51 = vshll.u32 %v1369_v45, 16  ;;  %v1801_v53 = vld [vmem:[#allocation2 + $0xc] sm:$0xe]  ;;  %v7806_v54 = vcombine.low %v1369_v45, %v8720_v49  ;;  %v8725_v55 = vld [vmem:[#allocation2 + $0x14] sm:$0x1]  ;;  %v1867_v57 = vrot.slane %v8720_v49, 5  ;;  %v1448_v58 = vor.u32 %v8711_v41, %v8709_v40 }
  0x3a   : > { %v7726_v56 = vrot.slane %v1801_v53, 9  ;;  %v8730_v59 = vrot.slane %v1418_v50, 4  ;;  %v1870_v62 = vrot.slane %v8725_v55, 5  ;;  %v2476_v63 = vrot.slane %v8702_v33, 5  ;;  %v1802_v2 = vld [vmem:[#allocation2 + $0x18] sm:$0xe] }
  0x3b   : > { %v8732_v60 = vrot.slane %v1421_v51, 5  ;;  %v1980_v61 = vld [vmem:[#allocation2 + $0x24] sm:$0xf]  ;;  %v1431_v3 = vshrl.u32 %v8720_v49, 16  ;;  %2874 = vrot.lane.b32.xlu0 %v7806_v54, %s8453_s26  ;;  %v1869_v8 = vrot.slane %v1867_v57, 4  ;;  %v2033_v16 = vor.u32 %v8716_v47, %v8714_v46  ;;  %s8465_s20 = smov 112  }
  0x3c   : > { %v2051_v4 = vshrl.u32 %v1980_v61, 16  ;;  %v2054_v7 = vshll.u32 %v1980_v61, 16  ;;  %v8738_v9 = vld [vmem:[#allocation2 + $0x10] sm:$0xf]  ;;  %v1868_v11 = vsel %vm8626_vm7, %v7726_v56, %v1867_v57  ;;  %v8742_v12 = vld [vmem:[#allocation2 + $0x14] sm:$0x1]  ;;  %v2477_v14 = vsel %vm8626_vm7, %v7742_v42, %v2476_v63 }
  0x3d   : > { %v1981_v10 = vld [vmem:[#allocation2 + $0x28] sm:$0xf]  ;;  %v1191_v13 = vld [vmem:[#allocation2 + $0xc] sm:$0xe]  ;;  %v1424_v15 = vor.u32 %v8732_v60, %v8730_v59  ;;  %v8750_v22 = vld [vmem:[#allocation2 + $0x20] sm:$0x1]  ;;  %v1871_v25 = vsel %vm8626_vm7, %v1869_v8, %v1870_v62 }
  0x3e   : > { %v2053_v17 = vrot.slane %v2051_v4, 4  ;;  %v2056_v19 = vrot.slane %v2054_v7, 5  ;;  %v2064_v20 = vshrl.u32 %v1981_v10, 16  ;;  %v7855_v21 = vcombine.low %v1980_v61, %v1981_v10  ;;  %v1402_v29 = vld [vmem:[#allocation2 + $0x20] sm:$0x1]  ;;  %s8466_s21 = smov 64  }
  0x3f   : > { %v7711_v26 = vrot.slane %v1191_v13, 9  ;;  %v1266_v27 = vrot.slane %v8738_v9, 5  ;;  %v1269_v28 = vrot.slane %v8742_v12, 5  ;;  %3130 = vrot.lane.b32.xlu0 %v7854_v52, %s8454_s27  ;;  %v7838_v30 = vcombine.low %v1868_v11, %v1871_v25  ;;  %v2011_v39 = vld [vmem:[#allocation2 + $0x2c] sm:$0x1] }
  0x40   : > { %3132 = vrot.lane.b32.xlu1 %v7855_v21, %s8454_s27  ;;  %v2478_v31 = vrot.slane %v2476_v63, 4  ;;  %v2479_v35 = vrot.slane %v8750_v22, 5  ;;  %v7727_v37 = vrot.slane %v1802_v2, 9  ;;  %v1874_v42 = vrot.slane %v8699_v32, 5  ;;  %v2411_v50 = vld [vmem:[#allocation2 + $0x24] sm:$0xe] }
  0x41   : > { %v1267_v40 = vsel %vm8626_vm7, %v7711_v26, %v1266_v27  ;;  %v1268_v41 = vrot.slane %v1266_v27, 4  ;;  %v1877_v45 = vrot.slane %v1402_v29, 5  ;;  %v7743_v53 = vrot.slane %v2411_v50, 9  ;;  %v8776_v21 = vld [vmem:[#allocation2 + $0xc] sm:$0xf] }
  0x42   : > { %v2480_v51 = vsel %vm8626_vm7, %v2478_v31, %v2479_v35  ;;  %v2483_v54 = vrot.slane %v1981_v10, 5  ;;  %v2486_v52 = vrot.slane %v2011_v39, 5  ;;  %v1875_v61 = vsel %vm8626_vm7, %v7727_v37, %v1874_v42  ;;  %v8792_v50 = vld [vmem:[#allocation2 + $0x1c] sm:$0xf]  ;;  %v1192_v47 = vld [vmem:[#allocation2 + $0x18] sm:$0xe] }
  0x43   : > { %v1270_v56 = vsel %vm8626_vm7, %v1268_v41, %v1269_v28  ;;  %v7886_v57 = vcombine.low %v2477_v14, %v2480_v51  ;;  %v1876_v62 = vrot.slane %v1874_v42, 4  ;;  %3034 = vrot.lane.b32.xlu0 %v7838_v30, %s8455_s28  ;;  %v1449_v7 = vrot.slane %v1448_v58, 4 }
  0x44   : > { %v7791_v63 = vcombine.low %v1267_v40, %v1270_v56  ;;  %v2484_v2 = vsel %vm8626_vm7, %v7743_v53, %v2483_v54  ;;  %v2485_v4 = vrot.slane %v2483_v54, 4  ;;  %v1451_v11 = vshll.u32 %v8699_v32, 16 }
  0x45   : > { %v1878_v8 = vsel %vm8626_vm7, %v1876_v62, %v1877_v45  ;;  %v1457_v13 = vrot.slane %v1455_v43, 4  ;;  %v1461_v14 = vshll.u32 %v1402_v29, 16  ;;  %v2057_v27 = vor.u32 %v2056_v19, %v2053_v17  ;;  %v8787_v17 = vld [vmem:[#allocation2 + $0x18] sm:$0xf] }
  0x46   : > { %2780 = vrot.lane.b32.xlu1 %v7791_v63, %s8451_s24  ;;  %v7839_v25 = vcombine.low %v1875_v61, %v1878_v8  ;;  %v2487_v26 = vsel %vm8626_vm7, %v2485_v4, %v2486_v52  ;;  %v2060_v28 = vshll.u32 %v1981_v10, 16  ;;  %v1453_v30 = vrot.slane %v1451_v11, 5 }
  0x47   : > { %v7887_v58 = vcombine.low %v2484_v2, %v2487_v26  ;;  %v1463_v31 = vrot.slane %v1461_v14, 5  ;;  %v2066_v35 = vrot.slane %v2064_v20, 4  ;;  %3290 = vrot.lane.b32.xlu0 %v7886_v57, %s8456_s29  ;;  %v2058_v32 = vrot.slane %v2057_v27, 4 }
  0x48   : > { %v2062_v43 = vrot.slane %v2060_v28, 5  ;;  %v2070_v29 = vshll.u32 %v2011_v39, 16  ;;  %v831_v37 = vshrl.u32 %v8776_v21, 16  ;;  %v1454_v40 = vsel %vm8646_vm11, %v1449_v7, %v1453_v30  ;;  %v8801_v7 = vld [vmem:[#allocation2 + $0x20] sm:$0x1] }
  0x49   : > { %v1458_v41 = vor.u32 %v1457_v13, %v1453_v30  ;;  %v834_v42 = vshll.u32 %v8776_v21, 16  ;;  %v840_v10 = vshll.u32 %v8738_v9, 16  ;;  %v844_v52 = vshrl.u32 %v8738_v9, 16 }
  0x4a   : > { %3036 = vrot.lane.b32.xlu1 %v7839_v25, %s8455_s28  ;;  %v2063_v19 = vsel %vm8646_vm11, %v2058_v32, %v2062_v43  ;;  %v2067_v20 = vor.u32 %v2066_v35, %v2062_v43  ;;  %v2072_v45 = vrot.slane %v2070_v29, 5  ;;  %v833_v39 = vrot.slane %v831_v37, 4  ;;  %v761_v32 = vld [vmem:[#allocation2 + $0x24] sm:$0xf] }
  0x4b   : > { %v1459_v51 = vrot.slane %v1458_v41, 4  ;;  %v836_v53 = vrot.slane %v834_v42, 5  ;;  %v842_v54 = vrot.slane %v840_v10, 5  ;;  %3292 = vrot.lane.b32.xlu0 %v7887_v58, %s8456_s29  ;;  %v850_v57 = vshll.u32 %v8742_v12, 16  ;;  %v762_v41 = vld [vmem:[#allocation2 + $0x28] sm:$0xf] }
  0x4c   : > { %v2068_v56 = vrot.slane %v2067_v20, 4  ;;  %v855_v61 = vshrl.u32 %v8787_v17, 16  ;;  %v858_v62 = vshll.u32 %v8787_v17, 16  ;;  %v846_v4 = vrot.slane %v844_v52, 4 }
  0x4d   : > { %v1464_v63 = vsel %vm8646_vm11, %v1459_v51, %v1463_v31  ;;  %v837_v2 = vor.u32 %v836_v53, %v833_v39  ;;  %v864_v8 = vshll.u32 %v8792_v50, 16  ;;  %v852_v14 = vrot.slane %v850_v57, 5 }
  0x4e   : > { %v7823_v11 = vcombine.low %v1454_v40, %v1464_v63  ;;  %v2073_v13 = vsel %vm8646_vm11, %v2068_v56, %v2072_v45  ;;  %v857_v25 = vrot.slane %v855_v61, 4  ;;  %v847_v27 = vor.u32 %v846_v4, %v842_v54  ;;  %v790_v45 = vld [vmem:[#allocation2 + $0x2c] sm:$0x1] }
  0x4f   : > { %v7871_v12 = vcombine.low %v2063_v19, %v2073_v13  ;;  %v838_v26 = vrot.slane %v837_v2, 4  ;;  %v860_v28 = vrot.slane %v858_v62, 5  ;;  %v866_v58 = vrot.slane %v864_v8, 5  ;;  %v1193_v2 = vld [vmem:[#allocation2 + $0x24] sm:$0xe] }
  0x50   : > { %2956 = vrot.lane.b32.xlu1 %v7823_v11, %s8457_s30  ;;  %v868_v30 = vshrl.u32 %v8792_v50, 16  ;;  %v874_v31 = vshll.u32 %v8801_v7, 16  ;;  %v1425_v35 = vrot.slane %v1424_v15, 4  ;;  %v848_v29 = vrot.slane %v847_v27, 4 }
  0x51   : > { %v843_v43 = vsel %vm8646_vm11, %v838_v26, %v842_v54  ;;  %v861_v37 = vor.u32 %v860_v28, %v857_v25  ;;  %v1427_v40 = vshll.u32 %v8720_v49, 16  ;;  %v1433_v19 = vrot.slane %v1431_v3, 4 }
  0x52   : > { %v870_v42 = vrot.slane %v868_v30, 4  ;;  %v876_v10 = vrot.slane %v874_v31, 5  ;;  %v1437_v20 = vshll.u32 %v8725_v55, 16  ;;  %v853_v59 = vsel %vm8646_vm11, %v848_v29, %v852_v14 }
  0x53   : > { %v862_v60 = vrot.slane %v861_v37, 4  ;;  %v1429_v15 = vrot.slane %v1427_v40, 5  ;;  %v879_v39 = vshrl.u32 %v761_v32, 16  ;;  %v7775_v51 = vcombine.low %v843_v43, %v853_v59 }
  0x54   : > { %3212 = vrot.lane.b32.xlu1 %v7871_v12, %s8458_s6  ;;  %v871_v53 = vor.u32 %v870_v42, %v866_v58  ;;  %v1439_v54 = vrot.slane %v1437_v20, 5  ;;  %v882_v52 = vshll.u32 %v761_v32, 16  ;;  %v888_v62 = vshll.u32 %v762_v41, 16 }
  0x55   : > { %v867_v49 = vsel %vm8646_vm11, %v862_v60, %v866_v58  ;;  %v1430_v55 = vsel %vm8646_vm11, %v1425_v35, %v1429_v15  ;;  %v1434_v3 = vor.u32 %v1433_v19, %v1429_v15  ;;  %v881_v56 = vrot.slane %v879_v39, 4  ;;  %2700 = vrot.lane.b32.xlu0 %v7775_v51, %s8452_s25 }
  0x56   : > { %v872_v57 = vrot.slane %v871_v53, 4  ;;  %v884_v61 = vrot.slane %v882_v52, 5  ;;  %v892_v63 = vshrl.u32 %v762_v41, 16  ;;  %v898_v8 = vshll.u32 %v790_v45, 16  ;;  %v1374_v52 = vld [vmem:[#allocation2 + $0x28] sm:$0xf] }
  0x57   : > { %v1435_v4 = vrot.slane %v1434_v3, 4  ;;  %v2034_v11 = vrot.slane %v2033_v16, 4  ;;  %v2036_v13 = vshll.u32 %v8702_v33, 16  ;;  %v890_v12 = vrot.slane %v888_v62, 5  ;;  %v1403_v62 = vld [vmem:[#allocation2 + $0x2c] sm:$0x1] }
  0x58   : > { %v877_v14 = vsel %vm8646_vm11, %v872_v57, %v876_v10  ;;  %v885_v25 = vor.u32 %v884_v61, %v881_v56  ;;  %v894_v26 = vrot.slane %v892_v63, 4  ;;  %v900_v58 = vrot.slane %v898_v8, 5  ;;  %v664_v56 = vld [vmem:[#allocation2 + $0x30] sm:$0xf] }
  0x59   : > { %v7776_v27 = vcombine.low %v867_v49, %v877_v14  ;;  %v1440_v28 = vsel %vm8646_vm11, %v1435_v4, %v1439_v54  ;;  %v2038_v30 = vrot.slane %v2036_v13, 5  ;;  %v2042_v46 = vrot.slane %v2040_v48, 4  ;;  %v1373_v54 = vld [vmem:[#allocation2 + $0x24] sm:$0xf] }
  0x5a   : > { %v7822_v31 = vcombine.low %v1430_v55, %v1440_v28  ;;  %v886_v35 = vrot.slane %v885_v25, 4  ;;  %v895_v32 = vor.u32 %v894_v26, %v890_v12  ;;  %v2046_v43 = vshll.u32 %v8750_v22, 16  ;;  %v668_v25 = vld [vmem:[#allocation2 + $0x38] sm:$0x1]  ;;  %v290_v28 = vld [vmem:[%s8624_s23 + $0x20] sm:$0xf] }
  0x5b   : > { %2702 = vrot.lane.b32.xlu1 %v7776_v27, %s8452_s25  ;;  %v2039_v16 = vsel %vm8646_vm11, %v2034_v11, %v2038_v30  ;;  %v7713_v29 = vrot.slane %v1193_v2, 9  ;;  %v1280_v37 = vrot.slane %v762_v41, 5  ;;  %v2043_v10 = vor.u32 %v2042_v46, %v2038_v30  ;;  %v1803_v11 = vld [vmem:[#allocation2 + $0x24] sm:$0xe] }
  0x5c   : > { %2954 = vrot.lane.b32.xlu0 %v7822_v31, %s8457_s30  ;;  %v891_v40 = vsel %vm8646_vm11, %v886_v35, %v890_v12  ;;  %v896_v42 = vrot.slane %v895_v32, 4  ;;  %v1283_v19 = vrot.slane %v790_v45, 5  ;;  %v2048_v33 = vrot.slane %v2046_v43, 5  ;;  %v291_v43 = vld [vmem:[%s8624_s23 + $0x24] sm:$0xf] }
  0x5d   : > { %v1281_v48 = vsel %vm8626_vm7, %v7713_v29, %v1280_v37  ;;  %v1282_v20 = vrot.slane %v1280_v37, 4  ;;  %v7712_v59 = vrot.slane %v1192_v47, 9  ;;  %v2044_v22 = vrot.slane %v2043_v10, 4  ;;  %v8877_v29 = vld [vmem:[%s8624_s23 + $0x28] sm:$0xf] }
  0x5e   : > { %v901_v60 = vsel %vm8646_vm11, %v896_v42, %v900_v58  ;;  %v1273_v41 = vrot.slane %v8792_v50, 5  ;;  %v1276_v15 = vrot.slane %v8801_v7, 5  ;;  %v371_v45 = vrot.slane %v369_v18, 7 }
  0x5f   : > { %v7777_v39 = vcombine.low %v891_v40, %v901_v60  ;;  %v1284_v51 = vsel %vm8626_vm7, %v1282_v20, %v1283_v19  ;;  %v379_v53 = vrot.slane %v377_v38, 7  ;;  %v2049_v49 = vsel %vm8646_vm11, %v2044_v22, %v2048_v33 }
  0x60   : > { %v7793_v55 = vcombine.low %v1281_v48, %v1284_v51  ;;  %v1274_v3 = vsel %vm8626_vm7, %v7712_v59, %v1273_v41  ;;  %v1275_v7 = vrot.slane %v1273_v41, 4  ;;  %v7870_v57 = vcombine.low %v2039_v16, %v2049_v49 }
  0x61   : > { %2704 = vrot.lane.b32.xlu1 %v7777_v39, %s8452_s25  ;;  %v374_v18 = vor.u32 %v372_v24, %v371_v45  ;;  %v375_v61 = vrot.slane %v371_v45, 4  ;;  %v380_v38 = vshll.u32 %v8691_v23, 16  ;;  %v1466_v2 = vshrl.u32 %v1373_v54, 16  ;;  %v671_v45 = vld [vmem:[#allocation2 + $0x3c] sm:$0xf] }
  0x62   : > { %v1277_v63 = vsel %vm8626_vm7, %v1275_v7, %v1276_v15  ;;  %v1469_v4 = vshll.u32 %v1373_v54, 16  ;;  %v1479_v8 = vshrl.u32 %v1374_v52, 16  ;;  %3210 = vrot.lane.b32.xlu0 %v7870_v57, %s8458_s6  ;;  %v7808_v24 = vcombine.low %v1373_v54, %v1374_v52 }
  0x63   : > { %v7792_v13 = vcombine.low %v1274_v3, %v1277_v63  ;;  %v382_v14 = vor.u32 %v380_v38, %v379_v53  ;;  %v665_v6 = vsel %vm8640_vm10, %v374_v18, %v664_v56  ;;  %v1468_v23 = vrot.slane %v1466_v2, 4 }
  0x64   : > { %666 = vst [vmem:[#allocation2 + $0x30] sm:$0xf] %v665_v6  ;;  %v1471_v12 = vrot.slane %v1469_v4, 5  ;;  %v384_v26 = vrot.slane %v379_v53, 4  ;;  %v1475_v27 = vshll.u32 %v1374_v52, 16  ;;  %v1481_v30 = vrot.slane %v1479_v8, 4 }
  0x65   : > { %2784 = vrot.lane.b32.xlu1 %v7793_v55, %s8451_s24  ;;  %v383_v58 = vsel %vm8654_vm12, %v375_v61, %v382_v14  ;;  %v1485_v31 = vshll.u32 %v1403_v62, 16  ;;  %v7728_v35 = vrot.slane %v1803_v11, 9  ;;  %v1881_v16 = vrot.slane %v1374_v52, 5 }
  0x66   : > { %667 = vst.msk [vmem:[#allocation2 + $0x34] sm:$0xf] %vm226_vm0, %v383_v58  ;;  %v669_v32 = vsel %vm8670_vm13, %v384_v26, %v668_v25  ;;  %v1472_v46 = vor.u32 %v1471_v12, %v1468_v23  ;;  %v1477_v47 = vrot.slane %v1475_v27, 5  ;;  %2782 = vrot.lane.b32.xlu0 %v7792_v13, %s8451_s24  ;;  %v1884_v40 = vrot.slane %v1403_v62, 5 }
  0x67   : > { %670 = vst [vmem:[#allocation2 + $0x38] sm:$0x1] %v669_v32  ;;  %v1487_v37 = vrot.slane %v1485_v31, 5  ;;  %v386_v42 = vshrl.u32 %v290_v28, 16  ;;  %v389_v10 = vshll.u32 %v290_v28, 16  ;;  %v1882_v48 = vsel %vm8626_vm7, %v7728_v35, %v1881_v16 }
  0x68   : > { %v1473_v19 = vrot.slane %v1472_v46, 4  ;;  %v1482_v33 = vor.u32 %v1481_v30, %v1477_v47  ;;  %v1883_v20 = vrot.slane %v1881_v16, 4  ;;  %v394_v60 = vshrl.u32 %v291_v43, 16  ;;  %v675_v16 = vld [vmem:[#allocation2 + $0x44] sm:$0x1] }
  0x69   : > { %v388_v59 = vrot.slane %v386_v42, 7  ;;  %v397_v22 = vshll.u32 %v291_v43, 16  ;;  %v403_v41 = vshrl.u32 %v8877_v29, 16  ;;  %v406_v53 = vshll.u32 %v8877_v29, 16 }
  0x6a   : > { %v1478_v15 = vsel %vm8646_vm11, %v1473_v19, %v1477_v47  ;;  %v1483_v39 = vrot.slane %v1482_v33, 4  ;;  %v1885_v51 = vsel %vm8626_vm7, %v1883_v20, %v1884_v40  ;;  %2878 = vrot.lane.b32.xlu0 %v7808_v24, %s8453_s26  ;;  %v396_v7 = vrot.slane %v394_v60, 7 }
  0x6b   : > { %v1375_v54 = vld [vmem:[#allocation2 + $0x30] sm:$0xf]  ;;  %v7840_v49 = vcombine.low %v1882_v48, %v1885_v51  ;;  %v391_v55 = vor.u32 %v389_v10, %v388_v59  ;;  %v392_v3 = vrot.slane %v388_v59, 4  ;;  %vm12524_vm1 = vcmask 72704  }
  0x6c   : > { %v1804_v52 = vld [vmem:[#allocation2 + $0x30] sm:$0xe]  ;;  %v1490_v56 = vshrl.u32 %v1375_v54, 16  ;;  %v1493_v57 = vshll.u32 %v1375_v54, 16  ;;  %v1488_v18 = vsel %vm8646_vm11, %v1483_v39, %v1487_v37  ;;  %v399_v2 = vor.u32 %v397_v22, %v396_v7 }
  0x6d   : > { %v7729_v61 = vrot.slane %v1804_v52, 9  ;;  %v1982_v38 = vld [vmem:[#allocation2 + $0x30] sm:$0xf]  ;;  %v1376_v62 = vld [vmem:[#allocation2 + $0x34] sm:$0xf]  ;;  %v7824_v63 = vcombine.low %v1478_v15, %v1488_v18  ;;  %v672_v4 = vsel %vm8640_vm10, %v391_v55, %v671_v45  ;;  %v401_v48 = vrot.slane %v396_v7, 4 }
  0x6e   : > { %v2075_v8 = vshrl.u32 %v1982_v38, 16  ;;  %v1492_v11 = vrot.slane %v1490_v56, 4  ;;  %v1495_v13 = vrot.slane %v1493_v57, 5  ;;  %v1503_v14 = vshrl.u32 %v1376_v62, 16  ;;  %v1404_v24 = vld [vmem:[#allocation2 + $0x38] sm:$0x1] }
  0x6f   : > { %v7809_v6 = vcombine.low %v1375_v54, %v1376_v62  ;;  %673 = vst [vmem:[#allocation2 + $0x3c] sm:$0xf] %v672_v4  ;;  %v1499_v25 = vshll.u32 %v1376_v62, 16  ;;  %v1509_v23 = vshll.u32 %v1404_v24, 16  ;;  %2958 = vrot.lane.b32.xlu0 %v7824_v63, %s8457_s30  ;;  %v1888_v12 = vrot.slane %v1376_v62, 5 }
  0x70   : > { %v1891_v26 = vrot.slane %v1404_v24, 5  ;;  %v8894_v27 = vld [vmem:[#allocation2 + $0x34] sm:$0xf]  ;;  %v1496_v28 = vor.u32 %v1495_v13, %v1492_v11  ;;  %v1505_v58 = vrot.slane %v1503_v14, 4  ;;  %v400_v30 = vsel %vm8654_vm12, %v392_v3, %v399_v2  ;;  %v8906_v10 = vld [vmem:[#allocation2 + $0x38] sm:$0x1] }
  0x71   : > { %2880 = vrot.lane.b32.xlu1 %v7809_v6, %s8453_s26  ;;  %v2077_v31 = vrot.slane %v2075_v8, 4  ;;  %v1501_v35 = vrot.slane %v1499_v25, 5  ;;  %v1511_v32 = vrot.slane %v1509_v23, 5  ;;  %v8901_v46 = vsel %vm8626_vm7, %v7729_v61, %v1888_v12  ;;  %674 = vst.msk [vmem:[#allocation2 + $0x40] sm:$0xf] %vm226_vm0, %v400_v30 }
  0x72   : > { %v1890_v47 = vrot.slane %v1888_v12, 4  ;;  %v1497_v43 = vrot.slane %v1496_v28, 4  ;;  %v2078_v37 = vshll.u32 %v1982_v38, 16  ;;  %v2088_v40 = vshrl.u32 %v8894_v27, 16  ;;  %v8912_v59 = vld [vmem:[#allocation2 + $0x30] sm:$0xf] }
  0x73   : > { %v7856_v42 = vcombine.low %v1982_v38, %v8894_v27  ;;  %v1506_v19 = vor.u32 %v1505_v58, %v1501_v35  ;;  %3038 = vrot.lane.b32.xlu0 %v7840_v49, %s8455_s28  ;;  %v2084_v20 = vshll.u32 %v8894_v27, 16  ;;  %v676_v54 = vsel %vm8670_vm13, %v401_v48, %v675_v16  ;;  %v8928_v38 = vld [vmem:[#allocation2 + $0x34] sm:$0xf]  ;;  %v8940_v12 = vld [vmem:[#allocation2 + $0x38] sm:$0x1] }
  0x74   : > { %v1892_v33 = vsel %vm8626_vm7, %v1890_v47, %v1891_v26  ;;  %v1502_v60 = vsel %vm8646_vm11, %v1497_v43, %v1501_v35  ;;  %v2080_v15 = vrot.slane %v2078_v37, 5  ;;  %v2090_v39 = vrot.slane %v2088_v40, 4  ;;  %677 = vst [vmem:[#allocation2 + $0x44] sm:$0x1] %v676_v54  ;;  %v2412_v58 = vld [vmem:[#allocation2 + $0x30] sm:$0xe] }
  0x75   : > { %v7841_v22 = vcombine.low %v8901_v46, %v1892_v33  ;;  %v1507_v51 = vrot.slane %v1506_v19, 4  ;;  %v2086_v52 = vrot.slane %v2084_v20, 5  ;;  %v2094_v49 = vshll.u32 %v8906_v10, 16 }
  0x76   : > { %v8917_v45 = vld [vmem:[#allocation2 + $0x3c] sm:$0xf]  ;;  %v2081_v7 = vor.u32 %v2080_v15, %v2077_v31  ;;  %v903_v56 = vshrl.u32 %v8912_v59, 16  ;;  %v906_v62 = vshll.u32 %v8912_v59, 16  ;;  %v916_v43 = vshrl.u32 %v8928_v38, 16 }
  0x77   : > { %v2099_v55 = vshrl.u32 %v8917_v45, 16  ;;  %v2102_v3 = vshll.u32 %v8917_v45, 16  ;;  %v1512_v57 = vsel %vm8646_vm11, %v1507_v51, %v1511_v32  ;;  %3134 = vrot.lane.b32.xlu0 %v7856_v42, %s8454_s27  ;;  %v2091_v18 = vor.u32 %v2090_v39, %v2086_v52  ;;  %v8946_v37 = vld [vmem:[#allocation2 + $0x3c] sm:$0xf] }
  0x78   : > { %v2096_v61 = vrot.slane %v2094_v49, 5  ;;  %v7825_v63 = vcombine.low %v1502_v60, %v1512_v57  ;;  %v8931_v2 = vld [vmem:[#allocation2 + $0x40] sm:$0xf]  ;;  %v2082_v11 = vrot.slane %v2081_v7, 4  ;;  %v905_v26 = vrot.slane %v903_v56, 4 }
  0x79   : > { %v2101_v4 = vrot.slane %v2099_v55, 4  ;;  %v2104_v8 = vrot.slane %v2102_v3, 5  ;;  %v2112_v13 = vshrl.u32 %v8931_v2, 16  ;;  %v7857_v14 = vcombine.low %v8917_v45, %v8931_v2  ;;  %v8956_v51 = vld [vmem:[#allocation2 + $0x40] sm:$0xf] }
  0x7a   : > { %v2108_v6 = vshll.u32 %v8931_v2, 16  ;;  %v2092_v24 = vrot.slane %v2091_v18, 4  ;;  %2960 = vrot.lane.b32.xlu1 %v7825_v63, %s8457_s30  ;;  %v2087_v23 = vsel %vm8646_vm11, %v2082_v11, %v2086_v52  ;;  %v908_v28 = vrot.slane %v906_v62, 5  ;;  %v8322_v11 = vld [vmem:[%s12516_s1] sm:$0xff]  }
  0x7b   : > { %v2105_v25 = vor.u32 %v2104_v8, %v2101_v4  ;;  %v2114_v31 = vrot.slane %v2112_v13, 4  ;;  %v912_v32 = vshll.u32 %v8928_v38, 16  ;;  %v8948_v40 = vld [vmem:[#allocation2 + $0x44] sm:$0x1]  ;;  %v922_v33 = vshll.u32 %v8940_v12, 16  ;;  %8225 = vmatprep.subr.bf16.mxu0 %v8322_v11 }
  0x7c   : > { %v2110_v30 = vrot.slane %v2108_v6, 5  ;;  %v2097_v35 = vsel %vm8646_vm11, %v2092_v24, %v2096_v61  ;;  %v909_v16 = vor.u32 %v908_v28, %v905_v26  ;;  %v7744_v48 = vrot.slane %v2412_v58, 9  ;;  %v792_v18 = vld [vmem:[#allocation2 + $0x44] sm:$0x1]  ;;  %v2413_v8 = vld [vmem:[#allocation2 + $0x3c] sm:$0xe]  ;;  %8226 = vmatpush3.bf16.msra.mxu0 %v8322_v11 }
  0x7d   : > { %v2106_v46 = vrot.slane %v2105_v25, 4  ;;  %v7872_v47 = vcombine.low %v2087_v23, %v2097_v35  ;;  %v914_v19 = vrot.slane %v912_v32, 5  ;;  %v2118_v60 = vshll.u32 %v8948_v40, 16  ;;  %v1195_v23 = vld [vmem:[#allocation2 + $0x3c] sm:$0xe] }
  0x7e   : > { %v2115_v42 = vor.u32 %v2114_v31, %v2110_v30  ;;  %3040 = vrot.lane.b32.xlu1 %v7841_v22, %s8455_s28  ;;  %v910_v15 = vrot.slane %v909_v16, 4  ;;  %v918_v39 = vrot.slane %v916_v43, 4  ;;  %v924_v54 = vrot.slane %v922_v33, 5 }
  0x7f   : > { %v2111_v20 = vsel %vm8646_vm11, %v2106_v46, %v2110_v30  ;;  %3214 = vrot.lane.b32.xlu0 %v7872_v47, %s8458_s6  ;;  %v2490_v52 = vrot.slane %v8894_v27, 5  ;;  %v2493_v49 = vrot.slane %v8906_v10, 5  ;;  %v2120_v55 = vrot.slane %v2118_v60, 5  ;;  %v1194_v46 = vld [vmem:[#allocation2 + $0x30] sm:$0xe] }
  0x80   : > { %v2116_v45 = vrot.slane %v2115_v42, 4  ;;  %v915_v22 = vsel %vm8646_vm11, %v910_v15, %v914_v19  ;;  %v919_v3 = vor.u32 %v918_v39, %v914_v19  ;;  %v927_v7 = vshrl.u32 %v8946_v37, 16 }
  0x81   : > { %v2491_v56 = vsel %vm8626_vm7, %v7744_v48, %v2490_v52  ;;  %v2492_v57 = vrot.slane %v2490_v52, 4  ;;  %v930_v61 = vshll.u32 %v8946_v37, 16  ;;  %v936_v62 = vshll.u32 %v8956_v51, 16 }
  0x82   : > { %3136 = vrot.lane.b32.xlu1 %v7857_v14, %s8454_s27  ;;  %v2121_v27 = vsel %vm8646_vm11, %v2116_v45, %v2120_v55  ;;  %v920_v10 = vrot.slane %v919_v3, 4  ;;  %v929_v63 = vrot.slane %v927_v7, 4  ;;  %v940_v4 = vshrl.u32 %v8956_v51, 16  ;;  %v1377_v55 = vld [vmem:[#allocation2 + $0x3c] sm:$0xf] }
  0x83   : > { %v7873_v13 = vcombine.low %v2111_v20, %v2121_v27  ;;  %v2494_v6 = vsel %vm8626_vm7, %v2492_v57, %v2493_v49  ;;  %v932_v24 = vrot.slane %v930_v61, 5  ;;  %v938_v25 = vrot.slane %v936_v62, 5  ;;  %v293_v49 = vld [vmem:[%s8624_s23 + $0x2c] sm:$0xf]  ;;  %v1378_v27 = vld [vmem:[#allocation2 + $0x40] sm:$0xf] }
  0x84   : > { %v925_v14 = vsel %vm8646_vm11, %v920_v10, %v924_v54  ;;  %v7888_v26 = vcombine.low %v2491_v56, %v2494_v6  ;;  %v942_v28 = vrot.slane %v940_v4, 4  ;;  %v946_v58 = vshll.u32 %v792_v18, 16 }
  0x85   : > { %v7778_v30 = vcombine.low %v915_v22, %v925_v14  ;;  %v933_v31 = vor.u32 %v932_v24, %v929_v63  ;;  %v7745_v35 = vrot.slane %v2413_v8, 9  ;;  %v2497_v32 = vrot.slane %v8931_v2, 5  ;;  %v678_v8 = vld [vmem:[#allocation2 + $0x48] sm:$0xf] }
  0x86   : > { %3216 = vrot.lane.b32.xlu1 %v7873_v13, %s8458_s6  ;;  %3294 = vrot.lane.b32.xlu0 %v7888_v26, %s8456_s29  ;;  %v943_v47 = vor.u32 %v942_v28, %v938_v25  ;;  %v948_v16 = vrot.slane %v946_v58, 5  ;;  %v2500_v43 = vrot.slane %v8948_v40, 5  ;;  %v7715_v42 = vrot.slane %v1195_v23, 9  ;;  %v1805_v28 = vld [vmem:[#allocation2 + $0x3c] sm:$0xe] }
  0x87   : > { %v934_v19 = vrot.slane %v933_v31, 4  ;;  %v2498_v33 = vsel %vm8626_vm7, %v7745_v35, %v2497_v32  ;;  %v2499_v48 = vrot.slane %v2497_v32, 4  ;;  %v1294_v20 = vrot.slane %v8956_v51, 5  ;;  %v682_v35 = vld [vmem:[#allocation2 + $0x50] sm:$0x1] }
  0x88   : > { %v944_v2 = vrot.slane %v943_v47, 4  ;;  %v1297_v60 = vrot.slane %v792_v18, 5  ;;  %v7714_v15 = vrot.slane %v1194_v46, 9  ;;  %v1287_v39 = vrot.slane %v8928_v38, 5 }
  0x89   : > { %v939_v45 = vsel %vm8646_vm11, %v934_v19, %v938_v25  ;;  %v2501_v54 = vsel %vm8626_vm7, %v2499_v48, %v2500_v43  ;;  %v1295_v40 = vsel %vm8626_vm7, %v7715_v42, %v1294_v20  ;;  %v1296_v52 = vrot.slane %v1294_v20, 4  ;;  %v295_v48 = vld [vmem:[%s8624_s23 + $0x34] sm:$0xf] }
  0x8a   : > { %2706 = vrot.lane.b32.xlu1 %v7778_v30, %s8452_s25  ;;  %v949_v22 = vsel %vm8646_vm11, %v944_v2, %v948_v16  ;;  %v7889_v3 = vcombine.low %v2498_v33, %v2501_v54  ;;  %v1288_v7 = vsel %vm8626_vm7, %v7714_v15, %v1287_v39  ;;  %v1289_v56 = vrot.slane %v1287_v39, 4  ;;  %v294_v16 = vld [vmem:[%s8624_s23 + $0x30] sm:$0xf] }
  0x8b   : > { %v7779_v57 = vcombine.low %v939_v45, %v949_v22  ;;  %v1298_v18 = vsel %vm8626_vm7, %v1296_v52, %v1297_v60  ;;  %v1290_v61 = vrot.slane %v8940_v12, 5  ;;  %v405_v62 = vrot.slane %v403_v41, 7  ;;  %v1405_v12 = vld [vmem:[#allocation2 + $0x44] sm:$0x1] }
  0x8c   : > { %3296 = vrot.lane.b32.xlu0 %v7889_v3, %s8456_s29  ;;  %v7795_v10 = vcombine.low %v1295_v40, %v1298_v18  ;;  %v411_v63 = vshrl.u32 %v293_v49, 16  ;;  %v414_v4 = vshll.u32 %v293_v49, 16  ;;  %v1514_v11 = vshrl.u32 %v1377_v55, 16  ;;  %v9021_v40 = vld [vmem:[%s8624_s23 + $0x38] sm:$0xf] }
  0x8d   : > { %v1291_v13 = vsel %vm8626_vm7, %v1289_v56, %v1290_v61  ;;  %v408_v6 = vor.u32 %v406_v53, %v405_v62  ;;  %v409_v24 = vrot.slane %v405_v62, 4  ;;  %v1517_v25 = vshll.u32 %v1377_v55, 16 }
  0x8e   : > { %2708 = vrot.lane.b32.xlu1 %v7779_v57, %s8452_s25  ;;  %v7794_v41 = vcombine.low %v1288_v7, %v1291_v13  ;;  %v413_v23 = vrot.slane %v411_v63, 7  ;;  %v1516_v14 = vrot.slane %v1514_v11, 4  ;;  %v1527_v26 = vshrl.u32 %v1378_v27, 16  ;;  %v9036_v13 = vld [vmem:[#allocation2 + $0x4] sm:$0xf] }
  0x8f   : > { %v679_v58 = vsel %vm8640_vm10, %v408_v6, %v678_v8  ;;  %v1519_v30 = vrot.slane %v1517_v25, 5  ;;  %v7810_v31 = vcombine.low %v1377_v55, %v1378_v27  ;;  %v1523_v29 = vshll.u32 %v1378_v27, 16  ;;  %v9038_v6 = vld [vmem:[#allocation2] sm:$0xf] }
  0x90   : > { %2786 = vrot.lane.b32.xlu0 %v7794_v41, %s8451_s24  ;;  %v416_v53 = vor.u32 %v414_v4, %v413_v23  ;;  %680 = vst [vmem:[#allocation2 + $0x48] sm:$0xf] %v679_v58  ;;  %v418_v32 = vrot.slane %v413_v23, 4  ;;  %v1529_v46 = vrot.slane %v1527_v26, 4  ;;  %v1533_v47 = vshll.u32 %v1405_v12, 16 }
  0x91   : > { %v1520_v43 = vor.u32 %v1519_v30, %v1516_v14  ;;  %v1525_v42 = vrot.slane %v1523_v29, 5  ;;  %v7730_v19 = vrot.slane %v1805_v28, 9  ;;  %v1895_v33 = vrot.slane %v1378_v27, 5  ;;  %v685_v58 = vld [vmem:[#allocation2 + $0x54] sm:$0xf] }
  0x92   : > { %2788 = vrot.lane.b32.xlu1 %v7795_v10, %s8451_s24  ;;  %v417_v20 = vsel %vm8654_vm12, %v409_v24, %v416_v53  ;;  %v683_v2 = vsel %vm8670_vm13, %v418_v32, %v682_v35  ;;  %v1898_v60 = vrot.slane %v1405_v12, 5  ;;  %v1535_v45 = vrot.slane %v1533_v47, 5 }
  0x93   : > { %681 = vst.msk [vmem:[#allocation2 + $0x4c] sm:$0xf] %vm226_vm0, %v417_v20  ;;  %684 = vst [vmem:[#allocation2 + $0x50] sm:$0x1] %v683_v2  ;;  %v1521_v15 = vrot.slane %v1520_v43, 4  ;;  %v1530_v39 = vor.u32 %v1529_v46, %v1525_v42  ;;  %v1897_v54 = vrot.slane %v1895_v33, 4  ;;  %v1896_v52 = vsel %vm8626_vm7, %v7730_v19, %v1895_v33 }
  0x94   : > { %2882 = vrot.lane.b32.xlu0 %v7810_v31, %s8453_s26  ;;  %v420_v49 = vshrl.u32 %v294_v16, 16  ;;  %v423_v55 = vshll.u32 %v294_v16, 16  ;;  %v428_v22 = vshrl.u32 %v295_v48, 16  ;;  %v431_v57 = vshll.u32 %v295_v48, 16 }
  0x95   : > { %v1526_v3 = vsel %vm8646_vm11, %v1521_v15, %v1525_v42  ;;  %v1531_v7 = vrot.slane %v1530_v39, 4  ;;  %v1899_v56 = vsel %vm8626_vm7, %v1897_v54, %v1898_v60  ;;  %v437_v62 = vshrl.u32 %v9021_v40, 16 }
  0x96   : > { %v422_v18 = vrot.slane %v420_v49, 7  ;;  %v9030_v61 = vrot.slane %v428_v22, 7  ;;  %v440_v27 = vshll.u32 %v9021_v40, 16  ;;  %v7842_v8 = vcombine.low %v1896_v52, %v1899_v56  ;;  %v689_v22 = vld [vmem:[#allocation2 + $0x5c] sm:$0x1] }
  0x97   : > { %v1379_v10 = vld [vmem:[#allocation2 + $0x48] sm:$0xf]  ;;  %v1536_v63 = vsel %vm8646_vm11, %v1531_v7, %v1535_v45  ;;  %v7758_v24 = vcombine.low %v9038_v6, %v9036_v13  ;;  %v7759_v32 = vcombine.low %v8776_v21, %v8738_v9  ;;  %v7760_v46 = vcombine.low %v8787_v17, %v8792_v50 }
  0x98   : > { %v1806_v4 = vld [vmem:[#allocation2 + $0x48] sm:$0xe]  ;;  %v1538_v25 = vshrl.u32 %v1379_v10, 16  ;;  %v1541_v12 = vshll.u32 %v1379_v10, 16  ;;  %v7826_v41 = vcombine.low %v1526_v3, %v1536_v63  ;;  %v425_v14 = vor.u32 %v423_v55, %v422_v18 }
  0x99   : > { %v1986_v11 = vld [vmem:[#allocation2 + $0x48] sm:$0xf]  ;;  %v7731_v23 = vrot.slane %v1806_v4, 9  ;;  %v426_v26 = vrot.slane %v422_v18, 4  ;;  %v433_v28 = vor.u32 %v431_v57, %v9030_v61  ;;  %vm3437_vm2 = vcmask 97280  }
  0x9a   : > { %v2123_v30 = vshrl.u32 %v1986_v11, 16  ;;  %v1380_v31 = vld [vmem:[#allocation2 + $0x4c] sm:$0xf]  ;;  %v1540_v35 = vrot.slane %v1538_v25, 4  ;;  %v1543_v29 = vrot.slane %v1541_v12, 5  ;;  %2962 = vrot.lane.b32.xlu0 %v7826_v41, %s8457_s30  ;;  %v686_v45 = vsel %vm8640_vm10, %v425_v14, %v685_v58 }
  0x9b   : > { %v1406_v53 = vld [vmem:[#allocation2 + $0x50] sm:$0x1]  ;;  %v1551_v47 = vshrl.u32 %v1380_v31, 16  ;;  %v7811_v16 = vcombine.low %v1379_v10, %v1380_v31  ;;  %v1547_v43 = vshll.u32 %v1380_v31, 16  ;;  %v1902_v33 = vrot.slane %v1380_v31, 5 }
  0x9c   : > { %v1557_v42 = vshll.u32 %v1406_v53, 16  ;;  %v1544_v19 = vor.u32 %v1543_v29, %v1540_v35  ;;  %v1905_v48 = vrot.slane %v1406_v53, 5  ;;  %v434_v20 = vsel %vm8654_vm12, %v426_v26, %v433_v28  ;;  %v9050_v2 = vld [vmem:[#allocation2 + $0x4c] sm:$0xf]  ;;  %687 = vst [vmem:[#allocation2 + $0x54] sm:$0xf] %v686_v45 }
  0x9d   : > { %2884 = vrot.lane.b32.xlu1 %v7811_v16, %s8453_s26  ;;  %v1549_v60 = vrot.slane %v1547_v43, 5  ;;  %v1553_v15 = vrot.slane %v1551_v47, 4  ;;  %688 = vst.msk [vmem:[#allocation2 + $0x58] sm:$0xf] %vm226_vm0, %v434_v20  ;;  %v1903_v52 = vsel %vm8626_vm7, %v7731_v23, %v1902_v33  ;;  %v1904_v49 = vrot.slane %v1902_v33, 4 }
  0x9e   : > { %v1559_v39 = vrot.slane %v1557_v42, 5  ;;  %v1545_v54 = vrot.slane %v1544_v19, 4  ;;  %3042 = vrot.lane.b32.xlu0 %v7842_v8, %s8455_s28  ;;  %v2125_v55 = vrot.slane %v2123_v30, 4  ;;  %v2126_v7 = vshll.u32 %v1986_v11, 16  ;;  %v9061_v18 = vld [vmem:[#allocation2 + $0x50] sm:$0x1] }
  0x9f   : > { %v1554_v3 = vor.u32 %v1553_v15, %v1549_v60  ;;  %v2136_v56 = vshrl.u32 %v9050_v2, 16  ;;  %v7858_v57 = vcombine.low %v1986_v11, %v9050_v2  ;;  %v767_v10 = vld [vmem:[#allocation2 + $0x48] sm:$0xf]  ;;  %v1906_v4 = vsel %vm8626_vm7, %v1904_v49, %v1905_v48  ;;  %v9069_v12 = vld [vmem:[#allocation2 + $0x4c] sm:$0xf] }
  0xa0   : > { %v1550_v63 = vsel %vm8646_vm11, %v1545_v54, %v1549_v60  ;;  %v435_v8 = vrot.slane %v9030_v61, 4  ;;  %v2132_v25 = vshll.u32 %v9050_v2, 16  ;;  %v7843_v23 = vcombine.low %v1903_v52, %v1906_v4 }
  0xa1   : > { %v1555_v41 = vrot.slane %v1554_v3, 4  ;;  %v2128_v14 = vrot.slane %v2126_v7, 5  ;;  %v2138_v26 = vrot.slane %v2136_v56, 4  ;;  %v2142_v58 = vshll.u32 %v9061_v18, 16  ;;  %v2414_v7 = vld [vmem:[#allocation2 + $0x48] sm:$0xe]  ;;  %v9090_v4 = vpop.permute.xlu0 %2698 }
  0xa2   : > { %3138 = vrot.lane.b32.xlu0 %v7858_v57, %s8454_s27  ;;  %v690_v11 = vsel %vm8670_vm13, %v435_v8, %v689_v22  ;;  %v2134_v28 = vrot.slane %v2132_v25, 5  ;;  %v951_v30 = vshrl.u32 %v767_v10, 16  ;;  %v954_v35 = vshll.u32 %v767_v10, 16  ;;  %v9086_v22 = vld [vmem:[#allocation2 + $0x50] sm:$0x1] }
  0xa3   : > { %v1560_v61 = vsel %vm8646_vm11, %v1555_v41, %v1559_v39  ;;  %691 = vst [vmem:[#allocation2 + $0x5c] sm:$0x1] %v690_v11  ;;  %v2129_v31 = vor.u32 %v2128_v14, %v2125_v55  ;;  %v960_v29 = vshll.u32 %v9069_v12, 16  ;;  %v2144_v43 = vrot.slane %v2142_v58, 5  ;;  %v1988_v19 = vld [vmem:[#allocation2 + $0x54] sm:$0xf] }
  0xa4   : > { %v7827_v53 = vcombine.low %v1550_v63, %v1560_v61  ;;  %v9078_v47 = vld [vmem:[#allocation2 + $0x58] sm:$0xf]  ;;  %v2139_v16 = vor.u32 %v2138_v26, %v2134_v28  ;;  %v953_v42 = vrot.slane %v951_v30, 4  ;;  %v956_v60 = vrot.slane %v954_v35, 5  ;;  %v769_v26 = vld [vmem:[#allocation2 + $0x54] sm:$0xf] }
  0xa5   : > { %v2160_v33 = vshrl.u32 %v9078_v47, 16  ;;  %v2156_v48 = vshll.u32 %v9078_v47, 16  ;;  %v2130_v20 = vrot.slane %v2129_v31, 4  ;;  %v2147_v15 = vshrl.u32 %v1988_v19, 16  ;;  %v9098_v31 = vpop.permute.xlu1 %2778 }
  0xa6   : > { %2964 = vrot.lane.b32.xlu1 %v7827_v53, %s8457_s30  ;;  %v2150_v39 = vshll.u32 %v1988_v19, 16  ;;  %v7859_v45 = vcombine.low %v1988_v19, %v9078_v47  ;;  %v2140_v54 = vrot.slane %v2139_v16, 4  ;;  %v957_v3 = vor.u32 %v956_v60, %v953_v42 }
  0xa7   : > { %v2158_v52 = vrot.slane %v2156_v48, 5  ;;  %v2162_v49 = vrot.slane %v2160_v33, 4  ;;  %v2135_v55 = vsel %vm8646_vm11, %v2130_v20, %v2134_v28  ;;  %v2149_v56 = vrot.slane %v2147_v15, 4  ;;  %v2415_v15 = vld [vmem:[#allocation2 + $0x54] sm:$0xe] }
  0xa8   : > { %v2152_v57 = vrot.slane %v2150_v39, 5  ;;  %v2145_v10 = vsel %vm8646_vm11, %v2140_v54, %v2144_v43  ;;  %v962_v63 = vrot.slane %v960_v29, 5  ;;  %v958_v41 = vrot.slane %v957_v3, 4 }
  0xa9   : > { %v2163_v8 = vor.u32 %v2162_v49, %v2158_v52  ;;  %v7874_v25 = vcombine.low %v2135_v55, %v2145_v10  ;;  %v964_v14 = vshrl.u32 %v9069_v12, 16  ;;  %v970_v58 = vshll.u32 %v9086_v22, 16 }
  0xaa   : > { %3044 = vrot.lane.b32.xlu1 %v7843_v23, %s8455_s28  ;;  %v9094_v11 = vld [vmem:[#allocation2 + $0x5c] sm:$0x1]  ;;  %v2153_v28 = vor.u32 %v2152_v57, %v2149_v56  ;;  %v7746_v30 = vrot.slane %v2414_v7, 9  ;;  %v2504_v61 = vrot.slane %v9050_v2, 5  ;;  %v963_v53 = vsel %vm8646_vm11, %v958_v41, %v962_v63  ;;  %v770_v23 = vld [vmem:[#allocation2 + $0x58] sm:$0xf] }
  0xab   : > { %v2164_v35 = vrot.slane %v2163_v8, 4  ;;  %v2166_v29 = vshll.u32 %v9094_v11, 16  ;;  %3218 = vrot.lane.b32.xlu0 %v7874_v25, %s8458_s6  ;;  %v966_v16 = vrot.slane %v964_v14, 4  ;;  %v972_v42 = vrot.slane %v970_v58, 5  ;;  %v794_v54 = vld [vmem:[#allocation2 + $0x5c] sm:$0x1] }
  0xac   : > { %v2154_v43 = vrot.slane %v2153_v28, 4  ;;  %v2505_v19 = vsel %vm8626_vm7, %v7746_v30, %v2504_v61  ;;  %v2506_v33 = vrot.slane %v2504_v61, 4  ;;  %v2507_v20 = vrot.slane %v9061_v18, 5  ;;  %v1197_v41 = vld [vmem:[#allocation2 + $0x54] sm:$0xe] }
  0xad   : > { %v2168_v48 = vrot.slane %v2166_v29, 5  ;;  %v967_v2 = vor.u32 %v966_v16, %v962_v63  ;;  %v975_v60 = vshrl.u32 %v769_v26, 16  ;;  %v978_v49 = vshll.u32 %v769_v26, 16  ;;  %v9110_v7 = vpop.permute.xlu0 %2874  ;;  %v1196_v16 = vld [vmem:[#allocation2 + $0x48] sm:$0xe] }
  0xae   : > { %3140 = vrot.lane.b32.xlu1 %v7859_v45, %s8454_s27  ;;  %v2159_v39 = vsel %vm8646_vm11, %v2154_v43, %v2158_v52  ;;  %v984_v55 = vshll.u32 %v770_v23, 16  ;;  %v988_v3 = vshrl.u32 %v770_v23, 16  ;;  %v2508_v18 = vsel %vm8626_vm7, %v2506_v33, %v2507_v20  ;;  %v9116_v52 = vpop.permute.xlu1 %2876 }
  0xaf   : > { %v2169_v56 = vsel %vm8646_vm11, %v2164_v35, %v2168_v48  ;;  %v968_v57 = vrot.slane %v967_v2, 4  ;;  %v977_v10 = vrot.slane %v975_v60, 4  ;;  %v7890_v8 = vcombine.low %v2505_v19, %v2508_v18 }
  0xb0   : > { %v7875_v63 = vcombine.low %v2159_v39, %v2169_v56  ;;  %v980_v45 = vrot.slane %v978_v49, 5  ;;  %v986_v25 = vrot.slane %v984_v55, 5  ;;  %v990_v26 = vrot.slane %v988_v3, 4  ;;  %v297_v56 = vld [vmem:[%s8624_s23 + $0x3c] sm:$0xf] }
  0xb1   : > { %v973_v14 = vsel %vm8646_vm11, %v968_v57, %v972_v42  ;;  %v994_v28 = vshll.u32 %v794_v54, 16  ;;  %v7747_v58 = vrot.slane %v2415_v15, 9  ;;  %3298 = vrot.lane.b32.xlu0 %v7890_v8, %s8456_s29  ;;  %v2511_v35 = vrot.slane %v9078_v47, 5  ;;  %v9124_v43 = vpop.permute.xlu0 %3130  ;;  %v1381_v8 = vld [vmem:[#allocation2 + $0x54] sm:$0xf] }
  0xb2   : > { %3220 = vrot.lane.b32.xlu1 %v7875_v63, %s8458_s6  ;;  %v7780_v30 = vcombine.low %v963_v53, %v973_v14  ;;  %v981_v61 = vor.u32 %v980_v45, %v977_v10  ;;  %v2514_v29 = vrot.slane %v9094_v11, 5  ;;  %v991_v19 = vor.u32 %v990_v26, %v986_v25  ;;  %v1382_v45 = vld [vmem:[#allocation2 + $0x58] sm:$0xf]  ;;  %v692_v26 = vld [vmem:[#allocation2 + $0x60] sm:$0xf] }
  0xb3   : > { %v996_v33 = vrot.slane %v994_v28, 5  ;;  %v7717_v42 = vrot.slane %v1197_v41, 9  ;;  %v1308_v48 = vrot.slane %v770_v23, 5  ;;  %v2512_v20 = vsel %vm8626_vm7, %v7747_v58, %v2511_v35 }
  0xb4   : > { %v982_v2 = vrot.slane %v981_v61, 4  ;;  %v2513_v53 = vrot.slane %v2511_v35, 4  ;;  %v1311_v60 = vrot.slane %v794_v54, 5  ;;  %v992_v15 = vrot.slane %v991_v19, 4  ;;  %v9138_v54 = vpop.permute.xlu1 %3132 }
  0xb5   : > { %v1309_v47 = vsel %vm8626_vm7, %v7717_v42, %v1308_v48  ;;  %v1310_v39 = vrot.slane %v1308_v48, 4  ;;  %v7716_v11 = vrot.slane %v1196_v16, 9  ;;  %v1301_v55 = vrot.slane %v9069_v12, 5 }
  0xb6   : > { %2710 = vrot.lane.b32.xlu1 %v7780_v30, %s8452_s25  ;;  %v987_v49 = vsel %vm8646_vm11, %v982_v2, %v986_v25  ;;  %v2515_v23 = vsel %vm8626_vm7, %v2513_v53, %v2514_v29  ;;  %v1304_v3 = vrot.slane %v9086_v22, 5  ;;  %v997_v57 = vsel %vm8646_vm11, %v992_v15, %v996_v33  ;;  %v9146_v25 = vpop.permute.xlu0 %3034  ;;  %v1407_v33 = vld [vmem:[#allocation2 + $0x5c] sm:$0x1]  ;;  %v696_v53 = vld [vmem:[#allocation2 + $0x68] sm:$0x1] }
  0xb7   : > { %v7891_v18 = vcombine.low %v2512_v20, %v2515_v23  ;;  %v1312_v10 = vsel %vm8626_vm7, %v1310_v39, %v1311_v60  ;;  %v439_v63 = vrot.slane %v437_v62, 7  ;;  %v7781_v12 = vcombine.low %v987_v49, %v997_v57  ;;  %v1807_v62 = vld [vmem:[#allocation2 + $0x54] sm:$0xe] }
  0xb8   : > { %v7797_v41 = vcombine.low %v1309_v47, %v1312_v10  ;;  %v1302_v22 = vsel %vm8626_vm7, %v7716_v11, %v1301_v55  ;;  %v1303_v14 = vrot.slane %v1301_v55, 4  ;;  %v445_v30 = vshrl.u32 %v297_v56, 16  ;;  %v9158_v47 = vpop.permute.xlu1 %2780  ;;  %v298_v55 = vld [vmem:[%s8624_s23 + $0x40] sm:$0xf] }
  0xb9   : > { %3300 = vrot.lane.b32.xlu0 %v7891_v18, %s8456_s29  ;;  %v442_v28 = vor.u32 %v440_v27, %v439_v63  ;;  %v443_v58 = vrot.slane %v439_v63, 4  ;;  %v448_v61 = vshll.u32 %v297_v56, 16  ;;  %v1562_v29 = vshrl.u32 %v1381_v8, 16  ;;  %v299_v63 = vld [vmem:[%s8624_s23 + $0x44] sm:$0xf] }
  0xba   : > { %2712 = vrot.lane.b32.xlu1 %v7781_v12, %s8452_s25  ;;  %v1305_v35 = vsel %vm8626_vm7, %v1303_v14, %v1304_v3  ;;  %v1565_v16 = vshll.u32 %v1381_v8, 16  ;;  %v1575_v19 = vshrl.u32 %v1382_v45, 16  ;;  %v447_v48 = vrot.slane %v445_v30, 7  ;;  %v9162_v3 = vpop.permute.xlu0 %3290 }
  0xbb   : > { %v7796_v42 = vcombine.low %v1302_v22, %v1305_v35  ;;  %v693_v40 = vsel %vm8640_vm10, %v442_v28, %v692_v26  ;;  %v7812_v27 = vcombine.low %v1381_v8, %v1382_v45  ;;  %v1564_v2 = vrot.slane %v1562_v29, 4  ;;  %v300_v35 = vld [vmem:[%s8624_s23 + $0x48] sm:$0xf] }
  0xbc   : > { %694 = vst [vmem:[#allocation2 + $0x60] sm:$0xf] %v693_v40  ;;  %v1567_v20 = vrot.slane %v1565_v16, 5  ;;  %v1571_v60 = vshll.u32 %v1382_v45, 16  ;;  %v1577_v15 = vrot.slane %v1575_v19, 4  ;;  %v450_v39 = vor.u32 %v448_v61, %v447_v48 }
  0xbd   : > { %2790 = vrot.lane.b32.xlu0 %v7796_v42, %s8451_s24  ;;  %v452_v11 = vrot.slane %v447_v48, 4  ;;  %v1581_v49 = vshll.u32 %v1407_v33, 16  ;;  %v7732_v23 = vrot.slane %v1807_v62, 9  ;;  %v1909_v18 = vrot.slane %v1382_v45, 5  ;;  %v9176_v61 = vld [vmem:[#allocation2 + $0x24] sm:$0xf]  ;;  %v9186_v42 = vpop.permute.xlu1 %3036 }
  0xbe   : > { %2792 = vrot.lane.b32.xlu1 %v7797_v41, %s8451_s24  ;;  %v1568_v56 = vor.u32 %v1567_v20, %v1564_v2  ;;  %v1573_v57 = vrot.slane %v1571_v60, 5  ;;  %v1912_v10 = vrot.slane %v1407_v33, 5  ;;  %v451_v8 = vsel %vm8654_vm12, %v443_v58, %v450_v39  ;;  %v9178_v62 = vld [vmem:[#allocation2 + $0x28] sm:$0xf]  ;;  %v9196_v60 = vpop.permute.xlu0 %3292 }
  0xbf   : > { %v697_v12 = vsel %vm8670_vm13, %v452_v11, %v696_v53  ;;  %v1583_v22 = vrot.slane %v1581_v49, 5  ;;  %695 = vst.msk [vmem:[#allocation2 + $0x64] sm:$0xf] %vm226_vm0, %v451_v8  ;;  %v9173_v41 = vsel %vm8626_vm7, %v7732_v23, %v1909_v18  ;;  %v1911_v45 = vrot.slane %v1909_v18, 4  ;;  %v699_v53 = vld [vmem:[#allocation2 + $0x6c] sm:$0xf] }
  0xc0   : > { %698 = vst [vmem:[#allocation2 + $0x68] sm:$0x1] %v697_v12  ;;  %v1569_v14 = vrot.slane %v1568_v56, 4  ;;  %v1578_v26 = vor.u32 %v1577_v15, %v1573_v57  ;;  %v454_v28 = vshrl.u32 %v298_v55, 16  ;;  %v457_v30 = vshll.u32 %v298_v55, 16 }
  0xc1   : > { %2886 = vrot.lane.b32.xlu0 %v7812_v27, %s8453_s26  ;;  %v462_v58 = vshrl.u32 %v299_v63, 16  ;;  %v1913_v19 = vsel %vm8626_vm7, %v1911_v45, %v1912_v10  ;;  %v465_v33 = vshll.u32 %v299_v63, 16  ;;  %v3325_v27 = vsel %vm3322_vm14, %v7758_v24, %v9090_v4 }
  0xc2   : > { %v1574_v29 = vsel %vm8646_vm11, %v1569_v14, %v1573_v57  ;;  %v1579_v16 = vrot.slane %v1578_v26, 4  ;;  %v7844_v40 = vcombine.low %v9173_v41, %v1913_v19  ;;  %v456_v2 = vrot.slane %v454_v28, 7 }
  0xc3   : > { %v1383_v48 = vld [vmem:[#allocation2 + $0x60] sm:$0xf]  ;;  %v9194_v20 = vrot.slane %v462_v58, 7  ;;  %vm3470_vm3 = vcmask 121856   ;;  %vm3657_vm4 = vcmask 1044480   ;;  %vm3658_vm5 = vcmask 1045504  }
  0xc4   : > { %v1586_v15 = vshrl.u32 %v1383_v48, 16  ;;  %v1589_v39 = vshll.u32 %v1383_v48, 16  ;;  %v1584_v11 = vsel %vm8646_vm11, %v1579_v16, %v1583_v22  ;;  %v1808_v49 = vld [vmem:[#allocation2 + $0x60] sm:$0xe]  ;;  %v459_v13 = vor.u32 %v457_v30, %v456_v2 }
  0xc5   : > { %v1990_v23 = vld [vmem:[#allocation2 + $0x60] sm:$0xf]  ;;  %v7828_v56 = vcombine.low %v1574_v29, %v1584_v11  ;;  %v460_v6 = vrot.slane %v456_v2, 4  ;;  %v467_v24 = vor.u32 %v465_v33, %v9194_v20  ;;  %v7733_v12 = vrot.slane %v1808_v49, 9  ;;  %v9213_v29 = vpop.permute.xlu1 %2956 }
  0xc6   : > { %v1588_v4 = vrot.slane %v1586_v15, 4  ;;  %v1591_v57 = vrot.slane %v1589_v39, 5  ;;  %v2171_v18 = vshrl.u32 %v1990_v23, 16  ;;  %v2174_v10 = vshll.u32 %v1990_v23, 16  ;;  %v1384_v63 = vld [vmem:[#allocation2 + $0x64] sm:$0xf] }
  0xc7   : > { %v1408_v8 = vld [vmem:[#allocation2 + $0x68] sm:$0x1]  ;;  %2966 = vrot.lane.b32.xlu0 %v7828_v56, %s8457_s30  ;;  %v468_v22 = vsel %vm8654_vm12, %v460_v6, %v467_v24  ;;  %v700_v14 = vsel %vm8640_vm10, %v459_v13, %v699_v53  ;;  %v1599_v41 = vshrl.u32 %v1384_v63, 16  ;;  %v7813_v45 = vcombine.low %v1383_v48, %v1384_v63  ;;  %v9211_v58 = vld [vmem:[#allocation2 + $0x64] sm:$0xf]  ;;  %v2701_v15 = vpop.permute.xlu0 %2700 }
  0xc8   : > { %v1592_v28 = vor.u32 %v1591_v57, %v1588_v4  ;;  %v1595_v30 = vshll.u32 %v1384_v63, 16  ;;  %701 = vst [vmem:[#allocation2 + $0x6c] sm:$0xf] %v700_v14  ;;  %702 = vst.msk [vmem:[#allocation2 + $0x70] sm:$0xf] %vm226_vm0, %v468_v22  ;;  %v1605_v16 = vshll.u32 %v1408_v8, 16  ;;  %v7860_v57 = vcombine.low %v1990_v23, %v9211_v58 }
  0xc9   : > { %v1916_v19 = vrot.slane %v1384_v63, 5  ;;  %v1919_v33 = vrot.slane %v1408_v8, 5  ;;  %v2173_v2 = vrot.slane %v2171_v18, 4  ;;  %2888 = vrot.lane.b32.xlu1 %v7813_v45, %s8453_s26  ;;  %v1601_v11 = vrot.slane %v1599_v41, 4  ;;  %v703_v18 = vld [vmem:[#allocation2 + $0x74] sm:$0x1]  ;;  %v9237_v41 = vpop.permute.xlu1 %3212 }
  0xca   : > { %v1593_v53 = vrot.slane %v1592_v28, 4  ;;  %v1597_v39 = vrot.slane %v1595_v30, 5  ;;  %v2176_v48 = vrot.slane %v2174_v10, 5  ;;  %v1607_v49 = vrot.slane %v1605_v16, 5  ;;  %v9235_v14 = vld [vmem:[#allocation2 + $0x68] sm:$0x1] }
  0xcb   : > { %v9218_v56 = vsel %vm8626_vm7, %v7733_v12, %v1916_v19  ;;  %v1918_v13 = vrot.slane %v1916_v19, 4  ;;  %3046 = vrot.lane.b32.xlu0 %v7844_v40, %s8455_s28  ;;  %v2184_v6 = vshrl.u32 %v9211_v58, 16  ;;  %v3373_v63 = vsel %vm12525_vm15, %v3325_v27, %v9098_v31 }
  0xcc   : > { %v1598_v24 = vsel %vm8646_vm11, %v1593_v53, %v1597_v39  ;;  %v1602_v4 = vor.u32 %v1601_v11, %v1597_v39  ;;  %v469_v8 = vrot.slane %v9194_v20, 4  ;;  %v9233_v22 = vsel %vm12524_vm1, %v3373_v63, %v9110_v7 }
  0xcd   : > { %v1920_v10 = vsel %vm8626_vm7, %v1918_v13, %v1919_v33  ;;  %v2177_v23 = vor.u32 %v2176_v48, %v2173_v2  ;;  %v2180_v27 = vshll.u32 %v9211_v58, 16  ;;  %v2186_v20 = vrot.slane %v2184_v6, 4 }
  0xce   : > { %v1603_v40 = vrot.slane %v1602_v4, 4  ;;  %v7845_v12 = vcombine.low %v9218_v56, %v1920_v10  ;;  %v704_v31 = vsel %vm8670_vm13, %v469_v8, %v703_v18  ;;  %v3328_v7 = vsel %vm3322_vm14, %v7759_v32, %v2701_v15  ;;  %v9251_v30 = vpop.permute.xlu0 %2954  ;;  %v2416_v32 = vld [vmem:[#allocation2 + $0x60] sm:$0xe] }
  0xcf   : > { %v9239_v45 = vld [vmem:[#allocation2 + $0x6c] sm:$0xf]  ;;  %v9241_v28 = vld [vmem:[#allocation2 + $0x70] sm:$0xf]  ;;  %3142 = vrot.lane.b32.xlu0 %v7860_v57, %s8454_s27  ;;  %705 = vst [vmem:[#allocation2 + $0x74] sm:$0x1] %v704_v31 }
  0xd0   : > { %v1608_v16 = vsel %vm8646_vm11, %v1603_v40, %v1607_v49  ;;  %v2195_v19 = vshrl.u32 %v9239_v45, 16  ;;  %v2198_v33 = vshll.u32 %v9239_v45, 16  ;;  %v2208_v2 = vshrl.u32 %v9241_v28, 16  ;;  %v2417_v53 = vld [vmem:[#allocation2 + $0x6c] sm:$0xe]  ;;  %v9266_v40 = vpop.permute.xlu1 %2702 }
  0xd1   : > { %v7829_v39 = vcombine.low %v1598_v24, %v1608_v16  ;;  %v7861_v11 = vcombine.low %v9239_v45, %v9241_v28  ;;  %v2204_v9 = vshll.u32 %v9241_v28, 16  ;;  %v2178_v21 = vrot.slane %v2177_v23, 4  ;;  %v773_v8 = vld [vmem:[#allocation2 + $0x6c] sm:$0xf]  ;;  %v8391_v5 = vld [vmem:[#allocation2 + $0x70] sm:$0xf] }
  0xd2   : > { %v2197_v15 = vrot.slane %v2195_v19, 4  ;;  %v2200_v48 = vrot.slane %v2198_v33, 5  ;;  %v2210_v56 = vrot.slane %v2208_v2, 4  ;;  %v2182_v49 = vrot.slane %v2180_v27, 5  ;;  %v9272_v16 = vld [vmem:[#allocation2 + $0x6c] sm:$0xf] }
  0xd3   : > { %2968 = vrot.lane.b32.xlu1 %v7829_v39, %s8457_s30  ;;  %v2206_v13 = vrot.slane %v2204_v9, 5  ;;  %v2190_v6 = vshll.u32 %v9235_v14, 16  ;;  %v7749_v4 = vrot.slane %v2417_v53, 9  ;;  %v2525_v57 = vrot.slane %v9241_v28, 5  ;;  %v9278_v53 = vld [vmem:[#allocation2 + $0x70] sm:$0xf] }
  0xd4   : > { %v2201_v24 = vor.u32 %v2200_v48, %v2197_v15  ;;  %v2183_v18 = vsel %vm8646_vm11, %v2178_v21, %v2182_v49  ;;  %v2187_v10 = vor.u32 %v2186_v20, %v2182_v49  ;;  %v7748_v63 = vrot.slane %v2416_v32, 9  ;;  %v9274_v19 = vpop.permute.xlu0 %3210  ;;  %v9281_v21 = vld [vmem:[#allocation2 + $0x70] sm:$0xf] }
  0xd5   : > { %v2211_v23 = vor.u32 %v2210_v56, %v2206_v13  ;;  %v2192_v45 = vrot.slane %v2190_v6, 5  ;;  %v9270_v31 = vsel %vm8626_vm7, %v7749_v4, %v2525_v57  ;;  %v2527_v27 = vrot.slane %v2525_v57, 4 }
  0xd6   : > { %v2202_v28 = vrot.slane %v2201_v24, 4  ;;  %v2188_v33 = vrot.slane %v2187_v10, 4  ;;  %v2518_v2 = vrot.slane %v9211_v58, 5  ;;  %v2521_v20 = vrot.slane %v9235_v14, 5  ;;  %v2017_v39 = vld [vmem:[#allocation2 + $0x74] sm:$0x1] }
  0xd7   : > { %3048 = vrot.lane.b32.xlu1 %v7845_v12, %s8455_s28  ;;  %v2212_v9 = vrot.slane %v2211_v23, 4  ;;  %v1023_v32 = vshrl.u32 %v773_v8, 16  ;;  %v7814_v15 = vcombine.low %v9272_v16, %v9278_v53  ;;  %v9287_v48 = vsel %vm12525_vm15, %v3328_v7, %v9158_v47  ;;  %v9293_v49 = vld [vmem:[#allocation2 + $0x74] sm:$0x1] }
  0xd8   : > { %v2207_v58 = vsel %vm8646_vm11, %v2202_v28, %v2206_v13  ;;  %v2214_v14 = vshll.u32 %v2017_v39, 16  ;;  %v2193_v56 = vsel %vm8646_vm11, %v2188_v33, %v2192_v45  ;;  %v2528_v12 = vrot.slane %v2017_v39, 5  ;;  %v9297_v10 = vpop.permute.xlu0 %2782  ;;  %v771_v28 = vld [vmem:[#allocation2 + $0x60] sm:$0xf]  ;;  %v9302_v45 = vpop.permute.xlu1 %2704 }
  0xd9   : > { %v7876_v6 = vcombine.low %v2183_v18, %v2193_v56  ;;  %v2519_v4 = vsel %vm8626_vm7, %v7748_v63, %v2518_v2  ;;  %v2520_v57 = vrot.slane %v2518_v2, 4  ;;  %v1025_v24 = vrot.slane %v1023_v32, 4  ;;  %v795_v56 = vld [vmem:[#allocation2 + $0x68] sm:$0x1] }
  0xda   : > { %v2216_v47 = vrot.slane %v2214_v14, 5  ;;  %v2529_v7 = vsel %vm8626_vm7, %v2527_v27, %v2528_v12  ;;  %v1026_v13 = vshll.u32 %v773_v8, 16  ;;  %v1032_v23 = vshll.u32 %v9281_v21, 16  ;;  %v772_v27 = vld [vmem:[#allocation2 + $0x64] sm:$0xf] }
  0xdb   : > { %3144 = vrot.lane.b32.xlu1 %v7861_v11, %s8454_s27  ;;  %3222 = vrot.lane.b32.xlu0 %v7876_v6, %s8458_s6  ;;  %v7893_v18 = vcombine.low %v9270_v31, %v2529_v7  ;;  %v2522_v63 = vsel %vm8626_vm7, %v2520_v57, %v2521_v20  ;;  %v1036_v33 = vshrl.u32 %v9281_v21, 16  ;;  %v1042_v2 = vshll.u32 %v9293_v49, 16  ;;  %v1199_v11 = vld [vmem:[#allocation2 + $0x6c] sm:$0xe] }
  0xdc   : > { %v2217_v8 = vsel %vm8646_vm11, %v2212_v9, %v2216_v47  ;;  %v7892_v39 = vcombine.low %v2519_v4, %v2522_v63  ;;  %v1028_v32 = vrot.slane %v1026_v13, 5  ;;  %v1034_v14 = vrot.slane %v1032_v23, 5  ;;  %v9313_v7 = vpop.permute.xlu0 %2878  ;;  %v1198_v23 = vld [vmem:[#allocation2 + $0x60] sm:$0xe] }
  0xdd   : > { %v7877_v12 = vcombine.low %v2207_v58, %v2217_v8  ;;  %v1038_v6 = vrot.slane %v1036_v33, 4  ;;  %v1044_v26 = vrot.slane %v1042_v2, 5  ;;  %v999_v31 = vshrl.u32 %v771_v28, 16  ;;  %v9317_v8 = vpop.permute.xlu1 %2784 }
  0xde   : > { %v1029_v20 = vor.u32 %v1028_v32, %v1025_v24  ;;  %v1002_v57 = vshll.u32 %v771_v28, 16  ;;  %v1008_v55 = vshll.u32 %v772_v27, 16  ;;  %v1012_v0 = vshrl.u32 %v772_v27, 16 }
  0xdf   : > { %3224 = vrot.lane.b32.xlu1 %v7877_v12, %s8458_s6  ;;  %3302 = vrot.lane.b32.xlu0 %v7892_v39, %s8456_s29  ;;  %v1039_v9 = vor.u32 %v1038_v6, %v1034_v14  ;;  %v1001_v4 = vrot.slane %v999_v31, 4  ;;  %v1018_v47 = vshll.u32 %v795_v56, 16  ;;  %v7719_v13 = vrot.slane %v1199_v11, 9 }
  0xe0   : > { %v1030_v58 = vrot.slane %v1029_v20, 4  ;;  %v1004_v63 = vrot.slane %v1002_v57, 5  ;;  %v1010_v33 = vrot.slane %v1008_v55, 5  ;;  %v1014_v2 = vrot.slane %v1012_v0, 4 }
  0xe1   : > { %v1040_v24 = vrot.slane %v1039_v9, 4  ;;  %v1020_v28 = vrot.slane %v1018_v47, 5  ;;  %v1322_v32 = vrot.slane %v9281_v21, 5  ;;  %v1325_v12 = vrot.slane %v9293_v49, 5  ;;  %v9324_v20 = vpop.permute.xlu0 %2958 }
  0xe2   : > { %v1035_v39 = vsel %vm8646_vm11, %v1030_v58, %v1034_v14  ;;  %v1005_v6 = vor.u32 %v1004_v63, %v1001_v4  ;;  %v1015_v31 = vor.u32 %v1014_v2, %v1010_v33  ;;  %v7718_v11 = vrot.slane %v1198_v23, 9  ;;  %v301_v4 = vld [vmem:[%s8624_s23 + $0x4c] sm:$0xf] }
  0xe3   : > { %3304 = vrot.lane.b32.xlu1 %v7893_v18, %s8456_s29  ;;  %v1045_v0 = vsel %vm8646_vm11, %v1040_v24, %v1044_v26  ;;  %v1323_v55 = vsel %vm8626_vm7, %v7719_v13, %v1322_v32  ;;  %v1324_v21 = vrot.slane %v1322_v32, 4  ;;  %v1315_v49 = vrot.slane %v772_v27, 5  ;;  %v9340_v24 = vpop.permute.xlu1 %2880 }
  0xe4   : > { %v7783_v57 = vcombine.low %v1035_v39, %v1045_v0  ;;  %v1006_v9 = vrot.slane %v1005_v6, 4  ;;  %v1016_v47 = vrot.slane %v1015_v31, 4  ;;  %v1318_v14 = vrot.slane %v795_v56, 5 }
  0xe5   : > { %v1326_v23 = vsel %vm8626_vm7, %v1324_v21, %v1325_v12  ;;  %v1316_v58 = vsel %vm8626_vm7, %v7718_v11, %v1315_v49  ;;  %v1317_v18 = vrot.slane %v1315_v49, 4  ;;  %v471_v63 = vshrl.u32 %v300_v35, 16  ;;  %v706_v11 = vld [vmem:[#allocation2 + $0x78] sm:$0xf] }
  0xe6   : > { %v1011_v26 = vsel %vm8646_vm11, %v1006_v9, %v1010_v33  ;;  %v1021_v13 = vsel %vm8646_vm11, %v1016_v47, %v1020_v28  ;;  %v7799_v27 = vcombine.low %v1323_v55, %v1326_v23  ;;  %v474_v2 = vshll.u32 %v300_v35, 16  ;;  %v9347_v28 = vpop.permute.xlu0 %3038 }
  0xe7   : > { %2716 = vrot.lane.b32.xlu1 %v7783_v57, %s8452_s25  ;;  %v7782_v56 = vcombine.low %v1011_v26, %v1021_v13  ;;  %v1319_v32 = vsel %vm8626_vm7, %v1317_v18, %v1318_v14  ;;  %v473_v12 = vrot.slane %v471_v63, 7  ;;  %v479_v39 = vshrl.u32 %v301_v4, 16  ;;  %v1409_v57 = vld [vmem:[#allocation2 + $0x74] sm:$0x1] }
  0xe8   : > { %v7798_v6 = vcombine.low %v1316_v58, %v1319_v32  ;;  %v482_v31 = vshll.u32 %v301_v4, 16  ;;  %v1610_v33 = vshrl.u32 %v9272_v16, 16  ;;  %v1613_v0 = vshll.u32 %v9272_v16, 16  ;;  %v710_v4 = vld [vmem:[#allocation2 + $0x80] sm:$0x1] }
  0xe9   : > { %2714 = vrot.lane.b32.xlu0 %v7782_v56, %s8452_s25  ;;  %v476_v35 = vor.u32 %v474_v2, %v473_v12  ;;  %v477_v55 = vrot.slane %v473_v12, 4  ;;  %v481_v21 = vrot.slane %v479_v39, 7  ;;  %v1623_v49 = vshrl.u32 %v9278_v53, 16  ;;  %v1809_v32 = vld [vmem:[#allocation2 + $0x6c] sm:$0xe] }
  0xea   : > { %v1612_v9 = vrot.slane %v1610_v33, 4  ;;  %v1615_v47 = vrot.slane %v1613_v0, 5  ;;  %v3408_v14 = vsel %vm12524_vm1, %v9287_v48, %v9116_v52  ;;  %v1619_v13 = vshll.u32 %v9278_v53, 16 }
  0xeb   : > { %2796 = vrot.lane.b32.xlu1 %v7799_v27, %s8451_s24  ;;  %v484_v23 = vor.u32 %v482_v31, %v481_v21  ;;  %v707_v58 = vsel %vm8640_vm10, %v476_v35, %v706_v11  ;;  %v9359_v18 = vsel %vm3437_vm2, %v3408_v14, %v9213_v29  ;;  %v486_v63 = vrot.slane %v481_v21, 4  ;;  %v9380_v11 = vpop.permute.xlu0 %3134  ;;  %v302_v35 = vld [vmem:[%s8624_s23 + $0x50] sm:$0xf] }
  0xec   : > { %708 = vst [vmem:[#allocation2 + $0x78] sm:$0xf] %v707_v58  ;;  %v1616_v26 = vor.u32 %v1615_v47, %v1612_v9  ;;  %v1625_v2 = vrot.slane %v1623_v49, 4  ;;  %v1629_v56 = vshll.u32 %v1409_v57, 16  ;;  %v9362_v52 = vpop.permute.xlu1 %2960  ;;  %v9374_v29 = vsel %vm3322_vm14, %v7760_v46, %v9266_v40 }
  0xed   : > { %2794 = vrot.lane.b32.xlu0 %v7798_v6, %s8451_s24  ;;  %v485_v48 = vsel %vm8654_vm12, %v477_v55, %v484_v23  ;;  %v711_v27 = vsel %vm8670_vm13, %v486_v63, %v710_v4  ;;  %v1621_v39 = vrot.slane %v1619_v13, 5  ;;  %v3439_v31 = vsel %vm3437_vm2, %v9233_v22, %v9251_v30  ;;  %v8323_v30 = vld [vmem:[%s12516_s1 + $0x8] sm:$0x3f]  }
  0xee   : > { %709 = vst.msk [vmem:[#allocation2 + $0x7c] sm:$0xf] %vm226_vm0, %v485_v48  ;;  %712 = vst [vmem:[#allocation2 + $0x80] sm:$0x1] %v711_v27  ;;  %v1617_v12 = vrot.slane %v1616_v26, 4  ;;  %v1631_v6 = vrot.slane %v1629_v56, 5  ;;  %v3472_v17 = vsel %vm3470_vm3, %v3439_v31, %v9146_v25  ;;  %v12557_v21 = vcombine.low %v9176_v61, %v9178_v62 }
  0xef   : > { %v7734_v50 = vrot.slane %v1809_v32, 9  ;;  %v1923_v46 = vrot.slane %v9278_v53, 5  ;;  %v1926_v40 = vrot.slane %v1409_v57, 5  ;;  %v1626_v0 = vor.u32 %v1625_v2, %v1621_v39 }
  0xf0   : > { %v1622_v33 = vsel %vm8646_vm11, %v1617_v12, %v1621_v39  ;;  %v9388_v55 = vpop.permute.xlu1 %3040  ;;  %v9404_v49 = vsel %vm3322_vm14, %v12557_v21, %v9302_v45  ;;  %v8459_v9 = vmov 65535   ;;  %vm3503_vm8 = vcmask 146432  }
  0xf1   : > { %2890 = vrot.lane.b32.xlu0 %v7814_v15, %s8453_s26  ;;  %v1924_v25 = vsel %vm8626_vm7, %v7734_v50, %v1923_v46  ;;  %v1925_v22 = vrot.slane %v1923_v46, 4  ;;  %v1627_v57 = vrot.slane %v1626_v0, 4  ;;  %v3659_v47 = vsel %vm3657_vm4, 4294967295, %v8459_v9  ;;  %v9415_v26 = vpop.permute.xlu0 %3214 }
  0xf2   : > { %vm3536_vm6 = vcmask 171008   ;;  %v3660_v14 = vsel %vm3658_vm5, %v3659_v47, 0  ;;  %v3505_v4 = vsel %vm3503_vm8, %v3472_v17, %v9124_v43  ;;  %v488_v23 = vshrl.u32 %v302_v35, 16  ;;  %v713_v47 = vld [vmem:[#allocation2 + $0x84] sm:$0xf] }
  0xf3   : > { %v1387_v16 = vld [vmem:[#allocation2 + $0x78] sm:$0xf]  ;;  %v1927_v15 = vsel %vm8626_vm7, %v1925_v22, %v1926_v40  ;;  %v1632_v45 = vsel %vm8646_vm11, %v1627_v57, %v1631_v6  ;;  %v3662_v48 = vand.u32 %v8323_v30, %v3660_v14  ;;  %v3538_v43 = vsel %vm3536_vm6, %v3505_v4, %v9274_v19  ;;  %v303_v40 = vld [vmem:[%s8624_s23 + $0x54] sm:$0xf] }
  0xf4   : > { %v1810_v53 = vld [vmem:[#allocation2 + $0x78] sm:$0xe]  ;;  %v1634_v61 = vshrl.u32 %v1387_v16, 16  ;;  %v1637_v62 = vshll.u32 %v1387_v16, 16  ;;  %v9413_v63 = vpop.permute.xlu1 %3136  ;;  %v7830_v56 = vcombine.low %v1622_v33, %v1632_v45  ;;  %v7846_v32 = vcombine.low %v1924_v25, %v1927_v15 }
  0xf5   : > { %v7735_v58 = vrot.slane %v1810_v53, 9  ;;  %v1388_v13 = vld [vmem:[#allocation2 + $0x7c] sm:$0xf]  ;;  %v1410_v2 = vld [vmem:[#allocation2 + $0x80] sm:$0x1]  ;;  %8227 = vmatprep.subr.bf16.mxu0 %v3662_v48  ;;  %v490_v25 = vrot.slane %v488_v23, 7 }
  0xf6   : > { %v1636_v27 = vrot.slane %v1634_v61, 4  ;;  %v1639_v12 = vrot.slane %v1637_v62, 5  ;;  %v1647_v39 = vshrl.u32 %v1388_v13, 16  ;;  %v7815_v31 = vcombine.low %v1387_v16, %v1388_v13  ;;  %2970 = vrot.lane.b32.xlu0 %v7830_v56, %s8457_s30  ;;  %8228 = vmatpush3.bf16.msra.mxu0 %v3662_v48  ;;  %v1994_v19 = vld [vmem:[#allocation2 + $0x78] sm:$0xf] }
  0xf7   : > { %v1643_v17 = vshll.u32 %v1388_v13, 16  ;;  %v1653_v6 = vshll.u32 %v1410_v2, 16  ;;  %v1930_v50 = vrot.slane %v1388_v13, 5  ;;  %v1933_v46 = vrot.slane %v1410_v2, 5  ;;  %v9427_v61 = vld [vmem:[#allocation2 + $0x7c] sm:$0xf] }
  0xf8   : > { %2892 = vrot.lane.b32.xlu1 %v7815_v31, %s8453_s26  ;;  %v1640_v33 = vor.u32 %v1639_v12, %v1636_v27  ;;  %v1649_v0 = vrot.slane %v1647_v39, 4  ;;  %v491_v22 = vshll.u32 %v302_v35, 16  ;;  %v12558_v16 = vmov 0   ;;  %v9429_v62 = vpop.permute.xlu1 %3216  ;;  %v9431_v35 = vpop.permute.xlu0 %3294 }
  0xf9   : > { %v1645_v30 = vrot.slane %v1643_v17, 5  ;;  %v1655_v21 = vrot.slane %v1653_v6, 5  ;;  %v9424_v57 = vsel %vm8626_vm7, %v7735_v58, %v1930_v50  ;;  %v1932_v9 = vrot.slane %v1930_v50, 4  ;;  %7365 = vmatprep.subr.bf16.mxu0 %v12558_v16 }
  0xfa   : > { %v1641_v53 = vrot.slane %v1640_v33, 4  ;;  %v493_v15 = vor.u32 %v491_v22, %v490_v25  ;;  %v494_v14 = vrot.slane %v490_v25, 4  ;;  %v496_v4 = vshrl.u32 %v303_v40, 16  ;;  %3050 = vrot.lane.b32.xlu0 %v7846_v32, %s8455_s28  ;;  %v2018_v25 = vld [vmem:[#allocation2 + $0x80] sm:$0x1] }
  0xfb   : > { %v1650_v23 = vor.u32 %v1649_v0, %v1645_v30  ;;  %v1934_v45 = vsel %vm8626_vm7, %v1932_v9, %v1933_v46  ;;  %v499_v58 = vshll.u32 %v303_v40, 16  ;;  %v2219_v13 = vshrl.u32 %v1994_v19, 16  ;;  %v717_v0 = vld [vmem:[#allocation2 + $0x8c] sm:$0x1] }
  0xfc   : > { %v1646_v2 = vsel %vm8646_vm11, %v1641_v53, %v1645_v30  ;;  %v7847_v56 = vcombine.low %v9424_v57, %v1934_v45  ;;  %v498_v48 = vrot.slane %v496_v4, 7  ;;  %v714_v27 = vsel %vm8640_vm10, %v493_v15, %v713_v47  ;;  %v2418_v47 = vld [vmem:[#allocation2 + $0x78] sm:$0xe] }
  0xfd   : > { %v1651_v12 = vrot.slane %v1650_v23, 4  ;;  %715 = vst [vmem:[#allocation2 + $0x84] sm:$0xf] %v714_v27  ;;  %v2221_v39 = vrot.slane %v2219_v13, 4  ;;  %v2222_v31 = vshll.u32 %v1994_v19, 16  ;;  %v2232_v17 = vshrl.u32 %v9427_v61, 16 }
  0xfe   : > { %v501_v6 = vor.u32 %v499_v58, %v498_v48  ;;  %v7862_v32 = vcombine.low %v1994_v19, %v9427_v61  ;;  %vm3569_vm4 = vcmask 195584   ;;  %vm3624_vm5 = vcmask 220160  }
  0xff   : > { %v1656_v50 = vsel %vm8646_vm11, %v1651_v12, %v1655_v21  ;;  %v2224_v46 = vrot.slane %v2222_v31, 5  ;;  %v3571_v40 = vsel %vm3569_vm4, %v3538_v43, %v9162_v3  ;;  %v3379_v33 = vsel %vm12525_vm15, %v9404_v49, %v9317_v8  ;;  %v9457_v3 = vpop.permute.xlu1 %2706  ;;  %v9459_v43 = vpop.permute.xlu0 %3296 }
 0x100   : > { %v7831_v22 = vcombine.low %v1646_v2, %v1656_v50  ;;  %v502_v30 = vsel %vm8654_vm12, %v494_v14, %v501_v6  ;;  %3146 = vrot.lane.b32.xlu0 %v7862_v32, %s8454_s27  ;;  %8229 = vmatprep.mubr.msk.bf16.mxu0 %vm3624_vm5, %v3571_v40  ;;  %v3474_v19 = vsel %vm3470_vm3, %v9359_v18, %v9186_v42  ;;  %v503_v21 = vrot.slane %v498_v48, 4 }
 0x101   : > { %716 = vst.msk [vmem:[#allocation2 + $0x88] sm:$0xf] %vm226_vm0, %v502_v30  ;;  %v3507_v8 = vsel %vm3503_vm8, %v3474_v19, %v9138_v54  ;;  %v3377_v49 = vsel %vm12525_vm15, %v9374_v29, %v9297_v10  ;;  %v2225_v57 = vor.u32 %v2224_v46, %v2221_v39  ;;  %v2228_v9 = vshll.u32 %v9427_v61, 16 }
 0x102   : > { %2972 = vrot.lane.b32.xlu1 %v7831_v22, %s8457_s30  ;;  %v3540_v42 = vsel %vm3536_vm6, %v3507_v8, %v9237_v41  ;;  %v718_v18 = vsel %vm8670_vm13, %v503_v21, %v717_v0  ;;  %v2234_v53 = vrot.slane %v2232_v17, 4  ;;  %v2238_v15 = vshll.u32 %v2018_v25, 16 }
 0x103   : > { %v3573_v54 = vsel %vm3569_vm4, %v3540_v42, %v9196_v60  ;;  %719 = vst [vmem:[#allocation2 + $0x8c] sm:$0x1] %v718_v18  ;;  %v2226_v14 = vrot.slane %v2225_v57, 4  ;;  %v2230_v10 = vrot.slane %v2228_v9, 5  ;;  %v3412_v29 = vsel %vm12524_vm1, %v3379_v33, %v9340_v24  ;;  %v9490_v17 = vpop.permute.xlu1 %2708 }
 0x104   : > { %v1996_v4 = vld [vmem:[#allocation2 + $0x84] sm:$0xf]  ;;  %8230 = vmatmul.mubr.msk.bf16.vlgmr.msra.gmra.mrb[0].mxu0 %vm3624_vm5, %v3573_v54  ;;  %v2240_v23 = vrot.slane %v2238_v15, 5  ;;  %v3410_v41 = vsel %vm12524_vm1, %v3377_v49, %v9313_v7  ;;  %v7750_v58 = vrot.slane %v2418_v47, 9  ;;  %v3445_v13 = vsel %vm3437_vm2, %v3412_v29, %v9362_v52  ;;  %v9492_v52 = vpop.permute.xlu0 %2786  ;;  %v775_v29 = vld [vmem:[#allocation2 + $0x78] sm:$0xf] }
 0x105   : > { %v2419_v45 = vld [vmem:[#allocation2 + $0x84] sm:$0xe]  ;;  %v2243_v2 = vshrl.u32 %v1996_v4, 16  ;;  %v2246_v60 = vshll.u32 %v1996_v4, 16  ;;  %v2231_v48 = vsel %vm8646_vm11, %v2226_v14, %v2230_v10  ;;  %v2235_v27 = vor.u32 %v2234_v53, %v2230_v10 }
 0x106   : > { %v777_v12 = vld [vmem:[#allocation2 + $0x84] sm:$0xf]  ;;  %3052 = vrot.lane.b32.xlu1 %v7847_v56, %s8455_s28  ;;  %v7751_v24 = vrot.slane %v2419_v45, 9  ;;  %v2532_v39 = vrot.slane %v9427_v61, 5  ;;  %v2535_v31 = vrot.slane %v2018_v25, 5  ;;  %v9488_v7 = vsel %vm3437_vm2, %v3410_v41, %v9324_v20 }
 0x107   : > { %v2245_v6 = vrot.slane %v2243_v2, 4  ;;  %v2248_v32 = vrot.slane %v2246_v60, 5  ;;  %v2236_v50 = vrot.slane %v2235_v27, 4  ;;  %v1071_v46 = vshrl.u32 %v777_v12, 16 }
 0x108   : > { %v1997_v40 = vld [vmem:[#allocation2 + $0x88] sm:$0xf]  ;;  %v2533_v56 = vsel %vm8626_vm7, %v7750_v58, %v2532_v39  ;;  %v2534_v33 = vrot.slane %v2532_v39, 4  ;;  %v1074_v0 = vshll.u32 %v777_v12, 16  ;;  %v9498_v61 = vsel %vm3470_vm3, %v3445_v13, %v9388_v55  ;;  %v776_v12 = vld [vmem:[#allocation2 + $0x7c] sm:$0xf] }
 0x109   : > { %v2256_v20 = vshrl.u32 %v1997_v40, 16  ;;  %v7863_v25 = vcombine.low %v1996_v4, %v1997_v40  ;;  %v2249_v22 = vor.u32 %v2248_v32, %v2245_v6  ;;  %v2252_v30 = vshll.u32 %v1997_v40, 16  ;;  %v778_v18 = vld [vmem:[#allocation2 + $0x88] sm:$0xf]  ;;  %v9509_v4 = vpop.permute.xlu1 %2788 }
 0x10a   : > { %v2019_v19 = vld [vmem:[#allocation2 + $0x8c] sm:$0x1]  ;;  %v2241_v21 = vsel %vm8646_vm11, %v2236_v50, %v2240_v23  ;;  %v2539_v8 = vrot.slane %v1997_v40, 5  ;;  %v2536_v49 = vsel %vm8626_vm7, %v2534_v33, %v2535_v31  ;;  %v1073_v57 = vrot.slane %v1071_v46, 4  ;;  %v9511_v23 = vpop.permute.xlu0 %2882  ;;  %v797_v40 = vld [vmem:[#allocation2 + $0x80] sm:$0x1] }
 0x10b   : > { %3148 = vrot.lane.b32.xlu1 %v7863_v25, %s8454_s27  ;;  %v2250_v9 = vrot.slane %v2249_v22, 4  ;;  %v2254_v47 = vrot.slane %v2252_v30, 5  ;;  %v2258_v42 = vrot.slane %v2256_v20, 4  ;;  %v2262_v55 = vshll.u32 %v2019_v19, 16  ;;  %v9507_v10 = vld [vmem:[#allocation2 + $0x8c] sm:$0x1] }
 0x10c   : > { %v7878_v53 = vcombine.low %v2231_v48, %v2241_v21  ;;  %v2540_v15 = vsel %vm8626_vm7, %v7751_v24, %v2539_v8  ;;  %v2541_v54 = vrot.slane %v2539_v8, 4  ;;  %v2542_v14 = vrot.slane %v2019_v19, 5 }
 0x10d   : > { %v2255_v41 = vsel %vm8646_vm11, %v2250_v9, %v2254_v47  ;;  %v2259_v45 = vor.u32 %v2258_v42, %v2254_v47  ;;  %v2264_v58 = vrot.slane %v2262_v55, 5  ;;  %v7894_v13 = vcombine.low %v2533_v56, %v2536_v49 }
 0x10e   : > { %3226 = vrot.lane.b32.xlu0 %v7878_v53, %s8458_s6  ;;  %v2543_v2 = vsel %vm8626_vm7, %v2541_v54, %v2542_v14  ;;  %v1076_v60 = vrot.slane %v1074_v0, 5  ;;  %v1080_v48 = vshll.u32 %v778_v18, 16  ;;  %v1084_v27 = vshrl.u32 %v778_v18, 16  ;;  %v1201_v0 = vld [vmem:[#allocation2 + $0x84] sm:$0xe] }
 0x10f   : > { %v2260_v24 = vrot.slane %v2259_v45, 4  ;;  %v7895_v39 = vcombine.low %v2540_v15, %v2543_v2  ;;  %v1090_v31 = vshll.u32 %v9507_v10, 16  ;;  %v1047_v6 = vshrl.u32 %v775_v29, 16  ;;  %v9522_v49 = vpop.permute.xlu1 %2884  ;;  %v1200_v53 = vld [vmem:[#allocation2 + $0x78] sm:$0xe] }
 0x110   : > { %v1077_v32 = vor.u32 %v1076_v60, %v1073_v57  ;;  %v1082_v50 = vrot.slane %v1080_v48, 5  ;;  %v1086_v46 = vrot.slane %v1084_v27, 4  ;;  %v1050_v33 = vshll.u32 %v775_v29, 16  ;;  %v9524_v57 = vpop.permute.xlu0 %2962 }
 0x111   : > { %v2265_v56 = vsel %vm8646_vm11, %v2260_v24, %v2264_v58  ;;  %v1092_v20 = vrot.slane %v1090_v31, 5  ;;  %v1049_v25 = vrot.slane %v1047_v6, 4  ;;  %v1056_v22 = vshll.u32 %v776_v12, 16  ;;  %v304_v6 = vld [vmem:[%s8624_s23 + $0x58] sm:$0xf] }
 0x112   : > { %v7879_v30 = vcombine.low %v2255_v41, %v2265_v56  ;;  %3306 = vrot.lane.b32.xlu0 %v7894_v13, %s8456_s29  ;;  %v1078_v19 = vrot.slane %v1077_v32, 4  ;;  %v1087_v21 = vor.u32 %v1086_v46, %v1082_v50  ;;  %v1052_v8 = vrot.slane %v1050_v33, 5  ;;  %v305_v46 = vld [vmem:[%s8624_s23 + $0x5c] sm:$0xf] }
 0x113   : > { %v1058_v9 = vrot.slane %v1056_v22, 5  ;;  %v1060_v47 = vshrl.u32 %v776_v12, 16  ;;  %v1066_v42 = vshll.u32 %v797_v40, 16  ;;  %v3476_v55 = vsel %vm3470_vm3, %v9488_v7, %v9347_v28  ;;  %v9555_v22 = vld [vmem:[#allocation2 + $0x84] sm:$0xf] }
 0x114   : > { %3228 = vrot.lane.b32.xlu1 %v7879_v30, %s8458_s6  ;;  %v1083_v15 = vsel %vm8646_vm11, %v1078_v19, %v1082_v50  ;;  %v1088_v54 = vrot.slane %v1087_v21, 4  ;;  %v1053_v14 = vor.u32 %v1052_v8, %v1049_v25  ;;  %v7721_v29 = vrot.slane %v1201_v0, 9  ;;  %v9559_v21 = vld [vmem:[#allocation2 + $0x88] sm:$0xf] }
 0x115   : > { %v1062_v41 = vrot.slane %v1060_v47, 4  ;;  %v1068_v45 = vrot.slane %v1066_v42, 5  ;;  %v1336_v58 = vrot.slane %v778_v18, 5  ;;  %v1339_v13 = vrot.slane %v9507_v10, 5 }
 0x116   : > { %v1093_v2 = vsel %vm8646_vm11, %v1088_v54, %v1092_v20  ;;  %v1054_v28 = vrot.slane %v1053_v14, 4  ;;  %v7720_v7 = vrot.slane %v1200_v53, 9  ;;  %v1329_v60 = vrot.slane %v776_v12, 5  ;;  %v9546_v12 = vpop.permute.xlu0 %3042 }
 0x117   : > { %v7785_v48 = vcombine.low %v1083_v15, %v1093_v2  ;;  %v1063_v27 = vor.u32 %v1062_v41, %v1058_v9  ;;  %v1337_v24 = vsel %vm8626_vm7, %v7721_v29, %v1336_v58  ;;  %v1338_v31 = vrot.slane %v1336_v58, 4  ;;  %v720_v15 = vld [vmem:[#allocation2 + $0x90] sm:$0xf]  ;;  %v1411_v41 = vld [vmem:[#allocation2 + $0x8c] sm:$0x1] }
 0x118   : > { %3308 = vrot.lane.b32.xlu1 %v7895_v39, %s8456_s29  ;;  %v1059_v18 = vsel %vm8646_vm11, %v1054_v28, %v1058_v9  ;;  %v1330_v10 = vsel %vm8626_vm7, %v7720_v7, %v1329_v60  ;;  %v1331_v32 = vrot.slane %v1329_v60, 4  ;;  %v1332_v50 = vrot.slane %v797_v40, 5  ;;  %v9544_v33 = vpop.permute.xlu1 %2964  ;;  %v724_v7 = vld [vmem:[#allocation2 + $0x98] sm:$0x1] }
 0x119   : > { %v1064_v56 = vrot.slane %v1063_v27, 4  ;;  %v1340_v20 = vsel %vm8626_vm7, %v1338_v31, %v1339_v13  ;;  %v3511_v39 = vsel %vm3503_vm8, %v9498_v61, %v9413_v63  ;;  %v3509_v25 = vsel %vm3503_vm8, %v3476_v55, %v9380_v11  ;;  %v1811_v31 = vld [vmem:[#allocation2 + $0x84] sm:$0xe] }
 0x11a   : > { %v7801_v0 = vcombine.low %v1337_v24, %v1340_v20  ;;  %v1333_v40 = vsel %vm8626_vm7, %v1331_v32, %v1332_v50  ;;  %v505_v30 = vshrl.u32 %v304_v6, 16  ;;  %v508_v19 = vshll.u32 %v304_v6, 16  ;;  %v9574_v60 = vpop.permute.xlu0 %3138 }
 0x11b   : > { %v1069_v8 = vsel %vm8646_vm11, %v1064_v56, %v1068_v45  ;;  %v7800_v9 = vcombine.low %v1330_v10, %v1333_v40  ;;  %v513_v47 = vshrl.u32 %v305_v46, 16  ;;  %v516_v42 = vshll.u32 %v305_v46, 16 }
 0x11c   : > { %2720 = vrot.lane.b32.xlu1 %v7785_v48, %s8452_s25  ;;  %v7784_v63 = vcombine.low %v1059_v18, %v1069_v8  ;;  %v507_v11 = vrot.slane %v505_v30, 7  ;;  %v1658_v61 = vshrl.u32 %v9555_v22, 16  ;;  %v1661_v55 = vshll.u32 %v9555_v22, 16  ;;  %v9571_v45 = vpop.permute.xlu1 %3044  ;;  %v307_v30 = vld [vmem:[%s8624_s23 + $0x64] sm:$0xf] }
 0x11d   : > { %v515_v53 = vrot.slane %v513_v47, 7  ;;  %v1671_v54 = vshrl.u32 %v9559_v21, 16  ;;  %v7816_v14 = vcombine.low %v9555_v22, %v9559_v21  ;;  %v3544_v29 = vsel %vm3536_vm6, %v3511_v39, %v9429_v62  ;;  %v306_v39 = vld [vmem:[%s8624_s23 + $0x60] sm:$0xf] }
 0x11e   : > { %2718 = vrot.lane.b32.xlu0 %v7784_v63, %s8452_s25  ;;  %v510_v58 = vor.u32 %v508_v19, %v507_v11  ;;  %v511_v13 = vrot.slane %v507_v11, 4  ;;  %v1660_v2 = vrot.slane %v1658_v61, 4  ;;  %v1663_v28 = vrot.slane %v1661_v55, 5 }
 0x11f   : > { %v518_v48 = vor.u32 %v516_v42, %v515_v53  ;;  %v3542_v27 = vsel %vm3536_vm6, %v3509_v25, %v9415_v26  ;;  %v520_v24 = vrot.slane %v515_v53, 4  ;;  %v1667_v62 = vshll.u32 %v9559_v21, 16 }
 0x120   : > { %2800 = vrot.lane.b32.xlu1 %v7801_v0, %s8451_s24  ;;  %v721_v6 = vsel %vm8640_vm10, %v510_v58, %v720_v15  ;;  %v1664_v18 = vor.u32 %v1663_v28, %v1660_v2  ;;  %v1673_v10 = vrot.slane %v1671_v54, 4  ;;  %v1677_v32 = vshll.u32 %v1411_v41, 16 }
 0x121   : > { %v519_v50 = vsel %vm8654_vm12, %v511_v13, %v518_v48  ;;  %722 = vst [vmem:[#allocation2 + $0x90] sm:$0xf] %v721_v6  ;;  %v725_v26 = vsel %vm8670_vm13, %v520_v24, %v724_v7  ;;  %v1669_v46 = vrot.slane %v1667_v62, 5  ;;  %v12559_v56 = vcombine.low %v8912_v59, %v8928_v38 }
 0x122   : > { %2798 = vrot.lane.b32.xlu0 %v7800_v9, %s8451_s24  ;;  %723 = vst.msk [vmem:[#allocation2 + $0x94] sm:$0xf] %vm226_vm0, %v519_v50  ;;  %726 = vst [vmem:[#allocation2 + $0x98] sm:$0x1] %v725_v26  ;;  %v1665_v25 = vrot.slane %v1664_v18, 4  ;;  %v1679_v22 = vrot.slane %v1677_v32, 5  ;;  %v3575_v0 = vsel %vm3569_vm4, %v3542_v27, %v9431_v35  ;;  %v12560_v59 = vcombine.low %v8946_v37, %v8956_v51 }
 0x123   : > { %v3337_v20 = vsel %vm3322_vm14, %v12559_v56, %v9457_v3  ;;  %v7736_v40 = vrot.slane %v1811_v31, 9  ;;  %v1674_v19 = vor.u32 %v1673_v10, %v1669_v46  ;;  %v1937_v8 = vrot.slane %v9559_v21, 5  ;;  %8233 = vmatprep.mubr.msk.bf16.mxu0 %vm3624_vm5, %v3575_v0  ;;  %v9604_v3 = vpop.permute.xlu1 %3140  ;;  %v9610_v21 = vpop.permute.xlu0 %3218  ;;  %v727_v32 = vld [vmem:[#allocation2 + $0x9c] sm:$0xf] }
 0x124   : > { %v1940_v47 = vrot.slane %v1411_v41, 5  ;;  %v3340_v38 = vsel %vm3322_vm14, %v12560_v59, %v9490_v17  ;;  %v1670_v9 = vsel %vm8646_vm11, %v1665_v25, %v1669_v46  ;;  %v3577_v35 = vsel %vm3569_vm4, %v3544_v29, %v9459_v43 }
 0x125   : > { %v522_v42 = vshrl.u32 %v306_v39, 16  ;;  %v525_v63 = vshll.u32 %v306_v39, 16  ;;  %v1675_v11 = vrot.slane %v1674_v19, 4  ;;  %v1938_v61 = vsel %vm8626_vm7, %v7736_v40, %v1937_v8  ;;  %8234 = vmatmul.mubr.msk.bf16.gmra.mrb[4].mxu0 %vm3624_vm5, %v3577_v35 }
 0x126   : > { %v1939_v55 = vrot.slane %v1937_v8, 4  ;;  %v530_v37 = vshrl.u32 %v307_v30, 16  ;;  %2894 = vrot.lane.b32.xlu0 %v7816_v14, %s8453_s26  ;;  %v533_v17 = vshll.u32 %v307_v30, 16  ;;  %v3383_v53 = vsel %vm12525_vm15, %v3340_v38, %v9509_v4 }
 0x127   : > { %v524_v51 = vrot.slane %v522_v42, 7  ;;  %v3381_v43 = vsel %vm12525_vm15, %v3337_v20, %v9492_v52  ;;  %v1680_v15 = vsel %vm8646_vm11, %v1675_v11, %v1679_v22  ;;  %v9628_v41 = vsel %vm12524_vm1, %v3383_v53, %v9522_v49  ;;  %v9635_v31 = vpop.permute.xlu1 %3220  ;;  %v9638_v50 = vpop.permute.xlu0 %3298 }
 0x128   : > { %v1941_v54 = vsel %vm8626_vm7, %v1939_v55, %v1940_v47  ;;  %v9624_v29 = vrot.slane %v530_v37, 7  ;;  %v1391_v14 = vld [vmem:[#allocation2 + $0x90] sm:$0xf]  ;;  %v7832_v58 = vcombine.low %v1670_v9, %v1680_v15  ;;  %v9633_v62 = vsel %vm12524_vm1, %v3381_v43, %v9511_v23 }
 0x129   : > { %v1812_v13 = vld [vmem:[#allocation2 + $0x90] sm:$0xe]  ;;  %v7848_v2 = vcombine.low %v1938_v61, %v1941_v54  ;;  %v527_v4 = vor.u32 %v525_v63, %v524_v51  ;;  %v528_v28 = vrot.slane %v524_v51, 4  ;;  %v1392_v7 = vld [vmem:[#allocation2 + $0x94] sm:$0xf]  ;;  %v1682_v52 = vshrl.u32 %v1391_v14, 16 }
 0x12a   : > { %v1685_v48 = vshll.u32 %v1391_v14, 16  ;;  %v1412_v27 = vld [vmem:[#allocation2 + $0x98] sm:$0x1]  ;;  %v535_v24 = vor.u32 %v533_v17, %v9624_v29  ;;  %v1695_v49 = vshrl.u32 %v1392_v7, 16  ;;  %v7817_v6 = vcombine.low %v1391_v14, %v1392_v7  ;;  %2974 = vrot.lane.b32.xlu0 %v7832_v58, %s8457_s30  ;;  %v1998_v39 = vld [vmem:[#allocation2 + $0x90] sm:$0xf] }
 0x12b   : > { %v1691_v18 = vshll.u32 %v1392_v7, 16  ;;  %v1701_v10 = vshll.u32 %v1412_v27, 16  ;;  %v1684_v26 = vrot.slane %v1682_v52, 4  ;;  %v7737_v56 = vrot.slane %v1812_v13, 9  ;;  %v1999_v40 = vld [vmem:[#allocation2 + $0x94] sm:$0xf]  ;;  %v9653_v51 = vpop.permute.xlu1 %2710  ;;  %v9656_v14 = vpop.permute.xlu0 %3300 }
 0x12c   : > { %v1687_v46 = vrot.slane %v1685_v48, 5  ;;  %v1944_v20 = vrot.slane %v1392_v7, 5  ;;  %2896 = vrot.lane.b32.xlu1 %v7817_v6, %s8453_s26  ;;  %v1697_v25 = vrot.slane %v1695_v49, 4  ;;  %v1947_v0 = vrot.slane %v1412_v27, 5  ;;  %v2020_v55 = vld [vmem:[#allocation2 + $0x98] sm:$0x1] }
 0x12d   : > { %v1693_v23 = vrot.slane %v1691_v18, 5  ;;  %v1703_v22 = vrot.slane %v1701_v10, 5  ;;  %v536_v47 = vsel %vm8654_vm12, %v528_v28, %v535_v24  ;;  %v728_v38 = vsel %vm8640_vm10, %v527_v4, %v727_v32  ;;  %v2420_v37 = vld [vmem:[#allocation2 + $0x90] sm:$0xe]  ;;  %v731_v54 = vld [vmem:[#allocation2 + $0xa4] sm:$0x1] }
 0x12e   : > { %v1688_v30 = vor.u32 %v1687_v46, %v1684_v26  ;;  %v9643_v19 = vsel %vm8626_vm7, %v7737_v56, %v1944_v20  ;;  %v1946_v8 = vrot.slane %v1944_v20, 4  ;;  %3054 = vrot.lane.b32.xlu0 %v7848_v2, %s8455_s28  ;;  %730 = vst.msk [vmem:[#allocation2 + $0xa0] sm:$0xf] %vm226_vm0, %v536_v47  ;;  %v2267_v9 = vshrl.u32 %v1998_v39, 16  ;;  %729 = vst [vmem:[#allocation2 + $0x9c] sm:$0xf] %v728_v38 }
 0x12f   : > { %v1698_v59 = vor.u32 %v1697_v25, %v1693_v23  ;;  %v2270_v35 = vshll.u32 %v1998_v39, 16  ;;  %v2280_v11 = vshrl.u32 %v1999_v40, 16  ;;  %v7864_v61 = vcombine.low %v1998_v39, %v1999_v40 }
 0x130   : > { %v1689_v42 = vrot.slane %v1688_v30, 4  ;;  %v1948_v63 = vsel %vm8626_vm7, %v1946_v8, %v1947_v0  ;;  %v2269_v43 = vrot.slane %v2267_v9, 4  ;;  %v537_v13 = vrot.slane %v9624_v29, 4  ;;  %v9685_v30 = vpop.permute.xlu0 %2790 }
 0x131   : > { %v1699_v17 = vrot.slane %v1698_v59, 4  ;;  %v7849_v53 = vcombine.low %v9643_v19, %v1948_v63  ;;  %v2272_v15 = vrot.slane %v2270_v35, 5  ;;  %v2276_v2 = vshll.u32 %v1999_v40, 16 }
 0x132   : > { %v1694_v58 = vsel %vm8646_vm11, %v1689_v42, %v1693_v23  ;;  %v2282_v4 = vrot.slane %v2280_v11, 4  ;;  %3150 = vrot.lane.b32.xlu0 %v7864_v61, %s8454_s27  ;;  %v2286_v52 = vshll.u32 %v2020_v55, 16  ;;  %v7752_v48 = vrot.slane %v2420_v37, 9  ;;  %v9677_v23 = vpop.permute.xlu1 %2712 }
 0x133   : > { %v1704_v28 = vsel %vm8646_vm11, %v1699_v17, %v1703_v22  ;;  %v2273_v7 = vor.u32 %v2272_v15, %v2269_v43  ;;  %v732_v24 = vsel %vm8670_vm13, %v537_v13, %v731_v54  ;;  %v2278_v49 = vrot.slane %v2276_v2, 5 }
 0x134   : > { %v7833_v27 = vcombine.low %v1694_v58, %v1704_v28  ;;  %v2546_v6 = vrot.slane %v1999_v40, 5  ;;  %733 = vst [vmem:[#allocation2 + $0xa4] sm:$0x1] %v732_v24  ;;  %v2288_v10 = vrot.slane %v2286_v52, 5  ;;  %v2549_v29 = vrot.slane %v2020_v55, 5 }
 0x135   : > { %v2274_v18 = vrot.slane %v2273_v7, 4  ;;  %v3449_v32 = vsel %vm3437_vm2, %v9628_v41, %v9544_v33  ;;  %v2001_v26 = vld [vmem:[#allocation2 + $0xa0] sm:$0xf]  ;;  %v2283_v46 = vor.u32 %v2282_v4, %v2278_v49  ;;  %v9675_v39 = vsel %vm3437_vm2, %v9633_v62, %v9524_v57  ;;  %v2000_v25 = vld [vmem:[#allocation2 + $0x9c] sm:$0xf] }
 0x136   : > { %2976 = vrot.lane.b32.xlu1 %v7833_v27, %s8457_s30  ;;  %v2547_v56 = vsel %vm8626_vm7, %v7752_v48, %v2546_v6  ;;  %v2548_v20 = vrot.slane %v2546_v6, 4  ;;  %v2304_v22 = vshrl.u32 %v2001_v26, 16  ;;  %v2300_v0 = vshll.u32 %v2001_v26, 16  ;;  %v2421_v41 = vld [vmem:[#allocation2 + $0x9c] sm:$0xe]  ;;  %v9700_v4 = vpop.permute.xlu1 %2792  ;;  %v9704_v27 = vpop.permute.xlu0 %2886 }
 0x137   : > { %v2279_v33 = vsel %vm8646_vm11, %v2274_v18, %v2278_v49  ;;  %v9683_v40 = vsel %vm3470_vm3, %v3449_v32, %v9571_v45  ;;  %v2291_v19 = vshrl.u32 %v2000_v25, 16  ;;  %v2294_v8 = vshll.u32 %v2000_v25, 16  ;;  %v781_v35 = vld [vmem:[#allocation2 + $0x9c] sm:$0xf]  ;;  %v9692_v61 = vld [vmem:[#allocation2 + $0xa0] sm:$0xf] }
 0x138   : > { %v7865_v47 = vcombine.low %v2000_v25, %v2001_v26  ;;  %v2284_v57 = vrot.slane %v2283_v46, 4  ;;  %v2302_v62 = vrot.slane %v2300_v0, 5  ;;  %v2306_v59 = vrot.slane %v2304_v22, 4  ;;  %v780_v0 = vld [vmem:[#allocation2 + $0x94] sm:$0xf] }
 0x139   : > { %v7753_v38 = vrot.slane %v2421_v41, 9  ;;  %v2553_v9 = vrot.slane %v2001_v26, 5  ;;  %v2293_v42 = vrot.slane %v2291_v19, 4  ;;  %v2296_v63 = vrot.slane %v2294_v8, 5 }
 0x13a   : > { %3056 = vrot.lane.b32.xlu1 %v7849_v53, %s8455_s28  ;;  %v2289_v11 = vsel %vm8646_vm11, %v2284_v57, %v2288_v10  ;;  %v2550_v45 = vsel %vm8626_vm7, %v2548_v20, %v2549_v29  ;;  %v2307_v55 = vor.u32 %v2306_v59, %v2302_v62  ;;  %v1119_v13 = vshrl.u32 %v781_v35, 16  ;;  %v779_v10 = vld [vmem:[#allocation2 + $0x90] sm:$0xf] }
 0x13b   : > { %v7880_v37 = vcombine.low %v2279_v33, %v2289_v11  ;;  %v9696_v17 = vsel %vm8626_vm7, %v7753_v38, %v2553_v9  ;;  %v2555_v43 = vrot.slane %v2553_v9, 4  ;;  %v2021_v15 = vld [vmem:[#allocation2 + $0xa4] sm:$0x1]  ;;  %v2297_v54 = vor.u32 %v2296_v63, %v2293_v42  ;;  %v799_v33 = vld [vmem:[#allocation2 + $0x98] sm:$0x1] }
 0x13c   : > { %v7896_v53 = vcombine.low %v2547_v56, %v2550_v45  ;;  %v9698_v58 = vld [vmem:[#allocation2 + $0xa4] sm:$0x1]  ;;  %v1122_v2 = vshll.u32 %v781_v35, 16  ;;  %v2308_v28 = vrot.slane %v2307_v55, 4  ;;  %v2310_v7 = vshll.u32 %v2021_v15, 16  ;;  %v9720_v55 = vpop.permute.xlu0 %2966 }
 0x13d   : > { %3230 = vrot.lane.b32.xlu0 %v7880_v37, %s8458_s6  ;;  %v2556_v52 = vrot.slane %v2021_v15, 5  ;;  %v1128_v48 = vshll.u32 %v9692_v61, 16  ;;  %v2298_v24 = vrot.slane %v2297_v54, 4  ;;  %v1121_v49 = vrot.slane %v1119_v13, 4  ;;  %v1203_v45 = vld [vmem:[#allocation2 + $0x9c] sm:$0xe] }
 0x13e   : > { %3152 = vrot.lane.b32.xlu1 %v7865_v47, %s8454_s27  ;;  %v1124_v6 = vrot.slane %v1122_v2, 5  ;;  %v1132_v18 = vshrl.u32 %v9692_v61, 16  ;;  %v2312_v29 = vrot.slane %v2310_v7, 5  ;;  %v1138_v46 = vshll.u32 %v9698_v58, 16  ;;  %v1202_v54 = vld [vmem:[#allocation2 + $0x90] sm:$0xe] }
 0x13f   : > { %v2557_v32 = vsel %vm8626_vm7, %v2555_v43, %v2556_v52  ;;  %v1130_v26 = vrot.slane %v1128_v48, 5  ;;  %v2303_v56 = vsel %vm8646_vm11, %v2298_v24, %v2302_v62  ;;  %v1353_v8 = vrot.slane %v9698_v58, 5  ;;  %v9718_v62 = vpop.permute.xlu1 %2888 }
 0x140   : > { %v7897_v20 = vcombine.low %v9696_v17, %v2557_v32  ;;  %v1125_v25 = vor.u32 %v1124_v6, %v1121_v49  ;;  %v1134_v22 = vrot.slane %v1132_v18, 4  ;;  %v2313_v41 = vsel %vm8646_vm11, %v2308_v28, %v2312_v29 }
 0x141   : > { %3310 = vrot.lane.b32.xlu0 %v7896_v53, %s8456_s29  ;;  %v1140_v19 = vrot.slane %v1138_v46, 5  ;;  %v1095_v47 = vshrl.u32 %v779_v10, 16  ;;  %v7881_v57 = vcombine.low %v2303_v56, %v2313_v41  ;;  %v1098_v9 = vshll.u32 %v779_v10, 16  ;;  %v308_v10 = vld [vmem:[%s8624_s23 + $0x68] sm:$0xf] }
 0x142   : > { %v1126_v59 = vrot.slane %v1125_v25, 4  ;;  %v1135_v38 = vor.u32 %v1134_v22, %v1130_v26  ;;  %v1104_v42 = vshll.u32 %v780_v0, 16  ;;  %v1108_v63 = vshrl.u32 %v780_v0, 16  ;;  %v9745_v22 = vpop.permute.xlu0 %3046  ;;  %v9751_v41 = vld [vmem:[#allocation2 + $0x9c] sm:$0xf] }
 0x143   : > { %v1097_v35 = vrot.slane %v1095_v47, 4  ;;  %v1114_v11 = vshll.u32 %v799_v33, 16  ;;  %3232 = vrot.lane.b32.xlu1 %v7881_v57, %s8458_s6  ;;  %v1100_v43 = vrot.slane %v1098_v9, 5  ;;  %v1346_v15 = vrot.slane %v799_v33, 5 }
 0x144   : > { %v1131_v37 = vsel %vm8646_vm11, %v1126_v59, %v1130_v26  ;;  %v1136_v17 = vrot.slane %v1135_v38, 4  ;;  %v1106_v53 = vrot.slane %v1104_v42, 5  ;;  %v1110_v58 = vrot.slane %v1108_v63, 4  ;;  %v734_v63 = vld [vmem:[#allocation2 + $0xa8] sm:$0xf] }
 0x145   : > { %v1116_v13 = vrot.slane %v1114_v11, 5  ;;  %v3480_v2 = vsel %vm3470_vm3, %v9675_v39, %v9546_v12  ;;  %v1101_v7 = vor.u32 %v1100_v43, %v1097_v35  ;;  %v7723_v52 = vrot.slane %v1203_v45, 9  ;;  %v309_v39 = vld [vmem:[%s8624_s23 + $0x6c] sm:$0xf]  ;;  %v9739_v46 = vpop.permute.xlu1 %2968 }
 0x146   : > { %v1141_v28 = vsel %vm8646_vm11, %v1136_v17, %v1140_v19  ;;  %v1350_v48 = vrot.slane %v9692_v61, 5  ;;  %v1111_v49 = vor.u32 %v1110_v58, %v1106_v53  ;;  %v7722_v6 = vrot.slane %v1202_v54, 9  ;;  %v9753_v19 = vld [vmem:[#allocation2 + $0xa0] sm:$0xf] }
 0x147   : > { %v7787_v24 = vcombine.low %v1131_v37, %v1141_v28  ;;  %v1343_v18 = vrot.slane %v780_v0, 5  ;;  %3312 = vrot.lane.b32.xlu1 %v7897_v20, %s8456_s29  ;;  %v1102_v29 = vrot.slane %v1101_v7, 4  ;;  %v3515_v12 = vsel %vm3503_vm8, %v9683_v40, %v9604_v3 }
 0x148   : > { %v1351_v32 = vsel %vm8626_vm7, %v7723_v52, %v1350_v48  ;;  %v1352_v26 = vrot.slane %v1350_v48, 4  ;;  %v1112_v61 = vrot.slane %v1111_v49, 4  ;;  %v3513_v20 = vsel %vm3503_vm8, %v3480_v2, %v9574_v60  ;;  %v738_v52 = vld [vmem:[#allocation2 + $0xb0] sm:$0x1]  ;;  %v1813_v48 = vld [vmem:[#allocation2 + $0x9c] sm:$0xe] }
 0x149   : > { %v1344_v56 = vsel %vm8626_vm7, %v7722_v6, %v1343_v18  ;;  %v1345_v25 = vrot.slane %v1343_v18, 4  ;;  %v1107_v0 = vsel %vm8646_vm11, %v1102_v29, %v1106_v53  ;;  %v539_v3 = vshrl.u32 %v308_v10, 16  ;;  %v1413_v53 = vld [vmem:[#allocation2 + $0xa4] sm:$0x1]  ;;  %v9768_v58 = vpop.permute.xlu1 %3048 }
 0x14a   : > { %v1354_v33 = vsel %vm8626_vm7, %v1352_v26, %v1353_v8  ;;  %v542_v40 = vshll.u32 %v308_v10, 16  ;;  %v1117_v47 = vsel %vm8646_vm11, %v1112_v61, %v1116_v13  ;;  %v547_v59 = vshrl.u32 %v309_v39, 16  ;;  %v8387_v26 = vld [vmem:[#allocation2 + $0x4c] sm:$0xf] }
 0x14b   : > { %v7803_v57 = vcombine.low %v1351_v32, %v1354_v33  ;;  %v1347_v60 = vsel %vm8626_vm7, %v1345_v25, %v1346_v15  ;;  %2724 = vrot.lane.b32.xlu1 %v7787_v24, %s8452_s25  ;;  %v7786_v38 = vcombine.low %v1107_v0, %v1117_v47  ;;  %v541_v35 = vrot.slane %v539_v3, 7  ;;  %v9772_v24 = vpop.permute.xlu0 %3142  ;;  %v8386_v32 = vld [vmem:[#allocation2 + $0x48] sm:$0xf] }
 0x14c   : > { %v7802_v9 = vcombine.low %v1344_v56, %v1347_v60  ;;  %v550_v8 = vshll.u32 %v309_v39, 16  ;;  %v549_v42 = vrot.slane %v547_v59, 7  ;;  %v1706_v11 = vshrl.u32 %v9751_v41, 16  ;;  %v8388_v60 = vld [vmem:[#allocation2 + $0x54] sm:$0xf] }
 0x14d   : > { %v1709_v45 = vshll.u32 %v9751_v41, 16  ;;  %v1719_v37 = vshrl.u32 %v9753_v19, 16  ;;  %2722 = vrot.lane.b32.xlu0 %v7786_v38, %s8452_s25  ;;  %v544_v17 = vor.u32 %v542_v40, %v541_v35  ;;  %v545_v43 = vrot.slane %v541_v35, 4  ;;  %v8389_v59 = vld [vmem:[#allocation2 + $0x58] sm:$0xf] }
 0x14e   : > { %v7818_v15 = vcombine.low %v9751_v41, %v9753_v19  ;;  %v3548_v54 = vsel %vm3536_vm6, %v3515_v12, %v9635_v31  ;;  %v552_v13 = vor.u32 %v550_v8, %v549_v42  ;;  %v1708_v2 = vrot.slane %v1706_v11, 4  ;;  %v311_v41 = vld [vmem:[%s8624_s23 + $0x74] sm:$0xf] }
 0x14f   : > { %v1711_v28 = vrot.slane %v1709_v45, 5  ;;  %v3546_v7 = vsel %vm3536_vm6, %v3513_v20, %v9610_v21  ;;  %2804 = vrot.lane.b32.xlu1 %v7803_v57, %s8451_s24  ;;  %v735_v49 = vsel %vm8640_vm10, %v544_v17, %v734_v63  ;;  %v554_v6 = vrot.slane %v549_v42, 4  ;;  %v9787_v20 = vld [vmem:[%s8624_s23 + $0x70] sm:$0xf]  ;;  %v9804_v42 = vpop.permute.xlu0 %3222 }
 0x150   : > { %v1715_v31 = vshll.u32 %v9753_v19, 16  ;;  %v1721_v18 = vrot.slane %v1719_v37, 4  ;;  %v553_v10 = vsel %vm8654_vm12, %v545_v43, %v552_v13  ;;  %736 = vst [vmem:[#allocation2 + $0xa8] sm:$0xf] %v735_v49  ;;  %v1725_v21 = vshll.u32 %v1413_v53, 16 }
 0x151   : > { %v1712_v29 = vor.u32 %v1711_v28, %v1708_v2  ;;  %v7764_v12 = vcombine.low %v8386_v32, %v8387_v26  ;;  %2802 = vrot.lane.b32.xlu0 %v7802_v9, %s8451_s24  ;;  %737 = vst.msk [vmem:[#allocation2 + $0xac] sm:$0xf] %vm226_vm0, %v553_v10  ;;  %v739_v39 = vsel %vm8670_vm13, %v554_v6, %v738_v52  ;;  %v7738_v25 = vrot.slane %v1813_v48, 9  ;;  %v9796_v9 = vpop.permute.xlu1 %3144 }
 0x152   : > { %v1717_v61 = vrot.slane %v1715_v31, 5  ;;  %v3579_v56 = vsel %vm3569_vm4, %v3546_v7, %v9638_v50  ;;  %740 = vst [vmem:[#allocation2 + $0xb0] sm:$0x1] %v739_v39  ;;  %v1727_v33 = vrot.slane %v1725_v21, 5  ;;  %v1951_v40 = vrot.slane %v9753_v19, 5 }
 0x153   : > { %v1713_v0 = vrot.slane %v1712_v29, 4  ;;  %v3343_v3 = vsel %vm3322_vm14, %v7764_v12, %v9653_v51  ;;  %8237 = vmatprep.mubr.msk.bf16.mxu0 %vm3624_vm5, %v3579_v56  ;;  %v1954_v57 = vrot.slane %v1413_v53, 5  ;;  %v7765_v38 = vcombine.low %v8388_v60, %v8389_v59 }
 0x154   : > { %v1722_v47 = vor.u32 %v1721_v18, %v1717_v61  ;;  %v3581_v50 = vsel %vm3569_vm4, %v3548_v54, %v9656_v14  ;;  %v1952_v51 = vsel %vm8626_vm7, %v7738_v25, %v1951_v40  ;;  %v1953_v19 = vrot.slane %v1951_v40, 4 }
 0x155   : > { %v1718_v35 = vsel %vm8646_vm11, %v1713_v0, %v1717_v61  ;;  %v556_v8 = vshrl.u32 %v9787_v20, 16  ;;  %8238 = vmatmul.mubr.msk.bf16.gmra.mrb[8].mxu0 %vm3624_vm5, %v3581_v50  ;;  %2898 = vrot.lane.b32.xlu0 %v7818_v15, %s8453_s26  ;;  %v3346_v14 = vsel %vm3322_vm14, %v7765_v38, %v9677_v23  ;;  %v559_v11 = vshll.u32 %v9787_v20, 16  ;;  %v9824_v21 = vpop.permute.xlu1 %3224  ;;  %v9827_v61 = vpop.permute.xlu0 %3302 }
 0x156   : > { %v1723_v63 = vrot.slane %v1722_v47, 4  ;;  %v564_v45 = vshrl.u32 %v311_v41, 16  ;;  %v1955_v37 = vsel %vm8626_vm7, %v1953_v19, %v1954_v57  ;;  %v567_v43 = vshll.u32 %v311_v41, 16 }
 0x157   : > { %v558_v17 = vrot.slane %v556_v8, 7  ;;  %v9814_v54 = vsel %vm12525_vm15, %v3346_v14, %v9700_v4  ;;  %v1395_v53 = vld [vmem:[#allocation2 + $0xa8] sm:$0xf]  ;;  %v7850_v2 = vcombine.low %v1952_v51, %v1955_v37  ;;  %v9822_v23 = vsel %vm12525_vm15, %v3343_v3, %v9685_v30 }
 0x158   : > { %v1728_v15 = vsel %vm8646_vm11, %v1723_v63, %v1727_v33  ;;  %v1814_v13 = vld [vmem:[#allocation2 + $0xa8] sm:$0xe]  ;;  %v9818_v28 = vrot.slane %v564_v45, 7  ;;  %v1396_v7 = vld [vmem:[#allocation2 + $0xac] sm:$0xf]  ;;  %v1730_v52 = vshrl.u32 %v1395_v53, 16 }
 0x159   : > { %v1733_v48 = vshll.u32 %v1395_v53, 16  ;;  %v7834_v49 = vcombine.low %v1718_v35, %v1728_v15  ;;  %v7739_v6 = vrot.slane %v1814_v13, 9  ;;  %v1743_v31 = vshrl.u32 %v1396_v7, 16  ;;  %v1414_v18 = vld [vmem:[#allocation2 + $0xb0] sm:$0x1] }
 0x15a   : > { %v7819_v4 = vcombine.low %v1395_v53, %v1396_v7  ;;  %v1739_v10 = vshll.u32 %v1396_v7, 16  ;;  %v1958_v29 = vrot.slane %v1396_v7, 5  ;;  %v1732_v32 = vrot.slane %v1730_v52, 4  ;;  %v2002_v30 = vld [vmem:[#allocation2 + $0xa8] sm:$0xf] }
 0x15b   : > { %v1735_v26 = vrot.slane %v1733_v48, 5  ;;  %v1749_v12 = vshll.u32 %v1414_v18, 16  ;;  %2978 = vrot.lane.b32.xlu0 %v7834_v49, %s8457_s30  ;;  %v1961_v39 = vrot.slane %v1414_v18, 5  ;;  %v1745_v25 = vrot.slane %v1743_v31, 4  ;;  %v741_v33 = vld [vmem:[#allocation2 + $0xb4] sm:$0xf]  ;;  %v9851_v52 = vpop.permute.xlu0 %2714 }
 0x15c   : > { %2900 = vrot.lane.b32.xlu1 %v7819_v4, %s8453_s26  ;;  %v1741_v56 = vrot.slane %v1739_v10, 5  ;;  %v9832_v20 = vsel %vm8626_vm7, %v7739_v6, %v1958_v29  ;;  %v1960_v0 = vrot.slane %v1958_v29, 4  ;;  %v561_v41 = vor.u32 %v559_v11, %v558_v17  ;;  %v2003_v57 = vld [vmem:[#allocation2 + $0xac] sm:$0xf]  ;;  %v9841_v63 = vld [vmem:[#allocation2 + $0xb0] sm:$0x1] }
 0x15d   : > { %v1736_v3 = vor.u32 %v1735_v26, %v1732_v32  ;;  %v1751_v40 = vrot.slane %v1749_v12, 5  ;;  %v562_v47 = vrot.slane %v558_v17, 4  ;;  %v569_v38 = vor.u32 %v567_v43, %v9818_v28  ;;  %v745_v17 = vld [vmem:[#allocation2 + $0xbc] sm:$0x1]  ;;  %v9845_v43 = vpop.permute.xlu1 %3304  ;;  %v2422_v7 = vld [vmem:[#allocation2 + $0xa8] sm:$0xe] }
 0x15e   : > { %v1746_v60 = vor.u32 %v1745_v25, %v1741_v56  ;;  %v1962_v59 = vsel %vm8626_vm7, %v1960_v0, %v1961_v39  ;;  %v2315_v50 = vshrl.u32 %v2002_v30, 16  ;;  %v742_v19 = vsel %vm8640_vm10, %v561_v41, %v741_v33  ;;  %v9862_v29 = vld [vmem:[#allocation2 + $0xa8] sm:$0xf] }
 0x15f   : > { %v1737_v35 = vrot.slane %v1736_v3, 4  ;;  %v7851_v51 = vcombine.low %v9832_v20, %v1962_v59  ;;  %3058 = vrot.lane.b32.xlu0 %v7850_v2, %s8455_s28  ;;  %v2318_v8 = vshll.u32 %v2002_v30, 16  ;;  %v570_v11 = vsel %vm8654_vm12, %v562_v47, %v569_v38  ;;  %743 = vst [vmem:[#allocation2 + $0xb4] sm:$0xf] %v742_v19 }
 0x160   : > { %v1747_v14 = vrot.slane %v1746_v60, 4  ;;  %v2317_v45 = vrot.slane %v2315_v50, 4  ;;  %v2328_v37 = vshrl.u32 %v2003_v57, 16  ;;  %744 = vst.msk [vmem:[#allocation2 + $0xb8] sm:$0xf] %vm226_vm0, %v570_v11  ;;  %v7866_v13 = vcombine.low %v2002_v30, %v2003_v57  ;;  %v9888_v60 = vpop.permute.xlu0 %2794 }
 0x161   : > { %v1742_v53 = vsel %vm8646_vm11, %v1737_v35, %v1741_v56  ;;  %v2320_v15 = vrot.slane %v2318_v8, 5  ;;  %v571_v2 = vrot.slane %v9818_v28, 4  ;;  %v2324_v49 = vshll.u32 %v2003_v57, 16  ;;  %v9867_v30 = vld [vmem:[#allocation2 + $0xac] sm:$0xf]  ;;  %v9881_v33 = vpop.permute.xlu1 %2716 }
 0x162   : > { %v1752_v48 = vsel %vm8646_vm11, %v1747_v14, %v1751_v40  ;;  %v2330_v6 = vrot.slane %v2328_v37, 4  ;;  %v2334_v31 = vshll.u32 %v9841_v63, 16  ;;  %v3420_v28 = vsel %vm12524_vm1, %v9814_v54, %v9718_v62 }
 0x163   : > { %v7835_v4 = vcombine.low %v1742_v53, %v1752_v48  ;;  %3154 = vrot.lane.b32.xlu0 %v7866_v13, %s8454_s27  ;;  %v746_v18 = vsel %vm8670_vm13, %v571_v2, %v745_v17  ;;  %v2321_v10 = vor.u32 %v2320_v15, %v2317_v45  ;;  %v2326_v32 = vrot.slane %v2324_v49, 5 }
 0x164   : > { %747 = vst [vmem:[#allocation2 + $0xbc] sm:$0x1] %v746_v18  ;;  %v2336_v26 = vrot.slane %v2334_v31, 5  ;;  %v3418_v12 = vsel %vm12524_vm1, %v9822_v23, %v9704_v27  ;;  %v7754_v39 = vrot.slane %v2422_v7, 9  ;;  %v2560_v25 = vrot.slane %v2003_v57, 5 }
 0x165   : > { %2980 = vrot.lane.b32.xlu1 %v7835_v4, %s8457_s30  ;;  %v2322_v56 = vrot.slane %v2321_v10, 4  ;;  %v2563_v20 = vrot.slane %v9841_v63, 5  ;;  %v9873_v62 = vsel %vm3437_vm2, %v3420_v28, %v9739_v46  ;;  %v2331_v54 = vor.u32 %v2330_v6, %v2326_v32  ;;  %v9899_v31 = vpop.permute.xlu1 %2796  ;;  %v9903_v10 = vld [vmem:[#allocation2 + $0xb0] sm:$0x1] }
 0x166   : > { %v9877_v0 = vsel %vm3437_vm2, %v3418_v12, %v9720_v55  ;;  %v1143_v27 = vshrl.u32 %v9862_v29, 16  ;;  %v1146_v23 = vshll.u32 %v9862_v29, 16  ;;  %v2004_v3 = vld [vmem:[#allocation2 + $0xb4] sm:$0xf]  ;;  %v2561_v46 = vsel %vm8626_vm7, %v7754_v39, %v2560_v25  ;;  %v9907_v12 = vpop.permute.xlu0 %2890 }
 0x167   : > { %v2327_v40 = vsel %vm8646_vm11, %v2322_v56, %v2326_v32  ;;  %v2423_v41 = vld [vmem:[#allocation2 + $0xb4] sm:$0xe]  ;;  %v2562_v47 = vrot.slane %v2560_v25, 4  ;;  %v1152_v57 = vshll.u32 %v9867_v30, 16  ;;  %v2005_v55 = vld [vmem:[#allocation2 + $0xb8] sm:$0xf] }
 0x168   : > { %v2339_v59 = vshrl.u32 %v2004_v3, 16  ;;  %v2342_v38 = vshll.u32 %v2004_v3, 16  ;;  %v2332_v50 = vrot.slane %v2331_v54, 4  ;;  %v7755_v35 = vrot.slane %v2423_v41, 9  ;;  %v9911_v54 = vld [vmem:[#allocation2 + $0xb8] sm:$0xf] }
 0x169   : > { %3060 = vrot.lane.b32.xlu1 %v7851_v51, %s8455_s28  ;;  %v2352_v19 = vshrl.u32 %v2005_v55, 16  ;;  %v7867_v8 = vcombine.low %v2004_v3, %v2005_v55  ;;  %v2348_v63 = vshll.u32 %v2005_v55, 16  ;;  %v2567_v14 = vrot.slane %v2005_v55, 5 }
 0x16a   : > { %v2341_v11 = vrot.slane %v2339_v59, 4  ;;  %v2344_v45 = vrot.slane %v2342_v38, 5  ;;  %v2337_v37 = vsel %vm8646_vm11, %v2332_v50, %v2336_v26  ;;  %v2564_v17 = vsel %vm8626_vm7, %v2562_v47, %v2563_v20  ;;  %v9905_v26 = vld [vmem:[#allocation2 + $0xb4] sm:$0xf] }
 0x16b   : > { %v2023_v53 = vld [vmem:[#allocation2 + $0xbc] sm:$0x1]  ;;  %v2350_v15 = vrot.slane %v2348_v63, 5  ;;  %v2354_v13 = vrot.slane %v2352_v19, 4  ;;  %v7882_v2 = vcombine.low %v2327_v40, %v2337_v37  ;;  %v9897_v7 = vsel %vm8626_vm7, %v7755_v35, %v2567_v14 }
 0x16c   : > { %v2345_v51 = vor.u32 %v2344_v45, %v2341_v11  ;;  %v2358_v48 = vshll.u32 %v2023_v53, 16  ;;  %v2569_v49 = vrot.slane %v2567_v14, 4  ;;  %v2570_v6 = vrot.slane %v2023_v53, 5  ;;  %v802_v50 = vld [vmem:[#allocation2 + $0xbc] sm:$0x1]  ;;  %v9924_v45 = vpop.permute.xlu1 %2892 }
 0x16d   : > { %3156 = vrot.lane.b32.xlu1 %v7867_v8, %s8454_s27  ;;  %v2355_v4 = vor.u32 %v2354_v13, %v2350_v15  ;;  %3234 = vrot.lane.b32.xlu0 %v7882_v2, %s8458_s6  ;;  %v7898_v18 = vcombine.low %v2561_v46, %v2564_v17  ;;  %v1145_v28 = vrot.slane %v1143_v27, 4  ;;  %v1148_v32 = vrot.slane %v1146_v23, 5  ;;  %v1204_v11 = vld [vmem:[#allocation2 + $0xa8] sm:$0xe]  ;;  %v1205_v13 = vld [vmem:[#allocation2 + $0xb4] sm:$0xe]  ;;  %v9929_v2 = vpop.permute.xlu0 %2970 }
 0x16e   : > { %v2346_v39 = vrot.slane %v2345_v51, 4  ;;  %v2360_v56 = vrot.slane %v2358_v48, 5  ;;  %v2571_v25 = vsel %vm8626_vm7, %v2569_v49, %v2570_v6  ;;  %v1154_v20 = vrot.slane %v1152_v57, 5 }
 0x16f   : > { %v2356_v3 = vrot.slane %v2355_v4, 4  ;;  %v7899_v40 = vcombine.low %v9897_v7, %v2571_v25  ;;  %v1149_v41 = vor.u32 %v1148_v32, %v1145_v28  ;;  %v1156_v46 = vshrl.u32 %v9867_v30, 16 }
 0x170   : > { %v2351_v27 = vsel %vm8646_vm11, %v2346_v39, %v2350_v15  ;;  %v1162_v23 = vshll.u32 %v9903_v10, 16  ;;  %v1167_v47 = vshrl.u32 %v9905_v26, 16  ;;  %v1170_v55 = vshll.u32 %v9905_v26, 16 }
 0x171   : > { %v2361_v57 = vsel %vm8646_vm11, %v2356_v3, %v2360_v56  ;;  %3314 = vrot.lane.b32.xlu0 %v7898_v18, %s8456_s29  ;;  %v1150_v59 = vrot.slane %v1149_v41, 4  ;;  %v1158_v38 = vrot.slane %v1156_v46, 4  ;;  %v1176_v35 = vshll.u32 %v9911_v54, 16 }
 0x172   : > { %v7883_v19 = vcombine.low %v2351_v27, %v2361_v57  ;;  %v1164_v8 = vrot.slane %v1162_v23, 5  ;;  %v1169_v63 = vrot.slane %v1167_v47, 4  ;;  %v1172_v14 = vrot.slane %v1170_v55, 5  ;;  %v9948_v27 = vld [vmem:[#allocation2 + $0xb8] sm:$0xf] }
 0x173   : > { %v1155_v37 = vsel %vm8646_vm11, %v1150_v59, %v1154_v20  ;;  %v1159_v17 = vor.u32 %v1158_v38, %v1154_v20  ;;  %v1178_v53 = vrot.slane %v1176_v35, 5  ;;  %v1180_v15 = vshrl.u32 %v9911_v54, 16  ;;  %v312_v59 = vld [vmem:[%s8624_s23 + $0x78] sm:$0xf]  ;;  %v9959_v38 = vpop.permute.xlu0 %3050 }
 0x174   : > { %3236 = vrot.lane.b32.xlu1 %v7883_v19, %s8458_s6  ;;  %v1173_v7 = vor.u32 %v1172_v14, %v1169_v63  ;;  %v1186_v51 = vshll.u32 %v802_v50, 16  ;;  %v3486_v48 = vsel %vm3470_vm3, %v9873_v62, %v9768_v58  ;;  %v3484_v49 = vsel %vm3470_vm3, %v9877_v0, %v9745_v22  ;;  %v1397_v22 = vld [vmem:[#allocation2 + $0xb4] sm:$0xf]  ;;  %v9950_v23 = vpop.permute.xlu1 %2972  ;;  %v313_v63 = vld [vmem:[%s8624_s23 + $0x7c] sm:$0xf] }
 0x175   : > { %v1160_v6 = vrot.slane %v1159_v17, 4  ;;  %v1182_v4 = vrot.slane %v1180_v15, 4  ;;  %v7724_v18 = vrot.slane %v1204_v11, 9  ;;  %v1357_v28 = vrot.slane %v9867_v30, 5 }
 0x176   : > { %v1174_v32 = vrot.slane %v1173_v7, 4  ;;  %v1188_v39 = vrot.slane %v1186_v51, 5  ;;  %v1360_v56 = vrot.slane %v9903_v10, 5  ;;  %v7725_v25 = vrot.slane %v1205_v13, 9 }
 0x177   : > { %v1165_v20 = vsel %vm8646_vm11, %v1160_v6, %v1164_v8  ;;  %v1183_v3 = vor.u32 %v1182_v4, %v1178_v53  ;;  %v1358_v58 = vsel %vm8626_vm7, %v7724_v18, %v1357_v28  ;;  %v1359_v62 = vrot.slane %v1357_v28, 4 }
 0x178   : > { %3316 = vrot.lane.b32.xlu1 %v7899_v40, %s8456_s29  ;;  %v7788_v0 = vcombine.low %v1155_v37, %v1165_v20  ;;  %v1179_v41 = vsel %vm8646_vm11, %v1174_v32, %v1178_v53  ;;  %v1364_v10 = vrot.slane %v9911_v54, 5  ;;  %v1367_v46 = vrot.slane %v802_v50, 5  ;;  %v9979_v32 = vpop.permute.xlu1 %3052 }
 0x179   : > { %v1184_v47 = vrot.slane %v1183_v3, 4  ;;  %v1361_v55 = vsel %vm8626_vm7, %v1359_v62, %v1360_v56  ;;  %v3519_v57 = vsel %vm3503_vm8, %v3486_v48, %v9796_v9  ;;  %v3517_v40 = vsel %vm3503_vm8, %v3484_v49, %v9772_v24  ;;  %v9971_v49 = vld [vmem:[#allocation2 + $0xbc] sm:$0x1]  ;;  %v748_v56 = vld [vmem:[#allocation2 + $0xc0] sm:$0xf] }
 0x17a   : > { %2726 = vrot.lane.b32.xlu0 %v7788_v0, %s8452_s25  ;;  %v7804_v50 = vcombine.low %v1358_v58, %v1361_v55  ;;  %v1365_v35 = vsel %vm8626_vm7, %v7725_v25, %v1364_v10  ;;  %v1366_v19 = vrot.slane %v1364_v10, 4  ;;  %v1754_v8 = vshrl.u32 %v1397_v22, 16  ;;  %v9982_v58 = vpop.permute.xlu0 %3146  ;;  %v1815_v10 = vld [vmem:[#allocation2 + $0xb4] sm:$0xe] }
 0x17b   : > { %v1189_v14 = vsel %vm8646_vm11, %v1184_v47, %v1188_v39  ;;  %v1757_v11 = vshll.u32 %v1397_v22, 16  ;;  %v1767_v9 = vshrl.u32 %v9948_v27, 16  ;;  %v7820_v24 = vcombine.low %v1397_v22, %v9948_v27 }
 0x17c   : > { %v7789_v37 = vcombine.low %v1179_v41, %v1189_v14  ;;  %v1368_v17 = vsel %vm8626_vm7, %v1366_v19, %v1367_v46  ;;  %v1756_v53 = vrot.slane %v1754_v8, 4  ;;  %v573_v15 = vshrl.u32 %v312_v59, 16  ;;  %v752_v41 = vld [vmem:[#allocation2 + $0xc8] sm:$0x1] }
 0x17d   : > { %v7805_v13 = vcombine.low %v1365_v35, %v1368_v17  ;;  %v1759_v7 = vrot.slane %v1757_v11, 5  ;;  %v576_v51 = vshll.u32 %v312_v59, 16  ;;  %v581_v48 = vshrl.u32 %v313_v63, 16  ;;  %v8390_v11 = vld [vmem:[#allocation2 + $0x6c] sm:$0xf] }
 0x17e   : > { %2728 = vrot.lane.b32.xlu1 %v7789_v37, %s8452_s25  ;;  %2806 = vrot.lane.b32.xlu0 %v7804_v50, %s8451_s24  ;;  %v575_v6 = vrot.slane %v573_v15, 7  ;;  %v584_v4 = vshll.u32 %v313_v63, 16  ;;  %v3552_v18 = vsel %vm3536_vm6, %v3519_v57, %v9824_v21  ;;  %v3550_v28 = vsel %vm3536_vm6, %v3517_v40, %v9804_v42  ;;  %v9993_v50 = vld [vmem:[#allocation2 + $0xcc] sm:$0xf]  ;;  %v10000_v63 = vld [vmem:[#allocation2 + $0xd0] sm:$0xf] }
 0x17f   : > { %v583_v39 = vrot.slane %v581_v48, 7  ;;  %v1760_v25 = vor.u32 %v1759_v7, %v1756_v53  ;;  %v1763_v20 = vshll.u32 %v9948_v27, 16  ;;  %v1769_v3 = vrot.slane %v1767_v9, 4  ;;  %v8392_v17 = vld [vmem:[#allocation2 + $0x60] sm:$0xf] }
 0x180   : > { %v578_v62 = vor.u32 %v576_v51, %v575_v6  ;;  %v579_v22 = vrot.slane %v575_v6, 4  ;;  %v1773_v0 = vshll.u32 %v9971_v49, 16  ;;  %v3585_v21 = vsel %vm3569_vm4, %v3552_v18, %v9845_v43  ;;  %v8393_v53 = vld [vmem:[#allocation2 + $0x64] sm:$0xf]  ;;  %v10012_v51 = vpop.permute.xlu0 %3226 }
 0x181   : > { %v586_v42 = vor.u32 %v584_v4, %v583_v39  ;;  %v1761_v46 = vrot.slane %v1760_v25, 4  ;;  %v1765_v47 = vrot.slane %v1763_v20, 5  ;;  %v588_v55 = vrot.slane %v583_v39, 4 }
 0x182   : > { %2808 = vrot.lane.b32.xlu1 %v7805_v13, %s8451_s24  ;;  %2902 = vrot.lane.b32.xlu0 %v7820_v24, %s8453_s26  ;;  %v749_v57 = vsel %vm8640_vm10, %v578_v62, %v748_v56  ;;  %v1775_v40 = vrot.slane %v1773_v0, 5  ;;  %v3583_v59 = vsel %vm3569_vm4, %v3550_v28, %v9827_v61  ;;  %v7740_v8 = vrot.slane %v1815_v10, 9  ;;  %v10008_v24 = vpop.permute.xlu1 %3148 }
 0x183   : > { %v587_v43 = vsel %vm8654_vm12, %v579_v22, %v586_v42  ;;  %750 = vst [vmem:[#allocation2 + $0xc0] sm:$0xf] %v749_v57  ;;  %v1770_v35 = vor.u32 %v1769_v3, %v1765_v47  ;;  %v753_v19 = vsel %vm8670_vm13, %v588_v55, %v752_v41  ;;  %8241 = vmatprep.mubr.msk.bf16.mxu0 %vm3624_vm5, %v3583_v59  ;;  %v1965_v61 = vrot.slane %v9948_v27, 5 }
 0x184   : > { %751 = vst.msk [vmem:[#allocation2 + $0xc4] sm:$0xf] %vm226_vm0, %v587_v43  ;;  %v1766_v34 = vsel %vm8646_vm11, %v1761_v46, %v1765_v47  ;;  %754 = vst [vmem:[#allocation2 + $0xc8] sm:$0x1] %v753_v19  ;;  %v1968_v14 = vrot.slane %v9971_v49, 5  ;;  %8242 = vmatmul.mubr.msk.bf16.gmra.mrb[12].mxu0 %vm3624_vm5, %v3585_v21  ;;  %v7767_v9 = vcombine.low %v8390_v11, %v8391_v5  ;;  %v2387_v13 = vshrl.u32 %v9993_v50, 16  ;;  %v10045_v57 = vpop.permute.xlu0 %3306 }
 0x185   : > { %v1771_v37 = vrot.slane %v1770_v35, 4  ;;  %v7766_v15 = vcombine.low %v8392_v17, %v8393_v53  ;;  %v2390_v7 = vshll.u32 %v9993_v50, 16  ;;  %v1967_v27 = vrot.slane %v1965_v61, 4 }
 0x186   : > { %v2400_v48 = vshrl.u32 %v10000_v63, 16  ;;  %v1966_v6 = vsel %vm8626_vm7, %v7740_v8, %v1965_v61  ;;  %v10019_v4 = vrot.slane %v2387_v13, 4  ;;  %v3352_v56 = vsel %vm3322_vm14, %v7767_v9, %v9881_v33  ;;  %v10039_v10 = vpop.permute.xlu1 %3228 }
 0x187   : > { %v1776_v49 = vsel %vm8646_vm11, %v1771_v37, %v1775_v40  ;;  %v10021_v18 = vrot.slane %v2390_v7, 5  ;;  %v1969_v39 = vsel %vm8626_vm7, %v1967_v27, %v1968_v14  ;;  %v3349_v25 = vsel %vm3322_vm14, %v7766_v15, %v9851_v52 }
 0x188   : > { %v7836_v28 = vcombine.low %v1766_v34, %v1776_v49  ;;  %v7869_v20 = vcombine.low %v9993_v50, %v10000_v63  ;;  %v3391_v3 = vsel %vm12525_vm15, %v3352_v56, %v9899_v31  ;;  %v7852_v22 = vcombine.low %v1966_v6, %v1969_v39  ;;  %v10055_v56 = vld [vmem:[#allocation2 + $0xd4] sm:$0x1] }
 0x189   : > { %v3389_v41 = vsel %vm12525_vm15, %v3349_v25, %v9888_v60  ;;  %v2396_v21 = vshll.u32 %v10000_v63, 16  ;;  %v10037_v33 = vrot.slane %v2400_v48, 4  ;;  %v2393_v31 = vor.u32 %v10021_v18, %v10019_v4 }
 0x18a   : > { %v1399_v62 = vld [vmem:[#allocation2 + $0xc0] sm:$0xf]  ;;  %2982 = vrot.lane.b32.xlu0 %v7836_v28, %s8457_s30  ;;  %v3424_v55 = vsel %vm12524_vm1, %v3391_v3, %v9924_v45  ;;  %v3422_v45 = vsel %vm12524_vm1, %v3389_v41, %v9907_v12  ;;  %v10051_v6 = vpop.permute.xlu1 %3308  ;;  %vm3857_vm0 = vcmask 125952   ;;  %v7773_v50 = vcombine.low %v9905_v26, %v9911_v54 }
 0x18b   : > { %v1816_v0 = vld [vmem:[#allocation2 + $0xc0] sm:$0xe]  ;;  %v1400_v52 = vld [vmem:[#allocation2 + $0xc4] sm:$0xf]  ;;  %v1778_v42 = vshrl.u32 %v1399_v62, 16  ;;  %v1781_v46 = vshll.u32 %v1399_v62, 16  ;;  %vm10301_vm13 = vmand %vm3857_vm0, %vm639_vm9 }
 0x18c   : > { %v1416_v47 = vld [vmem:[#allocation2 + $0xc8] sm:$0x1]  ;;  %v1791_v40 = vshrl.u32 %v1400_v52, 16  ;;  %v7821_v60 = vcombine.low %v1399_v62, %v1400_v52  ;;  %v1787_v59 = vshll.u32 %v1400_v52, 16  ;;  %v2006_v35 = vld [vmem:[#allocation2 + $0xc0] sm:$0xf] }
 0x18d   : > { %v1797_v43 = vshll.u32 %v1416_v47, 16  ;;  %v1780_v19 = vrot.slane %v1778_v42, 4  ;;  %v1783_v8 = vrot.slane %v1781_v46, 5  ;;  %v7741_v34 = vrot.slane %v1816_v0, 9  ;;  %v2007_v14 = vld [vmem:[#allocation2 + $0xc4] sm:$0xf] }
 0x18e   : > { %v1972_v61 = vrot.slane %v1400_v52, 5  ;;  %2904 = vrot.lane.b32.xlu1 %v7821_v60, %s8453_s26  ;;  %v1789_v11 = vrot.slane %v1787_v59, 5  ;;  %v1793_v5 = vrot.slane %v1791_v40, 4  ;;  %3062 = vrot.lane.b32.xlu0 %v7852_v22, %s8455_s28  ;;  %v1975_v9 = vrot.slane %v1416_v47, 5  ;;  %v2024_v49 = vld [vmem:[#allocation2 + $0xc8] sm:$0x1] }
 0x18f   : > { %v1784_v37 = vor.u32 %v1783_v8, %v1780_v19  ;;  %v1799_v17 = vrot.slane %v1797_v43, 5  ;;  %v2363_v15 = vshrl.u32 %v2006_v35, 16  ;;  %v2366_v7 = vshll.u32 %v2006_v35, 16  ;;  %v2424_v0 = vld [vmem:[#allocation2 + $0xc0] sm:$0xe] }
 0x190   : > { %v1974_v53 = vrot.slane %v1972_v61, 4  ;;  %v1794_v13 = vor.u32 %v1793_v5, %v1789_v11  ;;  %v2376_v27 = vshrl.u32 %v2007_v14, 16  ;;  %v7868_v48 = vcombine.low %v2006_v35, %v2007_v14  ;;  %v10057_v12 = vpop.permute.xlu0 %2718  ;;  %3865 = vst.msk [vmem:[#allocation3 + $0x18] sm:$0xf] %vm3857_vm0, %v12558_v16  ;;  %3858 = vst.msk [vmem:[#allocation3] sm:$0xf] %vm3857_vm0, %v12558_v16 }
 0x191   : > { %v1785_v4 = vrot.slane %v1784_v37, 4  ;;  %v1973_v18 = vsel %vm8626_vm7, %v7741_v34, %v1972_v61  ;;  %v2365_v28 = vrot.slane %v2363_v15, 4  ;;  %v2372_v39 = vshll.u32 %v2007_v14, 16  ;;  %v2425_v15 = vld [vmem:[#allocation2 + $0xcc] sm:$0xe] }
 0x192   : > { %v1795_v25 = vrot.slane %v1794_v13, 4  ;;  %v1976_v3 = vsel %vm8626_vm7, %v1974_v53, %v1975_v9  ;;  %v2368_v62 = vrot.slane %v2366_v7, 5  ;;  %3158 = vrot.lane.b32.xlu0 %v7868_v48, %s8454_s27  ;;  %v2378_v22 = vrot.slane %v2376_v27, 4  ;;  %v10072_v9 = vpop.permute.xlu1 %2720  ;;  %3859 = vst.msk [vmem:[#allocation3 + $0x4] sm:$0xf] %vm3857_vm0, %v12558_v16 }
 0x193   : > { %v1790_v41 = vsel %vm8646_vm11, %v1785_v4, %v1789_v11  ;;  %v2374_v52 = vrot.slane %v2372_v39, 5  ;;  %v2382_v42 = vshll.u32 %v2024_v49, 16  ;;  %v2394_v46 = vrot.slane %v2393_v31, 4  ;;  %3862 = vst.msk [vmem:[#allocation3 + $0xc] sm:$0xf] %vm3857_vm0, %v12558_v16 }
 0x194   : > { %v1800_v47 = vsel %vm8646_vm11, %v1795_v25, %v1799_v17  ;;  %v2369_v40 = vor.u32 %v2368_v62, %v2365_v28  ;;  %v2398_v60 = vrot.slane %v2396_v21, 5  ;;  %v2406_v59 = vshll.u32 %v10055_v56, 16  ;;  %v10067_v34 = vpop.permute.xlu0 %2798  ;;  %3863 = vst.msk [vmem:[#allocation3 + $0x10] sm:$0xf] %vm3857_vm0, %v12558_v16  ;;  %3866 = vst.msk [vmem:[#allocation3 + $0x1c] sm:$0xf] %vm3857_vm0, %v12558_v16 }
 0x195   : > { %v7837_v43 = vcombine.low %v1790_v41, %v1800_v47  ;;  %v2379_v35 = vor.u32 %v2378_v22, %v2374_v52  ;;  %v2384_v19 = vrot.slane %v2382_v42, 5  ;;  %v7756_v8 = vrot.slane %v2424_v0, 9  ;;  %3868 = vst.msk [vmem:[#allocation3 + $0x24] sm:$0xf] %vm3857_vm0, %v12558_v16  ;;  %3869 = vst.msk [vmem:[#allocation3 + $0x28] sm:$0xf] %vm3857_vm0, %v12558_v16 }
 0x196   : > { %v7853_v61 = vcombine.low %v1973_v18, %v1976_v3  ;;  %v2370_v5 = vrot.slane %v2369_v40, 4  ;;  %v2403_v11 = vor.u32 %v10037_v33, %v2398_v60  ;;  %v3457_v31 = vsel %vm3437_vm2, %v3424_v55, %v9950_v23  ;;  %v10105_v0 = vpop.permute.xlu1 %2800  ;;  %3871 = vst.msk [vmem:[#allocation3 + $0x30] sm:$0xf] %vm3857_vm0, %v12558_v16  ;;  %3872 = vst.msk [vmem:[#allocation3 + $0x34] sm:$0xf] %vm3857_vm0, %v12558_v16 }
 0x197   : > { %2984 = vrot.lane.b32.xlu1 %v7837_v43, %s8457_s30  ;;  %v2380_v21 = vrot.slane %v2379_v35, 4  ;;  %v2408_v37 = vrot.slane %v2406_v59, 5  ;;  %v2574_v17 = vrot.slane %v2007_v14, 5  ;;  %v2577_v53 = vrot.slane %v2024_v49, 5  ;;  %3874 = vst.msk [vmem:[#allocation3 + $0x3c] sm:$0xf] %vm3857_vm0, %v12558_v16 }
 0x198   : > { %v2375_v13 = vsel %vm8646_vm11, %v2370_v5, %v2374_v52  ;;  %v2404_v7 = vrot.slane %v2403_v11, 4  ;;  %v2581_v27 = vrot.slane %v10000_v63, 5  ;;  %v3455_v33 = vsel %vm3437_vm2, %v3422_v45, %v9929_v2  ;;  %v10086_v49 = vpop.permute.xlu0 %2894  ;;  %3875 = vst.msk [vmem:[#allocation3 + $0x40] sm:$0xf] %vm3857_vm0, %v12558_v16  ;;  %3877 = vst.msk [vmem:[#allocation3 + $0x48] sm:$0xf] %vm3857_vm0, %v12558_v16 }
 0x199   : > { %v2385_v23 = vsel %vm8646_vm11, %v2380_v21, %v2384_v19  ;;  %v2399_v55 = vsel %vm8646_vm11, %v2394_v46, %v2398_v60  ;;  %v2575_v14 = vsel %vm8626_vm7, %v7756_v8, %v2574_v17  ;;  %v2576_v48 = vrot.slane %v2574_v17, 4  ;;  %3878 = vst.msk [vmem:[#allocation3 + $0x4c] sm:$0xf] %vm3857_vm0, %v12558_v16  ;;  %3880 = vst.msk [vmem:[#allocation3 + $0x54] sm:$0xf] %vm3857_vm0, %v12558_v16 }
 0x19a   : > { %v7884_v4 = vcombine.low %v2375_v13, %v2385_v23  ;;  %v7757_v18 = vrot.slane %v2425_v15, 9  ;;  %v2584_v28 = vrot.slane %v10055_v56, 5  ;;  %v3490_v39 = vsel %vm3470_vm3, %v3457_v31, %v9979_v32  ;;  %3881 = vst.msk [vmem:[#allocation3 + $0x58] sm:$0xf] %vm3857_vm0, %v12558_v16  ;;  %3883 = vst.msk [vmem:[#allocation3 + $0x60] sm:$0xf] %vm3857_vm0, %v12558_v16 }
 0x19b   : > { %3064 = vrot.lane.b32.xlu1 %v7853_v61, %s8455_s28  ;;  %v2409_v2 = vsel %vm8646_vm11, %v2404_v7, %v2408_v37  ;;  %v2578_v45 = vsel %vm8626_vm7, %v2576_v48, %v2577_v53  ;;  %v3488_v25 = vsel %vm3470_vm3, %v3455_v33, %v9959_v38  ;;  %v3523_v3 = vsel %vm3503_vm8, %v3490_v39, %v10008_v24  ;;  %v4446_v42 = vld [vmem:[#allocation3] sm:$0xf]  ;;  %v8395_v47 = vld [vmem:[#allocation2 + $0x7c] sm:$0xf] }
 0x19c   : > { %3238 = vrot.lane.b32.xlu0 %v7884_v4, %s8458_s6  ;;  %v7900_v56 = vcombine.low %v2575_v14, %v2578_v45  ;;  %v2583_v62 = vrot.slane %v2581_v27, 4  ;;  %v3521_v32 = vsel %vm3503_vm8, %v3488_v25, %v9982_v58  ;;  %v3556_v22 = vsel %vm3536_vm6, %v3523_v3, %v10039_v10  ;;  %v10111_v52 = vpop.permute.xlu0 %2974  ;;  %3884 = vst.msk [vmem:[#allocation3 + $0x64] sm:$0xf] %vm3857_vm0, %v12558_v16  ;;  %v8394_v46 = vld [vmem:[#allocation2 + $0x78] sm:$0xf] }
 0x19d   : > { %v3554_v41 = vsel %vm3536_vm6, %v3521_v32, %v10012_v51  ;;  %v3589_v38 = vsel %vm3569_vm4, %v3556_v22, %v10051_v6  ;;  %v10119_v58 = vcombine.low %v2399_v55, %v2409_v2  ;;  %v7772_v51 = vcombine.low %v9862_v29, %v9867_v30  ;;  %3886 = vst.msk [vmem:[#allocation3 + $0x6c] sm:$0xf] %vm3857_vm0, %v12558_v16  ;;  %v4447_v59 = vld [vmem:[#allocation3 + $0x4] sm:$0xf]  ;;  %v4878_v53 = vld [vmem:[#allocation3] sm:$0xe] }
 0x19e   : > { %v3587_v24 = vsel %vm3569_vm4, %v3554_v41, %v10045_v57  ;;  %v10127_v10 = vsel %vm8626_vm7, %v7757_v18, %v2581_v27  ;;  %v2585_v57 = vsel %vm8626_vm7, %v2583_v62, %v2584_v28  ;;  %3887 = vst.msk [vmem:[#allocation3 + $0x70] sm:$0xf] %vm3857_vm0, %v12558_v16  ;;  %3889 = vst.msk [vmem:[#allocation3 + $0x78] sm:$0xf] %vm3857_vm0, %v12558_v16  ;;  %vm3860_vm10 = vcmask 122880   ;;  %v2897_v63 = vpop.permute.xlu1 %2896 }
 0x19f   : > { %3160 = vrot.lane.b32.xlu1 %v7869_v20, %s8454_s27  ;;  %8245 = vmatprep.mubr.msk.bf16.mxu0 %vm3624_vm5, %v3587_v24  ;;  %3890 = vst.msk [vmem:[#allocation3 + $0x7c] sm:$0xf] %vm3857_vm0, %v12558_v16  ;;  %3892 = vst.msk [vmem:[#allocation3 + $0x84] sm:$0xf] %vm3857_vm0, %v12558_v16  ;;  %v7901_v20 = vcombine.low %v10127_v10, %v2585_v57  ;;  %v7768_v40 = vcombine.low %v8394_v46, %v8395_v47  ;;  %v4495_v19 = vshrl.u32 %v4446_v42, 16  ;;  %vm12566_vm9 = vcmask 48128  }
 0x1a0   : > { %3318 = vrot.lane.b32.xlu0 %v7900_v56, %s8456_s29  ;;  %8246 = vmatmul.mubr.msk.bf16.gmra.mrb[16].mxu0 %vm3624_vm5, %v3589_v38  ;;  %3893 = vst.msk [vmem:[#allocation3 + $0x88] sm:$0xf] %vm3857_vm0, %v12558_v16  ;;  %3895 = vst.msk [vmem:[#allocation3 + $0x90] sm:$0xf] %vm3857_vm0, %v12558_v16  ;;  %v3055_v6 = vpop.permute.xlu0 %3054  ;;  %v4498_v8 = vshll.u32 %v4446_v42, 16  ;;  %v4504_v61 = vshll.u32 %v4447_v59, 16 }
 0x1a1   : > { %3896 = vst.msk [vmem:[#allocation3 + $0x94] sm:$0xf] %vm3857_vm0, %v12558_v16  ;;  %3898 = vst.msk [vmem:[#allocation3 + $0x9c] sm:$0xf] %vm3857_vm0, %v12558_v16  ;;  %v4508_v5 = vshrl.u32 %v4447_v59, 16  ;;  %v4944_v31 = vrot.slane %v4447_v59, 5  ;;  %v3355_v15 = vsel %vm3322_vm14, %v7768_v40, %v10057_v12 }
 0x1a2   : > { %3899 = vst.msk [vmem:[#allocation3 + $0xa0] sm:$0xf] %vm3857_vm0, %v12558_v16  ;;  %3901 = vst.msk [vmem:[#allocation3 + $0xa8] sm:$0xf] %vm3857_vm0, %v12558_v16  ;;  %v4497_v21 = vrot.slane %v4495_v19, 4  ;;  %v4500_v37 = vrot.slane %v4498_v8, 5  ;;  %v3393_v27 = vsel %vm12525_vm15, %v3355_v15, %v10067_v34 }
 0x1a3   : > { %3902 = vst.msk [vmem:[#allocation3 + $0xac] sm:$0xf] %vm3857_vm0, %v12558_v16  ;;  %3904 = vst.msk [vmem:[#allocation3 + $0xb4] sm:$0xf] %vm3857_vm0, %v12558_v16  ;;  %3240 = vrot.lane.b32.xlu1 %v10119_v58, %s8458_s6  ;;  %v4506_v17 = vrot.slane %v4504_v61, 5  ;;  %v4510_v7 = vrot.slane %v4508_v5, 4  ;;  %v3426_v18 = vsel %vm12524_vm1, %v3393_v27, %v10086_v49 }
 0x1a4   : > { %3905 = vst.msk [vmem:[#allocation3 + $0xb8] sm:$0xf] %vm3857_vm0, %v12558_v16  ;;  %3907 = vst.msk [vmem:[#allocation3 + $0xc0] sm:$0xf] %vm3857_vm0, %v12558_v16  ;;  %v3151_v43 = vpop.permute.xlu0 %3150  ;;  %v4501_v33 = vor.u32 %v4500_v37, %v4497_v21  ;;  %v7953_v48 = vrot.slane %v4878_v53, 9  ;;  %v4946_v4 = vrot.slane %v4944_v31, 4  ;;  %v3459_v12 = vsel %vm3437_vm2, %v3426_v18, %v10111_v52 }
 0x1a5   : > { %3908 = vst.msk [vmem:[#allocation3 + $0xc4] sm:$0xf] %vm3857_vm0, %v12558_v16  ;;  %3910 = vst.msk [vmem:[#allocation3 + $0xcc] sm:$0xf] %vm3857_vm0, %v12558_v16  ;;  %v4511_v55 = vor.u32 %v4510_v7, %v4506_v17  ;;  %v8396_v2 = vld [vmem:[#allocation2 + $0x84] sm:$0xf]  ;;  %v3492_v34 = vsel %vm3470_vm3, %v3459_v12, %v3055_v6 }
 0x1a6   : > { %3911 = vst.msk [vmem:[#allocation3 + $0xd0] sm:$0xf] %vm3857_vm0, %v12558_v16  ;;  %v4502_v39 = vrot.slane %v4501_v33, 4  ;;  %v8397_v45 = vld [vmem:[#allocation2 + $0x88] sm:$0xf]  ;;  %v3525_v32 = vsel %vm3503_vm8, %v3492_v34, %v3151_v43  ;;  %v4945_v22 = vsel %vm8626_vm7, %v7953_v48, %v4944_v31 }
 0x1a7   : > { %3867 = vst.msk [vmem:[#allocation3 + $0x20] sm:$0x1] %vm3860_vm10, %v12558_v16  ;;  %3861 = vst.msk [vmem:[#allocation3 + $0x8] sm:$0x1] %vm3860_vm10, %v12558_v16  ;;  %3320 = vrot.lane.b32.xlu1 %v7901_v20, %s8456_s29  ;;  %v7769_v25 = vcombine.low %v8396_v2, %v8397_v45  ;;  %v4512_v56 = vrot.slane %v4511_v55, 4 }
 0x1a8   : > { %3864 = vst.msk [vmem:[#allocation3 + $0x14] sm:$0x1] %vm3860_vm10, %v12558_v16  ;;  %3870 = vst.msk [vmem:[#allocation3 + $0x2c] sm:$0x1] %vm3860_vm10, %v12558_v16  ;;  %v2977_v60 = vpop.permute.xlu1 %2976  ;;  %v4507_v62 = vsel %vm8646_vm11, %v4502_v39, %v4506_v17  ;;  %v8398_v61 = vld [vmem:[#allocation2 + $0x90] sm:$0xf] }
 0x1a9   : > { %3873 = vst.msk [vmem:[#allocation3 + $0x38] sm:$0x1] %vm3860_vm10, %v12558_v16  ;;  %3876 = vst.msk [vmem:[#allocation3 + $0x44] sm:$0x1] %vm3860_vm10, %v12558_v16  ;;  %v3358_v58 = vsel %vm3322_vm14, %v7769_v25, %v10072_v9  ;;  %v8399_v5 = vld [vmem:[#allocation2 + $0x94] sm:$0xf] }
 0x1aa   : > { %3879 = vst.msk [vmem:[#allocation3 + $0x50] sm:$0x1] %vm3860_vm10, %v12558_v16  ;;  %3882 = vst.msk [vmem:[#allocation3 + $0x5c] sm:$0x1] %vm3860_vm10, %v12558_v16  ;;  %v3395_v57 = vsel %vm12525_vm15, %v3358_v58, %v10105_v0  ;;  %v10284_v17 = vld [vmem:[%s12517_s2] ss:$0 sm:$0xff] }
 0x1ab   : > { %3885 = vst.msk [vmem:[#allocation3 + $0x68] sm:$0x1] %vm3860_vm10, %v12558_v16  ;;  %3888 = vst.msk [vmem:[#allocation3 + $0x74] sm:$0x1] %vm3860_vm10, %v12558_v16  ;;  %v3428_v6 = vsel %vm12524_vm1, %v3395_v57, %v2897_v63  ;;  %v8400_v15 = vld [vmem:[#allocation2 + $0x9c] sm:$0xf] }
 0x1ac   : > { %3891 = vst.msk [vmem:[#allocation3 + $0x80] sm:$0x1] %vm3860_vm10, %v12558_v16  ;;  %3894 = vst.msk [vmem:[#allocation3 + $0x8c] sm:$0x1] %vm3860_vm10, %v12558_v16  ;;  %v3057_v13 = vpop.permute.xlu1 %3056  ;;  %v3461_v46 = vsel %vm3437_vm2, %v3428_v6, %v2977_v60 }
 0x1ad   : > { %3897 = vst.msk [vmem:[#allocation3 + $0x98] sm:$0x1] %vm3860_vm10, %v12558_v16  ;;  %3900 = vst.msk [vmem:[#allocation3 + $0xa4] sm:$0x1] %vm3860_vm10, %v12558_v16  ;;  %v3494_v47 = vsel %vm3470_vm3, %v3461_v46, %v3057_v13  ;;  %v8401_v13 = vld [vmem:[#allocation2 + $0xa0] sm:$0xf] }
 0x1ae   : > { %3903 = vst.msk [vmem:[#allocation3 + $0xb0] sm:$0x1] %vm3860_vm10, %v12558_v16  ;;  %3906 = vst.msk [vmem:[#allocation3 + $0xbc] sm:$0x1] %vm3860_vm10, %v12558_v16  ;;  %v4478_v35 = vld [vmem:[#allocation3 + $0x8] sm:$0x1]  ;;  %v7771_v7 = vcombine.low %v8400_v15, %v8401_v13 }
 0x1af   : > { %3909 = vst.msk [vmem:[#allocation3 + $0xc8] sm:$0x1] %vm3860_vm10, %v12558_v16  ;;  %3912 = vst.msk [vmem:[#allocation3 + $0xd4] sm:$0x1] %vm3860_vm10, %v12558_v16  ;;  %v4514_v11 = vshll.u32 %v4478_v35, 16  ;;  %v4947_v23 = vrot.slane %v4478_v35, 5  ;;  %v3231_v28 = vpop.permute.xlu0 %3230 }
 0x1b0   : > { %v3153_v3 = vpop.permute.xlu1 %3152  ;;  %v3558_v38 = vsel %vm3536_vm6, %v3525_v32, %v3231_v28 }
 0x1b1   : > { %v4516_v14 = vrot.slane %v4514_v11, 5  ;;  %v4948_v41 = vsel %vm8626_vm7, %v4946_v4, %v4947_v23  ;;  %v3527_v9 = vsel %vm3503_vm8, %v3494_v47, %v3153_v3  ;;  %v7770_v11 = vcombine.low %v8398_v61, %v8399_v5 }
 0x1b2   : > { %v8033_v20 = vcombine.low %v4945_v22, %v4948_v41 }
 0x1b3   : > { %v4517_v49 = vsel %vm8646_vm11, %v4512_v56, %v4516_v14  ;;  %v3311_v52 = vpop.permute.xlu0 %3310 }
 0x1b4   : > { %v8017_v24 = vcombine.low %v4507_v62, %v4517_v49  ;;  %v3591_v10 = vsel %vm3569_vm4, %v3558_v38, %v3311_v52 }
 0x1b5   : > { %8249 = vmatprep.mubr.msk.bf16.mxu0 %vm3624_vm5, %v3591_v10  ;;  %v3233_v42 = vpop.permute.xlu1 %3232 }
 0x1b6   : > { %6383 = vrot.lane.b32.xlu0 %v8017_v24, %s8460_s11  ;;  %v3560_v0 = vsel %vm3536_vm6, %v3527_v9, %v3233_v42 }
 0x1b9   : > { %v3313_v40 = vpop.permute.xlu1 %3312 }
 0x1ba   : > { %6463 = vrot.lane.b32.xlu0 %v8033_v20, %s8461_s12  ;;  %v3593_v59 = vsel %vm3569_vm4, %v3560_v0, %v3313_v40  ;;  %v4341_v40 = vld [vmem:[#allocation3 + $0x18] sm:$0xf] }
 0x1bb   : > { %8250 = vmatmul.mubr.msk.bf16.gmra.mrb[20].mxu0 %vm3624_vm5, %v3593_v59 }
 0x1bd   : > { %v2725_v63 = vpop.permute.xlu1 %2724 }
 0x1be   : > { %v3364_v25 = vsel %vm3322_vm14, %v7771_v7, %v2725_v63 }
 0x1bf   : > { %v2723_v43 = vpop.permute.xlu0 %2722 }
 0x1c0   : > { %v3361_v37 = vsel %vm3322_vm14, %v7770_v11, %v2723_v43 }
 0x1c1   : > { %v2805_v8 = vpop.permute.xlu1 %2804 }
 0x1c2   : > { %v3399_v22 = vsel %vm12525_vm15, %v3364_v25, %v2805_v8 }
 0x1c3   : > { %v2803_v35 = vpop.permute.xlu0 %2802 }
 0x1c4   : > { %v3397_v27 = vsel %vm12525_vm15, %v3361_v37, %v2803_v35  ;;  %v4345_v37 = vld [vmem:[#allocation3 + $0x20] sm:$0x1] }
 0x1c7   : > { %v2899_v19 = vpop.permute.xlu0 %2898 }
 0x1c8   : > { %v3430_v18 = vsel %vm12524_vm1, %v3397_v27, %v2899_v19  ;;  %v4332_v19 = vld [vmem:[#allocation3 + $0xc] sm:$0xf] }
 0x1cd   : > { %v2979_v60 = vpop.permute.xlu0 %2978 }
 0x1ce   : > { %v2901_v31 = vpop.permute.xlu1 %2900  ;;  %v3463_v62 = vsel %vm3437_vm2, %v3430_v18, %v2979_v60 }
 0x1cf   : > { %v3432_v47 = vsel %vm12524_vm1, %v3399_v22, %v2901_v31  ;;  %vm12563_vm1 = vsmask.f32 256 }
 0x1d0   : > { %vm10308_vm15 = vmand %vm3860_vm10, %vm12563_vm1  ;;  %vm12568_vm1 = vcmask 72704  }
 0x1d1   : > { %v3059_v21 = vpop.permute.xlu0 %3058  ;;  %vm12569_vm10 = vmmov %vm12568_vm1 }
 0x1d2   : > { %v3496_v41 = vsel %vm3470_vm3, %v3463_v62, %v3059_v21 }
 0x1d5   : > { %v3155_v23 = vpop.permute.xlu0 %3154 }
 0x1d6   : > { %v3529_v10 = vsel %vm3503_vm8, %v3496_v41, %v3155_v23 }
 0x1d7   : > { %v2981_v53 = vpop.permute.xlu1 %2980  ;;  %v8231_v33 = vpop.f32.mrb[0].mxu0 }
 0x1d8   : > { %v3707_v55 = vadd.f32 %v8231_v33, %v10284_v17  ;;  %v3698_v14 = vpop.f32.mrb[1].mxu0  ;;  %v3465_v23 = vsel %vm3437_vm2, %v3432_v47, %v2981_v53 }
 0x1d9   : > { %v3699_v48 = vadd.f32 %v10284_v17, %v3698_v14  ;;  %v8232_v4 = vpop.f32.mrb[2].mxu0 }
 0x1da   : > { %v3827_v39 = vmax.f32 %v3707_v55, 0.0  ;;  %v3710_v2 = vadd.f32 %v8232_v4, %v10284_v17  ;;  %v3701_v45 = vpop.f32.mrb[3].mxu0 }
 0x1db   : > { %v3061_v28 = vpop.permute.xlu1 %3060  ;;  %v3825_v12 = vmax.f32 %v3699_v48, 0.0  ;;  %v3702_v3 = vadd.f32 %v10284_v17, %v3701_v45 }
 0x1dc   : > { %v8177_v56 = vpack.c.bf16 %v3827_v39, %v3827_v39  ;;  %v3828_v34 = vmax.f32 %v3710_v2, 0.0  ;;  %v4338_v2 = vld [vmem:[#allocation3 + $0x14] sm:$0x1]  ;;  %v3498_v45 = vsel %vm3470_vm3, %v3465_v23, %v3061_v28 }
 0x1dd   : > { %v8175_v32 = vpack.c.bf16 %v3825_v12, %v3825_v12  ;;  %v3826_v49 = vmax.f32 %v3702_v3, 0.0 }
 0x1de   : > { %v4027_v52 = vshrl.u32 %v8177_v56, 16  ;;  %v8178_v24 = vpack.c.bf16 %v3828_v34, %v3828_v34  ;;  %v4030_v6 = vshll.u32 %v8177_v56, 16 }
 0x1df   : > { %v3235_v38 = vpop.permute.xlu0 %3234  ;;  %v3157_v58 = vpop.permute.xlu1 %3156  ;;  %v4010_v57 = vshrl.u32 %v8175_v32, 16  ;;  %v8176_v46 = vpack.c.bf16 %v3826_v49, %v3826_v49  ;;  %v4013_v43 = vshll.u32 %v8175_v32, 16 }
 0x1e0   : > { %v4029_v20 = vrot.slane %v4027_v52, 7  ;;  %v4035_v42 = vshrl.u32 %v8178_v24, 16  ;;  %v3562_v9 = vsel %vm3536_vm6, %v3529_v10, %v3235_v38  ;;  %v4038_v60 = vshll.u32 %v8178_v24, 16 }
 0x1e1   : > { %v4012_v59 = vrot.slane %v4010_v57, 7  ;;  %v4018_v61 = vshrl.u32 %v8176_v46, 16  ;;  %v4021_v15 = vshll.u32 %v8176_v46, 16  ;;  %v3531_v25 = vsel %vm3503_vm8, %v3498_v45, %v3157_v58 }
 0x1e2   : > { %v4032_v63 = vor.u32 %v4030_v6, %v4029_v20  ;;  %v4037_v8 = vrot.slane %v4035_v42, 7  ;;  %v4033_v11 = vrot.slane %v4029_v20, 4 }
 0x1e3   : > { %v3315_v35 = vpop.permute.xlu0 %3314  ;;  %v4015_v31 = vor.u32 %v4013_v43, %v4012_v59  ;;  %v4020_v33 = vrot.slane %v4018_v61, 7  ;;  %v4016_v48 = vrot.slane %v4012_v59, 4 }
 0x1e4   : > { %v3595_v5 = vsel %vm3569_vm4, %v3562_v9, %v3315_v35  ;;  %v4342_v13 = vsel %vm10301_vm13, %v4032_v63, %v4341_v40  ;;  %v4040_v7 = vor.u32 %v4038_v60, %v4037_v8  ;;  %v4042_v27 = vrot.slane %v4037_v8, 4 }
 0x1e5   : > { %8253 = vmatprep.mubr.msk.bf16.mxu0 %vm3624_vm5, %v3595_v5  ;;  %4343 = vst [vmem:[#allocation3 + $0x18] sm:$0xf] %v4342_v13  ;;  %v4333_v14 = vsel %vm10301_vm13, %v4015_v31, %v4332_v19  ;;  %v4023_v39 = vor.u32 %v4021_v15, %v4020_v33  ;;  %v4025_v53 = vrot.slane %v4020_v33, 4 }
 0x1e6   : > { %v3237_v55 = vpop.permute.xlu1 %3236  ;;  %4334 = vst [vmem:[#allocation3 + $0xc] sm:$0xf] %v4333_v14  ;;  %v4041_v4 = vsel %vm8654_vm12, %v4033_v11, %v4040_v7  ;;  %v4346_v18 = vsel %vm10308_vm15, %v4042_v27, %v4345_v37 }
 0x1e7   : > { %4344 = vst.msk [vmem:[#allocation3 + $0x1c] sm:$0xf] %vm3857_vm0, %v4041_v4  ;;  %4347 = vst [vmem:[#allocation3 + $0x20] sm:$0x1] %v4346_v18  ;;  %v4024_v12 = vsel %vm8654_vm12, %v4016_v48, %v4023_v39  ;;  %v3564_v3 = vsel %vm3536_vm6, %v3531_v25, %v3237_v55  ;;  %v4339_v34 = vsel %vm10308_vm15, %v4025_v53, %v4338_v2 }
 0x1e8   : > { %4335 = vst.msk [vmem:[#allocation3 + $0x10] sm:$0xf] %vm3857_vm0, %v4024_v12  ;;  %4340 = vst [vmem:[#allocation3 + $0x14] sm:$0x1] %v4339_v34 }
 0x1ea   : > { %v3317_v56 = vpop.permute.xlu1 %3316 }
 0x1eb   : > { %v3597_v62 = vsel %vm3569_vm4, %v3564_v3, %v3317_v56 }
 0x1ec   : > { %8254 = vmatmul.mubr.msk.bf16.gmra.mrb[24].mxu0 %vm3624_vm5, %v3597_v62  ;;  %v2727_v28 = vpop.permute.xlu0 %2726  ;;  %v5663_v32 = vld [vmem:[#allocation3 + $0x18] sm:$0xf] }
 0x1ed   : > { %v10335_v22 = vld [vmem:[#allocation3 + $0x18] sm:$0xf]  ;;  %v5712_v38 = vshrl.u32 %v5663_v32, 16  ;;  %v5715_v24 = vshll.u32 %v5663_v32, 16  ;;  %v3367_v20 = vsel %vm3322_vm14, %v7772_v51, %v2727_v28  ;;  %v10351_v47 = vld [vmem:[#allocation3 + $0xc] sm:$0xf] }
 0x1ee   : > { %v10333_v49 = vld [vmem:[#allocation3 + $0x1c] sm:$0xf]  ;;  %v5127_v57 = vshrl.u32 %v10335_v22, 16  ;;  %v5130_v42 = vshll.u32 %v10335_v22, 16  ;;  %v10360_v29 = vld [vmem:[#allocation3 + $0x20] sm:$0x1] }
 0x1ef   : > { %v8097_v52 = vcombine.low %v5663_v32, %v10333_v49  ;;  %v10338_v58 = vld [vmem:[#allocation3 + $0x1c] sm:$0xf]  ;;  %v10346_v6 = vrot.slane %v5712_v38, 4  ;;  %v10353_v9 = vld [vmem:[#allocation3 + $0x10] sm:$0xf]  ;;  %v10357_v59 = vrot.slane %v5715_v24, 5 }
 0x1f0   : > { %v2807_v41 = vpop.permute.xlu0 %2806  ;;  %v2729_v10 = vpop.permute.xlu1 %2728  ;;  %v8050_v46 = vcombine.low %v10335_v22, %v10338_v58  ;;  %v10355_v40 = vld [vmem:[#allocation3 + $0x1c] sm:$0xf]  ;;  %v5725_v43 = vshrl.u32 %v10333_v49, 16  ;;  %v5487_v30 = vld [vmem:[#allocation3 + $0x18] sm:$0xe]  ;;  %v10367_v19 = vrot.slane %v5127_v57, 4  ;;  %v8049_v26 = vcombine.low %v10351_v47, %v10353_v9 }
 0x1f1   : > { %6815 = vrot.lane.b32.xlu0 %v8097_v52, %s8462_s15  ;;  %v3370_v51 = vsel %vm3322_vm14, %v7773_v50, %v2729_v10  ;;  %v3401_v35 = vsel %vm12566_vm9, %v3367_v20, %v2807_v41  ;;  %v5559_v8 = vrot.slane %v10338_v58, 5  ;;  %v10371_v60 = vld [vmem:[#allocation3 + $0x20] sm:$0x1]  ;;  %v4880_v61 = vld [vmem:[#allocation3 + $0x18] sm:$0xe]  ;;  %v5140_v5 = vshrl.u32 %v10338_v58, 16  ;;  %vm12567_vm14 = vmmov %vm12566_vm9 }
 0x1f2   : > { %v4958_v54 = vrot.slane %v10355_v40, 5  ;;  %v10377_v50 = vld [vmem:[#allocation3 + $0x14] sm:$0x1]  ;;  %v5486_v11 = vld [vmem:[#allocation3 + $0xc] sm:$0xe]  ;;  %v7970_v37 = vrot.slane %v5487_v30, 9 }
 0x1f3   : > { %v5561_v15 = vrot.slane %v5559_v8, 4  ;;  %v5562_v13 = vrot.slane %v10360_v29, 5  ;;  %v5552_v7 = vrot.slane %v10353_v9, 5  ;;  %v10381_v27 = vld [vmem:[#allocation3 + $0x10] sm:$0xf]  ;;  %v7955_v14 = vrot.slane %v4880_v61, 9 }
 0x1f4   : > { %v2903_v63 = vpop.permute.xlu0 %2902  ;;  %v2809_v31 = vpop.permute.xlu1 %2808  ;;  %v4960_v48 = vrot.slane %v4958_v54, 4  ;;  %v4961_v2 = vrot.slane %v10371_v60, 5  ;;  %v7969_v45 = vrot.slane %v5486_v11, 9  ;;  %v4879_v53 = vld [vmem:[#allocation3 + $0xc] sm:$0xe]  ;;  %v5560_v3 = vsel %vm8626_vm7, %v7970_v37, %v5559_v8 }
 0x1f5   : > { %6561 = vrot.lane.b32.xlu0 %v8050_v46, %s8463_s16  ;;  %v10384_v33 = vsel %vm12567_vm14, %v3370_v51, %v2809_v31  ;;  %v3434_v23 = vsel %vm12568_vm1, %v3401_v35, %v2903_v63  ;;  %v5563_v39 = vsel %vm8626_vm7, %v5561_v15, %v5562_v13  ;;  %v5555_v56 = vrot.slane %v10377_v50, 5  ;;  %v10406_v63 = vld [vmem:[#allocation3 + $0x14] sm:$0x1] }
 0x1f6   : > { %v4951_v34 = vrot.slane %v10381_v27, 5  ;;  %v8082_v38 = vcombine.low %v5560_v3, %v5563_v39  ;;  %v5554_v52 = vrot.slane %v5552_v7, 4  ;;  %v4962_v57 = vsel %vm8626_vm7, %v4960_v48, %v4961_v2 }
 0x1f7   : > { %v7954_v20 = vrot.slane %v4879_v53, 9  ;;  %v4959_v51 = vsel %vm8626_vm7, %v7955_v14, %v4958_v54  ;;  %v5553_v35 = vsel %vm8626_vm7, %v7969_v45, %v5552_v7  ;;  %v4954_v14 = vrot.slane %v10406_v63, 5  ;;  %v4355_v53 = vld [vmem:[#allocation3 + $0x30] sm:$0xf] }
 0x1f8   : > { %v8235_v55 = vpop.f32.mrb[4].mxu0  ;;  %v4953_v11 = vrot.slane %v4951_v34, 4  ;;  %v8035_v15 = vcombine.low %v4959_v51, %v4962_v57  ;;  %v5556_v13 = vsel %vm8626_vm7, %v5554_v52, %v5555_v56  ;;  %v5721_v7 = vshll.u32 %v10333_v49, 16  ;;  %v4359_v52 = vld [vmem:[#allocation3 + $0x38] sm:$0x1] }
 0x1f9   : > { %v3723_v4 = vadd.f32 %v8235_v55, %v10284_v17  ;;  %v3714_v18 = vpop.f32.mrb[5].mxu0  ;;  %6559 = vrot.lane.b32.xlu0 %v8049_v26, %s8463_s16  ;;  %v4952_v26 = vsel %vm8626_vm7, %v7954_v20, %v4951_v34  ;;  %v8081_v3 = vcombine.low %v5553_v35, %v5556_v13  ;;  %v4348_v34 = vld [vmem:[#allocation3 + $0x24] sm:$0xf]  ;;  %v5142_v22 = vrot.slane %v5140_v5, 4 }
 0x1fa   : > { %v3715_v25 = vadd.f32 %v10284_v17, %v3714_v18  ;;  %v8236_v12 = vpop.f32.mrb[6].mxu0  ;;  %vm7189_vm9 = vcmask 916480  }
 0x1fb   : > { %v3831_v28 = vmax.f32 %v3723_v4, 0.0  ;;  %v3726_v32 = vadd.f32 %v8236_v12, %v10284_v17  ;;  %v3717_v41 = vpop.f32.mrb[7].mxu0 }
 0x1fc   : > { %v2983_v62 = vpop.permute.xlu0 %2982  ;;  %v3829_v24 = vmax.f32 %v3715_v25, 0.0  ;;  %v3718_v10 = vadd.f32 %v10284_v17, %v3717_v41 }
 0x1fd   : > { %v8181_v46 = vpack.c.bf16 %v3831_v28, %v3831_v28  ;;  %v3832_v30 = vmax.f32 %v3726_v32, 0.0  ;;  %6721 = vrot.lane.b32.xlu0 %v8082_v38, %s8464_s17  ;;  %v3467_v55 = vsel %vm3437_vm2, %v3434_v23, %v2983_v62  ;;  %v4955_v23 = vsel %vm8626_vm7, %v4953_v11, %v4954_v14 }
 0x1fe   : > { %v8179_v8 = vpack.c.bf16 %v3829_v24, %v3829_v24  ;;  %v3830_v61 = vmax.f32 %v3718_v10, 0.0  ;;  %v10418_v10 = vrot.slane %v5721_v7, 5  ;;  %v5727_v11 = vrot.slane %v5725_v43, 4 }
 0x1ff   : > { %v4061_v31 = vshrl.u32 %v8181_v46, 16  ;;  %v8182_v37 = vpack.c.bf16 %v3832_v30, %v3832_v30  ;;  %v4064_v18 = vshll.u32 %v8181_v46, 16  ;;  %v6161_v43 = vrot.slane %v10333_v49, 5 }
 0x200   : > { %v4044_v54 = vshrl.u32 %v8179_v8, 16  ;;  %v3063_v48 = vpop.permute.xlu0 %3062  ;;  %v8180_v2 = vpack.c.bf16 %v3830_v61, %v3830_v61  ;;  %v2905_v45 = vpop.permute.xlu1 %2904  ;;  %v4047_v12 = vshll.u32 %v8179_v8, 16  ;;  %v4352_v8 = vld [vmem:[#allocation3 + $0x2c] sm:$0x1]  ;;  %v8034_v61 = vcombine.low %v4952_v26, %v4955_v23 }
 0x201   : > { %v4063_v4 = vrot.slane %v4061_v31, 7  ;;  %v4069_v39 = vshrl.u32 %v8182_v37, 16  ;;  %6467 = vrot.lane.b32.xlu0 %v8035_v15, %s8461_s12  ;;  %v4072_v28 = vshll.u32 %v8182_v37, 16  ;;  %v6095_v37 = vld [vmem:[#allocation3 + $0x18] sm:$0xe]  ;;  %v5132_v26 = vrot.slane %v5130_v42, 5 }
 0x202   : > { %v4046_v25 = vrot.slane %v4044_v54, 7  ;;  %v4052_v32 = vshrl.u32 %v8180_v2, 16  ;;  %v4055_v24 = vshll.u32 %v8180_v2, 16  ;;  %v3436_v49 = vsel %vm12569_vm10, %v10384_v33, %v2905_v45 }
 0x203   : > { %v4066_v56 = vor.u32 %v4064_v18, %v4063_v4  ;;  %v4071_v62 = vrot.slane %v4069_v39, 7  ;;  %v4067_v41 = vrot.slane %v4063_v4, 4  ;;  %v3500_v4 = vsel %vm3470_vm3, %v3467_v55, %v3063_v48  ;;  %v5695_v18 = vld [vmem:[#allocation3 + $0x20] sm:$0x1] }
 0x204   : > { %v4049_v38 = vor.u32 %v4047_v12, %v4046_v25  ;;  %v4054_v30 = vrot.slane %v4052_v32, 7  ;;  %v4050_v51 = vrot.slane %v4046_v25, 4  ;;  %v3159_v31 = vpop.permute.xlu0 %3158  ;;  %v5136_v39 = vshll.u32 %v10338_v58, 16  ;;  %v10454_v58 = vld [vmem:[#allocation3 + $0x18] sm:$0xf] }
 0x205   : > { %v4356_v57 = vsel %vm10301_vm13, %v4066_v56, %v4355_v53  ;;  %v4074_v20 = vor.u32 %v4072_v28, %v4071_v62  ;;  %v4076_v46 = vrot.slane %v4071_v62, 4  ;;  %6719 = vrot.lane.b32.xlu0 %v8081_v3, %s8464_s17  ;;  %v5728_v55 = vor.u32 %v5727_v11, %v10418_v10 }
 0x206   : > { %4357 = vst [vmem:[#allocation3 + $0x30] sm:$0xf] %v4356_v57  ;;  %v4349_v35 = vsel %vm10301_vm13, %v4049_v38, %v4348_v34  ;;  %v4057_v54 = vor.u32 %v4055_v24, %v4054_v30  ;;  %v4059_v14 = vrot.slane %v4054_v30, 4  ;;  %v7985_v42 = vrot.slane %v6095_v37, 9 }
 0x207   : > { %4350 = vst [vmem:[#allocation3 + $0x24] sm:$0xf] %v4349_v35  ;;  %v4075_v15 = vsel %vm8654_vm12, %v4067_v41, %v4074_v20  ;;  %v4360_v13 = vsel %vm10308_vm15, %v4076_v46, %v4359_v52  ;;  %v5718_v48 = vor.u32 %v10357_v59, %v10346_v6  ;;  %v10450_v25 = vrot.slane %v5136_v39, 5 }
 0x208   : > { %4358 = vst.msk [vmem:[#allocation3 + $0x34] sm:$0xf] %vm3857_vm0, %v4075_v15  ;;  %4361 = vst [vmem:[#allocation3 + $0x38] sm:$0x1] %v4360_v13  ;;  %v4058_v2 = vsel %vm8654_vm12, %v4050_v51, %v4057_v54  ;;  %v4353_v53 = vsel %vm10308_vm15, %v4059_v14, %v4352_v8  ;;  %v6164_v12 = vrot.slane %v5695_v18, 5  ;;  %v5103_v3 = vshrl.u32 %v10351_v47, 16 }
 0x209   : > { %v2985_v7 = vpop.permute.xlu1 %2984  ;;  %6465 = vrot.lane.b32.xlu0 %v8034_v61, %s8461_s12  ;;  %4351 = vst.msk [vmem:[#allocation3 + $0x28] sm:$0xf] %vm3857_vm0, %v4058_v2  ;;  %4354 = vst [vmem:[#allocation3 + $0x2c] sm:$0x1] %v4353_v53  ;;  %v5106_v23 = vshll.u32 %v10351_v47, 16  ;;  %v5731_v56 = vshll.u32 %v5695_v18, 16  ;;  %v3533_v33 = vsel %vm3503_vm8, %v3500_v4, %v3159_v31  ;;  %v5133_v34 = vor.u32 %v5132_v26, %v10367_v19 }
 0x20a   : > { %v5116_v45 = vshrl.u32 %v10353_v9, 16  ;;  %v5143_v62 = vor.u32 %v5142_v22, %v10450_v25  ;;  %v3469_v6 = vsel %vm3437_vm2, %v3436_v49, %v2985_v7  ;;  %v6163_v28 = vrot.slane %v6161_v43, 4 }
 0x20b   : > { %v5729_v32 = vrot.slane %v5728_v55, 4  ;;  %v4552_v41 = vshll.u32 %v10355_v40, 16  ;;  %v5719_v47 = vrot.slane %v5718_v48, 4  ;;  %v5146_v38 = vshll.u32 %v10360_v29, 16  ;;  %v10498_v48 = vld [vmem:[#allocation3 + $0xc] sm:$0xf] }
 0x20c   : > { %v4543_v52 = vshrl.u32 %v10454_v58, 16  ;;  %v4546_v24 = vshll.u32 %v10454_v58, 16  ;;  %v10468_v19 = vsel %vm8626_vm7, %v7985_v42, %v6161_v43  ;;  %v5733_v30 = vrot.slane %v5731_v56, 5 }
 0x20d   : > { %v3065_v5 = vpop.permute.xlu1 %3064  ;;  %v5667_v20 = vld [vmem:[#allocation3 + $0x30] sm:$0xf]  ;;  %v4556_v51 = vshrl.u32 %v10355_v40, 16  ;;  %vm6975_vm2 = vcmask 130048   ;;  %v5134_v61 = vrot.slane %v5133_v34, 4  ;;  %v5144_v11 = vrot.slane %v5143_v62, 4 }
 0x20e   : > { %v3239_v59 = vpop.permute.xlu0 %3238  ;;  %v3502_v35 = vsel %vm3470_vm3, %v3469_v6, %v3065_v5  ;;  %v6165_v37 = vsel %vm8626_vm7, %v6163_v28, %v6164_v12  ;;  %v10477_v15 = vrot.slane %v5103_v3, 4  ;;  %v5734_v13 = vsel %vm8646_vm11, %v5729_v32, %v5733_v30  ;;  %v5665_v7 = vld [vmem:[#allocation3 + $0x24] sm:$0xf]  ;;  %v8433_v36 = vld [vmem:[#allocation3 + $0x30] sm:$0xf] }
 0x20f   : > { %v3566_v57 = vsel %vm3536_vm6, %v3533_v33, %v3239_v59  ;;  %v10470_v46 = vld [vmem:[#allocation3 + $0x34] sm:$0xf]  ;;  %v10481_v54 = vrot.slane %v4552_v41, 5  ;;  %v5148_v14 = vrot.slane %v5146_v38, 5  ;;  %v4545_v4 = vrot.slane %v4543_v52, 4 }
 0x210   : > { %v8099_v29 = vcombine.low %v5667_v20, %v10470_v46  ;;  %v4548_v26 = vrot.slane %v4546_v24, 5  ;;  %v10487_v43 = vrot.slane %v5106_v23, 5  ;;  %v5724_v39 = vsel %vm8646_vm11, %v5719_v47, %v10418_v10  ;;  %v5058_v30 = vld [vmem:[#allocation3 + $0x24] sm:$0xf] }
 0x211   : > { %v3161_v8 = vpop.permute.xlu1 %3160  ;;  %v4558_v2 = vrot.slane %v4556_v51, 4  ;;  %v8129_v55 = vcombine.low %v10468_v19, %v6165_v37  ;;  %v8113_v22 = vcombine.low %v5724_v39, %v5734_v13  ;;  %v5139_v49 = vsel %vm8646_vm11, %v5134_v61, %v10450_v25  ;;  %v10524_v61 = vld [vmem:[#allocation3 + $0x28] sm:$0xf] }
 0x212   : > { %v3319_v31 = vpop.permute.xlu0 %3318  ;;  %6819 = vrot.lane.b32.xlu0 %v8099_v29, %s8462_s15  ;;  %v3535_v18 = vsel %vm3503_vm8, %v3502_v35, %v3161_v8  ;;  %v5149_v42 = vsel %vm8646_vm11, %v5144_v11, %v5148_v14  ;;  %v5760_v12 = vshrl.u32 %v5667_v20, 16  ;;  %v5763_v3 = vshll.u32 %v5667_v20, 16  ;;  %12570 = vst [vmem:[#allocation5_spill] sm:$0xff] %v10524_v61 }
 0x213   : > { %v3599_v40 = vsel %vm3569_vm4, %v3566_v57, %v3319_v31  ;;  %v5736_v23 = vshrl.u32 %v5665_v7, 16  ;;  %v4559_v56 = vor.u32 %v4558_v2, %v10481_v54  ;;  %v4549_v5 = vor.u32 %v4548_v26, %v4545_v4  ;;  %v10516_v57 = vld [vmem:[#allocation3 + $0x28] sm:$0xf] }
 0x214   : > { %8257 = vmatprep.mubr.msk.bf16.mxu0 %vm3624_vm5, %v3599_v40  ;;  %v4562_v33 = vshll.u32 %v10371_v60, 16  ;;  %v5112_v25 = vshll.u32 %v10353_v9, 16  ;;  %v8066_v34 = vcombine.low %v5139_v49, %v5149_v42  ;;  %v5739_v62 = vshll.u32 %v5665_v7, 16  ;;  %v10514_v60 = vld [vmem:[#allocation3 + $0x28] sm:$0xf] }
 0x215   : > { %v3241_v53 = vpop.permute.xlu1 %3240  ;;  %v5118_v6 = vrot.slane %v5116_v45, 4  ;;  %v4519_v59 = vshrl.u32 %v10498_v48, 16  ;;  %v4522_v41 = vshll.u32 %v10498_v48, 16  ;;  %v4528_v47 = vshll.u32 %v10381_v27, 16  ;;  %v5488_v42 = vld [vmem:[#allocation3 + $0x24] sm:$0xe] }
 0x216   : > { %v3568_v10 = vsel %vm3536_vm6, %v3535_v18, %v3241_v53  ;;  %6895 = vrot.lane.b32.xlu0 %v8113_v22, %s8465_s20  ;;  %v10506_v32 = vrot.slane %v5112_v25, 5  ;;  %v4532_v38 = vshrl.u32 %v10381_v27, 16  ;;  %v10512_v24 = vrot.slane %v5760_v12, 4 }
 0x217   : > { %v4560_v9 = vrot.slane %v4559_v56, 4  ;;  %v10519_v45 = vrot.slane %v5763_v3, 5  ;;  %v4550_v19 = vrot.slane %v4549_v5, 4  ;;  %v4564_v20 = vrot.slane %v4562_v33, 5  ;;  %v10547_v3 = vld [vmem:[#allocation3 + $0x2c] sm:$0x1] }
 0x218   : > { %v4521_v27 = vrot.slane %v4519_v59, 4  ;;  %v5119_v51 = vor.u32 %v5118_v6, %v10506_v32  ;;  %v4524_v35 = vrot.slane %v4522_v41, 5  ;;  %v4530_v8 = vrot.slane %v4528_v47, 5  ;;  %v4881_v33 = vld [vmem:[#allocation3 + $0x24] sm:$0xe] }
 0x219   : > { %v3321_v28 = vpop.permute.xlu1 %3320  ;;  %v4534_v29 = vrot.slane %v4532_v38, 4  ;;  %v5773_v11 = vshrl.u32 %v10470_v46, 16  ;;  %v10527_v31 = vrot.slane %v5736_v23, 4  ;;  %v8098_v37 = vcombine.low %v5665_v7, %v10514_v60 }
 0x21a   : > { %v3601_v52 = vsel %vm3569_vm4, %v3568_v10, %v3321_v28  ;;  %6641 = vrot.lane.b32.xlu0 %v8066_v34, %s8466_s21  ;;  %v5566_v13 = vrot.slane %v10516_v57, 5  ;;  %v4565_v40 = vsel %vm8646_vm11, %v4560_v9, %v4564_v20  ;;  %v5109_v14 = vor.u32 %v10487_v43, %v10477_v15  ;;  %v10545_v43 = vld [vmem:[#allocation3 + $0x2c] sm:$0x1] }
 0x21b   : > { %8258 = vmatmul.mubr.msk.bf16.gmra.mrb[28].mxu0 %vm3624_vm5, %v3601_v52  ;;  %v5122_v4 = vshll.u32 %v10377_v50, 16  ;;  %v4535_v26 = vor.u32 %v4534_v29, %v4530_v8  ;;  %v10536_v18 = vrot.slane %v5739_v62, 5  ;;  %v5749_v39 = vshrl.u32 %v10514_v60, 16 }
 0x21c   : > { %8155 = vmatprep.mubr.msk.bf16.mxu0 %vm6975_vm2, %v8129_v55  ;;  %v5151_v2 = vshrl.u32 %v5058_v30, 16  ;;  %v4965_v7 = vrot.slane %v10524_v61, 5  ;;  %v4555_v53 = vsel %vm8646_vm11, %v4550_v19, %v10481_v54  ;;  %v5120_v55 = vrot.slane %v5119_v51, 4 }
 0x21d   : > { %v4525_v22 = vor.u32 %v4524_v35, %v4521_v27  ;;  %v4538_v15 = vshll.u32 %v10406_v63, 16  ;;  %v8019_v50 = vcombine.low %v4555_v53, %v4565_v40  ;;  %v5154_v49 = vshll.u32 %v5058_v30, 16 }
 0x21e   : > { %6817 = vrot.lane.b32.xlu0 %v8098_v37, %s8462_s15  ;;  %v5568_v12 = vrot.slane %v5566_v13, 4  ;;  %v5164_v23 = vshrl.u32 %v10516_v57, 16  ;;  %v5110_v56 = vrot.slane %v5109_v14, 4  ;;  %v5124_v10 = vrot.slane %v5122_v4, 5 }
 0x21f   : > { %v4536_v5 = vrot.slane %v4535_v26, 4  ;;  %v10551_v54 = vrot.slane %v5151_v2, 4  ;;  %v8051_v63 = vcombine.low %v5058_v30, %v10516_v57  ;;  %v5569_v25 = vrot.slane %v10545_v43, 5  ;;  %v10573_v30 = vld [vmem:[#allocation3 + $0x38] sm:$0x1] }
 0x220   : > { %v4967_v34 = vrot.slane %v4965_v7, 4  ;;  %v5125_v62 = vsel %vm8646_vm11, %v5120_v55, %v5124_v10  ;;  %v4526_v6 = vrot.slane %v4525_v22, 4  ;;  %v4540_v59 = vrot.slane %v4538_v15, 5 }
 0x221   : > { %v7971_v28 = vrot.slane %v5488_v42, 9  ;;  %v10557_v41 = vrot.slane %v5154_v49, 5  ;;  %v10561_v47 = vsel %vm8626_vm7, %v5568_v12, %v5569_v25  ;;  %v7956_v38 = vrot.slane %v4881_v33, 9  ;;  %v10602_v49 = vld [vmem:[#allocation3 + $0x2c] sm:$0x1] }
 0x222   : > { %6387 = vrot.lane.b32.xlu0 %v8019_v50, %s8460_s11  ;;  %v4968_v52 = vrot.slane %v10547_v3, 5  ;;  %v5115_v9 = vsel %vm8646_vm11, %v5110_v56, %v10506_v32  ;;  %v4541_v19 = vsel %vm8646_vm11, %v4536_v5, %v4540_v59  ;;  %v5769_v27 = vshll.u32 %v10470_v46, 16  ;;  %v10606_v42 = vld [vmem:[#allocation3 + $0x24] sm:$0xf] }
 0x223   : > { %v10571_v20 = vsel %vm8626_vm7, %v7971_v28, %v5566_v13  ;;  %v8065_v51 = vcombine.low %v5115_v9, %v5125_v62  ;;  %v10579_v35 = vsel %vm8626_vm7, %v7956_v38, %v4965_v7  ;;  %v5745_v29 = vshll.u32 %v10514_v60, 16  ;;  %12571 = vst [vmem:[#allocation6_spill] sm:$0xff] %v10606_v42  ;;  %v8353_v62 = vld [vmem:[%s12518_s3] sm:$0xff]  }
 0x224   : > { %v10583_v32 = vsel %vm8626_vm7, %v4967_v34, %v4968_v52  ;;  %v4531_v13 = vsel %vm8646_vm11, %v4526_v6, %v4530_v8  ;;  %v8083_v40 = vcombine.low %v10571_v20, %v10561_v47  ;;  %v5766_v14 = vor.u32 %v10519_v45, %v10512_v24  ;;  %7366 = vmatpush1.bf16.msra.mxu0 %v8353_v62 }
 0x225   : > { %v5160_v4 = vshll.u32 %v10516_v57, 16  ;;  %v8018_v7 = vcombine.low %v4531_v13, %v4541_v19  ;;  %v10594_v53 = vrot.slane %v5773_v11, 4  ;;  %v5779_v55 = vshll.u32 %v10573_v30, 16  ;;  %8270 = vmatpush1.bf16.msra.mxu1 %v8353_v62  ;;  %7367 = vmatprep.subr.bf16.mxu0 %v12558_v16 }
 0x226   : > { %6563 = vrot.lane.b32.xlu0 %v8051_v63, %s8463_s16  ;;  %v8036_v8 = vcombine.low %v10579_v35, %v10583_v32  ;;  %v10600_v50 = vrot.slane %v5769_v27, 5  ;;  %v5742_v57 = vor.u32 %v10536_v18, %v10527_v31  ;;  %v10610_v10 = vrot.slane %v5745_v29, 5  ;;  %8262 = vmatprep.subr.bf16.mxu1 %v12558_v16 }
 0x227   : > { %v10614_v5 = vrot.slane %v5749_v39, 4  ;;  %v10617_v25 = vrot.slane %v5160_v4, 5  ;;  %v10619_v34 = vrot.slane %v5164_v23, 4  ;;  %v5755_v28 = vshll.u32 %v10602_v49, 16 }
 0x228   : > { %v8239_v37 = vpop.f32.mrb[8].mxu0  ;;  %v4567_v47 = vshrl.u32 %v10606_v42, 16  ;;  %v5157_v52 = vor.u32 %v10557_v41, %v10551_v54  ;;  %v5776_v19 = vor.u32 %v10594_v53, %v10600_v50  ;;  %v5767_v35 = vrot.slane %v5766_v14, 4 }
 0x229   : > { %v3739_v26 = vadd.f32 %v8239_v37, %v10284_v17  ;;  %v3730_v2 = vpop.f32.mrb[9].mxu0  ;;  %v5752_v20 = vor.u32 %v10614_v5, %v10610_v10  ;;  %v5167_v29 = vor.u32 %v10619_v34, %v10617_v25  ;;  %v5170_v37 = vshll.u32 %v10545_v43, 16  ;;  %v4362_v5 = vld [vmem:[#allocation3 + $0x3c] sm:$0xf] }
 0x22a   : > { %v3731_v22 = vadd.f32 %v10284_v17, %v3730_v2  ;;  %v8240_v15 = vpop.f32.mrb[10].mxu0  ;;  %6639 = vrot.lane.b32.xlu0 %v8065_v51, %s8466_s21  ;;  %v5781_v32 = vrot.slane %v5779_v55, 5  ;;  %v5757_v24 = vrot.slane %v5755_v28, 5  ;;  %v10702_v28 = vld [vmem:[#allocation3 + $0x30] sm:$0xf]  ;;  %vm7024_vm6 = vcmask 261120  }
 0x22b   : > { %v3835_v12 = vmax.f32 %v3739_v26, 0.0  ;;  %v3742_v11 = vadd.f32 %v8240_v15, %v10284_v17  ;;  %v3733_v56 = vpop.f32.mrb[11].mxu0  ;;  %v4369_v26 = vld [vmem:[#allocation3 + $0x48] sm:$0xf]  ;;  %v5172_v45 = vrot.slane %v5170_v37, 5  ;;  %vm7057_vm3 = vcmask 392192  }
 0x22c   : > { %v3833_v33 = vmax.f32 %v3731_v22, 0.0  ;;  %v3734_v63 = vadd.f32 %v10284_v17, %v3733_v56  ;;  %v4570_v17 = vshll.u32 %v10606_v42, 16  ;;  %vm7090_vm8 = vcmask 523264  }
 0x22d   : > { %v8185_v6 = vpack.c.bf16 %v3835_v12, %v3835_v12  ;;  %v3836_v59 = vmax.f32 %v3742_v11, 0.0  ;;  %v8354_v11 = vld [vmem:[%s12518_s3 + $0x8] sm:$0xff]   ;;  %vm7123_vm4 = vcmask 654336   ;;  %vm7156_vm5 = vcmask 785408  }
 0x22e   : > { %v8183_v38 = vpack.c.bf16 %v3833_v33, %v3833_v33  ;;  %v3834_v39 = vmax.f32 %v3734_v63, 0.0  ;;  %6385 = vrot.lane.b32.xlu0 %v8018_v7, %s8460_s11  ;;  %v10639_v7 = vrot.slane %v4567_v47, 4  ;;  %v4572_v12 = vrot.slane %v4570_v17, 5  ;;  %7368 = vmatpush1.bf16.msra.mxu0 %v8354_v11 }
 0x22f   : > { %v4095_v23 = vshrl.u32 %v8185_v6, 16  ;;  %v8186_v9 = vpack.c.bf16 %v3836_v59, %v3836_v59  ;;  %v4098_v4 = vshll.u32 %v8185_v6, 16  ;;  %v4576_v63 = vshll.u32 %v10524_v61, 16  ;;  %v4373_v6 = vld [vmem:[#allocation3 + $0x50] sm:$0x1]  ;;  %8271 = vmatpush1.bf16.msra.mxu1 %v8354_v11  ;;  %7369 = vmatprep.subr.bf16.mxu0 %v12558_v16 }
 0x230   : > { %v4078_v27 = vshrl.u32 %v8183_v38, 16  ;;  %v8184_v51 = vpack.c.bf16 %v3834_v39, %v3834_v39  ;;  %v4081_v22 = vshll.u32 %v8183_v38, 16  ;;  %8263 = vmatprep.subr.bf16.mxu1 %v12558_v16 }
 0x231   : > { %v4097_v13 = vrot.slane %v4095_v23, 7  ;;  %v4103_v2 = vshrl.u32 %v8186_v9, 16  ;;  %v4106_v43 = vshll.u32 %v8186_v9, 16  ;;  %v10689_v14 = vrot.slane %v4576_v63, 5 }
 0x232   : > { %v4080_v53 = vrot.slane %v4078_v27, 7  ;;  %v4086_v15 = vshrl.u32 %v8184_v51, 16  ;;  %6723 = vrot.lane.b32.xlu0 %v8083_v40, %s8464_s17  ;;  %v4089_v47 = vshll.u32 %v8184_v51, 16  ;;  %v4366_v27 = vld [vmem:[#allocation3 + $0x44] sm:$0x1]  ;;  %v8355_v40 = vld [vmem:[%s12518_s3 + $0x10] sm:$0xff]  }
 0x233   : > { %v4100_v56 = vor.u32 %v4098_v4, %v4097_v13  ;;  %v4105_v33 = vrot.slane %v4103_v2, 7  ;;  %v4101_v34 = vrot.slane %v4097_v13, 4  ;;  %v4580_v4 = vshrl.u32 %v10524_v61, 16  ;;  %7370 = vmatpush1.bf16.msra.mxu0 %v8355_v40  ;;  %8272 = vmatpush1.bf16.msra.mxu1 %v8355_v40 }
 0x234   : > { %v4083_v62 = vor.u32 %v4081_v22, %v4080_v53  ;;  %v4088_v59 = vrot.slane %v4086_v15, 7  ;;  %v4084_v39 = vrot.slane %v4080_v53, 4  ;;  %v5777_v53 = vrot.slane %v5776_v19, 4  ;;  %7371 = vmatprep.subr.bf16.mxu0 %v12558_v16  ;;  %8264 = vmatprep.subr.bf16.mxu1 %v12558_v16 }
 0x235   : > { %v4370_v38 = vsel %vm10301_vm13, %v4100_v56, %v4369_v26  ;;  %v4108_v17 = vor.u32 %v4106_v43, %v4105_v33  ;;  %v4110_v23 = vrot.slane %v4105_v33, 4  ;;  %v5753_v22 = vrot.slane %v5752_v20, 4  ;;  %v8356_v20 = vld [vmem:[%s12518_s3 + $0x18] sm:$0xff]  }
 0x236   : > { %4371 = vst [vmem:[#allocation3 + $0x48] sm:$0xf] %v4370_v38  ;;  %v4363_v9 = vsel %vm10301_vm13, %v4083_v62, %v4362_v5  ;;  %v4091_v51 = vor.u32 %v4089_v47, %v4088_v59  ;;  %v4093_v13 = vrot.slane %v4088_v59, 4  ;;  %6469 = vrot.lane.b32.xlu0 %v8036_v8, %s8461_s12  ;;  %v5168_v56 = vrot.slane %v5167_v29, 4 }
 0x237   : > { %4364 = vst [vmem:[#allocation3 + $0x3c] sm:$0xf] %v4363_v9  ;;  %v4109_v26 = vsel %vm8654_vm12, %v4101_v34, %v4108_v17  ;;  %v4374_v2 = vsel %vm10308_vm15, %v4110_v23, %v4373_v6  ;;  %v4573_v5 = vor.u32 %v4572_v12, %v10639_v7  ;;  %v5743_v8 = vrot.slane %v5742_v57, 4  ;;  %7372 = vmatpush1.bf16.msra.mxu0 %v8356_v20  ;;  %v8357_v57 = vld [vmem:[%s12518_s3 + $0x20] sm:$0xff]  }
 0x238   : > { %4372 = vst.msk [vmem:[#allocation3 + $0x4c] sm:$0xf] %vm3857_vm0, %v4109_v26  ;;  %4375 = vst [vmem:[#allocation3 + $0x50] sm:$0x1] %v4374_v2  ;;  %v4092_v15 = vsel %vm8654_vm12, %v4084_v39, %v4091_v51  ;;  %v4367_v11 = vsel %vm10308_vm15, %v4093_v13, %v4366_v27  ;;  %v5158_v19 = vrot.slane %v5157_v52, 4  ;;  %v4582_v31 = vrot.slane %v4580_v4, 4  ;;  %8273 = vmatpush1.bf16.msra.mxu1 %v8356_v20 }
 0x239   : > { %4365 = vst.msk [vmem:[#allocation3 + $0x40] sm:$0xf] %vm3857_vm0, %v4092_v15  ;;  %4368 = vst [vmem:[#allocation3 + $0x44] sm:$0x1] %v4367_v11  ;;  %v5782_v18 = vsel %vm8646_vm11, %v5777_v53, %v5781_v32  ;;  %v5758_v54 = vsel %vm8646_vm11, %v5753_v22, %v5757_v24  ;;  %v5173_v41 = vsel %vm8646_vm11, %v5168_v56, %v5172_v45  ;;  %v10697_v55 = vrot.slane %v4573_v5, 4 }
 0x23a   : > { %v5772_v29 = vsel %vm8646_vm11, %v5767_v35, %v10600_v50  ;;  %v5748_v37 = vsel %vm8646_vm11, %v5743_v8, %v10610_v10  ;;  %v5163_v7 = vsel %vm8646_vm11, %v5158_v19, %v10617_v25  ;;  %7373 = vmatprep.subr.bf16.mxu0 %v12558_v16  ;;  %8265 = vmatprep.subr.bf16.mxu1 %v12558_v16  ;;  %v4586_v34 = vshll.u32 %v10547_v3, 16  ;;  %v8360_v25 = vld [vmem:[%s12518_s3 + $0x28] sm:$0xff]   ;;  %v10749_v8 = vld [vmem:[#allocation3] sm:$0xf]  ;;  %v10751_v19 = vld [vmem:[#allocation3 + $0x4] sm:$0xf] }
 0x23b   : > { %v4583_v63 = vor.u32 %v4582_v31, %v10689_v14  ;;  %v8115_v10 = vcombine.low %v5772_v29, %v5782_v18  ;;  %v10721_v6 = vcombine.low %v5748_v37, %v5758_v54  ;;  %v10723_v59 = vcombine.low %v5163_v7, %v5173_v41  ;;  %7374 = vmatpush1.bf16.msra.mxu0 %v8357_v57  ;;  %v10742_v13 = vld [vmem:[#allocation3 + $0x34] sm:$0xf] }
 0x23c   : > { %v5175_v47 = vshrl.u32 %v10702_v28, 16  ;;  %v4579_v27 = vsel %vm8646_vm11, %v10697_v55, %v10689_v14  ;;  %8274 = vmatpush1.bf16.msra.mxu1 %v8357_v57  ;;  %7375 = vmatprep.subr.bf16.mxu0 %v12558_v16  ;;  %v5178_v4 = vshll.u32 %v10702_v28, 16  ;;  %v4588_v32 = vrot.slane %v4586_v34, 5  ;;  %v6096_v14 = vld [vmem:[#allocation3 + $0x24] sm:$0xe] }
 0x23d   : > { %v5064_v52 = vld [vmem:[#allocation3 + $0x48] sm:$0xf]  ;;  %8266 = vmatprep.subr.bf16.mxu1 %v12558_v16  ;;  %v4584_v22 = vrot.slane %v4583_v63, 4  ;;  %v8001_v20 = vcombine.low %v10749_v8, %v10751_v19  ;;  %v5188_v45 = vshrl.u32 %v10742_v13, 16  ;;  %v6168_v63 = vrot.slane %v10514_v60, 5 }
 0x23e   : > { %v4883_v12 = vld [vmem:[#allocation3 + $0x3c] sm:$0xe]  ;;  %v5223_v33 = vshrl.u32 %v5064_v52, 16  ;;  %v5226_v43 = vshll.u32 %v5064_v52, 16  ;;  %v4458_v35 = vld [vmem:[#allocation3 + $0x48] sm:$0xf] }
 0x23f   : > { %v10717_v50 = vld [vmem:[#allocation3 + $0x4c] sm:$0xf]  ;;  %v10719_v62 = vld [vmem:[#allocation3 + $0x50] sm:$0x1]  ;;  %v7958_v26 = vrot.slane %v4883_v12, 9  ;;  %7376 = vmatpush1.bf16.msra.mxu0 %v8360_v25  ;;  %v10755_v24 = vrot.slane %v5175_v47, 4 }
 0x240   : > { %v10729_v38 = vld [vmem:[#allocation3 + $0x40] sm:$0xf]  ;;  %v10731_v39 = vld [vmem:[#allocation3 + $0x44] sm:$0x1]  ;;  %v5225_v3 = vrot.slane %v5223_v33, 4  ;;  %v5228_v17 = vrot.slane %v5226_v43, 5  ;;  %v8054_v23 = vcombine.low %v5064_v52, %v10717_v50  ;;  %8275 = vmatpush1.bf16.msra.mxu1 %v8360_v25  ;;  %7377 = vmatprep.subr.bf16.mxu0 %v12558_v16  ;;  %v4589_v52 = vsel %vm8646_vm11, %v4584_v22, %v4588_v32 }
 0x241   : > { %v4979_v40 = vrot.slane %v10729_v38, 5  ;;  %v5236_v9 = vshrl.u32 %v10717_v50, 16  ;;  %v5232_v51 = vshll.u32 %v10717_v50, 16  ;;  %v4982_v2 = vrot.slane %v10731_v39, 5  ;;  %v10762_v55 = vld [vmem:[#allocation3 + $0x4c] sm:$0xf]  ;;  %8267 = vmatprep.subr.bf16.mxu1 %v12558_v16 }
 0x242   : > { %6569 = vrot.lane.b32.xlu0 %v8054_v23, %s8463_s16  ;;  %v5229_v53 = vor.u32 %v5228_v17, %v5225_v3  ;;  %v5242_v5 = vshll.u32 %v10719_v62, 16  ;;  %v4639_v29 = vshrl.u32 %v4458_v35, 16  ;;  %v4456_v37 = vld [vmem:[#allocation3 + $0x3c] sm:$0xf]  ;;  %v10769_v7 = vrot.slane %v5178_v4, 5 }
 0x243   : > { %v4981_v15 = vrot.slane %v4979_v40, 4  ;;  %v5234_v11 = vrot.slane %v5232_v51, 5  ;;  %v5238_v56 = vrot.slane %v5236_v9, 4  ;;  %v4980_v31 = vsel %vm8626_vm7, %v7958_v26, %v4979_v40  ;;  %v5491_v34 = vld [vmem:[#allocation3 + $0x48] sm:$0xe] }
 0x244   : > { %v5230_v54 = vrot.slane %v5229_v53, 4  ;;  %v5244_v33 = vrot.slane %v5242_v5, 5  ;;  %v7986_v43 = vrot.slane %v6096_v14, 9  ;;  %v5587_v25 = vrot.slane %v10717_v50, 5 }
 0x245   : > { %v4983_v18 = vsel %vm8626_vm7, %v4981_v15, %v4982_v2  ;;  %v5239_v41 = vor.u32 %v5238_v56, %v5234_v11  ;;  %v4642_v47 = vshll.u32 %v4458_v35, 16  ;;  %v4652_v3 = vshrl.u32 %v10762_v55, 16  ;;  %v4484_v2 = vld [vmem:[#allocation3 + $0x50] sm:$0x1] }
 0x246   : > { %v8038_v57 = vcombine.low %v4980_v31, %v4983_v18  ;;  %6899 = vrot.lane.b32.xlu0 %v8115_v10, %s8465_s20  ;;  %v4648_v10 = vshll.u32 %v10762_v55, 16  ;;  %v5235_v17 = vsel %vm8646_vm11, %v5230_v54, %v5234_v11  ;;  %v8020_v40 = vcombine.low %v4579_v27, %v4589_v52  ;;  %v4884_v18 = vld [vmem:[#allocation3 + $0x48] sm:$0xe] }
 0x247   : > { %v5240_v12 = vrot.slane %v5239_v41, 4  ;;  %v4615_v9 = vshrl.u32 %v4456_v37, 16  ;;  %v4641_v60 = vrot.slane %v4639_v29, 4  ;;  %v4644_v4 = vrot.slane %v4642_v47, 5 }
 0x248   : > { %6473 = vrot.lane.b32.xlu1 %v8038_v57, %s8461_s12  ;;  %v10782_v50 = vrot.slane %v4648_v10, 5  ;;  %v7974_v26 = vrot.slane %v5491_v34, 9  ;;  %v4986_v53 = vrot.slane %v10762_v55, 5  ;;  %v4654_v22 = vrot.slane %v4652_v3, 4  ;;  %v6384_v55 = vpop.permute.xlu0 %6383  ;;  %v8361_v57 = vld [vmem:[%s12518_s3 + $0x30] sm:$0xff]  }
 0x249   : > { %v5245_v23 = vsel %vm8646_vm11, %v5240_v12, %v5244_v33  ;;  %v4618_v15 = vshll.u32 %v4456_v37, 16  ;;  %v5589_v11 = vrot.slane %v5587_v25, 4  ;;  %v4617_v27 = vrot.slane %v4615_v9, 4  ;;  %7378 = vmatpush1.bf16.msra.mxu0 %v8361_v57  ;;  %v8362_v12 = vld [vmem:[%s12518_s3 + $0x38] sm:$0xff]   ;;  %8276 = vmatpush1.bf16.msra.mxu1 %v8361_v57  ;;  %v10823_v9 = vld [vmem:[#allocation3 + $0x38] sm:$0x1] }
 0x24a   : > { %v8070_v51 = vcombine.low %v5235_v17, %v5245_v23  ;;  %6897 = vrot.lane.b32.xlu0 %v10721_v6, %s8465_s20  ;;  %v4624_v56 = vshll.u32 %v10729_v38, 16  ;;  %v4628_v5 = vshrl.u32 %v10729_v38, 16  ;;  %v4655_v6 = vor.u32 %v4654_v22, %v10782_v50  ;;  %7379 = vmatprep.subr.bf16.mxu0 %v12558_v16  ;;  %v8364_v22 = vld [vmem:[%s12518_s3 + $0x40] sm:$0xff]  }
 0x24b   : > { %v4620_v35 = vrot.slane %v4618_v15, 5  ;;  %v6170_v32 = vrot.slane %v6168_v63, 4  ;;  %v6171_v14 = vrot.slane %v10602_v49, 5  ;;  %v5590_v31 = vrot.slane %v10719_v62, 5  ;;  %8268 = vmatprep.subr.bf16.mxu1 %v12558_v16 }
 0x24c   : > { %6649 = vrot.lane.b32.xlu1 %v8070_v51, %s8466_s21  ;;  %v4645_v54 = vor.u32 %v4644_v4, %v4641_v60  ;;  %v4658_v41 = vshll.u32 %v4484_v2, 16  ;;  %v10798_v38 = vsel %vm8626_vm7, %v7986_v43, %v6168_v63  ;;  %v4988_v52 = vrot.slane %v4986_v53, 4 }
 0x24d   : > { %v10800_v29 = vrot.slane %v4624_v56, 5  ;;  %v4630_v49 = vrot.slane %v4628_v5, 4  ;;  %v4656_v62 = vrot.slane %v4655_v6, 4  ;;  %v4621_v37 = vor.u32 %v4620_v35, %v4617_v27  ;;  %7380 = vmatpush1.bf16.msra.mxu0 %v8362_v12  ;;  %8277 = vmatpush1.bf16.msra.mxu1 %v8362_v12  ;;  %v10862_v5 = vld [vmem:[#allocation3 + $0x10] sm:$0xf] }
 0x24e   : > { %6643 = vrot.lane.b32.xlu0 %v10723_v59, %s8466_s21  ;;  %v10804_v59 = vsel %vm8626_vm7, %v6170_v32, %v6171_v14  ;;  %v5184_v43 = vshll.u32 %v10742_v13, 16  ;;  %v5591_v63 = vsel %vm8626_vm7, %v5589_v11, %v5590_v31  ;;  %v7959_v34 = vrot.slane %v4884_v18, 9  ;;  %7381 = vmatprep.subr.bf16.mxu0 %v12558_v16  ;;  %v10853_v11 = vld [vmem:[#allocation3 + $0x30] sm:$0xe]  ;;  %v10866_v35 = vld [vmem:[#allocation3 + $0x40] sm:$0xf] }
 0x24f   : > { %v4989_v47 = vrot.slane %v4484_v2, 5  ;;  %v6978_v10 = vsel %vm6975_vm2, %v8001_v20, %v6384_v55  ;;  %v5588_v3 = vsel %vm8626_vm7, %v7974_v26, %v5587_v25  ;;  %v4646_v17 = vrot.slane %v4645_v54, 4  ;;  %v6464_v2 = vpop.permute.xlu0 %6463  ;;  %8269 = vmatprep.subr.bf16.mxu1 %v12558_v16  ;;  %12572 = vst [vmem:[#allocation7_spill] sm:$0xff] %v10866_v35  ;;  %v10880_v54 = vld [vmem:[%s12517_s2] ss:$0 sm:$0xff] }
 0x250   : > { %v4660_v23 = vrot.slane %v4658_v41, 5  ;;  %v5181_v51 = vor.u32 %v10769_v7, %v10755_v24  ;;  %v4634_v19 = vshll.u32 %v10731_v39, 16  ;;  %v10830_v20 = vrot.slane %v5184_v43, 5  ;;  %v10844_v7 = vld [vmem:[#allocation3 + $0x1c] sm:$0xf] }
 0x251   : > { %v4990_v8 = vsel %vm8626_vm7, %v4988_v52, %v4989_v47  ;;  %v8086_v60 = vcombine.low %v5588_v3, %v5591_v63  ;;  %v10836_v4 = vrot.slane %v4621_v37, 4  ;;  %v4631_v26 = vor.u32 %v4630_v49, %v10800_v29  ;;  %7382 = vmatpush1.bf16.msra.mxu0 %v8364_v22  ;;  %8278 = vmatpush1.bf16.msra.mxu1 %v8364_v22  ;;  %v5698_v22 = vld [vmem:[#allocation3 + $0x44] sm:$0x1] }
 0x252   : > { %6389 = vrot.lane.b32.xlu0 %v8020_v40, %s8460_s11  ;;  %v5190_v40 = vrot.slane %v5188_v45, 4  ;;  %v4661_v25 = vsel %vm8646_vm11, %v4656_v62, %v4660_v23  ;;  %v4987_v24 = vsel %vm8626_vm7, %v7959_v34, %v4986_v53  ;;  %v10842_v39 = vsel %vm7024_vm6, %v6978_v10, %v6464_v2 }
 0x253   : > { %v5194_v15 = vshll.u32 %v10823_v9, 16  ;;  %v8039_v53 = vcombine.low %v4987_v24, %v4990_v8  ;;  %v4651_v27 = vsel %vm8646_vm11, %v4646_v17, %v10782_v50  ;;  %v10870_v16 = vrot.slane %v4634_v19, 5  ;;  %v10875_v50 = vld [vmem:[#allocation3 + $0x3c] sm:$0xf] }
 0x254   : > { %v10868_v14 = vcombine.low %v4651_v27, %v4661_v25  ;;  %v10872_v31 = vrot.slane %v5181_v51, 4  ;;  %v5191_v18 = vor.u32 %v5190_v40, %v10830_v20  ;;  %12573 = vst [vmem:[#allocation8_spill] sm:$0xff] %v10875_v50  ;;  %v10887_v52 = vrot.slane %v4631_v26, 4 }
 0x255   : > { %v10891_v12 = vrot.slane %v5194_v15, 5  ;;  %v5797_v43 = vshrl.u32 %v10866_v35, 16  ;;  %v5793_v63 = vshll.u32 %v10866_v35, 16  ;;  %v12526_v3 = vrot.slane %v10742_v13, 5 }
 0x256   : > { %6729 = vrot.lane.b32.xlu0 %v8086_v60, %s8464_s17  ;;  %v5784_v17 = vshrl.u32 %v10875_v50, 16  ;;  %v10900_v8 = vrot.slane %v5191_v18, 4  ;;  %v5787_v19 = vshll.u32 %v10875_v50, 16  ;;  %v4637_v25 = vsel %vm8646_vm11, %v10887_v52, %v10870_v16  ;;  %v10967_v52 = vld [vmem:[#allocation3 + $0x38] sm:$0x1] }
 0x257   : > { %v8243_v32 = vpop.f32.mrb[12].mxu0  ;;  %v10908_v15 = vrot.slane %v5793_v63, 5  ;;  %v10912_v18 = vrot.slane %v12526_v3, 4  ;;  %v6175_v26 = vrot.slane %v10470_v46, 5  ;;  %v4387_v3 = vld [vmem:[#allocation3 + $0x68] sm:$0x1] }
 0x258   : > { %v3755_v41 = vadd.f32 %v10880_v54, %v8243_v32  ;;  %v3746_v55 = vpop.f32.mrb[13].mxu0  ;;  %v6178_v16 = vrot.slane %v10573_v30, 5  ;;  %12579 = vst [vmem:[#allocation11_spill] sm:$0xff] %v10967_v52 }
 0x259   : > { %v3747_v62 = vadd.f32 %v10880_v54, %v3746_v55  ;;  %v8244_v37 = vpop.f32.mrb[14].mxu0 }
 0x25a   : > { %v3839_v34 = vmax.f32 %v3755_v41, 0.0  ;;  %v3758_v47 = vadd.f32 %v10880_v54, %v8244_v37  ;;  %v3749_v10 = vpop.f32.mrb[15].mxu0  ;;  %6475 = vrot.lane.b32.xlu0 %v8039_v53, %s8461_s12  ;;  %v5799_v53 = vrot.slane %v5797_v43, 4  ;;  %v5786_v41 = vrot.slane %v5784_v17, 4  ;;  %v4383_v43 = vld [vmem:[#allocation3 + $0x60] sm:$0xf] }
 0x25b   : > { %v3837_v23 = vmax.f32 %v3747_v62, 0.0  ;;  %v3750_v51 = vadd.f32 %v10880_v54, %v3749_v10  ;;  %v5197_v37 = vsel %vm8646_vm11, %v10900_v8, %v10891_v12  ;;  %v4376_v17 = vld [vmem:[#allocation3 + $0x54] sm:$0xf] }
 0x25c   : > { %v8189_v40 = vpack.c.bf16 %v3839_v34, %v3839_v34  ;;  %v3840_v60 = vmax.f32 %v3758_v47, 0.0  ;;  %v5789_v34 = vrot.slane %v5787_v19, 5  ;;  %v5800_v56 = vor.u32 %v5799_v53, %v10908_v15  ;;  %v4454_v53 = vld [vmem:[#allocation3 + $0x30] sm:$0xf] }
 0x25d   : > { %v8187_v2 = vpack.c.bf16 %v3837_v23, %v3837_v23  ;;  %v3838_v24 = vmax.f32 %v3750_v51, 0.0  ;;  %v5803_v23 = vshll.u32 %v5698_v22, 16 }
 0x25e   : > { %v4129_v27 = vshrl.u32 %v8189_v40, 16  ;;  %v8190_v32 = vpack.c.bf16 %v3840_v60, %v3840_v60  ;;  %v4132_v10 = vshll.u32 %v8189_v40, 16  ;;  %v5790_v19 = vor.u32 %v5789_v34, %v5786_v41 }
 0x25f   : > { %v4112_v55 = vshrl.u32 %v8187_v2, 16  ;;  %v8188_v62 = vpack.c.bf16 %v3838_v24, %v3838_v24  ;;  %v4115_v60 = vshll.u32 %v8187_v2, 16 }
 0x260   : > { %v4131_v47 = vrot.slane %v4129_v27, 7  ;;  %v4137_v63 = vshrl.u32 %v8190_v32, 16  ;;  %v4140_v24 = vshll.u32 %v8190_v32, 16 }
 0x261   : > { %v4114_v51 = vrot.slane %v4112_v55, 7  ;;  %v4120_v45 = vshrl.u32 %v8188_v62, 16  ;;  %v4123_v8 = vshll.u32 %v8188_v62, 16  ;;  %v4380_v55 = vld [vmem:[#allocation3 + $0x5c] sm:$0x1]  ;;  %v6177_v62 = vrot.slane %v6175_v26, 4 }
 0x262   : > { %v4134_v33 = vor.u32 %v4132_v10, %v4131_v47  ;;  %v4139_v6 = vrot.slane %v4137_v63, 7  ;;  %v4135_v40 = vrot.slane %v4131_v47, 4  ;;  %v4591_v47 = vshrl.u32 %v4454_v53, 16 }
 0x263   : > { %v4117_v49 = vor.u32 %v4115_v60, %v4114_v51  ;;  %v4122_v12 = vrot.slane %v4120_v45, 7  ;;  %v10922_v57 = vpop.permute.xlu0 %6815  ;;  %v4118_v10 = vrot.slane %v4114_v51, 4  ;;  %v10926_v45 = vld [vmem:[#allocation3 + $0x34] sm:$0xf]  ;;  %v6097_v60 = vld [vmem:[#allocation3 + $0x30] sm:$0xe]  ;;  %v10984_v30 = vsel %vm8626_vm7, %v6177_v62, %v6178_v16 }
 0x264   : > { %v4384_v22 = vsel %vm10301_vm13, %v4134_v33, %v4383_v43  ;;  %v4142_v27 = vor.u32 %v4140_v24, %v4139_v6  ;;  %v4144_v2 = vrot.slane %v4139_v6, 4  ;;  %12574 = vst [vmem:[#allocation9_spill] sm:$0xff] %v10926_v45  ;;  %v5801_v6 = vrot.slane %v5800_v56, 4  ;;  %12583 = vst [vmem:[#allocation14_spill] sm:$0xff] %v10984_v30 }
 0x265   : > { %4385 = vst [vmem:[#allocation3 + $0x60] sm:$0xf] %v4384_v22  ;;  %v4377_v46 = vsel %vm10301_vm13, %v4117_v49, %v4376_v17  ;;  %v4125_v32 = vor.u32 %v4123_v8, %v4122_v12  ;;  %v4127_v63 = vrot.slane %v4122_v12, 4  ;;  %v4594_v43 = vshll.u32 %v4454_v53, 16 }
 0x266   : > { %4378 = vst [vmem:[#allocation3 + $0x54] sm:$0xf] %v4377_v46  ;;  %v4143_v41 = vsel %vm8654_vm12, %v4135_v40, %v4142_v27  ;;  %v4388_v33 = vsel %vm10308_vm15, %v4144_v2, %v4387_v3  ;;  %v5791_v3 = vrot.slane %v5790_v19, 4  ;;  %v5805_v56 = vrot.slane %v5803_v23, 5 }
 0x267   : > { %4386 = vst.msk [vmem:[#allocation3 + $0x64] sm:$0xf] %vm3857_vm0, %v4143_v41  ;;  %4389 = vst [vmem:[#allocation3 + $0x68] sm:$0x1] %v4388_v33  ;;  %v4126_v34 = vsel %vm8654_vm12, %v4118_v10, %v4125_v32  ;;  %v4381_v49 = vsel %vm10308_vm15, %v4127_v63, %v4380_v55  ;;  %v10938_v51 = vpop.permute.xlu0 %6561  ;;  %v4600_v17 = vshll.u32 %v10926_v45, 16  ;;  %v4604_v24 = vshrl.u32 %v10926_v45, 16 }
 0x268   : > { %4379 = vst.msk [vmem:[#allocation3 + $0x58] sm:$0xf] %vm3857_vm0, %v4126_v34  ;;  %4382 = vst [vmem:[#allocation3 + $0x5c] sm:$0x1] %v4381_v49  ;;  %v12575_v12 = vsel %vm8646_vm11, %v10836_v4, %v10800_v29  ;;  %v5187_v23 = vsel %vm8646_vm11, %v10872_v31, %v10830_v20  ;;  %v12576_v19 = vrot.slane %v10742_v13, 5  ;;  %v12577_v40 = vrot.slane %v10853_v11, 9 }
 0x269   : > { %v10952_v8 = vcombine.low %v12575_v12, %v4637_v25  ;;  %v10969_v29 = vcombine.low %v5187_v23, %v5197_v37  ;;  %v12581_v4 = vrot.slane %v10823_v9, 5  ;;  %v5806_v31 = vsel %vm8646_vm11, %v5801_v6, %v5805_v56  ;;  %v4882_v9 = vld [vmem:[#allocation3 + $0x30] sm:$0xe] }
 0x26a   : > { %v10964_v22 = vsel %vm8626_vm7, %v12577_v40, %v12576_v19  ;;  %v7987_v25 = vrot.slane %v6097_v60, 9  ;;  %v10986_v37 = vrot.slane %v4591_v47, 4  ;;  %v10988_v27 = vrot.slane %v4594_v43, 5 }
 0x26b   : > { %12578 = vst [vmem:[#allocation10_spill] sm:$0xff] %v10964_v22  ;;  %12580 = vst [vmem:[#allocation12_spill] sm:$0xff] %v10969_v29  ;;  %v10976_v20 = vsel %vm8626_vm7, %v10912_v18, %v12581_v4  ;;  %v5796_v18 = vsel %vm8646_vm11, %v5791_v3, %v10908_v15  ;;  %v10993_v55 = vrot.slane %v4600_v17, 5  ;;  %v10995_v53 = vrot.slane %v4604_v24, 4  ;;  %v6560_v49 = vpop.permute.xlu0 %6559 }
 0x26c   : > { %12582 = vst [vmem:[#allocation13_spill] sm:$0xff] %v10976_v20  ;;  %12584 = vst [vmem:[#allocation15_spill] sm:$0xff] %v10986_v37  ;;  %v5675_v2 = vld [vmem:[#allocation3 + $0x60] sm:$0xf]  ;;  %v4610_v10 = vshll.u32 %v10967_v52, 16  ;;  %v11002_v63 = vcombine.low %v5796_v18, %v5806_v31  ;;  %v11006_v41 = vsel %vm8626_vm7, %v7987_v25, %v6175_v26  ;;  %v12527_v33 = vrot.slane %v10926_v45, 5 }
 0x26d   : > { %12585 = vst [vmem:[#allocation16_spill] sm:$0xff] %v10988_v27  ;;  %12586 = vst [vmem:[#allocation17_spill] sm:$0xff] %v10993_v55  ;;  %v10998_v46 = vld [vmem:[#allocation3 + $0x54] sm:$0xf]  ;;  %v5856_v62 = vshrl.u32 %v5675_v2, 16  ;;  %v5859_v34 = vshll.u32 %v5675_v2, 16 }
 0x26e   : > { %12587 = vst [vmem:[#allocation18_spill] sm:$0xff] %v10995_v53  ;;  %12588 = vst [vmem:[#allocation19_spill] sm:$0xff] %v11002_v63  ;;  %v6100_v15 = vld [vmem:[#allocation3 + $0x54] sm:$0xe]  ;;  %v11009_v6 = vld [vmem:[#allocation3 + $0x64] sm:$0xf] }
 0x26f   : > { %12589 = vst [vmem:[#allocation20_spill] sm:$0xff] %v11006_v41  ;;  %v11015_v3 = vld [vmem:[#allocation3 + $0x58] sm:$0xf]  ;;  %v5832_v56 = vshrl.u32 %v10998_v46, 16  ;;  %v8103_v26 = vcombine.low %v5675_v2, %v11009_v6  ;;  %v5068_v60 = vld [vmem:[#allocation3 + $0x60] sm:$0xf]  ;;  %v11062_v47 = vpop.permute.xlu0 %6721 }
 0x270   : > { %v7957_v24 = vrot.slane %v4882_v9, 9  ;;  %v8102_v12 = vcombine.low %v10998_v46, %v11015_v3  ;;  %v11023_v23 = vld [vmem:[#allocation3 + $0x5c] sm:$0x1]  ;;  %v11027_v40 = vrot.slane %v4610_v10, 5  ;;  %v7990_v31 = vrot.slane %v6100_v15, 9  ;;  %12592 = vst [vmem:[#allocation23_spill] sm:$0xff] %v11062_v47 }
 0x271   : > { %v6196_v25 = vrot.slane %v11015_v3, 5  ;;  %6827 = vrot.lane.b32.xlu0 %v8103_v26, %s8462_s15  ;;  %v11033_v9 = vld [vmem:[#allocation3 + $0x58] sm:$0xf]  ;;  %v11043_v10 = vrot.slane %v5856_v62, 4  ;;  %v11045_v11 = vrot.slane %v5859_v34, 5  ;;  %v5271_v16 = vshrl.u32 %v5068_v60, 16 }
 0x272   : > { %12590 = vst [vmem:[#allocation21_spill] sm:$0xff] %v11027_v40  ;;  %v11039_v2 = vsel %vm8626_vm7, %v7957_v24, %v12527_v33  ;;  %6825 = vrot.lane.b32.xlu1 %v8102_v12, %s8462_s15  ;;  %v11047_v15 = vld [vmem:[#allocation3 + $0x64] sm:$0xf]  ;;  %v11049_v26 = vrot.slane %v5832_v56, 4  ;;  %v6199_v19 = vrot.slane %v11023_v23, 5  ;;  %v11056_v24 = vsel %vm7057_vm3, %v10842_v39, %v6560_v49 }
 0x273   : > { %12591 = vst [vmem:[#allocation22_spill] sm:$0xff] %v11039_v2  ;;  %v8247_v32 = vpop.f32.mrb[16].mxu0  ;;  %v6198_v43 = vrot.slane %v6196_v25, 4  ;;  %v11052_v17 = vld [vmem:[#allocation3 + $0x54] sm:$0xf]  ;;  %v5274_v56 = vshll.u32 %v5068_v60, 16  ;;  %v6197_v18 = vsel %vm8626_vm7, %v7990_v31, %v6196_v25 }
 0x274   : > { %v3771_v62 = vadd.f32 %v10880_v54, %v8247_v32  ;;  %v3762_v12 = vpop.f32.mrb[17].mxu0  ;;  %v8055_v33 = vcombine.low %v11052_v17, %v11033_v9  ;;  %v8056_v32 = vcombine.low %v5068_v60, %v11047_v15  ;;  %v11070_v63 = vld [vmem:[#allocation3 + $0x5c] sm:$0x1]  ;;  %v5492_v34 = vld [vmem:[#allocation3 + $0x54] sm:$0xe]  ;;  %v11075_v31 = vrot.slane %v5271_v16, 4 }
 0x275   : > { %v6200_v4 = vsel %vm8626_vm7, %v6198_v43, %v6199_v19  ;;  %v3763_v39 = vadd.f32 %v10880_v54, %v3762_v12  ;;  %v8248_v49 = vpop.f32.mrb[18].mxu0  ;;  %v4885_v25 = vld [vmem:[#allocation3 + $0x54] sm:$0xe]  ;;  %v11078_v12 = vrot.slane %v5274_v56, 5  ;;  %v5594_v60 = vrot.slane %v11033_v9, 5 }
 0x276   : > { %6395 = vrot.lane.b32.xlu1 %v10868_v14, %s8460_s11  ;;  %v3843_v35 = vmax.f32 %v3771_v62, 0.0  ;;  %v8134_v50 = vcombine.low %v6197_v18, %v6200_v4  ;;  %v3774_v2 = vadd.f32 %v10880_v54, %v8248_v49  ;;  %v3765_v52 = vpop.f32.mrb[19].mxu0  ;;  %6573 = vrot.lane.b32.xlu0 %v8056_v32, %s8463_s16  ;;  %v11082_v20 = vld [vmem:[#allocation3 + $0x58] sm:$0xf]  ;;  %v7975_v18 = vrot.slane %v5492_v34, 9 }
 0x277   : > { %v3841_v43 = vmax.f32 %v3763_v39, 0.0  ;;  %v3766_v19 = vadd.f32 %v10880_v54, %v3765_v52  ;;  %v5597_v16 = vrot.slane %v11070_v63, 5  ;;  %v5596_v39 = vrot.slane %v5594_v60, 4  ;;  %v11096_v40 = vld [vmem:[#allocation3 + $0x5c] sm:$0x1] }
 0x278   : > { %v8193_v14 = vpack.c.bf16 %v3843_v35, %v3843_v35  ;;  %8160 = vmatprep.mubr.msk.bf16.mxu1 %vm6975_vm2, %v8134_v50  ;;  %v3844_v4 = vmax.f32 %v3774_v2, 0.0  ;;  %v7960_v22 = vrot.slane %v4885_v25, 9  ;;  %v5595_v32 = vsel %vm8626_vm7, %v7975_v18, %v5594_v60  ;;  %v11090_v35 = vpop.permute.xlu0 %6467  ;;  %v4397_v60 = vld [vmem:[#allocation3 + $0x78] sm:$0xf]  ;;  %v4390_v55 = vld [vmem:[#allocation3 + $0x6c] sm:$0xf] }
 0x279   : > { %v8191_v62 = vpack.c.bf16 %v3841_v43, %v3841_v43  ;;  %v3842_v49 = vmax.f32 %v3766_v19, 0.0  ;;  %v4993_v45 = vrot.slane %v11082_v20, 5  ;;  %12593 = vst [vmem:[#allocation24_spill] sm:$0xff] %v11090_v35  ;;  %v5598_v43 = vsel %vm8626_vm7, %v5596_v39, %v5597_v16  ;;  %v4401_v53 = vld [vmem:[#allocation3 + $0x80] sm:$0x1] }
 0x27a   : > { %v4163_v52 = vshrl.u32 %v8193_v14, 16  ;;  %v8194_v56 = vpack.c.bf16 %v3844_v4, %v3844_v4  ;;  %6571 = vrot.lane.b32.xlu1 %v8055_v33, %s8463_s16  ;;  %v4166_v50 = vshll.u32 %v8193_v14, 16  ;;  %6393 = vrot.lane.b32.xlu0 %v10952_v8, %s8460_s11  ;;  %v8087_v33 = vcombine.low %v5595_v32, %v5598_v43  ;;  %v4394_v32 = vld [vmem:[#allocation3 + $0x74] sm:$0x1]  ;;  %v5493_v37 = vld [vmem:[#allocation3 + $0x60] sm:$0xe] }
 0x27b   : > { %v4146_v2 = vshrl.u32 %v8191_v62, 16  ;;  %v8192_v34 = vpack.c.bf16 %v3842_v49, %v3842_v49  ;;  %v4149_v19 = vshll.u32 %v8191_v62, 16  ;;  %v4994_v8 = vsel %vm8626_vm7, %v7960_v22, %v4993_v45 }
 0x27c   : > { %v4165_v25 = vrot.slane %v4163_v52, 7  ;;  %v4171_v4 = vshrl.u32 %v8194_v56, 16  ;;  %v4174_v61 = vshll.u32 %v8194_v56, 16  ;;  %v4995_v16 = vrot.slane %v4993_v45, 4 }
 0x27d   : > { %v4148_v18 = vrot.slane %v4146_v2, 7  ;;  %v4154_v42 = vshrl.u32 %v8192_v34, 16  ;;  %v4157_v29 = vshll.u32 %v8192_v34, 16  ;;  %v4996_v43 = vrot.slane %v11096_v40, 5 }
 0x27e   : > { %v4168_v14 = vor.u32 %v4166_v50, %v4165_v25  ;;  %v4173_v49 = vrot.slane %v4171_v4, 7  ;;  %6731 = vrot.lane.b32.xlu1 %v8087_v33, %s8464_s17  ;;  %v4169_v62 = vrot.slane %v4165_v25, 4  ;;  %v11104_v4 = vld [vmem:[#allocation3 + $0x68] sm:$0x1]  ;;  %v11106_v33 = vpop.permute.xlu0 %6719 }
 0x27f   : > { %v4151_v39 = vor.u32 %v4149_v19, %v4148_v18  ;;  %v4156_v52 = vrot.slane %v4154_v42, 7  ;;  %v4152_v2 = vrot.slane %v4148_v18, 4  ;;  %v4997_v25 = vsel %vm8626_vm7, %v4995_v16, %v4996_v43 }
 0x280   : > { %v4398_v56 = vsel %vm10301_vm13, %v4168_v14, %v4397_v60  ;;  %v4176_v50 = vor.u32 %v4174_v61, %v4173_v49  ;;  %v4178_v34 = vrot.slane %v4173_v49, 4  ;;  %v8040_v60 = vcombine.low %v4994_v8, %v4997_v25  ;;  %v5701_v14 = vld [vmem:[#allocation3 + $0x68] sm:$0x1]  ;;  %v11117_v49 = vld [vmem:[#allocation3 + $0x64] sm:$0xf] }
 0x281   : > { %4399 = vst [vmem:[#allocation3 + $0x78] sm:$0xf] %v4398_v56  ;;  %v4391_v45 = vsel %vm10301_vm13, %v4151_v39, %v4390_v55  ;;  %v4159_v22 = vor.u32 %v4157_v29, %v4156_v52  ;;  %v4161_v42 = vrot.slane %v4156_v52, 4  ;;  %v5601_v18 = vrot.slane %v11047_v15, 5  ;;  %v11132_v56 = vld [vmem:[#allocation3 + $0x68] sm:$0x1] }
 0x282   : > { %4392 = vst [vmem:[#allocation3 + $0x6c] sm:$0xf] %v4391_v45  ;;  %v4177_v19 = vsel %vm8654_vm12, %v4169_v62, %v4176_v50  ;;  %v4402_v61 = vsel %vm10308_vm15, %v4178_v34, %v4401_v53  ;;  %v7976_v16 = vrot.slane %v5493_v37, 9  ;;  %v5604_v62 = vrot.slane %v11104_v4, 5  ;;  %6477 = vrot.lane.b32.xlu1 %v8040_v60, %s8461_s12  ;;  %v4886_v50 = vld [vmem:[#allocation3 + $0x60] sm:$0xe] }
 0x283   : > { %4400 = vst.msk [vmem:[#allocation3 + $0x7c] sm:$0xf] %vm3857_vm0, %v4177_v19  ;;  %4403 = vst [vmem:[#allocation3 + $0x80] sm:$0x1] %v4402_v61  ;;  %v4160_v29 = vsel %vm8654_vm12, %v4152_v2, %v4159_v22  ;;  %v4395_v55 = vsel %vm10308_vm15, %v4161_v42, %v4394_v32  ;;  %v5603_v53 = vrot.slane %v5601_v18, 4  ;;  %v5862_v8 = vor.u32 %v11045_v11, %v11043_v10  ;;  %v11142_v22 = vpop.permute.xlu0 %6465 }
 0x284   : > { %4393 = vst.msk [vmem:[#allocation3 + $0x70] sm:$0xf] %vm3857_vm0, %v4160_v29  ;;  %4396 = vst [vmem:[#allocation3 + $0x74] sm:$0x1] %v4395_v55  ;;  %v5865_v39 = vshll.u32 %v11009_v6, 16  ;;  %v12594_v52 = vshrl.u32 %v11009_v6, 16  ;;  %v5602_v11 = vsel %vm8626_vm7, %v7976_v16, %v5601_v18  ;;  %v5277_v19 = vor.u32 %v11078_v12, %v11075_v31 }
 0x285   : > { %v5851_v37 = vshll.u32 %v11023_v23, 16  ;;  %v5284_v32 = vshrl.u32 %v11047_v15, 16  ;;  %v5875_v2 = vshll.u32 %v5701_v14, 16  ;;  %v5000_v34 = vrot.slane %v11117_v49, 5 }
 0x286   : > { %v5871_v43 = vrot.slane %v12594_v52, 4  ;;  %v5247_v45 = vshrl.u32 %v11052_v17, 16  ;;  %v5605_v10 = vsel %vm8626_vm7, %v5603_v53, %v5604_v62  ;;  %v5867_v6 = vrot.slane %v5865_v39, 5 }
 0x287   : > { %v8088_v42 = vcombine.low %v5602_v11, %v5605_v10  ;;  %v5002_v25 = vrot.slane %v5000_v34, 4  ;;  %v5003_v23 = vrot.slane %v11132_v56, 5  ;;  %v5863_v61 = vrot.slane %v5862_v8, 4 }
 0x288   : > { %v5872_v60 = vor.u32 %v5871_v43, %v5867_v6  ;;  %v7961_v14 = vrot.slane %v4886_v50, 9  ;;  %v5280_v29 = vshll.u32 %v11047_v15, 16  ;;  %v5679_v55 = vld [vmem:[#allocation3 + $0x78] sm:$0xf]  ;;  %v5250_v18 = vshll.u32 %v11052_v17, 16  ;;  %v11157_v15 = vpop.permute.xlu0 %6819 }
 0x289   : > { %6733 = vrot.lane.b32.xlu0 %v8088_v42, %s8464_s17  ;;  %v5877_v16 = vrot.slane %v5875_v2, 5  ;;  %v5004_v62 = vsel %vm8626_vm7, %v5002_v25, %v5003_v23  ;;  %v5286_v53 = vrot.slane %v5284_v32, 4  ;;  %v5290_v12 = vshll.u32 %v11104_v4, 16  ;;  %12595 = vst [vmem:[#allocation25_spill] sm:$0xff] %v11157_v15  ;;  %v4462_v4 = vld [vmem:[#allocation3 + $0x60] sm:$0xf] }
 0x28a   : > { %v5873_v39 = vrot.slane %v5872_v60, 4  ;;  %v5001_v52 = vsel %vm8626_vm7, %v7961_v14, %v5000_v34  ;;  %v5282_v31 = vrot.slane %v5280_v29, 5  ;;  %v11155_v8 = vld [vmem:[#allocation3 + $0x7c] sm:$0xf]  ;;  %v12596_v17 = vshll.u32 %v10998_v46, 16 }
 0x28b   : > { %v8041_v2 = vcombine.low %v5001_v52, %v5004_v62  ;;  %v5278_v50 = vrot.slane %v5277_v19, 4  ;;  %v5904_v11 = vshrl.u32 %v5679_v55, 16  ;;  %v5868_v32 = vsel %vm8646_vm11, %v5863_v61, %v5867_v6  ;;  %v11172_v19 = vld [vmem:[#allocation3 + $0x70] sm:$0xf] }
 0x28c   : > { %v11161_v43 = vrot.slane %v12596_v17, 5  ;;  %v5878_v34 = vsel %vm8646_vm11, %v5873_v39, %v5877_v16  ;;  %v5287_v10 = vor.u32 %v5286_v53, %v5282_v31  ;;  %v5907_v42 = vshll.u32 %v5679_v55, 16  ;;  %v11184_v53 = vld [vmem:[#allocation3 + $0x6c] sm:$0xf]  ;;  %v11193_v17 = vld [vmem:[#allocation3 + $0x7c] sm:$0xf] }
 0x28d   : > { %v11167_v25 = vrot.slane %v5851_v37, 5  ;;  %v8119_v60 = vcombine.low %v5868_v32, %v5878_v34  ;;  %6479 = vrot.lane.b32.xlu0 %v8041_v2, %s8461_s12  ;;  %v8105_v46 = vcombine.low %v5679_v55, %v11155_v8  ;;  %v11174_v14 = vrot.slane %v5247_v45, 4  ;;  %v11195_v2 = vpop.permute.xlu0 %6895  ;;  %v11229_v47 = vld [vmem:[#allocation3 + $0x70] sm:$0xf] }
 0x28e   : > { %v11176_v6 = vrot.slane %v5250_v18, 5  ;;  %v5288_v61 = vrot.slane %v5287_v10, 4  ;;  %v5292_v29 = vrot.slane %v5290_v12, 5  ;;  %v5283_v37 = vsel %vm8646_vm11, %v5278_v50, %v5282_v31  ;;  %v8251_v39 = vpop.f32.mrb[20].mxu0 }
 0x28f   : > { %6907 = vrot.lane.b32.xlu1 %v8119_v60, %s8465_s20  ;;  %v11181_v16 = vrot.slane %v5904_v11, 4  ;;  %v4687_v55 = vshrl.u32 %v4462_v4, 16  ;;  %v11188_v18 = vrot.slane %v5907_v42, 5  ;;  %v8104_v12 = vcombine.low %v11184_v53, %v11172_v19  ;;  %v3778_v31 = vpop.f32.mrb[21].mxu0  ;;  %v11200_v60 = vld [vmem:[#allocation3 + $0x78] sm:$0xf] }
 0x290   : > { %v5293_v45 = vsel %vm8646_vm11, %v5288_v61, %v5292_v29  ;;  %v4690_v32 = vshll.u32 %v4462_v4, 16  ;;  %v4696_v34 = vshll.u32 %v11117_v49, 16  ;;  %v8252_v10 = vpop.f32.mrb[22].mxu0  ;;  %v4700_v61 = vshrl.u32 %v11117_v49, 16 }
 0x291   : > { %v8072_v50 = vcombine.low %v5283_v37, %v5293_v45  ;;  %6831 = vrot.lane.b32.xlu0 %v8105_v46, %s8462_s15  ;;  %v4689_v11 = vrot.slane %v4687_v55, 4  ;;  %v3787_v29 = vadd.f32 %v10880_v54, %v8251_v39  ;;  %v3779_v52 = vadd.f32 %v10880_v54, %v3778_v31  ;;  %v3781_v62 = vpop.f32.mrb[23].mxu0 }
 0x292   : > { %v8058_v46 = vcombine.low %v11200_v60, %v11193_v17  ;;  %v4692_v4 = vrot.slane %v4690_v32, 5  ;;  %v4698_v37 = vrot.slane %v4696_v34, 5  ;;  %v3790_v55 = vadd.f32 %v10880_v54, %v8252_v10  ;;  %v11215_v10 = vpop.permute.xlu0 %6641 }
 0x293   : > { %6653 = vrot.lane.b32.xlu1 %v8072_v50, %s8466_s21  ;;  %v4702_v45 = vrot.slane %v4700_v61, 4  ;;  %v4706_v23 = vshll.u32 %v11132_v56, 16  ;;  %v3847_v42 = vmax.f32 %v3787_v29, 0.0  ;;  %v3845_v15 = vmax.f32 %v3779_v52, 0.0 }
 0x294   : > { %v4693_v49 = vor.u32 %v4692_v4, %v4689_v11  ;;  %v3848_v39 = vmax.f32 %v3790_v55, 0.0  ;;  %v5838_v31 = vor.u32 %v11161_v43, %v11049_v26  ;;  %v5841_v50 = vshll.u32 %v11015_v3, 16 }
 0x295   : > { %6577 = vrot.lane.b32.xlu0 %v8058_v46, %s8463_s16  ;;  %v4703_v32 = vor.u32 %v4702_v45, %v4698_v37  ;;  %v8197_v34 = vpack.c.bf16 %v3847_v42, %v3847_v42  ;;  %v8195_v30 = vpack.c.bf16 %v3845_v15, %v3845_v15  ;;  %v12597_v11 = vshrl.u32 %v11015_v3, 16  ;;  %v4411_v3 = vld [vmem:[#allocation3 + $0x90] sm:$0xf] }
 0x296   : > { %v4694_v56 = vrot.slane %v4693_v49, 4  ;;  %v8198_v52 = vpack.c.bf16 %v3848_v39, %v3848_v39  ;;  %v5843_v61 = vrot.slane %v5841_v50, 5  ;;  %v4708_v4 = vrot.slane %v4706_v23, 5 }
 0x297   : > { %6829 = vrot.lane.b32.xlu1 %v8104_v12, %s8462_s15  ;;  %v5847_v29 = vrot.slane %v12597_v11, 4  ;;  %v4704_v46 = vrot.slane %v4703_v32, 4  ;;  %v4197_v26 = vshrl.u32 %v8197_v34, 16  ;;  %v4180_v43 = vshrl.u32 %v8195_v30, 16  ;;  %v4404_v11 = vld [vmem:[#allocation3 + $0x84] sm:$0xf] }
 0x298   : > { %v4699_v55 = vsel %vm8646_vm11, %v4694_v56, %v4698_v37  ;;  %v4200_v45 = vshll.u32 %v8197_v34, 16  ;;  %v4205_v42 = vshrl.u32 %v8198_v52, 16  ;;  %v5839_v15 = vrot.slane %v5838_v31, 4  ;;  %v4415_v56 = vld [vmem:[#allocation3 + $0x98] sm:$0x1] }
 0x299   : > { %v4709_v27 = vsel %vm8646_vm11, %v4704_v46, %v4708_v4  ;;  %v4199_v12 = vrot.slane %v4197_v26, 7  ;;  %v11224_v49 = vrot.slane %v4180_v43, 7  ;;  %v4183_v39 = vshll.u32 %v8195_v30, 16  ;;  %v11231_v46 = vpop.permute.xlu0 %6817 }
 0x29a   : > { %v8025_v50 = vcombine.low %v4699_v55, %v4709_v27  ;;  %v4207_v32 = vrot.slane %v4205_v42, 7  ;;  %v4208_v23 = vshll.u32 %v8198_v52, 16  ;;  %v5848_v41 = vor.u32 %v5847_v29, %v5843_v61  ;;  %v11240_v55 = vld [vmem:[#allocation3 + $0x6c] sm:$0xf] }
 0x29b   : > { %v5319_v35 = vshrl.u32 %v11200_v60, 16  ;;  %v4202_v34 = vor.u32 %v4200_v45, %v4199_v12  ;;  %v4185_v31 = vor.u32 %v4183_v39, %v11224_v49  ;;  %v4203_v30 = vrot.slane %v4199_v12, 4 }
 0x29c   : > { %6399 = vrot.lane.b32.xlu1 %v8025_v50, %s8460_s11  ;;  %v4210_v27 = vor.u32 %v4208_v23, %v4207_v32  ;;  %v4212_v4 = vrot.slane %v4207_v32, 4  ;;  %v5849_v26 = vrot.slane %v5848_v41, 4  ;;  %v5844_v43 = vsel %vm8646_vm11, %v5839_v15, %v5843_v61  ;;  %v5494_v61 = vld [vmem:[#allocation3 + $0x6c] sm:$0xe]  ;;  %v4460_v32 = vld [vmem:[#allocation3 + $0x54] sm:$0xf] }
 0x29d   : > { %v4412_v52 = vsel %vm10301_vm13, %v4202_v34, %v4411_v3  ;;  %v4405_v29 = vsel %vm10301_vm13, %v4185_v31, %v4404_v11  ;;  %v3782_v45 = vadd.f32 %v10880_v54, %v3781_v62  ;;  %v8057_v39 = vcombine.low %v11240_v55, %v11229_v47  ;;  %v11259_v11 = vld [vmem:[#allocation3 + $0x74] sm:$0x1] }
 0x29e   : > { %4413 = vst [vmem:[#allocation3 + $0x90] sm:$0xf] %v4412_v52  ;;  %4406 = vst [vmem:[#allocation3 + $0x84] sm:$0xf] %v4405_v29  ;;  %v4211_v42 = vsel %vm8654_vm12, %v4203_v30, %v4210_v27  ;;  %v4416_v41 = vsel %vm10308_vm15, %v4212_v4, %v4415_v56  ;;  %v5854_v12 = vsel %vm8646_vm11, %v5849_v26, %v11167_v25  ;;  %v12598_v15 = vshrl.u32 %v11184_v53, 16 }
 0x29f   : > { %4414 = vst.msk [vmem:[#allocation3 + $0x94] sm:$0xf] %vm3857_vm0, %v4211_v42  ;;  %4417 = vst [vmem:[#allocation3 + $0x98] sm:$0x1] %v4416_v41  ;;  %v8118_v54 = vcombine.low %v5844_v43, %v5854_v12  ;;  %v3846_v62 = vmax.f32 %v3782_v45, 0.0  ;;  %v5253_v3 = vor.u32 %v11176_v6, %v11174_v14  ;;  %v4186_v25 = vrot.slane %v11224_v49, 4  ;;  %v11269_v6 = vpop.permute.xlu0 %6387 }
 0x2a0   : > { %v11254_v50 = vrot.slane %v12598_v15, 4  ;;  %6575 = vrot.lane.b32.xlu1 %v8057_v39, %s8463_s16  ;;  %v5256_v23 = vshll.u32 %v11033_v9, 16  ;;  %v12599_v34 = vshrl.u32 %v11033_v9, 16  ;;  %v5266_v56 = vshll.u32 %v11070_v63, 16 }
 0x2a1   : > { %6905 = vrot.lane.b32.xlu0 %v8118_v54, %s8465_s20  ;;  %v8196_v30 = vpack.c.bf16 %v3846_v62, %v3846_v62  ;;  %v5254_v27 = vrot.slane %v5253_v3, 4  ;;  %v7977_v4 = vrot.slane %v5494_v61, 9  ;;  %v5608_v14 = vrot.slane %v11229_v47, 5  ;;  %v4408_v3 = vld [vmem:[#allocation3 + $0x8c] sm:$0x1] }
 0x2a2   : > { %v5262_v31 = vrot.slane %v12599_v34, 4  ;;  %v5258_v26 = vrot.slane %v5256_v23, 5  ;;  %v5611_v49 = vrot.slane %v11259_v11, 5  ;;  %v4663_v52 = vshrl.u32 %v4460_v32, 16 }
 0x2a3   : > { %v4666_v29 = vshll.u32 %v4460_v32, 16  ;;  %v4188_v43 = vshrl.u32 %v8196_v30, 16  ;;  %v4191_v45 = vshll.u32 %v8196_v30, 16  ;;  %v5268_v9 = vrot.slane %v5266_v56, 5 }
 0x2a4   : > { %v5610_v42 = vrot.slane %v5608_v14, 4  ;;  %v5263_v41 = vor.u32 %v5262_v31, %v5258_v26  ;;  %v5609_v63 = vsel %vm8626_vm7, %v7977_v4, %v5608_v14  ;;  %v4665_v12 = vrot.slane %v4663_v52, 4  ;;  %v11279_v14 = vld [vmem:[#allocation3 + $0x70] sm:$0xf]  ;;  %v11281_v52 = vpop.permute.xlu0 %6563 }
 0x2a5   : > { %v4668_v39 = vrot.slane %v4666_v29, 5  ;;  %v4190_v61 = vrot.slane %v4188_v43, 7  ;;  %v4672_v54 = vshll.u32 %v11082_v20, 16  ;;  %v4676_v62 = vshrl.u32 %v11082_v20, 16  ;;  %12600 = vst [vmem:[#allocation26_spill] sm:$0xff] %v11281_v52 }
 0x2a6   : > { %v5612_v15 = vsel %vm8626_vm7, %v5610_v42, %v5611_v49  ;;  %v5264_v32 = vrot.slane %v5263_v41, 4  ;;  %v4682_v56 = vshll.u32 %v11096_v40, 16  ;;  %v5259_v29 = vsel %vm8646_vm11, %v5254_v27, %v5258_v26 }
 0x2a7   : > { %v8089_v23 = vcombine.low %v5609_v63, %v5612_v15  ;;  %v4669_v34 = vor.u32 %v4668_v39, %v4665_v12  ;;  %v4193_v31 = vor.u32 %v4191_v45, %v4190_v61  ;;  %v4195_v30 = vrot.slane %v4190_v61, 4  ;;  %v11293_v63 = vld [vmem:[#allocation3 + $0x74] sm:$0x1]  ;;  %v4887_v12 = vld [vmem:[#allocation3 + $0x6c] sm:$0xe] }
 0x2a8   : > { %v4674_v37 = vrot.slane %v4672_v54, 5  ;;  %v4678_v4 = vrot.slane %v4676_v62, 4  ;;  %v5269_v20 = vsel %vm8646_vm11, %v5264_v32, %v5268_v9  ;;  %v11295_v39 = vld [vmem:[#allocation3 + $0x7c] sm:$0xf]  ;;  %v12601_v27 = vshll.u32 %v11184_v53, 16 }
 0x2a9   : > { %6735 = vrot.lane.b32.xlu1 %v8089_v23, %s8464_s17  ;;  %v4670_v43 = vrot.slane %v4669_v34, 4  ;;  %v4194_v40 = vsel %vm8654_vm12, %v4186_v25, %v4193_v31  ;;  %v4409_v45 = vsel %vm10308_vm15, %v4195_v30, %v4408_v3  ;;  %v8071_v42 = vcombine.low %v5259_v29, %v5269_v20  ;;  %v11308_v15 = vld [vmem:[#allocation3 + $0x80] sm:$0x1]  ;;  %v5495_v3 = vld [vmem:[#allocation3 + $0x78] sm:$0xe] }
 0x2aa   : > { %v4679_v41 = vor.u32 %v4678_v4, %v4674_v37  ;;  %v11299_v26 = vrot.slane %v12601_v27, 5  ;;  %v11303_v9 = vrot.slane %v5319_v35, 4  ;;  %v5295_v25 = vshrl.u32 %v11240_v55, 16  ;;  %4407 = vst.msk [vmem:[#allocation3 + $0x88] sm:$0xf] %vm3857_vm0, %v4194_v40  ;;  %v11324_v40 = vpop.permute.xlu0 %6639 }
 0x2ab   : > { %4410 = vst [vmem:[#allocation3 + $0x8c] sm:$0x1] %v4409_v45  ;;  %v5007_v61 = vrot.slane %v11279_v14, 5  ;;  %v5298_v54 = vshll.u32 %v11240_v55, 16  ;;  %6651 = vrot.lane.b32.xlu0 %v8071_v42, %s8466_s21  ;;  %v4684_v62 = vrot.slane %v4682_v56, 5  ;;  %v5615_v32 = vrot.slane %v11193_v17, 5 }
 0x2ac   : > { %v4680_v53 = vrot.slane %v4679_v41, 4  ;;  %v7962_v35 = vrot.slane %v4887_v12, 9  ;;  %v5010_v34 = vrot.slane %v11293_v63, 5  ;;  %v5014_v31 = vrot.slane %v11295_v39, 5  ;;  %v11315_v30 = vld [vmem:[#allocation3 + $0x90] sm:$0xf] }
 0x2ad   : > { %v5009_v23 = vrot.slane %v5007_v61, 4  ;;  %v4675_v4 = vsel %vm8646_vm11, %v4670_v43, %v4674_v37  ;;  %v5617_v29 = vrot.slane %v5615_v32, 4  ;;  %v5618_v56 = vrot.slane %v11308_v15, 5  ;;  %v11322_v20 = vld [vmem:[#allocation3 + $0x80] sm:$0x1] }
 0x2ae   : > { %v4685_v55 = vsel %vm8646_vm11, %v4680_v53, %v4684_v62  ;;  %v5008_v42 = vsel %vm8626_vm7, %v7962_v35, %v5007_v61  ;;  %v4888_v12 = vld [vmem:[#allocation3 + $0x78] sm:$0xe]  ;;  %v5016_v27 = vrot.slane %v5014_v31, 4  ;;  %v11330_v37 = vld [vmem:[#allocation3 + $0x94] sm:$0xf]  ;;  %v7978_v53 = vrot.slane %v5495_v3, 9 }
 0x2af   : > { %v8024_v45 = vcombine.low %v4675_v4, %v4685_v55  ;;  %v5011_v41 = vsel %vm8626_vm7, %v5009_v23, %v5010_v34  ;;  %v5619_v62 = vsel %vm8626_vm7, %v5617_v29, %v5618_v56  ;;  %v5367_v49 = vshrl.u32 %v11315_v30, 16  ;;  %v5703_v23 = vld [vmem:[#allocation3 + $0x80] sm:$0x1] }
 0x2b0   : > { %v8042_v43 = vcombine.low %v5008_v42, %v5011_v41  ;;  %v12602_v52 = vshll.u32 %v11200_v60, 16  ;;  %v5308_v55 = vshrl.u32 %v11229_v47, 16  ;;  %v5297_v61 = vrot.slane %v5295_v25, 4  ;;  %v11347_v25 = vld [vmem:[#allocation3 + $0x94] sm:$0xf] }
 0x2b1   : > { %6397 = vrot.lane.b32.xlu0 %v8024_v45, %s8460_s11  ;;  %v5017_v35 = vrot.slane %v11322_v20, 5  ;;  %v5300_v34 = vrot.slane %v5298_v54, 5  ;;  %v5616_v3 = vsel %vm8626_vm7, %v7978_v53, %v5615_v32  ;;  %v7963_v29 = vrot.slane %v4888_v12, 9  ;;  %v5702_v53 = vld [vmem:[#allocation3 + $0x74] sm:$0x1] }
 0x2b2   : > { %v5324_v4 = vrot.slane %v12602_v52, 5  ;;  %6481 = vrot.lane.b32.xlu1 %v8042_v43, %s8461_s12  ;;  %v8060_v56 = vcombine.low %v11315_v30, %v11330_v37  ;;  %v8090_v60 = vcombine.low %v5616_v3, %v5619_v62  ;;  %v5910_v45 = vor.u32 %v11188_v18, %v11181_v16  ;;  %v11358_v62 = vpop.permute.xlu0 %6385 }
 0x2b3   : > { %v5018_v52 = vsel %vm8626_vm7, %v5016_v27, %v5017_v35  ;;  %v5913_v54 = vshll.u32 %v11155_v8, 16  ;;  %v5015_v42 = vsel %vm8626_vm7, %v7963_v29, %v5014_v31  ;;  %v11354_v41 = vrot.slane %v5367_v49, 4  ;;  %v11361_v27 = vld [vmem:[#allocation3 + $0x90] sm:$0xf] }
 0x2b4   : > { %v12604_v32 = vshrl.u32 %v11155_v8, 16  ;;  %v5923_v43 = vshll.u32 %v5703_v23, 16  ;;  %v5911_v35 = vrot.slane %v5910_v45, 4  ;;  %v5886_v18 = vor.u32 %v11299_v26, %v11254_v50 }
 0x2b5   : > { %12603 = vst [vmem:[#allocation27_spill] sm:$0xff] %v11354_v41  ;;  %6737 = vrot.lane.b32.xlu0 %v8090_v60, %s8464_s17  ;;  %v5915_v16 = vrot.slane %v5913_v54, 5  ;;  %v5889_v31 = vshll.u32 %v11172_v19, 16  ;;  %v8043_v49 = vcombine.low %v5015_v42, %v5018_v52  ;;  %v5370_v3 = vshll.u32 %v11315_v30, 16 }
 0x2b6   : > { %v5919_v12 = vrot.slane %v12604_v32, 4  ;;  %6581 = vrot.lane.b32.xlu1 %v8060_v56, %s8463_s16  ;;  %v8107_v8 = vcombine.low %v11361_v27, %v11347_v25  ;;  %v12605_v23 = vshrl.u32 %v11172_v19, 16  ;;  %v5925_v32 = vrot.slane %v5923_v43, 5 }
 0x2b7   : > { %v5891_v45 = vrot.slane %v5889_v31, 5  ;;  %v5899_v54 = vshll.u32 %v5702_v53, 16  ;;  %v5916_v50 = vsel %vm8646_vm11, %v5911_v35, %v5915_v16  ;;  %v5325_v26 = vor.u32 %v5324_v4, %v11303_v9  ;;  %v11381_v35 = vpop.permute.xlu0 %6723 }
 0x2b8   : > { %v5895_v29 = vrot.slane %v12605_v23, 4  ;;  %v5920_v60 = vor.u32 %v5919_v12, %v5915_v16  ;;  %v5328_v52 = vshll.u32 %v11193_v17, 16  ;;  %v12606_v30 = vshrl.u32 %v11193_v17, 16 }
 0x2b9   : > { %6483 = vrot.lane.b32.xlu0 %v8043_v49, %s8461_s12  ;;  %v5887_v41 = vrot.slane %v5886_v18, 4  ;;  %v5338_v12 = vshll.u32 %v11308_v15, 16  ;;  %v5326_v43 = vrot.slane %v5325_v26, 4  ;;  %v5301_v53 = vor.u32 %v5300_v34, %v5297_v61 }
 0x2ba   : > { %v5334_v56 = vrot.slane %v12606_v30, 4  ;;  %v5921_v42 = vrot.slane %v5920_v60, 4  ;;  %v5896_v19 = vor.u32 %v5895_v29, %v5891_v45  ;;  %v5330_v31 = vrot.slane %v5328_v52, 5  ;;  %v11386_v30 = vld [vmem:[#allocation3 + $0x88] sm:$0xf] }
 0x2bb   : > { %v5304_v23 = vshll.u32 %v11229_v47, 16  ;;  %v5901_v17 = vrot.slane %v5899_v54, 5  ;;  %v5310_v16 = vrot.slane %v5308_v55, 4  ;;  %v5302_v29 = vrot.slane %v5301_v53, 4  ;;  %v11414_v53 = vpop.permute.xlu0 %6469 }
 0x2bc   : > { %v5926_v9 = vsel %vm8646_vm11, %v5921_v42, %v5925_v32  ;;  %v5897_v4 = vrot.slane %v5896_v19, 4  ;;  %v5335_v18 = vor.u32 %v5334_v56, %v5330_v31  ;;  %v11388_v15 = vrot.slane %v5370_v3, 5  ;;  %v4464_v3 = vld [vmem:[#allocation3 + $0x6c] sm:$0xf]  ;;  %v11401_v42 = vld [vmem:[#allocation3 + $0x84] sm:$0xf] }
 0x2bd   : > { %v8121_v60 = vcombine.low %v5916_v50, %v5926_v9  ;;  %6835 = vrot.lane.b32.xlu0 %v8107_v8, %s8462_s15  ;;  %v5306_v61 = vrot.slane %v5304_v23, 5  ;;  %v5314_v34 = vshll.u32 %v11259_v11, 16  ;;  %v5892_v55 = vsel %vm8646_vm11, %v5887_v41, %v5891_v45  ;;  %v11407_v41 = vld [vmem:[%s12517_s2] ss:$0 sm:$0xff]  ;;  %12608 = vst [vmem:[#allocation29_spill] sm:$0xff] %v11414_v53 }
 0x2be   : > { %v5902_v47 = vsel %vm8646_vm11, %v5897_v4, %v5901_v17  ;;  %v5331_v32 = vsel %vm8646_vm11, %v5326_v43, %v5330_v31  ;;  %v5336_v54 = vrot.slane %v5335_v18, 4  ;;  %v5340_v50 = vrot.slane %v5338_v12, 5  ;;  %12607 = vst [vmem:[#allocation28_spill] sm:$0xff] %v11407_v41 }
 0x2bf   : > { %6911 = vrot.lane.b32.xlu1 %v8121_v60, %s8465_s20  ;;  %v8120_v26 = vcombine.low %v5892_v55, %v5902_v47  ;;  %v8255_v52 = vpop.f32.mrb[24].mxu0  ;;  %v5307_v8 = vsel %vm8646_vm11, %v5302_v29, %v5306_v61  ;;  %v5311_v56 = vor.u32 %v5310_v16, %v5306_v61  ;;  %v5316_v43 = vrot.slane %v5314_v34, 5  ;;  %v4418_v61 = vld [vmem:[#allocation3 + $0x9c] sm:$0xf] }
 0x2c0   : > { %v3803_v45 = vadd.f32 %v11407_v41, %v8255_v52  ;;  %v3794_v19 = vpop.f32.mrb[25].mxu0  ;;  %v5341_v12 = vsel %vm8646_vm11, %v5336_v54, %v5340_v50  ;;  %v8106_v31 = vcombine.low %v11401_v42, %v11386_v30  ;;  %v4711_v16 = vshrl.u32 %v4464_v3, 16 }
 0x2c1   : > { %6909 = vrot.lane.b32.xlu0 %v8120_v26, %s8465_s20  ;;  %v3795_v23 = vadd.f32 %v11407_v41, %v3794_v19  ;;  %v8074_v9 = vcombine.low %v5331_v32, %v5341_v12  ;;  %v8256_v4 = vpop.f32.mrb[26].mxu0  ;;  %v5312_v17 = vrot.slane %v5311_v56, 4  ;;  %v5928_v47 = vshrl.u32 %v11401_v42, 16 }
 0x2c2   : > { %v3851_v60 = vmax.f32 %v3803_v45, 0.0  ;;  %v3806_v18 = vadd.f32 %v11407_v41, %v8256_v4  ;;  %v3797_v29 = vpop.f32.mrb[27].mxu0  ;;  %v4713_v32 = vrot.slane %v4711_v16, 4  ;;  %v4714_v56 = vshll.u32 %v4464_v3, 16  ;;  %v11430_v16 = vpop.permute.xlu0 %6569 }
 0x2c3   : > { %v3849_v34 = vmax.f32 %v3795_v23, 0.0  ;;  %6657 = vrot.lane.b32.xlu1 %v8074_v9, %s8466_s21  ;;  %v5317_v55 = vsel %vm8646_vm11, %v5312_v17, %v5316_v43  ;;  %v3798_v54 = vadd.f32 %v11407_v41, %v3797_v29  ;;  %v4720_v12 = vshll.u32 %v11279_v14, 16  ;;  %12609 = vst [vmem:[#allocation30_spill] sm:$0xff] %v11430_v16  ;;  %v4429_v16 = vld [vmem:[#allocation3 + $0xb0] sm:$0x1] }
 0x2c4   : > { %v8201_v50 = vpack.c.bf16 %v3851_v60, %v3851_v60  ;;  %v3852_v26 = vmax.f32 %v3806_v18, 0.0  ;;  %v8073_v52 = vcombine.low %v5307_v8, %v5317_v55  ;;  %v4724_v23 = vshrl.u32 %v11279_v14, 16 }
 0x2c5   : > { %v8199_v45 = vpack.c.bf16 %v3849_v34, %v3849_v34  ;;  %v3850_v19 = vmax.f32 %v3798_v54, 0.0  ;;  %v11428_v43 = vrot.slane %v5928_v47, 4  ;;  %v4716_v17 = vrot.slane %v4714_v56, 5  ;;  %v4425_v54 = vld [vmem:[#allocation3 + $0xa8] sm:$0xf] }
 0x2c6   : > { %v4231_v4 = vshrl.u32 %v8201_v50, 16  ;;  %v8202_v9 = vpack.c.bf16 %v3852_v26, %v3852_v26  ;;  %6655 = vrot.lane.b32.xlu0 %v8073_v52, %s8466_s21  ;;  %v4234_v60 = vshll.u32 %v8201_v50, 16  ;;  %v11433_v18 = vrot.slane %v4720_v12, 5  ;;  %v11438_v41 = vpop.permute.xlu0 %6899 }
 0x2c7   : > { %v4214_v8 = vshrl.u32 %v8199_v45, 16  ;;  %v8200_v3 = vpack.c.bf16 %v3850_v19, %v3850_v19  ;;  %6833 = vrot.lane.b32.xlu1 %v8106_v31, %s8462_s15  ;;  %v4217_v34 = vshll.u32 %v8199_v45, 16  ;;  %v4717_v55 = vor.u32 %v4716_v17, %v4713_v32 }
 0x2c8   : > { %v4233_v29 = vrot.slane %v4231_v4, 7  ;;  %v4239_v14 = vshrl.u32 %v8202_v9, 16  ;;  %v4242_v52 = vshll.u32 %v8202_v9, 16  ;;  %v4726_v49 = vrot.slane %v4724_v23, 4  ;;  %v4466_v23 = vld [vmem:[#allocation3 + $0x78] sm:$0xf] }
 0x2c9   : > { %v4216_v26 = vrot.slane %v4214_v8, 7  ;;  %v4222_v47 = vshrl.u32 %v8200_v3, 16  ;;  %v4225_v53 = vshll.u32 %v8200_v3, 16  ;;  %v4718_v12 = vrot.slane %v4717_v55, 4  ;;  %v4422_v8 = vld [vmem:[#allocation3 + $0xa4] sm:$0x1] }
 0x2ca   : > { %v4236_v56 = vor.u32 %v4234_v60, %v4233_v29  ;;  %v4237_v11 = vrot.slane %v4233_v29, 4  ;;  %v4241_v50 = vrot.slane %v4239_v14, 7  ;;  %v4727_v4 = vor.u32 %v4726_v49, %v11433_v18 }
 0x2cb   : > { %v4219_v19 = vor.u32 %v4217_v34, %v4216_v26  ;;  %v4224_v31 = vrot.slane %v4222_v47, 7  ;;  %v4220_v45 = vrot.slane %v4216_v26, 4  ;;  %v4730_v55 = vshll.u32 %v11293_v63, 16 }
 0x2cc   : > { %v4426_v32 = vsel %vm10301_vm13, %v4236_v56, %v4425_v54  ;;  %v4244_v17 = vor.u32 %v4242_v52, %v4241_v50  ;;  %v4246_v9 = vrot.slane %v4241_v50, 4  ;;  %v4728_v34 = vrot.slane %v4727_v4, 4 }
 0x2cd   : > { %4427 = vst [vmem:[#allocation3 + $0xa8] sm:$0xf] %v4426_v32  ;;  %v4419_v60 = vsel %vm10301_vm13, %v4219_v19, %v4418_v61  ;;  %v4227_v3 = vor.u32 %v4225_v53, %v4224_v31  ;;  %v4229_v29 = vrot.slane %v4224_v31, 4  ;;  %v7092_v54 = vsel %vm7090_vm8, %v11056_v24, %v11324_v40  ;;  %v11470_v32 = vld [vmem:[#allocation3 + $0x84] sm:$0xf] }
 0x2ce   : > { %4420 = vst [vmem:[#allocation3 + $0x9c] sm:$0xf] %v4419_v60  ;;  %v4245_v49 = vsel %vm8654_vm12, %v4237_v11, %v4244_v17  ;;  %v4430_v14 = vsel %vm10308_vm15, %v4246_v9, %v4429_v16  ;;  %v7125_v11 = vsel %vm7123_vm4, %v7092_v54, %v11106_v33  ;;  %v4735_v26 = vshrl.u32 %v4466_v23, 16 }
 0x2cf   : > { %4428 = vst.msk [vmem:[#allocation3 + $0xac] sm:$0xf] %vm3857_vm0, %v4245_v49  ;;  %4431 = vst [vmem:[#allocation3 + $0xb0] sm:$0x1] %v4430_v14  ;;  %v4228_v53 = vsel %vm8654_vm12, %v4220_v45, %v4227_v3  ;;  %v4423_v61 = vsel %vm10308_vm15, %v4229_v29, %v4422_v8  ;;  %v12610_v63 = vshll.u32 %v11401_v42, 16  ;;  %v4732_v24 = vrot.slane %v4730_v55, 5  ;;  %v11472_v45 = vpop.permute.xlu0 %6897 }
 0x2d0   : > { %4421 = vst.msk [vmem:[#allocation3 + $0xa0] sm:$0xf] %vm3857_vm0, %v4228_v53  ;;  %4424 = vst [vmem:[#allocation3 + $0xa4] sm:$0x1] %v4423_v61  ;;  %v4738_v40 = vshll.u32 %v4466_v23, 16  ;;  %v4744_v52 = vshll.u32 %v11295_v39, 16  ;;  %v7158_v47 = vsel %vm7156_vm5, %v7125_v11, %v10922_v57  ;;  %v4723_v33 = vsel %vm8646_vm11, %v4718_v12, %v11433_v18 }
 0x2d1   : > { %v5933_v16 = vrot.slane %v12610_v63, 5  ;;  %v4737_v56 = vrot.slane %v4735_v26, 4  ;;  %v4748_v50 = vshrl.u32 %v11295_v39, 16  ;;  %v4754_v19 = vshll.u32 %v11322_v20, 16  ;;  %v11476_v20 = vld [vmem:[#allocation3 + $0x88] sm:$0xf] }
 0x2d2   : > { %v4733_v42 = vsel %vm8646_vm11, %v4728_v34, %v4732_v24  ;;  %v4740_v31 = vrot.slane %v4738_v40, 5  ;;  %v4746_v4 = vrot.slane %v4744_v52, 5  ;;  %v5952_v57 = vshrl.u32 %v11361_v27, 16  ;;  %v5704_v3 = vld [vmem:[#allocation3 + $0x8c] sm:$0x1] }
 0x2d3   : > { %v5955_v17 = vshll.u32 %v11361_v27, 16  ;;  %v8026_v39 = vcombine.low %v4723_v33, %v4733_v42  ;;  %v4750_v9 = vrot.slane %v4748_v50, 4  ;;  %v4756_v23 = vrot.slane %v4754_v19, 5  ;;  %v11503_v63 = vpop.permute.xlu0 %6643  ;;  %v11513_v52 = vld [vmem:[#allocation3 + $0x98] sm:$0x1] }
 0x2d4   : > { %v4741_v8 = vor.u32 %v4740_v31, %v4737_v56  ;;  %v12611_v18 = vcombine.low %v10498_v48, %v10862_v5  ;;  %v7191_v60 = vsel %vm7189_vm9, %v7158_v47, %v11195_v2  ;;  %v5343_v27 = vshrl.u32 %v11470_v32, 16  ;;  %v5497_v19 = vld [vmem:[#allocation3 + $0x90] sm:$0xe]  ;;  %v11517_v31 = vld [vmem:[#allocation3 + $0x94] sm:$0xf] }
 0x2d5   : > { %6401 = vrot.lane.b32.xlu0 %v8026_v39, %s8460_s11  ;;  %v4751_v29 = vor.u32 %v4750_v9, %v4746_v4  ;;  %7398 = vmatmul.mubr.bf16.vlgmr.msra.gmra.mrb[32].mxu0 %v7191_v60  ;;  %v5346_v34 = vshll.u32 %v11470_v32, 16  ;;  %v5934_v49 = vor.u32 %v5933_v16, %v11428_v43  ;;  %v12612_v48 = vcombine.low %v10798_v38, %v10804_v59  ;;  %v4890_v60 = vld [vmem:[#allocation3 + $0x90] sm:$0xe] }
 0x2d6   : > { %v6981_v12 = vsel %vm6975_vm2, %v12611_v18, %v11358_v62  ;;  %v4742_v14 = vrot.slane %v4741_v8, 4  ;;  %v5356_v5 = vshrl.u32 %v11476_v20, 16  ;;  %v5937_v2 = vshll.u32 %v11386_v30, 16 }
 0x2d7   : > { %8156 = vmatprep.mubr.msk.bf16.mxu0 %vm6975_vm2, %v12612_v48  ;;  %v12613_v62 = vshrl.u32 %v11386_v30, 16  ;;  %v4752_v54 = vrot.slane %v4751_v29, 4  ;;  %v5345_v53 = vrot.slane %v5343_v27, 4  ;;  %v5348_v61 = vrot.slane %v5346_v34, 5 }
 0x2d8   : > { %v5947_v11 = vshll.u32 %v5704_v3, 16  ;;  %v11497_v26 = vrot.slane %v5952_v57, 4  ;;  %v11499_v43 = vrot.slane %v5955_v17, 5  ;;  %v7028_v38 = vsel %vm7024_vm6, %v6981_v12, %v11142_v22  ;;  %v5096_v22 = vld [vmem:[#allocation3 + $0x8c] sm:$0x1] }
 0x2d9   : > { %v5943_v55 = vrot.slane %v12613_v62, 4  ;;  %v5939_v59 = vrot.slane %v5937_v2, 5  ;;  %v4747_v16 = vsel %vm8646_vm11, %v4742_v14, %v4746_v4  ;;  %v4757_v30 = vsel %vm8646_vm11, %v4752_v54, %v4756_v23  ;;  %v11534_v14 = vld [vmem:[#allocation3 + $0x88] sm:$0xf] }
 0x2da   : > { %v12614_v24 = vcombine.low %v10702_v28, %v10742_v13  ;;  %v5935_v40 = vrot.slane %v5934_v49, 4  ;;  %v5629_v47 = vrot.slane %v11330_v37, 5  ;;  %v8027_v56 = vcombine.low %v4747_v16, %v4757_v30  ;;  %v11532_v49 = vld [vmem:[#allocation3 + $0x98] sm:$0x1] }
 0x2db   : > { %v5944_v50 = vor.u32 %v5943_v55, %v5939_v59  ;;  %v5349_v33 = vor.u32 %v5348_v61, %v5345_v53  ;;  %v5352_v42 = vshll.u32 %v11476_v20, 16  ;;  %v7061_v4 = vsel %vm7057_vm3, %v7028_v38, %v10938_v51 }
 0x2dc   : > { %6565 = vrot.lane.b32.xlu0 %v12614_v24, %s8463_s16  ;;  %v5949_v57 = vrot.slane %v5947_v11, 5  ;;  %v5631_v28 = vrot.slane %v5629_v47, 4  ;;  %v5358_v13 = vrot.slane %v5356_v5, 4  ;;  %6403 = vrot.lane.b32.xlu1 %v8027_v56, %s8460_s11  ;;  %v5632_v39 = vrot.slane %v11513_v52, 5 }
 0x2dd   : > { %v5945_v17 = vrot.slane %v5944_v50, 4  ;;  %v5354_v9 = vrot.slane %v5352_v42, 5  ;;  %v5362_v8 = vshll.u32 %v5096_v22, 16  ;;  %v8059_v23 = vcombine.low %v11470_v32, %v11476_v20  ;;  %v6390_v32 = vpop.permute.xlu0 %6389 }
 0x2de   : > { %v5940_v18 = vsel %vm8646_vm11, %v5935_v40, %v5939_v59  ;;  %v7980_v12 = vrot.slane %v5497_v19, 9  ;;  %v5028_v51 = vrot.slane %v11517_v31, 5  ;;  %v5633_v29 = vsel %vm8626_vm7, %v5631_v28, %v5632_v39 }
 0x2df   : > { %v5950_v3 = vsel %vm8646_vm11, %v5945_v17, %v5949_v57  ;;  %v5350_v27 = vrot.slane %v5349_v33, 4  ;;  %v5359_v34 = vor.u32 %v5358_v13, %v5354_v9  ;;  %v12615_v48 = vcombine.low %v10454_v58, %v10844_v7  ;;  %v5496_v58 = vld [vmem:[#allocation3 + $0x84] sm:$0xe]  ;;  %v11547_v7 = vld [vmem:[#allocation3 + $0x8c] sm:$0x1]  ;;  %v12617_v13 = vld [vmem:[#allocation24_spill] sm:$0xff] }
 0x2e0   : > { %v8122_v2 = vcombine.low %v5940_v18, %v5950_v3  ;;  %v5630_v62 = vsel %vm8626_vm7, %v7980_v12, %v5629_v47  ;;  %v5030_v55 = vrot.slane %v5028_v51, 4  ;;  %6579 = vrot.lane.b32.xlu1 %v8059_v23, %s8463_s16  ;;  %v5364_v53 = vrot.slane %v5362_v8, 5  ;;  %v4889_v47 = vld [vmem:[#allocation3 + $0x84] sm:$0xe]  ;;  %v12616_v33 = vld [vmem:[#allocation23_spill] sm:$0xff] }
 0x2e1   : > { %v6984_v5 = vsel %vm6975_vm2, %v12615_v48, %v11269_v6  ;;  %v5360_v54 = vrot.slane %v5359_v34, 4  ;;  %v7965_v61 = vrot.slane %v4890_v60, 9  ;;  %v5622_v11 = vrot.slane %v11476_v20, 5  ;;  %v11566_v28 = vpop.permute.xlu0 %6729  ;;  %v11575_v23 = vld [vmem:[#allocation3 + $0xac] sm:$0xf]  ;;  %v12618_v18 = vld [vmem:[#allocation26_spill] sm:$0xff] }
 0x2e2   : > { %6913 = vrot.lane.b32.xlu0 %v8122_v2, %s8465_s20  ;;  %v8092_v38 = vcombine.low %v5630_v62, %v5633_v29  ;;  %v5031_v59 = vrot.slane %v11532_v49, 5  ;;  %v5021_v6 = vrot.slane %v11534_v14, 5  ;;  %v7094_v16 = vsel %vm7090_vm8, %v7061_v4, %v11215_v10  ;;  %v11583_v29 = vld [vmem:[#allocation3 + $0xac] sm:$0xf]  ;;  %v11588_v34 = vld [vmem:[#allocation3 + $0xa8] sm:$0xf] }
 0x2e3   : > { %v5355_v30 = vsel %vm8646_vm11, %v5350_v27, %v5354_v9  ;;  %v5365_v24 = vsel %vm8646_vm11, %v5360_v54, %v5364_v53  ;;  %v5624_v20 = vrot.slane %v5622_v11, 4  ;;  %v5625_v40 = vrot.slane %v5096_v22, 5  ;;  %v12619_v48 = vld [vmem:[#allocation20_spill] sm:$0xff] }
 0x2e4   : > { %v8075_v56 = vcombine.low %v5355_v30, %v5365_v24  ;;  %v5032_v50 = vsel %vm8626_vm7, %v5030_v55, %v5031_v59  ;;  %v5023_v19 = vrot.slane %v5021_v6, 4  ;;  %v7127_v42 = vsel %vm7123_vm4, %v7094_v16, %v12616_v33  ;;  %6741 = vrot.lane.b32.xlu1 %v8092_v38, %s8464_s17  ;;  %v11596_v55 = vpop.permute.xlu1 %6473  ;;  %v12623_v38 = vld [vmem:[#allocation15_spill] sm:$0xff]  ;;  %v12626_v16 = vld [vmem:[#allocation17_spill] sm:$0xff] }
 0x2e5   : > { %v7979_v10 = vrot.slane %v5496_v58, 9  ;;  %v5626_v4 = vsel %vm8626_vm7, %v5624_v20, %v5625_v40  ;;  %v5024_v57 = vrot.slane %v11547_v7, 5  ;;  %v7160_v22 = vsel %vm7156_vm5, %v7127_v42, %v11231_v46  ;;  %v5705_v24 = vld [vmem:[#allocation3 + $0x98] sm:$0x1]  ;;  %v12628_v20 = vld [vmem:[#allocation12_spill] sm:$0xff] }
 0x2e6   : > { %v7030_v17 = vsel %vm7024_vm6, %v6984_v5, %v12617_v13  ;;  %6659 = vrot.lane.b32.xlu0 %v8075_v56, %s8466_s21  ;;  %v5029_v39 = vsel %vm8626_vm7, %v7965_v61, %v5028_v51  ;;  %v7964_v9 = vrot.slane %v4889_v47, 9  ;;  %v7194_v8 = vsel %vm7189_vm9, %v7160_v22, %v11472_v45  ;;  %v12620_v5 = vld [vmem:[#allocation14_spill] sm:$0xff]  ;;  %v11603_v61 = vld [vmem:[#allocation3 + $0xa8] sm:$0xf]  ;;  %v12632_v33 = vld [vmem:[#allocation25_spill] sm:$0xff] }
 0x2e7   : > { %v7063_v12 = vsel %vm7057_vm3, %v7030_v17, %v12618_v18  ;;  %v8045_v46 = vcombine.low %v5029_v39, %v5032_v50  ;;  %v5623_v60 = vsel %vm8626_vm7, %v7979_v10, %v5622_v11  ;;  %v5025_v3 = vsel %vm8626_vm7, %v5023_v19, %v5024_v57  ;;  %7406 = vmatmul.mubr.bf16.gmra.mrb[36].mxu0 %v7194_v8  ;;  %v12622_v11 = vld [vmem:[#allocation16_spill] sm:$0xff]  ;;  %v12629_v56 = vld [vmem:[#allocation6_spill] sm:$0xff]  ;;  %v6098_v10 = vld [vmem:[#allocation3 + $0x3c] sm:$0xe] }
 0x2e8   : > { %v5965_v51 = vshrl.u32 %v11347_v25, 16  ;;  %v8091_v27 = vcombine.low %v5623_v60, %v5626_v4  ;;  %v5022_v45 = vsel %vm8626_vm7, %v7964_v9, %v5021_v6  ;;  %v12621_v2 = vcombine.low %v12619_v48, %v12620_v5  ;;  %v12625_v6 = vld [vmem:[#allocation18_spill] sm:$0xff]  ;;  %v12633_v57 = vld [vmem:[#allocation21_spill] sm:$0xff] }
 0x2e9   : > { %v7096_v62 = vsel %vm7090_vm8, %v7063_v12, %v11503_v63  ;;  %6487 = vrot.lane.b32.xlu1 %v8045_v46, %s8461_s12  ;;  %v8109_v54 = vcombine.low %v11588_v34, %v11575_v23  ;;  %v12624_v59 = vor.u32 %v12622_v11, %v12623_v38  ;;  %v12627_v30 = vor.u32 %v12625_v6, %v12626_v16  ;;  %v12634_v46 = vld [vmem:[#allocation9_spill] sm:$0xff]  ;;  %v8408_v48 = vld [vmem:[#allocation3 + $0x40] sm:$0xf] }
 0x2ea   : > { %8157 = vmatprep.mubr.msk.bf16.mxu0 %vm6975_vm2, %v12621_v2  ;;  %v7129_v53 = vsel %vm7123_vm4, %v7096_v62, %v11381_v35  ;;  %6645 = vrot.lane.b32.xlu0 %v12628_v20, %s8466_s21  ;;  %v8044_v40 = vcombine.low %v5022_v45, %v5025_v3  ;;  %v8062_v47 = vcombine.low %v11603_v61, %v11583_v29  ;;  %v12630_v35 = vld [vmem:[#allocation5_spill] sm:$0xff]  ;;  %v5961_v9 = vshll.u32 %v11347_v25, 16  ;;  %v12636_v5 = vld [vmem:[#allocation10_spill] sm:$0xff] }
 0x2eb   : > { %v4598_v58 = vrot.slane %v12624_v59, 4  ;;  %v4608_v63 = vrot.slane %v12627_v30, 4  ;;  %v12631_v50 = vcombine.low %v12629_v56, %v12630_v35  ;;  %v7162_v42 = vsel %vm7156_vm5, %v7129_v53, %v12632_v33  ;;  %v8409_v53 = vld [vmem:[#allocation3 + $0x44] sm:$0x1]  ;;  %v12640_v59 = vld [vmem:[#allocation11_spill] sm:$0xff] }
 0x2ec   : > { %v7197_v13 = vsel %vm7189_vm9, %v7162_v42, %v11438_v41  ;;  %v5958_v17 = vor.u32 %v11499_v43, %v11497_v26  ;;  %v5967_v8 = vrot.slane %v5965_v51, 4  ;;  %v5971_v18 = vshll.u32 %v5705_v24, 16  ;;  %v12637_v26 = vld [vmem:[#allocation13_spill] sm:$0xff]  ;;  %v12639_v51 = vld [vmem:[#allocation27_spill] sm:$0xff]  ;;  %v12642_v24 = vld [vmem:[#allocation28_spill] sm:$0xff] }
 0x2ed   : > { %v11619_v19 = vsel %vm6975_vm2, %v12631_v50, %v6390_v32  ;;  %v4603_v4 = vsel %vm8646_vm11, %v4598_v58, %v12626_v16  ;;  %v4613_v22 = vsel %vm8646_vm11, %v4608_v63, %v12633_v57  ;;  %v11633_v32 = vpop.permute.xlu0 %6475  ;;  %6739 = vrot.lane.b32.xlu1 %v8091_v27, %s8464_s17  ;;  %v12635_v60 = vrot.slane %v12634_v46, 5  ;;  %v11647_v27 = vpop.permute.xlu1 %6649  ;;  %v12643_v50 = vld [vmem:[#allocation22_spill] sm:$0xff] }
 0x2ee   : > { %v11635_v39 = vcombine.low %v4603_v4, %v4613_v22  ;;  %v5959_v12 = vrot.slane %v5958_v17, 4  ;;  %v7988_v45 = vrot.slane %v6098_v10, 9  ;;  %v6182_v41 = vrot.slane %v8408_v48, 5  ;;  %v8259_v38 = vpop.f32.mrb[28].mxu0  ;;  %v12644_v17 = vld [vmem:[#allocation8_spill] sm:$0xff] }
 0x2ef   : > { %v4974_v3 = vrot.slane %v12635_v60, 4  ;;  %v12638_v43 = vcombine.low %v12636_v5, %v12637_v26  ;;  %v5963_v2 = vrot.slane %v5961_v9, 5  ;;  %v5973_v62 = vrot.slane %v5971_v18, 5  ;;  %7414 = vmatmul.mubr.bf16.gmra.mrb[40].mxu0 %v7197_v13  ;;  %v3810_v56 = vpop.f32.mrb[29].mxu0  ;;  %v12645_v9 = vld [vmem:[#allocation7_spill] sm:$0xff] }
 0x2f0   : > { %v6185_v25 = vrot.slane %v8409_v53, 5  ;;  %v5373_v11 = vor.u32 %v11388_v15, %v12639_v51  ;;  %v12641_v58 = vrot.slane %v12640_v59, 5  ;;  %v6183_v16 = vsel %vm8626_vm7, %v7988_v45, %v6182_v41  ;;  %v8260_v10 = vpop.f32.mrb[30].mxu0 }
 0x2f1   : > { %6725 = vrot.lane.b32.xlu0 %v12638_v43, %s8464_s17  ;;  %v6184_v30 = vrot.slane %v6182_v41, 4  ;;  %v5376_v63 = vshll.u32 %v11330_v37, 16  ;;  %v3819_v20 = vadd.f32 %v12642_v24, %v8259_v38  ;;  %v5964_v15 = vsel %vm8646_vm11, %v5959_v12, %v5963_v2  ;;  %6485 = vrot.lane.b32.xlu1 %v8044_v40, %s8461_s12  ;;  %v11667_v13 = vpop.permute.xlu0 %6827  ;;  %v3813_v46 = vpop.f32.mrb[31].mxu0 }
 0x2f2   : > { %v11653_v6 = vsel %vm8626_vm7, %v4974_v3, %v12641_v58  ;;  %v5968_v35 = vor.u32 %v5967_v8, %v5963_v2  ;;  %v3811_v42 = vadd.f32 %v12642_v24, %v3810_v56  ;;  %v5374_v57 = vrot.slane %v5373_v11, 4  ;;  %v11675_v48 = vpop.permute.xlu1 %6825 }
 0x2f3   : > { %v8037_v33 = vcombine.low %v12643_v50, %v11653_v6  ;;  %v6186_v4 = vsel %vm8626_vm7, %v6184_v30, %v6185_v25  ;;  %v5378_v22 = vrot.slane %v5376_v63, 5  ;;  %v12646_v18 = vcombine.low %v12644_v17, %v12645_v9  ;;  %v11735_v6 = vld [vmem:[#allocation3 + $0xa0] sm:$0xf]  ;;  %v5090_v50 = vld [vmem:[#allocation3 + $0x44] sm:$0x1] }
 0x2f4   : > { %v3855_v8 = vmax.f32 %v3819_v20, 0.0  ;;  %v3822_v12 = vadd.f32 %v12642_v24, %v8260_v10  ;;  %v5969_v40 = vrot.slane %v5968_v35, 4  ;;  %v8132_v60 = vcombine.low %v6183_v16, %v6186_v4  ;;  %v4439_v4 = vld [vmem:[#allocation3 + $0xc0] sm:$0xf] }
 0x2f5   : > { %6821 = vrot.lane.b32.xlu0 %v12646_v18, %s8462_s15  ;;  %v3853_v3 = vmax.f32 %v3811_v42, 0.0  ;;  %v3814_v45 = vadd.f32 %v12642_v24, %v3813_v46  ;;  %v5379_v41 = vsel %vm8646_vm11, %v5374_v57, %v5378_v22  ;;  %v12647_v5 = vshrl.u32 %v11330_v37, 16  ;;  %6839 = vrot.lane.b32.xlu1 %v8109_v54, %s8462_s15  ;;  %v11689_v37 = vld [vmem:[#allocation3 + $0x3c] sm:$0xf]  ;;  %v11693_v35 = vpop.permute.xlu0 %6573  ;;  %v4432_v46 = vld [vmem:[#allocation3 + $0xb4] sm:$0xf] }
 0x2f6   : > { %v8205_v43 = vpack.c.bf16 %v3855_v8, %v3855_v8  ;;  %v3856_v2 = vmax.f32 %v3822_v12, 0.0  ;;  %v5974_v53 = vsel %vm8646_vm11, %v5969_v40, %v5973_v62  ;;  %8158 = vmatprep.mubr.msk.bf16.mxu0 %vm6975_vm2, %v8132_v60  ;;  %v5386_v25 = vshll.u32 %v11513_v52, 16  ;;  %v12648_v62 = vld [vmem:[#allocation19_spill] sm:$0xff]  ;;  %v11702_v18 = vpop.permute.xlu1 %6395 }
 0x2f7   : > { %v5382_v26 = vrot.slane %v12647_v5, 4  ;;  %v8203_v51 = vpack.c.bf16 %v3853_v3, %v3853_v3  ;;  %v3854_v11 = vmax.f32 %v3814_v45, 0.0  ;;  %v8123_v38 = vcombine.low %v5964_v15, %v5974_v53  ;;  %v11706_v3 = vld [vmem:[#allocation3 + $0x40] sm:$0xf] }
 0x2f8   : > { %v4265_v58 = vshrl.u32 %v8205_v43, 16  ;;  %v4268_v16 = vshll.u32 %v8205_v43, 16  ;;  %v8206_v30 = vpack.c.bf16 %v3856_v2, %v3856_v2  ;;  %v5388_v63 = vrot.slane %v5386_v25, 5 }
 0x2f9   : > { %v5383_v59 = vor.u32 %v5382_v26, %v5378_v22  ;;  %6901 = vrot.lane.b32.xlu0 %v12648_v62, %s8465_s20  ;;  %v4248_v24 = vshrl.u32 %v8203_v51, 16  ;;  %v4251_v52 = vshll.u32 %v8203_v51, 16  ;;  %v8204_v20 = vpack.c.bf16 %v3854_v11, %v3854_v11  ;;  %6585 = vrot.lane.b32.xlu1 %v8062_v47, %s8463_s16  ;;  %v4443_v26 = vld [vmem:[#allocation3 + $0xc8] sm:$0x1]  ;;  %v4436_v51 = vld [vmem:[#allocation3 + $0xbc] sm:$0x1] }
 0x2fa   : > { %v4267_v42 = vrot.slane %v4265_v58, 7  ;;  %v4273_v54 = vshrl.u32 %v8206_v30, 16  ;;  %v4276_v10 = vshll.u32 %v8206_v30, 16  ;;  %v5199_v15 = vshrl.u32 %v11689_v37, 16 }
 0x2fb   : > { %v5384_v56 = vrot.slane %v5383_v59, 4  ;;  %v4250_v57 = vrot.slane %v4248_v24, 7  ;;  %v4256_v22 = vshrl.u32 %v8204_v20, 16  ;;  %v4259_v17 = vshll.u32 %v8204_v20, 16  ;;  %v11730_v24 = vpop.permute.xlu1 %6571  ;;  %v4470_v20 = vld [vmem:[#allocation3 + $0x90] sm:$0xf] }
 0x2fc   : > { %v4270_v8 = vor.u32 %v4268_v16, %v4267_v42  ;;  %v4271_v12 = vrot.slane %v4267_v42, 4  ;;  %v4275_v40 = vrot.slane %v4273_v54, 7  ;;  %v5201_v47 = vrot.slane %v5199_v15, 4  ;;  %v11715_v16 = vpop.permute.xlu0 %6393  ;;  %v11742_v54 = vld [vmem:[#allocation3 + $0x9c] sm:$0xf] }
 0x2fd   : > { %v5389_v9 = vsel %vm8646_vm11, %v5384_v56, %v5388_v63  ;;  %6391 = vrot.lane.b32.xlu0 %v11635_v39, %s8460_s11  ;;  %v4253_v45 = vor.u32 %v4251_v52, %v4250_v57  ;;  %v4254_v5 = vrot.slane %v4250_v57, 4  ;;  %v4258_v43 = vrot.slane %v4256_v22, 7  ;;  %6915 = vrot.lane.b32.xlu1 %v8123_v38, %s8465_s20 }
 0x2fe   : > { %v8076_v60 = vcombine.low %v5379_v41, %v5389_v9  ;;  %v4440_v2 = vsel %vm10301_vm13, %v4270_v8, %v4439_v4  ;;  %v4278_v53 = vor.u32 %v4276_v10, %v4275_v40  ;;  %v4280_v25 = vrot.slane %v4275_v40, 4 }
 0x2ff   : > { %v5202_v11 = vshll.u32 %v11689_v37, 16  ;;  %4441 = vst [vmem:[#allocation3 + $0xc0] sm:$0xf] %v4440_v2  ;;  %v4433_v39 = vsel %vm10301_vm13, %v4253_v45, %v4432_v46  ;;  %v4261_v41 = vor.u32 %v4259_v17, %v4258_v43  ;;  %v4263_v59 = vrot.slane %v4258_v43, 4 }
 0x300   : > { %v5212_v58 = vshrl.u32 %v11706_v3, 16  ;;  %4434 = vst [vmem:[#allocation3 + $0xb4] sm:$0xf] %v4433_v39  ;;  %v4279_v30 = vsel %vm8654_vm12, %v4271_v12, %v4278_v53  ;;  %v4444_v62 = vsel %vm10308_vm15, %v4280_v25, %v4443_v26  ;;  %v8053_v52 = vcombine.low %v11689_v37, %v11706_v3  ;;  %v11746_v57 = vpop.permute.xlu0 %6733 }
 0x301   : > { %6471 = vrot.lane.b32.xlu0 %v8037_v33, %s8461_s12  ;;  %v5204_v0 = vrot.slane %v5202_v11, 5  ;;  %4442 = vst.msk [vmem:[#allocation3 + $0xc4] sm:$0xf] %vm3857_vm0, %v4279_v30  ;;  %4445 = vst [vmem:[#allocation3 + $0xc8] sm:$0x1] %v4444_v62  ;;  %v4262_v38 = vsel %vm8654_vm12, %v4254_v5, %v4261_v41  ;;  %v4437_v63 = vsel %vm10308_vm15, %v4263_v59, %v4436_v51  ;;  %v6000_v56 = vshrl.u32 %v11588_v34, 16 }
 0x302   : > { %4435 = vst.msk [vmem:[#allocation3 + $0xb8] sm:$0xf] %vm3857_vm0, %v4262_v38  ;;  %4438 = vst [vmem:[#allocation3 + $0xbc] sm:$0x1] %v4437_v63  ;;  %v6003_v44 = vshll.u32 %v11588_v34, 16  ;;  %6661 = vrot.lane.b32.xlu1 %v8076_v60, %s8466_s21  ;;  %v5208_v21 = vshll.u32 %v11706_v3, 16  ;;  %v8108_v37 = vcombine.low %v11742_v54, %v11735_v6  ;;  %v11755_v60 = vpop.permute.xlu1 %6731 }
 0x303   : > { %v5205_v33 = vor.u32 %v5204_v0, %v5201_v47  ;;  %v5214_v42 = vrot.slane %v5212_v58, 4  ;;  %v5218_v15 = vshll.u32 %v5090_v50, 16  ;;  %v4783_v4 = vshrl.u32 %v4470_v20, 16  ;;  %v5490_v47 = vld [vmem:[#allocation3 + $0x3c] sm:$0xe] }
 0x304   : > { %v5210_v10 = vrot.slane %v5208_v21, 5  ;;  %v4786_v17 = vshll.u32 %v4470_v20, 16  ;;  %v4792_v34 = vshll.u32 %v11517_v31, 16  ;;  %v4796_v9 = vshrl.u32 %v11517_v31, 16  ;;  %v11763_v59 = vld [vmem:[#allocation3 + $0x48] sm:$0xf]  ;;  %v11767_v0 = vpop.permute.xlu0 %6479 }
 0x305   : > { %6567 = vrot.lane.b32.xlu0 %v8053_v52, %s8463_s16  ;;  %v5206_v22 = vrot.slane %v5205_v33, 4  ;;  %v11750_v8 = vrot.slane %v6000_v56, 4  ;;  %v11752_v12 = vrot.slane %v6003_v44, 5  ;;  %v4785_v40 = vrot.slane %v4783_v4, 4  ;;  %v11769_v33 = vld [vmem:[#allocation3 + $0x4c] sm:$0xf] }
 0x306   : > { %6837 = vrot.lane.b32.xlu1 %v8108_v37, %s8462_s15  ;;  %v5215_v46 = vor.u32 %v5214_v42, %v5210_v10  ;;  %v4788_v45 = vrot.slane %v4786_v17, 5  ;;  %v4794_v5 = vrot.slane %v4792_v34, 5  ;;  %v4798_v26 = vrot.slane %v4796_v9, 4  ;;  %v11776_v42 = vpop.permute.xlu1 %6477  ;;  %v8415_v37 = vld [vmem:[#allocation3 + $0x68] sm:$0x1] }
 0x307   : > { %v4802_v43 = vshll.u32 %v11532_v49, 16  ;;  %v6013_v2 = vshrl.u32 %v11575_v23, 16  ;;  %v5220_v31 = vrot.slane %v5218_v15, 5  ;;  %v5580_v25 = vrot.slane %v11706_v3, 5 }
 0x308   : > { %v5216_v53 = vrot.slane %v5215_v46, 4  ;;  %v5415_v51 = vshrl.u32 %v11603_v61, 16  ;;  %v5211_v11 = vsel %vm8646_vm11, %v5206_v22, %v5210_v10  ;;  %v4789_v39 = vor.u32 %v4788_v45, %v4785_v40  ;;  %v11786_v9 = vpop.permute.xlu0 %6831  ;;  %v11788_v46 = vld [vmem:[#allocation3 + $0xa0] sm:$0xf] }
 0x309   : > { %v4799_v41 = vor.u32 %v4798_v26, %v4794_v5  ;;  %v7973_v49 = vrot.slane %v5490_v47, 9  ;;  %v5582_v30 = vrot.slane %v5580_v25, 4  ;;  %v5583_v62 = vrot.slane %v5090_v50, 5  ;;  %v4468_v50 = vld [vmem:[#allocation3 + $0x84] sm:$0xf] }
 0x30a   : > { %v5221_v58 = vsel %vm8646_vm11, %v5216_v53, %v5220_v31  ;;  %v4790_v63 = vrot.slane %v4789_v39, 4  ;;  %v4804_v52 = vrot.slane %v4802_v43, 5  ;;  %v5418_v20 = vshll.u32 %v11603_v61, 16  ;;  %v11798_v31 = vld [vmem:[#allocation3 + $0x50] sm:$0x1] }
 0x30b   : > { %v8069_v38 = vcombine.low %v5211_v11, %v5221_v58  ;;  %v4800_v3 = vrot.slane %v4799_v41, 4  ;;  %v5584_v56 = vsel %vm8626_vm7, %v5582_v30, %v5583_v62  ;;  %v5808_v44 = vshrl.u32 %v11763_v59, 16  ;;  %12649 = vst [vmem:[#allocation23_spill] sm:$0xff] %v11798_v31  ;;  %v11802_v11 = vld [vmem:[#allocation3 + $0x9c] sm:$0xf] }
 0x30c   : > { %v5811_v21 = vshll.u32 %v11763_v59, 16  ;;  %v4795_v10 = vsel %vm8646_vm11, %v4790_v63, %v4794_v5  ;;  %v5581_v15 = vsel %vm8626_vm7, %v7973_v49, %v5580_v25  ;;  %v5821_v40 = vshrl.u32 %v11769_v33, 16  ;;  %v8411_v30 = vld [vmem:[#allocation3 + $0x4c] sm:$0xf] }
 0x30d   : > { %6647 = vrot.lane.b32.xlu0 %v8069_v38, %s8466_s21  ;;  %v4805_v61 = vsel %vm8646_vm11, %v4800_v3, %v4804_v52  ;;  %v8085_v22 = vcombine.low %v5581_v15, %v5584_v56  ;;  %v5810_v17 = vrot.slane %v5808_v44, 4  ;;  %v4759_v45 = vshrl.u32 %v4468_v50, 16  ;;  %v11807_v3 = vpop.permute.xlu1 %6907  ;;  %v11815_v15 = vld [vmem:[#allocation3 + $0xac] sm:$0xf] }
 0x30e   : > { %v8029_v4 = vcombine.low %v4795_v10, %v4805_v61  ;;  %v5813_v34 = vrot.slane %v5811_v21, 5  ;;  %v4762_v26 = vshll.u32 %v4468_v50, 16  ;;  %v4768_v5 = vshll.u32 %v11534_v14, 16 }
 0x30f   : > { %v11792_v43 = vrot.slane %v5415_v51, 4  ;;  %v11794_v47 = vrot.slane %v5418_v20, 5  ;;  %v4772_v53 = vshrl.u32 %v11534_v14, 16  ;;  %v5817_v25 = vshll.u32 %v11769_v33, 16  ;;  %v8410_v51 = vld [vmem:[#allocation3 + $0x48] sm:$0xf] }
 0x310   : > { %6407 = vrot.lane.b32.xlu1 %v8029_v4, %s8460_s11  ;;  %v4761_v39 = vrot.slane %v4759_v45, 4  ;;  %v4764_v41 = vrot.slane %v4762_v26, 5  ;;  %v4770_v58 = vrot.slane %v4768_v5, 5  ;;  %v5814_v49 = vor.u32 %v5813_v34, %v5810_v17  ;;  %v11821_v34 = vld [vmem:[#allocation3 + $0xb0] sm:$0x1] }
 0x311   : > { %6727 = vrot.lane.b32.xlu0 %v8085_v22, %s8464_s17  ;;  %v8007_v62 = vcombine.low %v8410_v51, %v8411_v30  ;;  %v8061_v38 = vcombine.low %v11802_v11, %v11788_v46  ;;  %v4774_v63 = vrot.slane %v4772_v53, 4  ;;  %v4778_v14 = vshll.u32 %v11547_v7, 16  ;;  %v11817_v7 = vpop.permute.xlu0 %6577  ;;  %v8413_v45 = vld [vmem:[#allocation3 + $0x3c] sm:$0xf] }
 0x312   : > { %v8101_v52 = vcombine.low %v11763_v59, %v11769_v33  ;;  %v4765_v20 = vor.u32 %v4764_v41, %v4761_v39  ;;  %v5819_v56 = vrot.slane %v5817_v25, 5  ;;  %v5823_v44 = vrot.slane %v5821_v40, 4  ;;  %v8412_v40 = vld [vmem:[#allocation3 + $0x40] sm:$0xf]  ;;  %v5499_v25 = vld [vmem:[#allocation3 + $0xa8] sm:$0xe] }
 0x313   : > { %v5976_v21 = vshrl.u32 %v11742_v54, 16  ;;  %v4775_v50 = vor.u32 %v4774_v63, %v4770_v58  ;;  %v5827_v10 = vshll.u32 %v11798_v31, 16  ;;  %v5643_v61 = vrot.slane %v11583_v29, 5 }
 0x314   : > { %6583 = vrot.lane.b32.xlu1 %v8061_v38, %s8463_s16  ;;  %v5979_v4 = vshll.u32 %v11742_v54, 16  ;;  %v4766_v59 = vrot.slane %v4765_v20, 4  ;;  %v5815_v22 = vrot.slane %v5814_v49, 4  ;;  %v5824_v17 = vor.u32 %v5823_v44, %v5819_v56  ;;  %v11835_v20 = vld [vmem:[#allocation3 + $0xb0] sm:$0x1] }
 0x315   : > { %6823 = vrot.lane.b32.xlu0 %v8101_v52, %s8462_s15  ;;  %v8006_v26 = vcombine.low %v8413_v45, %v8412_v40  ;;  %v4776_v5 = vrot.slane %v4775_v50, 4  ;;  %v4780_v53 = vrot.slane %v4778_v14, 5  ;;  %v5645_v39 = vrot.slane %v5643_v61, 4  ;;  %v11833_v52 = vpop.permute.xlu1 %6653  ;;  %v11844_v40 = vld [vmem:[#allocation3 + $0xa0] sm:$0xf]  ;;  %v6906_v45 = vpop.permute.xlu0 %6905 }
 0x316   : > { %v6996_v41 = vsel %vm6975_vm2, %v8007_v62, %v11702_v18  ;;  %v5825_v51 = vrot.slane %v5824_v17, 4  ;;  %v5829_v30 = vrot.slane %v5827_v10, 5  ;;  %v5042_v54 = vrot.slane %v11815_v15, 5  ;;  %v4892_v10 = vld [vmem:[#allocation3 + $0xa8] sm:$0xe] }
 0x317   : > { %v6993_v49 = vsel %vm6975_vm2, %v8006_v26, %v11715_v16  ;;  %v4771_v38 = vsel %vm8646_vm11, %v4766_v59, %v4770_v58  ;;  %v4781_v63 = vsel %vm8646_vm11, %v4776_v5, %v4780_v53  ;;  %v5646_v14 = vrot.slane %v11821_v34, 5  ;;  %v11853_v53 = vld [vmem:[#allocation3 + $0xa4] sm:$0x1] }
 0x318   : > { %v8028_v18 = vcombine.low %v4771_v38, %v4781_v63  ;;  %v5820_v62 = vsel %vm8646_vm11, %v5815_v22, %v5819_v56  ;;  %v5830_v44 = vsel %vm8646_vm11, %v5825_v51, %v5829_v30  ;;  %v7982_v16 = vrot.slane %v5499_v25, 9  ;;  %v5498_v51 = vld [vmem:[#allocation3 + $0x9c] sm:$0xe] }
 0x319   : > { %v8117_v50 = vcombine.low %v5820_v62, %v5830_v44  ;;  %v5647_v58 = vsel %vm8626_vm7, %v5645_v39, %v5646_v14  ;;  %v5044_v59 = vrot.slane %v5042_v54, 4  ;;  %v5636_v17 = vrot.slane %v11788_v46, 5  ;;  %v11862_v38 = vpop.permute.xlu1 %6829  ;;  %v11866_v14 = vld [vmem:[#allocation3 + $0xa4] sm:$0x1] }
 0x31a   : > { %v11847_v5 = vrot.slane %v5976_v21, 4  ;;  %v7036_v56 = vsel %vm7024_vm6, %v6993_v49, %v11596_v55  ;;  %6405 = vrot.lane.b32.xlu1 %v8028_v18, %s8460_s11  ;;  %v5045_v22 = vrot.slane %v11835_v20, 5  ;;  %v11855_v25 = vrot.slane %v5979_v4, 5  ;;  %v4891_v4 = vld [vmem:[#allocation3 + $0x9c] sm:$0xe] }
 0x31b   : > { %v7038_v39 = vsel %vm7024_vm6, %v6996_v41, %v11633_v32  ;;  %6903 = vrot.lane.b32.xlu0 %v8117_v50, %s8465_s20  ;;  %v5644_v21 = vsel %vm8626_vm7, %v7982_v16, %v5643_v61  ;;  %v5638_v30 = vrot.slane %v5636_v17, 4  ;;  %v7967_v49 = vrot.slane %v4892_v10, 9  ;;  %v12650_v61 = vld [vmem:[#allocation30_spill] sm:$0xff] }
 0x31c   : > { %v8094_v55 = vcombine.low %v5644_v21, %v5647_v58  ;;  %v5046_v63 = vsel %vm8626_vm7, %v5044_v59, %v5045_v22  ;;  %v5035_v18 = vrot.slane %v11844_v40, 5  ;;  %v7071_v32 = vsel %vm7057_vm3, %v7038_v39, %v11730_v24  ;;  %v11880_v59 = vld [vmem:[#allocation3 + $0xc0] sm:$0xf] }
 0x31d   : > { %v7069_v62 = vsel %vm7057_vm3, %v7036_v56, %v12650_v61  ;;  %v5639_v44 = vrot.slane %v11853_v53, 5  ;;  %v5391_v16 = vshrl.u32 %v11802_v11, 16  ;;  %v5394_v50 = vshll.u32 %v11802_v11, 16  ;;  %v6652_v21 = vpop.permute.xlu0 %6651 }
 0x31e   : > { %6745 = vrot.lane.b32.xlu1 %v8094_v55, %s8464_s17  ;;  %v5043_v58 = vsel %vm8626_vm7, %v7967_v49, %v5042_v54  ;;  %v7981_v10 = vrot.slane %v5498_v51, 9  ;;  %v7966_v39 = vrot.slane %v4891_v4, 9  ;;  %v5038_v56 = vrot.slane %v11866_v14, 5  ;;  %v6101_v51 = vld [vmem:[#allocation3 + $0x60] sm:$0xe]  ;;  %v6400_v49 = vpop.permute.xlu1 %6399 }
 0x31f   : > { %v8047_v24 = vcombine.low %v5043_v58, %v5046_v63  ;;  %v5640_v22 = vsel %vm8626_vm7, %v5638_v30, %v5639_v44  ;;  %v5037_v61 = vrot.slane %v5035_v18, 4  ;;  %v6009_v41 = vshll.u32 %v11575_v23, 16  ;;  %v11893_v63 = vld [vmem:[#allocation3 + $0xb0] sm:$0x1]  ;;  %v8414_v44 = vld [vmem:[#allocation3 + $0x64] sm:$0xf] }
 0x320   : > { %v6015_v11 = vrot.slane %v6013_v2, 4  ;;  %v7102_v54 = vsel %vm7090_vm8, %v7069_v62, %v11647_v27  ;;  %v5637_v55 = vsel %vm8626_vm7, %v7981_v10, %v5636_v17  ;;  %v6048_v30 = vshrl.u32 %v11880_v59, 16 }
 0x321   : > { %v7135_v4 = vsel %vm7123_vm4, %v7102_v54, %v11566_v28  ;;  %v6203_v58 = vrot.slane %v8414_v44, 5  ;;  %v8093_v23 = vcombine.low %v5637_v55, %v5640_v22  ;;  %v6006_v27 = vor.u32 %v11752_v12, %v11750_v8  ;;  %v11922_v55 = vld [vmem:[#allocation3 + $0xc4] sm:$0xf] }
 0x322   : > { %6491 = vrot.lane.b32.xlu1 %v8047_v24, %s8461_s12  ;;  %v11900_v2 = vrot.slane %v6009_v41, 5  ;;  %v7168_v17 = vsel %vm7156_vm5, %v7135_v4, %v11675_v48  ;;  %v7991_v10 = vrot.slane %v6101_v51, 9  ;;  %v6206_v31 = vrot.slane %v8415_v37, 5  ;;  %v11924_v4 = vpop.permute.xlu1 %6575 }
 0x323   : > { %v7206_v62 = vsel %vm7189_vm9, %v7168_v17, %v6906_v45  ;;  %v6205_v26 = vrot.slane %v6203_v58, 4  ;;  %v5039_v28 = vsel %vm8626_vm7, %v5037_v61, %v5038_v56  ;;  %v6019_v22 = vshll.u32 %v11893_v63, 16  ;;  %v11910_v12 = vpop.permute.xlu0 %6397 }
 0x324   : > { %v6016_v24 = vor.u32 %v6015_v11, %v11900_v2  ;;  %7438 = vmatmul.mubr.bf16.vlgmr.msra.gmra.mrb[0].mxu1 %v7206_v62  ;;  %v7104_v8 = vsel %vm7090_vm8, %v7071_v32, %v6652_v21  ;;  %v6204_v48 = vsel %vm8626_vm7, %v7991_v10, %v6203_v58  ;;  %v5424_v37 = vshll.u32 %v11583_v29, 16  ;;  %v8416_v11 = vld [vmem:[#allocation3 + $0x64] sm:$0xf]  ;;  %v8417_v32 = vld [vmem:[#allocation3 + $0x60] sm:$0xf] }
 0x325   : > { %v6207_v45 = vsel %vm8626_vm7, %v6205_v26, %v6206_v31  ;;  %v12651_v41 = vshrl.u32 %v11583_v29, 16  ;;  %v5036_v61 = vsel %vm8626_vm7, %v7966_v39, %v5035_v18  ;;  %v8009_v21 = vcombine.low %v8417_v32, %v8416_v11  ;;  %v6102_v10 = vld [vmem:[#allocation3 + $0x6c] sm:$0xe]  ;;  %v8420_v32 = vld [vmem:[#allocation3 + $0x58] sm:$0xf] }
 0x326   : > { %6743 = vrot.lane.b32.xlu1 %v8093_v23, %s8464_s17  ;;  %v6007_v54 = vrot.slane %v6006_v27, 4  ;;  %v8135_v51 = vcombine.low %v6204_v48, %v6207_v45  ;;  %v6017_v31 = vrot.slane %v6016_v24, 4  ;;  %v7137_v26 = vsel %vm7123_vm4, %v7104_v8, %v11755_v60  ;;  %v8418_v8 = vld [vmem:[#allocation3 + $0x70] sm:$0xf] }
 0x327   : > { %v5430_v56 = vrot.slane %v12651_v41, 4  ;;  %v5421_v29 = vor.u32 %v11794_v47, %v11792_v43  ;;  %v11930_v44 = vrot.slane %v5424_v37, 5  ;;  %v11932_v58 = vrot.slane %v5391_v16, 4  ;;  %v11938_v27 = vpop.permute.xlu0 %6737  ;;  %v11944_v47 = vld [vmem:[#allocation3 + $0xa8] sm:$0xf] }
 0x328   : > { %v11934_v18 = vrot.slane %v5394_v50, 5  ;;  %v8046_v39 = vcombine.low %v5036_v61, %v5039_v28  ;;  %v7002_v23 = vsel %vm6975_vm2, %v8009_v21, %v6400_v49  ;;  %8161 = vmatprep.mubr.msk.bf16.mxu1 %vm6975_vm2, %v8135_v51  ;;  %v11940_v17 = vrot.slane %v6048_v30, 4  ;;  %v8419_v61 = vld [vmem:[#allocation3 + $0x74] sm:$0x1] }
 0x329   : > { %v6051_v60 = vshll.u32 %v11880_v59, 16  ;;  %v6021_v62 = vrot.slane %v6019_v22, 5  ;;  %v5431_v43 = vor.u32 %v5430_v56, %v11930_v44  ;;  %v8111_v16 = vcombine.low %v11880_v59, %v11922_v55  ;;  %v8421_v21 = vld [vmem:[#allocation3 + $0x54] sm:$0xf] }
 0x32a   : > { %6489 = vrot.lane.b32.xlu1 %v8046_v39, %s8461_s12  ;;  %v6012_v50 = vsel %vm8646_vm11, %v6007_v54, %v11900_v2  ;;  %v5434_v49 = vshll.u32 %v11821_v34, 16  ;;  %v7170_v30 = vsel %vm7156_vm5, %v7137_v26, %v11667_v13  ;;  %v5422_v24 = vrot.slane %v5421_v29, 4  ;;  %v11964_v13 = vpop.permute.xlu1 %6735  ;;  %v5689_v39 = vld [vmem:[#allocation3 + $0xb4] sm:$0xf] }
 0x32b   : > { %v6022_v28 = vsel %vm8646_vm11, %v6017_v31, %v6021_v62  ;;  %v7209_v22 = vsel %vm7189_vm9, %v7170_v30, %v11807_v3  ;;  %v6210_v48 = vrot.slane %v8418_v8, 5  ;;  %v5432_v59 = vrot.slane %v5431_v43, 4  ;;  %v11962_v37 = vpop.permute.xlu0 %6483 }
 0x32c   : > { %7446 = vmatmul.mubr.bf16.gmra.mrb[4].mxu1 %v7209_v22  ;;  %v4831_v45 = vshrl.u32 %v11944_v47, 16  ;;  %v4834_v2 = vshll.u32 %v11944_v47, 16  ;;  %v4840_v34 = vshll.u32 %v11815_v15, 16  ;;  %v7992_v41 = vrot.slane %v6102_v10, 9 }
 0x32d   : > { %v6212_v56 = vrot.slane %v6210_v48, 4  ;;  %v6213_v11 = vrot.slane %v8419_v61, 5  ;;  %v4844_v3 = vshrl.u32 %v11815_v15, 16  ;;  %v8008_v54 = vcombine.low %v8421_v21, %v8420_v32  ;;  %v12006_v32 = vld [vmem:[#allocation3 + $0xa4] sm:$0x1] }
 0x32e   : > { %6843 = vrot.lane.b32.xlu1 %v8111_v16, %s8462_s15  ;;  %v4833_v51 = vrot.slane %v4831_v45, 4  ;;  %v4836_v31 = vrot.slane %v4834_v2, 5  ;;  %v11968_v26 = vrot.slane %v4840_v34, 5  ;;  %v5436_v29 = vrot.slane %v5434_v49, 5 }
 0x32f   : > { %v6211_v62 = vsel %vm8626_vm7, %v7992_v41, %v6210_v48  ;;  %v6214_v43 = vsel %vm8626_vm7, %v6212_v56, %v6213_v11  ;;  %v4846_v30 = vrot.slane %v4844_v3, 4  ;;  %v6061_v15 = vshrl.u32 %v11922_v55, 16  ;;  %v11977_v8 = vpop.permute.xlu0 %6835  ;;  %v11983_v48 = vld [vmem:[#allocation3 + $0xb8] sm:$0xf] }
 0x330   : > { %v8125_v10 = vcombine.low %v6012_v50, %v6022_v28  ;;  %v6999_v16 = vsel %vm6975_vm2, %v8008_v54, %v11910_v12  ;;  %v8136_v22 = vcombine.low %v6211_v62, %v6214_v43  ;;  %v7042_v49 = vsel %vm7024_vm6, %v7002_v23, %v11767_v0  ;;  %v12004_v3 = vld [vmem:[#allocation3 + $0xb8] sm:$0xf]  ;;  %v12021_v43 = vld [vmem:[#allocation3 + $0xb4] sm:$0xf] }
 0x331   : > { %v5437_v45 = vsel %vm8646_vm11, %v5432_v59, %v5436_v29  ;;  %v4847_v2 = vor.u32 %v4846_v30, %v11968_v26  ;;  %v4850_v34 = vshll.u32 %v11835_v20, 16  ;;  %v11987_v41 = vrot.slane %v6051_v60, 5  ;;  %v11997_v59 = vpop.permute.xlu1 %6481 }
 0x332   : > { %6919 = vrot.lane.b32.xlu1 %v8125_v10, %s8465_s20  ;;  %v6024_v12 = vshrl.u32 %v5689_v39, 16  ;;  %8162 = vmatprep.mubr.msk.bf16.mxu1 %vm6975_vm2, %v8136_v22  ;;  %v4837_v50 = vor.u32 %v4836_v31, %v4833_v51  ;;  %v5985_v28 = vshll.u32 %v11735_v6, 16  ;;  %v5427_v0 = vsel %vm8646_vm11, %v5422_v24, %v11930_v44  ;;  %v12014_v31 = vld [vmem:[#allocation3 + $0x9c] sm:$0xf] }
 0x333   : > { %v7040_v23 = vsel %vm7024_vm6, %v6999_v16, %v11776_v42  ;;  %v6027_v20 = vshll.u32 %v5689_v39, 16  ;;  %v4848_v60 = vrot.slane %v4847_v2, 4  ;;  %v12001_v56 = vsel %vm7057_vm3, %v7042_v49, %v11924_v4  ;;  %v6910_v10 = vpop.permute.xlu0 %6909 }
 0x334   : > { %v8078_v61 = vcombine.low %v5427_v0, %v5437_v45  ;;  %v6037_v11 = vshrl.u32 %v11983_v48, 16  ;;  %v5400_v44 = vshll.u32 %v11788_v46, 16  ;;  %v8110_v24 = vcombine.low %v5689_v39, %v11983_v48 }
 0x335   : > { %v4852_v42 = vrot.slane %v4850_v34, 5  ;;  %v12010_v21 = vrot.slane %v5985_v28, 5  ;;  %v12652_v54 = vshrl.u32 %v11735_v6, 16  ;;  %v7073_v4 = vsel %vm7057_vm3, %v7040_v23, %v11693_v35  ;;  %v12031_v49 = vpop.permute.xlu1 %6581 }
 0x336   : > { %6665 = vrot.lane.b32.xlu1 %v8078_v61, %s8466_s21  ;;  %v12019_v29 = vrot.slane %v6024_v12, 4  ;;  %v4838_v62 = vrot.slane %v4837_v50, 4  ;;  %v12653_v39 = vshrl.u32 %v11788_v46, 16  ;;  %v12025_v16 = vrot.slane %v6027_v20, 5 }
 0x337   : > { %v5991_v51 = vrot.slane %v12652_v54, 4  ;;  %v4853_v6 = vsel %vm8646_vm11, %v4848_v60, %v4852_v42  ;;  %v8063_v22 = vcombine.low %v12021_v43, %v12004_v3  ;;  %v12033_v35 = vrot.slane %v5400_v44, 5 }
 0x338   : > { %v5406_v30 = vrot.slane %v12653_v39, 4  ;;  %v4807_v45 = vshrl.u32 %v12014_v31, 16  ;;  %v4810_v2 = vshll.u32 %v12014_v31, 16  ;;  %v4816_v46 = vshll.u32 %v11844_v40, 16  ;;  %v6656_v39 = vpop.permute.xlu0 %6655 }
 0x339   : > { %v4820_v34 = vshrl.u32 %v11844_v40, 16  ;;  %v5439_v12 = vshrl.u32 %v12021_v43, 16  ;;  %v5982_v50 = vor.u32 %v11855_v25, %v11847_v5  ;;  %v5992_v28 = vor.u32 %v5991_v51, %v12010_v21  ;;  %v8422_v51 = vld [vmem:[#allocation3 + $0x7c] sm:$0xf] }
 0x33a   : > { %v5995_v0 = vshll.u32 %v12006_v32, 16  ;;  %6841 = vrot.lane.b32.xlu1 %v8110_v24, %s8462_s15  ;;  %v4843_v23 = vsel %vm8646_vm11, %v4838_v62, %v11968_v26  ;;  %v5407_v20 = vor.u32 %v5406_v30, %v12033_v35  ;;  %v12049_v60 = vrot.slane %v4816_v46, 5  ;;  %v6103_v26 = vld [vmem:[#allocation3 + $0x78] sm:$0xe] }
 0x33b   : > { %v4822_v40 = vrot.slane %v4820_v34, 4  ;;  %v8031_v61 = vcombine.low %v4843_v23, %v4853_v6  ;;  %v5442_v44 = vshll.u32 %v12021_v43, 16  ;;  %v5397_v5 = vor.u32 %v11934_v18, %v11932_v58  ;;  %v6912_v34 = vpop.permute.xlu1 %6911  ;;  %v8423_v23 = vld [vmem:[#allocation3 + $0x80] sm:$0x1] }
 0x33c   : > { %v7106_v25 = vsel %vm7090_vm8, %v7073_v4, %v11833_v52  ;;  %v4809_v42 = vrot.slane %v4807_v45, 4  ;;  %v4812_v24 = vrot.slane %v4810_v2, 5  ;;  %v6217_v62 = vrot.slane %v8422_v51, 5 }
 0x33d   : > { %v7139_v54 = vsel %vm7123_vm4, %v7106_v25, %v11746_v57  ;;  %v5983_v30 = vrot.slane %v5982_v50, 4  ;;  %v5993_v46 = vrot.slane %v5992_v28, 4  ;;  %v5410_v6 = vshll.u32 %v11853_v53, 16 }
 0x33e   : > { %v7172_v58 = vsel %vm7156_vm5, %v7139_v54, %v11862_v38  ;;  %6411 = vrot.lane.b32.xlu1 %v8031_v61, %s8460_s11  ;;  %v5997_v52 = vrot.slane %v5995_v0, 5  ;;  %v5408_v18 = vrot.slane %v5407_v20, 4  ;;  %v4823_v4 = vor.u32 %v4822_v40, %v12049_v60  ;;  %v12069_v20 = vld [vmem:[#allocation3 + $0xb8] sm:$0xf] }
 0x33f   : > { %v7212_v57 = vsel %vm7189_vm9, %v7172_v58, %v6910_v10  ;;  %v7993_v45 = vrot.slane %v6103_v26, 9  ;;  %v6219_v2 = vrot.slane %v6217_v62, 4  ;;  %v6220_v50 = vrot.slane %v8423_v23, 5  ;;  %v12084_v26 = vpop.permute.xlu1 %6657 }
 0x340   : > { %7454 = vmatmul.mubr.bf16.gmra.mrb[8].mxu1 %v7212_v57  ;;  %v7108_v53 = vsel %vm7090_vm8, %v12001_v56, %v6656_v39  ;;  %v5398_v28 = vrot.slane %v5397_v5, 4  ;;  %v4813_v25 = vor.u32 %v4812_v24, %v4809_v42  ;;  %v4826_v38 = vshll.u32 %v11866_v14, 16  ;;  %v6104_v42 = vld [vmem:[#allocation3 + $0x84] sm:$0xe]  ;;  %v8425_v57 = vld [vmem:[#allocation3 + $0x8c] sm:$0x1] }
 0x341   : > { %v7141_v0 = vsel %vm7123_vm4, %v7108_v53, %v11964_v13  ;;  %v5998_v10 = vsel %vm8646_vm11, %v5993_v46, %v5997_v52  ;;  %v5412_v40 = vrot.slane %v5410_v6, 5  ;;  %v6218_v61 = vsel %vm8626_vm7, %v7993_v45, %v6217_v62  ;;  %v12094_v52 = vld [vmem:[#allocation3 + $0xbc] sm:$0x1] }
 0x342   : > { %v6221_v54 = vsel %vm8626_vm7, %v6219_v2, %v6220_v50  ;;  %6587 = vrot.lane.b32.xlu1 %v8063_v22, %s8463_s16  ;;  %v5988_v14 = vsel %vm8646_vm11, %v5983_v30, %v12010_v21  ;;  %v4824_v56 = vrot.slane %v4823_v4, 4  ;;  %v5650_v5 = vrot.slane %v12004_v3, 5  ;;  %v8424_v22 = vld [vmem:[#allocation3 + $0x88] sm:$0xf]  ;;  %v8427_v50 = vld [vmem:[#allocation3 + $0x6c] sm:$0xf] }
 0x343   : > { %v8137_v13 = vcombine.low %v6218_v61, %v6221_v54  ;;  %v5413_v24 = vsel %vm8646_vm11, %v5408_v18, %v5412_v40  ;;  %v5049_v51 = vrot.slane %v12069_v20, 5  ;;  %v7174_v62 = vsel %vm7156_vm5, %v7141_v0, %v11786_v9 }
 0x344   : > { %v6224_v39 = vrot.slane %v8424_v22, 5  ;;  %v8124_v46 = vcombine.low %v5988_v14, %v5998_v10  ;;  %v4814_v6 = vrot.slane %v4813_v25, 4  ;;  %v4828_v21 = vrot.slane %v4826_v38, 5  ;;  %v12101_v25 = vld [vmem:[#allocation3 + $0xbc] sm:$0x1] }
 0x345   : > { %8163 = vmatprep.mubr.msk.bf16.mxu1 %vm6975_vm2, %v8137_v13  ;;  %v7215_v30 = vsel %vm7189_vm9, %v7174_v62, %v6912_v34  ;;  %v5403_v58 = vsel %vm8646_vm11, %v5398_v28, %v12033_v35  ;;  %v7994_v18 = vrot.slane %v6104_v42, 9  ;;  %v6227_v45 = vrot.slane %v8425_v57, 5  ;;  %v8426_v34 = vld [vmem:[#allocation3 + $0x70] sm:$0xf]  ;;  %v5500_v35 = vld [vmem:[#allocation3 + $0xb4] sm:$0xe]  ;;  %v6834_v42 = vpop.permute.xlu1 %6833 }
 0x346   : > { %v6226_v4 = vrot.slane %v6224_v39, 4  ;;  %6917 = vrot.lane.b32.xlu1 %v8124_v46, %s8465_s20  ;;  %v8077_v9 = vcombine.low %v5403_v58, %v5413_v24  ;;  %v4829_v2 = vsel %vm8646_vm11, %v4824_v56, %v4828_v21  ;;  %v5652_v23 = vrot.slane %v5650_v5, 4  ;;  %v4893_v28 = vld [vmem:[#allocation3 + $0xb4] sm:$0xe] }
 0x347   : > { %v8010_v53 = vcombine.low %v8427_v50, %v8426_v34  ;;  %v5051_v38 = vrot.slane %v5049_v51, 4  ;;  %v6225_v0 = vsel %vm8626_vm7, %v7994_v18, %v6224_v39  ;;  %v6057_v40 = vshll.u32 %v11922_v55, 16  ;;  %v6402_v14 = vpop.permute.xlu0 %6401 }
 0x348   : > { %7462 = vmatmul.mubr.bf16.gmra.mrb[12].mxu1 %v7215_v30  ;;  %v6228_v10 = vsel %vm8626_vm7, %v6226_v4, %v6227_v45  ;;  %v4819_v61 = vsel %vm8646_vm11, %v4814_v6, %v12049_v60  ;;  %v5653_v54 = vrot.slane %v12094_v52, 5  ;;  %v6063_v13 = vrot.slane %v6061_v15, 4  ;;  %v12125_v15 = vld [vmem:[#allocation3 + $0xc8] sm:$0x1] }
 0x349   : > { %v8138_v56 = vcombine.low %v6225_v0, %v6228_v10  ;;  %v7005_v24 = vsel %vm6975_vm2, %v8010_v53, %v6402_v14  ;;  %v5052_v62 = vrot.slane %v12101_v25, 5  ;;  %v12118_v22 = vrot.slane %v6057_v40, 5  ;;  %v6105_v0 = vld [vmem:[#allocation3 + $0x90] sm:$0xe]  ;;  %v12167_v14 = vld [vmem:[#allocation3 + $0xb4] sm:$0xf] }
 0x34a   : > { %v6033_v39 = vshll.u32 %v11983_v48, 16  ;;  %6663 = vrot.lane.b32.xlu1 %v8077_v9, %s8466_s21  ;;  %v8030_v46 = vcombine.low %v4819_v61, %v4829_v2  ;;  %v7983_v60 = vrot.slane %v5500_v35, 9  ;;  %v7044_v6 = vsel %vm7024_vm6, %v7005_v24, %v11997_v59  ;;  %v8428_v9 = vld [vmem:[#allocation3 + $0x94] sm:$0xf] }
 0x34b   : > { %v7968_v21 = vrot.slane %v4893_v28, 9  ;;  %8164 = vmatprep.mubr.msk.bf16.mxu1 %vm6975_vm2, %v8138_v56  ;;  %v5654_v30 = vsel %vm8626_vm7, %v5652_v23, %v5653_v54  ;;  %v7077_v58 = vsel %vm7057_vm3, %v7044_v6, %v11817_v7  ;;  %v5053_v18 = vsel %vm8626_vm7, %v5051_v38, %v5052_v62 }
 0x34c   : > { %v6054_v4 = vor.u32 %v11987_v41, %v11940_v17  ;;  %v6064_v57 = vor.u32 %v6063_v13, %v12118_v22  ;;  %v12136_v59 = vrot.slane %v6033_v39, 5  ;;  %v6039_v45 = vrot.slane %v6037_v11, 4 }
 0x34d   : > { %v6231_v2 = vrot.slane %v8428_v9, 5  ;;  %v5452_v23 = vshrl.u32 %v12004_v3, 16  ;;  %v12143_v7 = vrot.slane %v5439_v12, 4  ;;  %v6067_v34 = vshll.u32 %v12125_v15, 16  ;;  %v12159_v12 = vld [vmem:[#allocation3 + $0xbc] sm:$0x1] }
 0x34e   : > { %v6030_v17 = vor.u32 %v12025_v16, %v12019_v29  ;;  %6409 = vrot.lane.b32.xlu1 %v8030_v46, %s8460_s11  ;;  %v5651_v41 = vsel %vm8626_vm7, %v7983_v60, %v5650_v5  ;;  %v5050_v11 = vsel %vm8626_vm7, %v7968_v21, %v5049_v51  ;;  %v12157_v50 = vpop.permute.xlu0 %6565  ;;  %v7110_v53 = vsel %vm7090_vm8, %v7077_v58, %v12084_v26  ;;  %v6404_v38 = vpop.permute.xlu1 %6403  ;;  %v8429_v51 = vld [vmem:[#allocation3 + $0x98] sm:$0x1] }
 0x34f   : > { %v6233_v29 = vrot.slane %v6231_v2, 4  ;;  %v5444_v16 = vrot.slane %v5442_v44, 5  ;;  %v8095_v35 = vcombine.low %v5651_v41, %v5654_v30  ;;  %v8048_v28 = vcombine.low %v5050_v11, %v5053_v18  ;;  %v12195_v11 = vld [vmem:[#allocation3 + $0xc4] sm:$0xf] }
 0x350   : > { %v6055_v5 = vrot.slane %v6054_v4, 4  ;;  %v6065_v10 = vrot.slane %v6064_v57, 4  ;;  %v6040_v40 = vor.u32 %v6039_v45, %v12136_v59  ;;  %v6234_v61 = vrot.slane %v8429_v51, 5 }
 0x351   : > { %v5448_v54 = vshll.u32 %v12004_v3, 16  ;;  %v6069_v56 = vrot.slane %v6067_v34, 5  ;;  %v6031_v26 = vrot.slane %v6030_v17, 4  ;;  %v6043_v13 = vshll.u32 %v12159_v12, 16 }
 0x352   : > { %v7143_v43 = vsel %vm7123_vm4, %v7110_v53, %v11938_v27  ;;  %6747 = vrot.lane.b32.xlu1 %v8095_v35, %s8464_s17  ;;  %v7995_v44 = vrot.slane %v6105_v0, 9  ;;  %v6235_v24 = vsel %vm8626_vm7, %v6233_v29, %v6234_v61  ;;  %v5454_v39 = vrot.slane %v5452_v23, 4  ;;  %v12177_v46 = vpop.permute.xlu1 %6579  ;;  %v8431_v0 = vld [vmem:[#allocation3 + $0x78] sm:$0xf] }
 0x353   : > { %v12175_v62 = vrot.slane %v5448_v54, 5  ;;  %v4855_v3 = vshrl.u32 %v12167_v14, 16  ;;  %v4858_v60 = vshll.u32 %v12167_v14, 16  ;;  %v4864_v6 = vshll.u32 %v12069_v20, 16 }
 0x354   : > { %v4868_v21 = vshrl.u32 %v12069_v20, 16  ;;  %v6070_v27 = vsel %vm8646_vm11, %v6065_v10, %v6069_v56  ;;  %v6914_v30 = vpop.permute.xlu0 %6913  ;;  %v6041_v58 = vrot.slane %v6040_v40, 4  ;;  %v7176_v18 = vsel %vm7156_vm5, %v7143_v43, %v6834_v42  ;;  %v12206_v40 = vld [vmem:[#allocation3 + $0xc0] sm:$0xf] }
 0x355   : > { %v6232_v4 = vsel %vm8626_vm7, %v7995_v44, %v6231_v2  ;;  %v7218_v57 = vsel %vm7189_vm9, %v7176_v18, %v6914_v30  ;;  %v5455_v9 = vor.u32 %v5454_v39, %v12175_v62  ;;  %v12190_v23 = vrot.slane %v4864_v6, 5  ;;  %v12654_v30 = vld [vmem:[#allocation29_spill] sm:$0xff] }
 0x356   : > { %v8139_v45 = vcombine.low %v6232_v4, %v6235_v24  ;;  %6493 = vrot.lane.b32.xlu1 %v8048_v28, %s8461_s12  ;;  %7470 = vmatmul.mubr.bf16.gmra.mrb[16].mxu1 %v7218_v57  ;;  %v5445_v34 = vor.u32 %v5444_v16, %v12143_v7  ;;  %v5458_v17 = vshll.u32 %v12094_v52, 16  ;;  %v4870_v41 = vrot.slane %v4868_v21, 4  ;;  %v12201_v53 = vpop.permute.xlu1 %6741  ;;  %v8430_v28 = vld [vmem:[#allocation3 + $0x7c] sm:$0xf]  ;;  %v12233_v4 = vld [vmem:[#allocation3 + $0xc8] sm:$0x1] }
 0x357   : > { %v6060_v42 = vsel %vm8646_vm11, %v6055_v5, %v12118_v22  ;;  %v6045_v2 = vrot.slane %v6043_v13, 5  ;;  %v4857_v29 = vrot.slane %v4855_v3, 4  ;;  %v4860_v35 = vrot.slane %v4858_v60, 5 }
 0x358   : > { %8165 = vmatprep.mubr.msk.bf16.mxu1 %vm6975_vm2, %v8139_v45  ;;  %v8011_v10 = vcombine.low %v8431_v0, %v8430_v28  ;;  %v8127_v7 = vcombine.low %v6060_v42, %v6070_v27  ;;  %v6036_v52 = vsel %vm8646_vm11, %v6031_v26, %v12136_v59  ;;  %v6660_v16 = vpop.permute.xlu0 %6659  ;;  %v5456_v5 = vrot.slane %v5455_v9, 4  ;;  %v12236_v42 = vld [vmem:[#allocation3 + $0xcc] sm:$0xf] }
 0x359   : > { %v6046_v22 = vsel %vm8646_vm11, %v6041_v58, %v6045_v2  ;;  %v4871_v51 = vor.u32 %v4870_v41, %v12190_v23  ;;  %v5476_v61 = vshrl.u32 %v12195_v11, 16  ;;  %v5446_v56 = vrot.slane %v5445_v34, 4 }
 0x35a   : > { %v7008_v54 = vsel %vm6975_vm2, %v8011_v10, %v6404_v38  ;;  %6923 = vrot.lane.b32.xlu1 %v8127_v7, %s8465_s20  ;;  %v5460_v13 = vrot.slane %v5458_v17, 5  ;;  %v5472_v43 = vshll.u32 %v12195_v11, 16  ;;  %v4861_v26 = vor.u32 %v4860_v35, %v4857_v29  ;;  %v5501_v10 = vld [vmem:[#allocation3 + $0xc0] sm:$0xe] }
 0x35b   : > { %v12215_v59 = vpop.permute.xlu1 %6487  ;;  %v4874_v44 = vshll.u32 %v12101_v25, 16  ;;  %v5463_v24 = vshrl.u32 %v12206_v40, 16  ;;  %v5466_v39 = vshll.u32 %v12206_v40, 16  ;;  %v8126_v3 = vcombine.low %v6036_v52, %v6046_v22 }
 0x35c   : > { %v6646_v60 = vpop.permute.xlu0 %6645  ;;  %v5461_v38 = vsel %vm8646_vm11, %v5456_v5, %v5460_v13  ;;  %v4872_v6 = vrot.slane %v4871_v51, 4  ;;  %v12222_v21 = vrot.slane %v5472_v43, 5  ;;  %v5478_v27 = vrot.slane %v5476_v61, 4 }
 0x35d   : > { %v7032_v58 = vsel %vm7024_vm6, %v11619_v19, %v12654_v30  ;;  %v7046_v25 = vsel %vm7024_vm6, %v7008_v54, %v11962_v37  ;;  %v5451_v18 = vsel %vm8646_vm11, %v5446_v56, %v12175_v62  ;;  %v6189_v57 = vrot.slane %v11769_v33, 5  ;;  %v12242_v62 = vld [vmem:[#allocation3 + $0xd0] sm:$0xf]  ;;  %v8432_v30 = vld [vmem:[#allocation3 + $0xa0] sm:$0xf] }
 0x35e   : > { %6921 = vrot.lane.b32.xlu1 %v8126_v3, %s8465_s20  ;;  %v4862_v45 = vrot.slane %v4861_v26, 4  ;;  %v4876_v9 = vrot.slane %v4874_v44, 5  ;;  %v5465_v17 = vrot.slane %v5463_v24, 4  ;;  %v5468_v41 = vrot.slane %v5466_v39, 5  ;;  %v12655_v26 = vld [vmem:[#allocation23_spill] sm:$0xff] }
 0x35f   : > { %v6740_v34 = vpop.permute.xlu1 %6739  ;;  %v7065_v19 = vsel %vm7057_vm3, %v7032_v58, %v12157_v50  ;;  %v7079_v37 = vsel %vm7057_vm3, %v7046_v25, %v12177_v46  ;;  %v8079_v2 = vcombine.low %v5451_v18, %v5461_v38  ;;  %v8064_v35 = vcombine.low %v12206_v40, %v12195_v11  ;;  %v6099_v46 = vld [vmem:[#allocation3 + $0x48] sm:$0xe] }
 0x360   : > { %v4877_v33 = vsel %vm8646_vm11, %v4872_v6, %v4876_v9  ;;  %v5479_v28 = vor.u32 %v5478_v27, %v12222_v21  ;;  %v5482_v0 = vshll.u32 %v12233_v4, 16  ;;  %v7112_v50 = vsel %vm7090_vm8, %v7079_v37, %v6660_v16 }
 0x361   : > { %v6191_v7 = vrot.slane %v6189_v57, 4  ;;  %v6072_v52 = vshrl.u32 %v12236_v42, 16  ;;  %v6075_v22 = vshll.u32 %v12236_v42, 16  ;;  %v4867_v5 = vsel %vm8646_vm11, %v4862_v45, %v12190_v23  ;;  %v5710_v45 = vld [vmem:[#allocation3 + $0xd4] sm:$0x1] }
 0x362   : > { %6667 = vrot.lane.b32.xlu1 %v8079_v2, %s8466_s21  ;;  %v5469_v51 = vor.u32 %v5468_v41, %v5465_v17  ;;  %v6085_v61 = vshrl.u32 %v12242_v62, 16  ;;  %v6081_v54 = vshll.u32 %v12242_v62, 16  ;;  %v8032_v16 = vcombine.low %v4867_v5, %v4877_v33 }
 0x363   : > { %v6726_v29 = vpop.permute.xlu0 %6725  ;;  %v12257_v40 = vpop.permute.xlu1 %6485  ;;  %v7984_v13 = vrot.slane %v5501_v10, 9  ;;  %v5657_v43 = vrot.slane %v12195_v11, 5  ;;  %v6192_v44 = vrot.slane %v12655_v26, 5  ;;  %v7098_v24 = vsel %vm7090_vm8, %v7065_v19, %v6646_v60 }
 0x364   : > { %v5480_v39 = vrot.slane %v5479_v28, 4  ;;  %v5484_v3 = vrot.slane %v5482_v0, 5  ;;  %v7989_v38 = vrot.slane %v6099_v46, 9  ;;  %v6074_v6 = vrot.slane %v6072_v52, 4  ;;  %v6106_v0 = vld [vmem:[#allocation3 + $0x9c] sm:$0xe] }
 0x365   : > { %v6193_v23 = vsel %vm8626_vm7, %v6191_v7, %v6192_v44  ;;  %v6077_v27 = vrot.slane %v6075_v22, 5  ;;  %v6238_v58 = vrot.slane %v8432_v30, 5  ;;  %v7131_v25 = vsel %vm7123_vm4, %v7098_v24, %v6726_v29 }
 0x366   : > { %6413 = vrot.lane.b32.xlu1 %v8032_v16, %s8460_s11  ;;  %v5470_v18 = vrot.slane %v5469_v51, 4  ;;  %v6083_v9 = vrot.slane %v6081_v54, 5  ;;  %v6087_v60 = vrot.slane %v6085_v61, 4  ;;  %v5659_v19 = vrot.slane %v5657_v43, 4 }
 0x367   : > { %v6822_v56 = vpop.permute.xlu0 %6821  ;;  %v12268_v11 = vpop.permute.xlu1 %6839  ;;  %v5660_v37 = vrot.slane %v12233_v4, 5  ;;  %v6190_v2 = vsel %vm8626_vm7, %v7989_v38, %v6189_v57  ;;  %v5485_v33 = vsel %vm8646_vm11, %v5480_v39, %v5484_v3  ;;  %v6240_v10 = vrot.slane %v6238_v58, 4 }
 0x368   : > { %v7164_v17 = vsel %vm7156_vm5, %v7131_v25, %v6822_v56  ;;  %v8133_v28 = vcombine.low %v6190_v2, %v6193_v23  ;;  %v7145_v46 = vsel %vm7123_vm4, %v7112_v50, %v6740_v34  ;;  %v6078_v7 = vor.u32 %v6077_v27, %v6074_v6  ;;  %v6110_v34 = vld [vmem:[#allocation3 + $0xcc] sm:$0xe]  ;;  %v8434_v2 = vld [vmem:[#allocation3 + $0x34] sm:$0xf] }
 0x369   : > { %v6091_v52 = vshll.u32 %v5710_v45, 16  ;;  %v5475_v4 = vsel %vm8646_vm11, %v5470_v18, %v12222_v21  ;;  %v6088_v22 = vor.u32 %v6087_v60, %v6083_v9  ;;  %v6241_v5 = vrot.slane %v12006_v32, 5 }
 0x36a   : > { %6589 = vrot.lane.b32.xlu1 %v8064_v35, %s8463_s16  ;;  %v8080_v51 = vcombine.low %v5475_v4, %v5485_v33  ;;  %v7996_v54 = vrot.slane %v6106_v0, 9  ;;  %v5658_v35 = vsel %vm8626_vm7, %v7984_v13, %v5657_v43  ;;  %v5661_v50 = vsel %vm8626_vm7, %v5659_v19, %v5660_v37  ;;  %v8436_v4 = vld [vmem:[#allocation3 + $0x84] sm:$0xf] }
 0x36b   : > { %v6902_v41 = vpop.permute.xlu0 %6901  ;;  %v12283_v57 = vpop.permute.xlu1 %6585  ;;  %v7178_v21 = vsel %vm7156_vm5, %v7145_v46, %v11977_v8  ;;  %v6242_v16 = vsel %vm8626_vm7, %v6240_v10, %v6241_v5  ;;  %v6079_v56 = vrot.slane %v6078_v7, 4  ;;  %v6093_v32 = vrot.slane %v6091_v52, 5  ;;  %v8435_v52 = vld [vmem:[#allocation3 + $0x88] sm:$0xf] }
 0x36c   : > { %v7200_v29 = vsel %vm7189_vm9, %v7164_v17, %v6902_v41  ;;  %v6239_v26 = vsel %vm8626_vm7, %v7996_v54, %v6238_v58  ;;  %v8016_v44 = vcombine.low %v12167_v14, %v12069_v20  ;;  %v6089_v43 = vrot.slane %v6088_v22, 4 }
 0x36d   : > { %7422 = vmatmul.mubr.bf16.gmra.mrb[44].mxu0 %v7200_v29  ;;  %v8000_v24 = vrot.slane %v6110_v34, 9  ;;  %v6266_v39 = vrot.slane %v12242_v62, 5  ;;  %v6269_v3 = vrot.slane %v5710_v45, 5  ;;  %v8096_v8 = vcombine.low %v5658_v35, %v5661_v50 }
 0x36e   : > { %8159 = vmatprep.mubr.msk.bf16.mxu0 %vm6975_vm2, %v8133_v28  ;;  %6669 = vrot.lane.b32.xlu1 %v8080_v51, %s8466_s21  ;;  %v8140_v23 = vcombine.low %v6239_v26, %v6242_v16  ;;  %v8112_v30 = vcombine.low %v12236_v42, %v12242_v62  ;;  %v6084_v25 = vsel %vm8646_vm11, %v6079_v56, %v6083_v9 }
 0x36f   : > { %v6392_v61 = vpop.permute.xlu0 %6391  ;;  %v6916_v13 = vpop.permute.xlu1 %6915  ;;  %v12303_v6 = vsel %vm8626_vm7, %v8000_v24, %v6266_v39  ;;  %v6268_v27 = vrot.slane %v6266_v39, 4  ;;  %v6094_v18 = vsel %vm8646_vm11, %v6089_v43, %v6093_v32  ;;  %v8005_v33 = vcombine.low %v8433_v36, %v8434_v2 }
 0x370   : > { %v7221_v38 = vsel %vm7189_vm9, %v7178_v21, %v6916_v13  ;;  %v8128_v42 = vcombine.low %v6084_v25, %v6094_v18  ;;  %v8012_v22 = vcombine.low %v8436_v4, %v8435_v52  ;;  %v6107_v25 = vld [vmem:[#allocation3 + $0xa8] sm:$0xe]  ;;  %vm7637_vm11 = vcmask 257024  }
 0x371   : > { %7478 = vmatmul.mubr.bf16.gmra.mrb[20].mxu1 %v7221_v38  ;;  %v12315_v45 = vsel %vm8626_vm7, %v6268_v27, %v6269_v3  ;;  %v6990_v0 = vsel %vm6975_vm2, %v8005_v33, %v6392_v61  ;;  %v8437_v27 = vld [vmem:[#allocation3 + $0xac] sm:$0xf]  ;;  %v7997_v36 = vrot.slane %v6107_v25, 9  ;;  %v6252_v33 = vrot.slane %v11983_v48, 5 }
 0x372   : > { %6749 = vrot.lane.b32.xlu1 %v8096_v8, %s8464_s17  ;;  %8166 = vmatprep.mubr.msk.bf16.mxu1 %vm6975_vm2, %v8140_v23  ;;  %v8144_v60 = vcombine.low %v12303_v6, %v12315_v45 }
 0x373   : > { %v6472_v58 = vpop.permute.xlu0 %6471  ;;  %v6254_v4 = vrot.slane %v6252_v33, 4 }
 0x374   : > { %v6662_v17 = vpop.permute.xlu1 %6661  ;;  %v7034_v10 = vsel %vm7024_vm6, %v6990_v0, %v6472_v58 }
 0x376   : > { %6845 = vrot.lane.b32.xlu1 %v8112_v30, %s8462_s15  ;;  %v6245_v30 = vrot.slane %v8437_v27, 5  ;;  %s8174_s15 = sshll.u32 %s12657_s19, 5 }
 0x377   : > { %v6568_v62 = vpop.permute.xlu0 %6567 }
 0x378   : > { %v6838_v41 = vpop.permute.xlu1 %6837  ;;  %v7067_v46 = vsel %vm7057_vm3, %v7034_v10, %v6568_v62  ;;  %v8439_v62 = vld [vmem:[#allocation3 + $0x90] sm:$0xf] }
 0x37a   : > { %6925 = vrot.lane.b32.xlu1 %v8128_v42, %s8465_s20  ;;  %v8438_v42 = vld [vmem:[#allocation3 + $0x94] sm:$0xf]  ;;  %s12408_s20 = scalar_lea.vmem %s12520_s5, %s8174_s15 }
 0x37f   : > { %v6648_v19 = vpop.permute.xlu0 %6647 }
 0x380   : > { %v7100_v7 = vsel %vm7090_vm8, %v7067_v46, %v6648_v19  ;;  %v8013_v19 = vcombine.low %v8439_v62, %v8438_v42 }
 0x382   : > { %v6408_v9 = vpop.permute.xlu1 %6407 }
 0x383   : > { %v6728_v37 = vpop.permute.xlu0 %6727 }
 0x384   : > { %v7133_v5 = vsel %vm7123_vm4, %v7100_v7, %v6728_v37  ;;  %v12358_v37 = vld [vmem:[%s12519_s4] ss:$0 sm:$0xff] }
 0x386   : > { %v12321_v29 = vpop.permute.xlu1 %6583 }
 0x387   : > { %v6824_v28 = vpop.permute.xlu0 %6823 }
 0x388   : > { %v7166_v54 = vsel %vm7156_vm5, %v7133_v5, %v6824_v28  ;;  %v7014_v28 = vsel %vm6975_vm2, %v8013_v19, %v6408_v9  ;;  %v6108_v9 = vld [vmem:[#allocation3 + $0xb4] sm:$0xe] }
 0x389   : > { %v7050_v5 = vsel %vm7024_vm6, %v7014_v28, %v12215_v59  ;;  %v6259_v28 = vrot.slane %v11922_v55, 5 }
 0x38c   : > { %v6406_v51 = vpop.permute.xlu1 %6405 }
 0x38d   : > { %v7011_v34 = vsel %vm6975_vm2, %v8012_v22, %v6406_v51  ;;  %v6904_v35 = vpop.permute.xlu0 %6903 }
 0x38e   : > { %v7048_v61 = vsel %vm7024_vm6, %v7011_v34, %v12257_v40  ;;  %v7203_v50 = vsel %vm7189_vm9, %v7166_v54, %v6904_v35  ;;  %v7083_v54 = vsel %vm7057_vm3, %v7050_v5, %v12321_v29  ;;  %v6255_v35 = vrot.slane %v12159_v12, 5 }
 0x38f   : > { %v7081_v21 = vsel %vm7057_vm3, %v7048_v61, %v12031_v49  ;;  %7430 = vmatmul.mubr.bf16.gmra.mrb[48].mxu0 %v7203_v50 }
 0x390   : > { %v12335_v16 = vpop.permute.xlu1 %6745  ;;  %v7114_v56 = vsel %vm7090_vm8, %v7081_v21, %v6662_v17  ;;  %v6248_v17 = vrot.slane %v11893_v63, 5  ;;  %v6246_v63 = vsel %vm8626_vm7, %v7997_v36, %v6245_v30  ;;  %v6256_v29 = vsel %vm8626_vm7, %v6254_v4, %v6255_v35 }
 0x391   : > { %v7147_v32 = vsel %vm7123_vm4, %v7114_v56, %v12201_v53  ;;  %v6247_v53 = vrot.slane %v6245_v30, 4  ;;  %v6261_v4 = vrot.slane %v6259_v28, 4 }
 0x392   : > { %v7180_v10 = vsel %vm7156_vm5, %v7147_v32, %v6838_v41 }
 0x393   : > { %v6249_v2 = vsel %vm8626_vm7, %v6247_v53, %v6248_v17 }
 0x394   : > { %v12340_v26 = vpop.permute.xlu1 %6491  ;;  %v8141_v52 = vcombine.low %v6246_v63, %v6249_v2  ;;  %v6109_v63 = vld [vmem:[#allocation3 + $0xc0] sm:$0xe] }
 0x395   : > { %v7999_v55 = vrot.slane %v6109_v63, 9 }
 0x398   : > { %v6744_v13 = vpop.permute.xlu1 %6743 }
 0x39c   : > { %v12342_v43 = vpop.permute.xlu1 %6489 }
 0x3a0   : > { %v12344_v24 = vpop.permute.xlu1 %6843 }
 0x3a4   : > { %v6920_v40 = vpop.permute.xlu1 %6919 }
 0x3a8   : > { %v12346_v39 = vpop.permute.xlu1 %6665  ;;  %v7399_v3 = vpop.f32.mrb[32].mxu0 }
 0x3a9   : > { %v7401_v49 = vpop.f32.mrb[33].mxu0  ;;  %v7400_v7 = vadd.f32 %v12358_v37, %v7399_v3 }
 0x3aa   : > { %v7402_v8 = vpop.f32.mrb[34].mxu0  ;;  %v8440_v49 = vld [vmem:[#allocation3 + $0xa0] sm:$0xf] }
 0x3ab   : > { %v7404_v23 = vpop.f32.mrb[35].mxu0  ;;  %v7403_v48 = vadd.f32 %v12358_v37, %v7402_v8  ;;  %v7526_v50 = vmax.f32 %v7400_v7, 0.0  ;;  %v8014_v8 = vcombine.low %v12014_v31, %v8440_v49 }
 0x3ac   : > { %v12348_v38 = vpop.permute.xlu1 %6841  ;;  %v7998_v23 = vrot.slane %v6108_v9, 9  ;;  %v8441_v9 = vld [vmem:[#allocation3 + $0xac] sm:$0xf] }
 0x3ad   : > { %v7527_v27 = vmax.f32 %v7403_v48, 0.0 }
 0x3ae   : > { %v6253_v42 = vsel %vm8626_vm7, %v7998_v23, %v6252_v33 }
 0x3af   : > { %v8142_v31 = vcombine.low %v6253_v42, %v6256_v29 }
 0x3b0   : > { %v12350_v58 = vpop.permute.xlu1 %6411 }
 0x3b4   : > { %v12352_v18 = vpop.permute.xlu1 %6587 }
 0x3b8   : > { %v6918_v0 = vpop.permute.xlu1 %6917 }
 0x3b9   : > { %v7224_v46 = vsel %vm7189_vm9, %v7180_v10, %v6918_v0 }
 0x3ba   : > { %7486 = vmatmul.mubr.bf16.gmra.mrb[24].mxu1 %v7224_v46  ;;  %v7407_v22 = vpop.f32.mrb[36].mxu0 }
 0x3bb   : > { %8167 = vmatprep.mubr.msk.bf16.mxu1 %vm6975_vm2, %v8141_v52  ;;  %v7408_v41 = vadd.f32 %v12358_v37, %v7407_v22  ;;  %v7409_v51 = vpop.f32.mrb[37].mxu0 }
 0x3bc   : > { %v6664_v34 = vpop.permute.xlu1 %6663  ;;  %v7410_v61 = vpop.f32.mrb[38].mxu0 }
 0x3bd   : > { %v7116_v21 = vsel %vm7090_vm8, %v7083_v54, %v6664_v34  ;;  %v7528_v56 = vmax.f32 %v7408_v41, 0.0  ;;  %v7411_v59 = vadd.f32 %v12358_v37, %v7410_v61  ;;  %v7412_v32 = vpop.f32.mrb[39].mxu0  ;;  %v6260_v34 = vsel %vm8626_vm7, %v7999_v55, %v6259_v28 }
 0x3be   : > { %v7149_v3 = vsel %vm7123_vm4, %v7116_v21, %v6744_v13 }
 0x3bf   : > { %v7182_v12 = vsel %vm7156_vm5, %v7149_v3, %v12268_v11  ;;  %v7558_v30 = vmax.f32 %v7526_v50, %v7528_v56  ;;  %v7529_v53 = vmax.f32 %v7411_v59, 0.0 }
 0x3c0   : > { %v6410_v25 = vpop.permute.xlu1 %6409  ;;  %v7227_v17 = vsel %vm7189_vm9, %v7182_v12, %v6920_v40 }
 0x3c1   : > { %v7017_v13 = vsel %vm6975_vm2, %v8014_v8, %v6410_v25  ;;  %7574 = vst.msk [vmem:[#allocation4] sm:$0xff] %vm7024_vm6, %v7558_v30  ;;  %v7559_v62 = vmax.f32 %v7527_v27, %v7529_v53 }
 0x3c2   : > { %7494 = vmatmul.mubr.bf16.gmra.mrb[28].mxu1 %v7227_v17  ;;  %v12390_v19 = vpop.f32.mrb[40].mxu0  ;;  %v7052_v40 = vsel %vm7024_vm6, %v7017_v13, %v12342_v43  ;;  %v6262_v43 = vrot.slane %v12125_v15, 5 }
 0x3c3   : > { %8168 = vmatprep.mubr.msk.bf16.mxu1 %vm6975_vm2, %v8142_v31  ;;  %7575 = vst.msk [vmem:[#allocation4 + $0x8] sm:$0xff] %vm7024_vm6, %v7559_v62  ;;  %v7417_v11 = vpop.f32.mrb[41].mxu0  ;;  %v7085_v0 = vsel %vm7057_vm3, %v7052_v40, %v12283_v57 }
 0x3c4   : > { %v6748_v36 = vpop.permute.xlu1 %6747  ;;  %v12396_v2 = vpop.f32.mrb[42].mxu0  ;;  %v7118_v52 = vsel %vm7090_vm8, %v7085_v0, %v12346_v39  ;;  %v8015_v39 = vcombine.low %v11944_v47, %v8441_v9  ;;  %v6263_v15 = vsel %vm8626_vm7, %v6261_v4, %v6262_v43 }
 0x3c5   : > { %v7420_v33 = vpop.f32.mrb[43].mxu0  ;;  %v7151_v48 = vsel %vm7123_vm4, %v7118_v52, %v12335_v16  ;;  %v8143_v35 = vcombine.low %v6260_v34, %v6263_v15 }
 0x3c6   : > { %v7020_v41 = vsel %vm6975_vm2, %v8015_v39, %v12350_v58  ;;  %v7184_v54 = vsel %vm7156_vm5, %v7151_v48, %v12348_v38 }
 0x3c7   : > { %v7054_v47 = vsel %vm7024_vm6, %v7020_v41, %v12340_v26 }
 0x3c8   : > { %v6494_v10 = vpop.permute.xlu1 %6493  ;;  %v7087_v61 = vsel %vm7057_vm3, %v7054_v47, %v12352_v18 }
 0x3ca   : > { %v7590_v46 = vld [vmem:[#allocation4] ss:$2 sm:$0xff]  ;;  %v7606_v7 = vld [vmem:[#allocation4 + $0x1] ss:$2 sm:$0xff] }
 0x3cb   : > { %v7621_v22 = vmax.f32 %v7590_v46, %v7606_v7 }
 0x3cc   : > { %v6924_v5 = vpop.permute.xlu1 %6923 }
 0x3cd   : > { %v7629_v57 = vpack.c.bf16 %v7621_v22, %v7621_v22 }
 0x3cf   : > { %7638 = vst.msk [vmem:[%s12408_s20] sm:$0xf] %vm7637_vm11, %v7629_v57 }
 0x3d0   : > { %v6922_v51 = vpop.permute.xlu1 %6921 }
 0x3d1   : > { %v7230_v16 = vsel %vm7189_vm9, %v7184_v54, %v6922_v51 }
 0x3d2   : > { %7502 = vmatmul.mubr.bf16.gmra.mrb[32].mxu1 %v7230_v16 }
 0x3d3   : > { %8169 = vmatprep.mubr.msk.bf16.mxu1 %vm6975_vm2, %v8143_v35 }
 0x3d4   : > { %v6668_v58 = vpop.permute.xlu1 %6667 }
 0x3d5   : > { %v7120_v50 = vsel %vm7090_vm8, %v7087_v61, %v6668_v58 }
 0x3d6   : > { %v7153_v38 = vsel %vm7123_vm4, %v7120_v50, %v6748_v36 }
 0x3d7   : > { %v7186_v1 = vsel %vm7156_vm5, %v7153_v38, %v12344_v24 }
 0x3d8   : > { %v6414_v21 = vpop.permute.xlu1 %6413  ;;  %v7233_v56 = vsel %vm7189_vm9, %v7186_v1, %v6924_v5 }
 0x3d9   : > { %v7023_v32 = vsel %vm6975_vm2, %v8016_v44, %v6414_v21  ;;  %v7416_v21 = vadd.f32 %v12358_v37, %v12390_v19 }
 0x3da   : > { %7510 = vmatmul.mubr.bf16.gmra.mrb[36].mxu1 %v7233_v56  ;;  %v7056_v3 = vsel %vm7024_vm6, %v7023_v32, %v6494_v10 }
 0x3db   : > { %8170 = vmatprep.mubr.msk.bf16.mxu1 %vm6975_vm2, %v8144_v60 }
 0x3dc   : > { %v6590_v26 = vpop.permute.xlu1 %6589 }
 0x3dd   : > { %v7089_v49 = vsel %vm7057_vm3, %v7056_v3, %v6590_v26 }
 0x3e0   : > { %v6670_v59 = vpop.permute.xlu1 %6669 }
 0x3e1   : > { %v7122_v8 = vsel %vm7090_vm8, %v7089_v49, %v6670_v59  ;;  %v7419_v59 = vadd.f32 %v12358_v37, %v12396_v2 }
 0x3e4   : > { %v6750_v18 = vpop.permute.xlu1 %6749 }
 0x3e5   : > { %v7155_v23 = vsel %vm7123_vm4, %v7122_v8, %v6750_v18 }
 0x3e8   : > { %v6846_v24 = vpop.permute.xlu1 %6845 }
 0x3e9   : > { %v7188_v6 = vsel %vm7156_vm5, %v7155_v23, %v6846_v24  ;;  %v7530_v24 = vmax.f32 %v7416_v21, 0.0 }
 0x3ec   : > { %v6926_v45 = vpop.permute.xlu1 %6925 }
 0x3ed   : > { %v7236_v60 = vsel %vm7189_vm9, %v7188_v6, %v6926_v45  ;;  %v7531_v6 = vmax.f32 %v7419_v59, 0.0 }
 0x3ee   : > { %7518 = vmatmul.mubr.bf16.gmra.mrb[40].mxu1 %v7236_v60 }
 0x3f7   : > { %v12448_v29 = vpop.f32.mrb[0].mxu1 }
 0x3f8   : > { %v7441_v20 = vpop.f32.mrb[1].mxu1 }
 0x3f9   : > { %v12450_v14 = vpop.f32.mrb[2].mxu1 }
 0x3fa   : > { %v7444_v44 = vpop.f32.mrb[3].mxu1 }
 0x3ff   : > { %v7447_v27 = vpop.f32.mrb[4].mxu1 }
 0x400   : > { %v7449_v12 = vpop.f32.mrb[5].mxu1  ;;  %v7448_v25 = vadd.f32 %v12358_v37, %v7447_v27 }
 0x401   : > { %v7450_v30 = vpop.f32.mrb[6].mxu1 }
 0x402   : > { %v7452_v53 = vpop.f32.mrb[7].mxu1  ;;  %v7451_v42 = vadd.f32 %v12358_v37, %v7450_v30  ;;  %v7538_v11 = vmax.f32 %v7448_v25, 0.0 }
 0x404   : > { %v7539_v28 = vmax.f32 %v7451_v42, 0.0 }
 0x413   : > { %v7455_v17 = vpop.f32.mrb[8].mxu1 }
 0x414   : > { %v7456_v13 = vadd.f32 %v12358_v37, %v7455_v17  ;;  %v7457_v31 = vpop.f32.mrb[9].mxu1  ;;  %v7440_v17 = vadd.f32 %v12358_v37, %v12448_v29 }
 0x415   : > { %v7458_v62 = vpop.f32.mrb[10].mxu1 }
 0x416   : > { %v7540_v40 = vmax.f32 %v7456_v13, 0.0  ;;  %v7459_v36 = vadd.f32 %v12358_v37, %v7458_v62  ;;  %v7460_v33 = vpop.f32.mrb[11].mxu1  ;;  %v7443_v13 = vadd.f32 %v12358_v37, %v12450_v14 }
 0x418   : > { %v7564_v0 = vmax.f32 %v7538_v11, %v7540_v40  ;;  %v7541_v10 = vmax.f32 %v7459_v36, 0.0  ;;  %v7536_v40 = vmax.f32 %v7440_v17, 0.0 }
 0x41a   : > { %7580 = vst.msk [vmem:[#allocation4 + $0x30] sm:$0xff] %vm7024_vm6, %v7564_v0  ;;  %v7565_v63 = vmax.f32 %v7539_v28, %v7541_v10  ;;  %v7537_v0 = vmax.f32 %v7443_v13, 0.0 }
 0x41b   : > { %v7463_v46 = vpop.f32.mrb[12].mxu1 }
 0x41c   : > { %7581 = vst.msk [vmem:[#allocation4 + $0x38] sm:$0xff] %vm7024_vm6, %v7565_v63  ;;  %v7465_v7 = vpop.f32.mrb[13].mxu1  ;;  %v7464_v57 = vadd.f32 %v12358_v37, %v7463_v46 }
 0x41d   : > { %v7466_v52 = vpop.f32.mrb[14].mxu1 }
 0x41e   : > { %v7468_v4 = vpop.f32.mrb[15].mxu1  ;;  %v7467_v9 = vadd.f32 %v12358_v37, %v7466_v52  ;;  %v7542_v51 = vmax.f32 %v7464_v57, 0.0 }
 0x420   : > { %v7543_v35 = vmax.f32 %v7467_v9, 0.0 }
 0x423   : > { %v7596_v43 = vld [vmem:[#allocation4 + $0x30] ss:$2 sm:$0xff]  ;;  %v7612_v22 = vld [vmem:[#allocation4 + $0x31] ss:$2 sm:$0xff] }
 0x424   : > { %v7624_v5 = vmax.f32 %v7596_v43, %v7612_v22 }
 0x426   : > { %v7632_v55 = vpack.c.bf16 %v7624_v5, %v7624_v5 }
 0x428   : > { %7641 = vst.msk [vmem:[%s12408_s20 + $0xc] sm:$0xf] %vm7637_vm11, %v7632_v55 }
 0x429   : > { %v7471_v48 = vpop.f32.mrb[16].mxu1 }
 0x42a   : > { %v7472_v39 = vadd.f32 %v12358_v37, %v7471_v48  ;;  %v7473_v15 = vpop.f32.mrb[17].mxu1 }
 0x42b   : > { %v7474_v41 = vpop.f32.mrb[18].mxu1 }
 0x42c   : > { %v7544_v54 = vmax.f32 %v7472_v39, 0.0  ;;  %v7475_v34 = vadd.f32 %v12358_v37, %v7474_v41  ;;  %v7476_v16 = vpop.f32.mrb[19].mxu1 }
 0x42e   : > { %v7566_v47 = vmax.f32 %v7542_v51, %v7544_v54  ;;  %v7545_v61 = vmax.f32 %v7475_v34, 0.0 }
 0x430   : > { %7582 = vst.msk [vmem:[#allocation4 + $0x40] sm:$0xff] %vm7024_vm6, %v7566_v47  ;;  %v7567_v58 = vmax.f32 %v7543_v35, %v7545_v61 }
 0x432   : > { %7583 = vst.msk [vmem:[#allocation4 + $0x48] sm:$0xff] %vm7024_vm6, %v7567_v58 }
 0x439   : > { %v7598_v50 = vld [vmem:[#allocation4 + $0x40] ss:$2 sm:$0xff]  ;;  %v7614_v38 = vld [vmem:[#allocation4 + $0x41] ss:$2 sm:$0xff] }
 0x43a   : > { %v7625_v1 = vmax.f32 %v7598_v50, %v7614_v38 }
 0x43c   : > { %v7633_v56 = vpack.c.bf16 %v7625_v1, %v7625_v1 }
 0x43e   : > { %7642 = vst.msk [vmem:[%s12408_s20 + $0x10] sm:$0xf] %vm7637_vm11, %v7633_v56 }
 0x440   : > { %v7423_v26 = vpop.f32.mrb[44].mxu0 }
 0x441   : > { %v7424_v18 = vadd.f32 %v12358_v37, %v7423_v26  ;;  %v7425_v32 = vpop.f32.mrb[45].mxu0 }
 0x442   : > { %v7426_v3 = vpop.f32.mrb[46].mxu0 }
 0x443   : > { %v7532_v49 = vmax.f32 %v7424_v18, 0.0  ;;  %v7427_v8 = vadd.f32 %v12358_v37, %v7426_v3  ;;  %v7428_v23 = vpop.f32.mrb[47].mxu0 }
 0x444   : > { %v7479_v20 = vpop.f32.mrb[20].mxu1 }
 0x445   : > { %v7560_v45 = vmax.f32 %v7530_v24, %v7532_v49  ;;  %v7533_v19 = vmax.f32 %v7427_v8, 0.0  ;;  %v7481_v2 = vpop.f32.mrb[21].mxu1  ;;  %v7480_v4 = vadd.f32 %v12358_v37, %v7479_v20 }
 0x446   : > { %v7482_v44 = vpop.f32.mrb[22].mxu1 }
 0x447   : > { %7576 = vst.msk [vmem:[#allocation4 + $0x10] sm:$0xff] %vm7024_vm6, %v7560_v45  ;;  %v7561_v60 = vmax.f32 %v7531_v6, %v7533_v19  ;;  %v7484_v27 = vpop.f32.mrb[23].mxu1  ;;  %v7483_v22 = vadd.f32 %v12358_v37, %v7482_v44  ;;  %v7546_v48 = vmax.f32 %v7480_v4, 0.0 }
 0x449   : > { %7577 = vst.msk [vmem:[#allocation4 + $0x18] sm:$0xff] %vm7024_vm6, %v7561_v60  ;;  %v7547_v41 = vmax.f32 %v7483_v22, 0.0 }
 0x450   : > { %v7592_v12 = vld [vmem:[#allocation4 + $0x10] ss:$2 sm:$0xff]  ;;  %v7608_v30 = vld [vmem:[#allocation4 + $0x11] ss:$2 sm:$0xff] }
 0x451   : > { %v7622_v53 = vmax.f32 %v7592_v12, %v7608_v30 }
 0x453   : > { %v7630_v25 = vpack.c.bf16 %v7622_v53, %v7622_v53 }
 0x455   : > { %7639 = vst.msk [vmem:[%s12408_s20 + $0x4] sm:$0xf] %vm7637_vm11, %v7630_v25 }
 0x462   : > { %v7431_v42 = vpop.f32.mrb[48].mxu0 }
 0x463   : > { %v7432_v31 = vadd.f32 %v12358_v37, %v7431_v42  ;;  %v7433_v62 = vpop.f32.mrb[49].mxu0 }
 0x464   : > { %v7434_v11 = vpop.f32.mrb[50].mxu0 }
 0x465   : > { %v7534_v36 = vmax.f32 %v7432_v31, 0.0  ;;  %v7435_v33 = vadd.f32 %v12358_v37, %v7434_v11  ;;  %v7436_v28 = vpop.f32.mrb[51].mxu0 }
 0x467   : > { %v7562_v10 = vmax.f32 %v7534_v36, %v7536_v40  ;;  %v7535_v63 = vmax.f32 %v7435_v33, 0.0 }
 0x469   : > { %7578 = vst.msk [vmem:[#allocation4 + $0x20] sm:$0xff] %vm7024_vm6, %v7562_v10  ;;  %v7563_v29 = vmax.f32 %v7535_v63, %v7537_v0 }
 0x46b   : > { %7579 = vst.msk [vmem:[#allocation4 + $0x28] sm:$0xff] %vm7024_vm6, %v7563_v29 }
 0x472   : > { %v7594_v46 = vld [vmem:[#allocation4 + $0x20] ss:$2 sm:$0xff]  ;;  %v7610_v14 = vld [vmem:[#allocation4 + $0x21] ss:$2 sm:$0xff] }
 0x473   : > { %v7623_v7 = vmax.f32 %v7594_v46, %v7610_v14 }
 0x475   : > { %v7631_v52 = vpack.c.bf16 %v7623_v7, %v7623_v7 }
 0x477   : > { %7640 = vst.msk [vmem:[%s12408_s20 + $0x8] sm:$0xf] %vm7637_vm11, %v7631_v52 }
 0x48d   : > { %v7487_v43 = vpop.f32.mrb[24].mxu1 }
 0x48e   : > { %v7488_v5 = vadd.f32 %v12358_v37, %v7487_v43  ;;  %v7489_v55 = vpop.f32.mrb[25].mxu1 }
 0x48f   : > { %v7490_v57 = vpop.f32.mrb[26].mxu1 }
 0x490   : > { %v7548_v9 = vmax.f32 %v7488_v5, 0.0  ;;  %v7491_v39 = vadd.f32 %v12358_v37, %v7490_v57  ;;  %v7492_v15 = vpop.f32.mrb[27].mxu1 }
 0x492   : > { %v7568_v51 = vmax.f32 %v7546_v48, %v7548_v9  ;;  %v7549_v54 = vmax.f32 %v7491_v39, 0.0 }
 0x494   : > { %7584 = vst.msk [vmem:[#allocation4 + $0x50] sm:$0xff] %vm7024_vm6, %v7568_v51  ;;  %v7569_v34 = vmax.f32 %v7547_v41, %v7549_v54 }
 0x495   : > { %v7495_v16 = vpop.f32.mrb[28].mxu1 }
 0x496   : > { %7585 = vst.msk [vmem:[#allocation4 + $0x58] sm:$0xff] %vm7024_vm6, %v7569_v34  ;;  %v7497_v35 = vpop.f32.mrb[29].mxu1  ;;  %v7496_v21 = vadd.f32 %v12358_v37, %v7495_v16 }
 0x497   : > { %v7498_v47 = vpop.f32.mrb[30].mxu1 }
 0x498   : > { %v7500_v61 = vpop.f32.mrb[31].mxu1  ;;  %v7499_v26 = vadd.f32 %v12358_v37, %v7498_v47  ;;  %v7550_v3 = vmax.f32 %v7496_v21, 0.0 }
 0x49a   : > { %v7551_v23 = vmax.f32 %v7499_v26, 0.0 }
 0x49d   : > { %v7600_v58 = vld [vmem:[#allocation4 + $0x50] ss:$2 sm:$0xff]  ;;  %v7616_v50 = vld [vmem:[#allocation4 + $0x51] ss:$2 sm:$0xff] }
 0x49e   : > { %v7626_v38 = vmax.f32 %v7600_v58, %v7616_v50 }
 0x4a0   : > { %v7634_v1 = vpack.c.bf16 %v7626_v38, %v7626_v38 }
 0x4a2   : > { %7643 = vst.msk [vmem:[%s12408_s20 + $0x14] sm:$0xf] %vm7637_vm11, %v7634_v1 }
 0x4a5   : > { %v7503_v56 = vpop.f32.mrb[32].mxu1 }
 0x4a6   : > { %v7504_v59 = vadd.f32 %v12358_v37, %v7503_v56  ;;  %v7505_v18 = vpop.f32.mrb[33].mxu1 }
 0x4a7   : > { %v7506_v32 = vpop.f32.mrb[34].mxu1 }
 0x4a8   : > { %v7552_v24 = vmax.f32 %v7504_v59, 0.0  ;;  %v7507_v49 = vadd.f32 %v12358_v37, %v7506_v32  ;;  %v7508_v8 = vpop.f32.mrb[35].mxu1 }
 0x4aa   : > { %v7570_v6 = vmax.f32 %v7550_v3, %v7552_v24  ;;  %v7553_v45 = vmax.f32 %v7507_v49, 0.0 }
 0x4ac   : > { %7586 = vst.msk [vmem:[#allocation4 + $0x60] sm:$0xff] %vm7024_vm6, %v7570_v6  ;;  %v7571_v19 = vmax.f32 %v7551_v23, %v7553_v45 }
 0x4ad   : > { %v7511_v60 = vpop.f32.mrb[36].mxu1 }
 0x4ae   : > { %7587 = vst.msk [vmem:[#allocation4 + $0x68] sm:$0xff] %vm7024_vm6, %v7571_v19  ;;  %v7513_v20 = vpop.f32.mrb[37].mxu1  ;;  %v7512_v25 = vadd.f32 %v12358_v37, %v7511_v60 }
 0x4af   : > { %v7514_v2 = vpop.f32.mrb[38].mxu1 }
 0x4b0   : > { %v7516_v44 = vpop.f32.mrb[39].mxu1  ;;  %v7515_v42 = vadd.f32 %v12358_v37, %v7514_v2  ;;  %v7554_v11 = vmax.f32 %v7512_v25, 0.0 }
 0x4b2   : > { %v7555_v28 = vmax.f32 %v7515_v42, 0.0 }
 0x4b5   : > { %v7602_v27 = vld [vmem:[#allocation4 + $0x60] ss:$2 sm:$0xff]  ;;  %v7618_v12 = vld [vmem:[#allocation4 + $0x61] ss:$2 sm:$0xff] }
 0x4b6   : > { %v7627_v30 = vmax.f32 %v7602_v27, %v7618_v12 }
 0x4b8   : > { %v7635_v53 = vpack.c.bf16 %v7627_v30, %v7627_v30 }
 0x4ba   : > { %7644 = vst.msk [vmem:[%s12408_s20 + $0x18] sm:$0xf] %vm7637_vm11, %v7635_v53 }
 0x4c1   : > { %v7519_v17 = vpop.f32.mrb[40].mxu1 }
 0x4c2   : > { %v7520_v13 = vadd.f32 %v12358_v37, %v7519_v17  ;;  %v7521_v31 = vpop.f32.mrb[41].mxu1 }
 0x4c3   : > { %v7522_v62 = vpop.f32.mrb[42].mxu1 }
 0x4c4   : > { %v7556_v40 = vmax.f32 %v7520_v13, 0.0  ;;  %v7523_v36 = vadd.f32 %v12358_v37, %v7522_v62  ;;  %v7524_v33 = vpop.f32.mrb[43].mxu1 }
 0x4c6   : > { %v7572_v0 = vmax.f32 %v7554_v11, %v7556_v40  ;;  %v7557_v10 = vmax.f32 %v7523_v36, 0.0 }
 0x4c8   : > { %7588 = vst.msk [vmem:[#allocation4 + $0x70] sm:$0xff] %vm7024_vm6, %v7572_v0  ;;  %v7573_v63 = vmax.f32 %v7555_v28, %v7557_v10 }
 0x4ca   : > { %7589 = vst.msk [vmem:[#allocation4 + $0x78] sm:$0xff] %vm7024_vm6, %v7573_v63 }
 0x4d1   : > { %v7604_v29 = vld [vmem:[#allocation4 + $0x70] ss:$2 sm:$0xff]  ;;  %v7620_v46 = vld [vmem:[#allocation4 + $0x71] ss:$2 sm:$0xff] }
 0x4d2   : > { %v7628_v14 = vmax.f32 %v7604_v29, %v7620_v46 }
 0x4d4   : > { %v7636_v7 = vpack.c.bf16 %v7628_v14, %v7628_v14 }
 0x4d6   : > { %7645 = vst.msk [vmem:[%s12408_s20 + $0x1c] sm:$0xf] %vm7637_vm11, %v7636_v7 }
 0x4d7 PF: > { %s15_s18 = sadd.s32 1, %s8448_s18  }
 0x4d8   : > { %p12_p4 = scmp.ge.s32.totalorder %s15_s18, 4  }
 0x4da   :  { %14 = sbr.rel (!%p12_p4) target bundleno = 1 (0x1), region = 89 }

</bundles_post_ra>
